<compile_context>
chip_gen: v7x
topology: tpu7x:2x2x1
jax: 0.10.0
libtpu: 0.0.40
codegen_flags: <defaults>
</compile_context>

<pallas_src>
import functools

import jax
import jax.numpy as jnp
from jax.experimental import pallas as pl
from jax.experimental.pallas import tpu as pltpu

# ---------------- mini Swin-Tiny config ----------------
IMG = 32
PATCH = 4
IN_CH = 3
EMBED = 16
DEPTHS = (2, 2)
HEADS = (2, 4)
WINDOW = 4
OUT_DIM = 1  # cfg.output_dim

# MXU operand dtype (f32 at toy scale; use bf16 at real Swin-Tiny dims).
MM_DTYPE = jnp.float32


# ---------------- in-kernel helpers ----------------
def _mm(a, b):
    return jnp.dot(a.astype(MM_DTYPE), b.astype(MM_DTYPE),
                   preferred_element_type=jnp.float32)


def _ln(x, g, b, eps=1e-5):
    x = x.astype(jnp.float32)
    mu = jnp.mean(x, axis=-1, keepdims=True)
    xc = x - mu
    var = jnp.mean(xc * xc, axis=-1, keepdims=True)
    return xc * jax.lax.rsqrt(var + eps) * g.astype(jnp.float32) + b.astype(jnp.float32)


# ---------------- the single fused forward kernel ----------------
def _swin_forward_kernel(x_ref, *refs, meta):
    """Whole SwinTiny forward for one image; all intermediates stay in VMEM."""
    feat_ref, logit_ref = refs[-2], refs[-1]
    w_iter = iter(refs[:-2])

    def nxt():
        return next(w_iter)[...]

    f32 = jnp.float32
    xp = x_ref[0].astype(f32)                              # (L0, PATCH*PATCH*IN_CH)

    # ---- patch embed (stride-4 4x4 conv == per-patch linear) + LayerNorm ----
    pw, pb, pg, pbb = nxt(), nxt(), nxt(), nxt()
    x = _mm(xp, pw) + pb.astype(f32)
    x = _ln(x, pg, pbb)                                    # (L0, EMBED), windowed token order

    for entry in meta:
        if entry[0] == "block":
            _, heads, nW, N, shifted = entry
            L, C = x.shape
            D = C // heads
            scale = D ** -0.5

            n1g, n1b = nxt(), nxt()
            qkvw, qkvb = nxt(), nxt()
            relb = nxt()                                   # (heads, N, N)
            projw, projb = nxt(), nxt()
            n2g, n2b = nxt(), nxt()
            fc1w, fc1b = nxt(), nxt()
            fc2w, fc2b = nxt(), nxt()

            if shifted:
                mask = nxt().astype(f32)                   # (nW, N, N)
                perm_m = nxt().astype(f32)                 # (L, L) one-hot
                inv_perm_m = nxt().astype(f32)
                # roll(-shift) + window re-partition == token permutation (MXU matmul)
                xa = _mm(perm_m, x)
            else:
                xa = x

            # ---- LN1 fused with QKV projection ----
            y = _ln(xa, n1g, n1b)
            qkv = _mm(y, qkvw) + qkvb.astype(f32)          # (L, 3C); cols = (3, heads, D)
            qkv = qkv.reshape(nW, N, 3 * C)

            # ---- window MHA batched over heads*windows (single softmax) ----
            q = jnp.stack([qkv[:, :, h * D:(h + 1) * D] for h in range(heads)], 0)
            k = jnp.stack([qkv[:, :, C + h * D:C + (h + 1) * D] for h in range(heads)], 0)
            v = jnp.stack([qkv[:, :, 2 * C + h * D:2 * C + (h + 1) * D]
                           for h in range(heads)], 0)      # (heads, nW, N, D)
            q = (q * scale).reshape(heads * nW, N, D)
            k = k.reshape(heads * nW, N, D)
            v = v.reshape(heads * nW, N, D)

            s = jnp.einsum("bnd,bmd->bnm", q, k,
                           preferred_element_type=f32)     # (heads*nW, N, N)
            s = s.reshape(heads, nW, N, N) + relb.astype(f32)[:, None]
            if shifted:
                s = s + mask[None]
            s = s.reshape(heads * nW, N, N)
            s = s - jnp.max(s, axis=-1, keepdims=True)
            p = jnp.exp(s)
            p = p * pl.reciprocal(jnp.sum(p, axis=-1, keepdims=True), approx=True)
            o = jnp.einsum("bnm,bmd->bnd", p, v,
                           preferred_element_type=f32)     # (heads*nW, N, D)

            # concat-over-heads + out-projection == sum_h O_h @ W_proj[h*D:(h+1)*D, :]
            projw_f = projw.astype(f32)
            acc = _mm(o[0:nW].reshape(L, D), projw_f[0:D, :])
            for h in range(1, heads):
                acc = acc + _mm(o[h * nW:(h + 1) * nW].reshape(L, D),
                                projw_f[h * D:(h + 1) * D, :])
            xa = xa + acc + projb.astype(f32)              # residual 1

            # ---- LN2 fused with MLP ----
            z = _ln(xa, n2g, n2b)
            h1 = _mm(z, fc1w) + fc1b.astype(f32)
            # TODO(synk): torch nn.GELU default is exact erf; tanh approximation for lowering.
            h1 = jax.nn.gelu(h1, approximate=True)
            h2 = _mm(h1, fc2w) + fc2b.astype(f32)
            xa = xa + h2                                   # residual 2

            x = _mm(inv_perm_m, xa) if shifted else xa

        else:  # ("merge",): patch merging = LN over virtual 4C concat + reduction matmul
            mg, mb, mred, sel = nxt(), nxt(), nxt(), nxt()  # sel: (4, L2, L) one-hot
            L, C = x.shape
            sel_f = sel.astype(f32)
            ys = [_mm(sel_f[j], x) for j in range(4)]       # even/odd spatial gathers
            inv4c = 1.0 / (4 * C)
            mean = sum(jnp.sum(yj, -1, keepdims=True) for yj in ys) * inv4c
            ex2 = sum(jnp.sum(yj * yj, -1, keepdims=True) for yj in ys) * inv4c
            rstd = jax.lax.rsqrt(ex2 - mean * mean + 1e-5)
            mgf, mbf, mredf = mg.astype(f32), mb.astype(f32), mred.astype(f32)
            xnew = None
            for j in range(4):
                yhat = (ys[j] - mean) * rstd * mgf[:, j * C:(j + 1) * C] \
                       + mbf[:, j * C:(j + 1) * C]
                t = _mm(yhat, mredf[j * C:(j + 1) * C, :])
                xnew = t if xnew is None else xnew + t
            x = xnew                                        # (L2, 2C)

    # ---- head: final LN + token mean-pool + linear ----
    ng, nb, fcw, fcb = nxt(), nxt(), nxt(), nxt()
    xn = _ln(x, ng, nb)
    feats = jnp.mean(xn, axis=0, keepdims=True)             # (1, Cf)
    logits = _mm(feats, fcw) + fcb.astype(f32)               # (1, OUT_DIM)
    feat_ref[...] = feats[None].astype(feat_ref.dtype)
    logit_ref[...] = logits[None].astype(logit_ref.dtype)


# ---------------- wrapper: specs / flattening ----------------
def _const_spec(arr):
    nd = arr.ndim
    return pl.BlockSpec(arr.shape, lambda b, _n=nd: (0,) * _n)


def _flatten_for_kernel(params):
    """Flatten weights (plus static per-block meta) in the exact order the kernel consumes."""
    def v2(a):
        return a.reshape(1, -1)

    flat = [params["patch_w"], v2(params["patch_b"]),
            v2(params["patch_norm_g"]), v2(params["patch_norm_b"])]
    meta = []
    Hp = IMG // PATCH
    for si, stage in enumerate(params["stages"]):
        heads = HEADS[si]
        Hs = Hp // (2 ** si)
        ws = min(WINDOW, Hs)
        nW = (Hs // ws) * (Hs // ws)
        N = ws * ws
        for blk in stage["blocks"]:
            flat += [v2(blk["norm1_g"]), v2(blk["norm1_b"]),
                     blk["qkv_w"], v2(blk["qkv_b"]), blk["rel_bias"],
                     blk["proj_w"], v2(blk["proj_b"]),
                     v2(blk["norm2_g"]), v2(blk["norm2_b"]),
                     blk["fc1_w"], v2(blk["fc1_b"]),
                     blk["fc2_w"], v2(blk["fc2_b"])]
            shifted = "attn_mask" in blk
            if shifted:
                flat += [blk["attn_mask"], blk["perm_mat"], blk["inv_perm_mat"]]
            meta.append(("block", heads, nW, N, shifted))
        if "merge" in stage:
            m = stage["merge"]
            flat += [v2(m["norm_g"]), v2(m["norm_b"]), m["red_w"], m["sel"]]
            meta.append(("merge",))
    flat += [v2(params["norm_g"]), v2(params["norm_b"]),
             params["fc_w"], v2(params["fc_b"])]
    return flat, tuple(meta)


def swin_tiny_forward(params, x_nchw, return_embeds=False):
    B = x_nchw.shape[0]
    Hp = Wp = IMG // PATCH
    nwh = Hp // WINDOW
    # Patch extraction emitted directly in stage-0 *windowed* token order, so the kernel
    # never has to re-partition: token = (win_row, win_col, row-in-window, col-in-window).
    x = jnp.transpose(x_nchw, (0, 2, 3, 1))                               # NHWC
    x = x.reshape(B, nwh, WINDOW, PATCH, nwh, WINDOW, PATCH, IN_CH)
    x = jnp.transpose(x, (0, 1, 4, 2, 5, 3, 6, 7))
    x = x.reshape(B, Hp * Wp, PATCH * PATCH * IN_CH)

    flat, meta = _flatten_for_kernel(params)
    Cf = params["norm_g"].shape[0]

    in_specs = [pl.BlockSpec((1, Hp * Wp, PATCH * PATCH * IN_CH), lambda b: (b, 0, 0))]
    in_specs += [_const_spec(w) for w in flat]

    feats, logits = pl.pallas_call(
        functools.partial(_swin_forward_kernel, meta=meta),
        out_shape=(jax.ShapeDtypeStruct((B, 1, Cf), jnp.float32),
                   jax.ShapeDtypeStruct((B, 1, OUT_DIM), jnp.float32)),
        grid=(B,),
        in_specs=in_specs,
        out_specs=(pl.BlockSpec((1, 1, Cf), lambda b: (b, 0, 0)),
                   pl.BlockSpec((1, 1, OUT_DIM), lambda b: (b, 0, 0))),
        compiler_params=pltpu.CompilerParams(dimension_semantics=("parallel",)),
    )(x, *flat)

    feats = feats.reshape(B, Cf)
    logits = logits.reshape(B, OUT_DIM)
    if return_embeds:
        return logits, feats
    return logits


# ---------------- init-time constants (masks, permutations, rel-pos bias) ----------------
def window_partition(x, ws):
    B, H, W, C = x.shape
    x = x.reshape(B, H // ws, ws, W // ws, ws, C)
    return x.transpose(0, 1, 3, 2, 4, 5).reshape(-1, ws * ws, C)


def relative_position_index(ws):
    coords = jnp.stack(jnp.meshgrid(jnp.arange(ws), jnp.arange(ws), indexing="ij"))
    coords_flat = coords.reshape(2, -1)
    rel = coords_flat[:, :, None] - coords_flat[:, None, :]
    rel = rel.transpose(1, 2, 0) + jnp.array([ws - 1, ws - 1])
    return rel[..., 0] * (2 * ws - 1) + rel[..., 1]


def compute_attn_mask(H, W, ws, shift):
    img_mask = jnp.zeros((1, H, W, 1), jnp.float32)
    cnt = 0
    slices = (slice(0, -ws), slice(-ws, -shift), slice(-shift, None))
    for hs in slices:
        for wsl in slices:
            img_mask = img_mask.at[:, hs, wsl, :].set(float(cnt))
            cnt += 1
    mw = window_partition(img_mask, ws).reshape(-1, ws * ws)
    attn_mask = mw[:, None, :] - mw[:, :, None]
    return jnp.where(attn_mask != 0, -100.0, 0.0)                      # (nW, N, N)


def shifted_perm_matrices(H, W, ws, shift):
    """One-hot matrices: windowed order -> roll(-shift)+re-partition order, and inverse."""
    idx = jnp.arange(H * W).reshape(1, H, W, 1)
    std = window_partition(idx, ws).reshape(-1)
    shf = window_partition(jnp.roll(idx, (-shift, -shift), axis=(1, 2)), ws).reshape(-1)
    inv_std = jnp.argsort(std)
    perm = inv_std[shf]
    pmat = jax.nn.one_hot(perm, H * W, dtype=jnp.float32)
    return pmat, pmat.T


def merge_select_matrices(H, W, ws):
    """One-hot gathers: current windowed order -> next-stage windowed order, per (di,dj)."""
    L = H * W
    idx = jnp.arange(L).reshape(1, H, W, 1)
    std = window_partition(idx, ws).reshape(-1)
    inv_std = jnp.argsort(std)
    H2, W2 = H // 2, W // 2
    ws2 = min(ws, H2, W2)
    idx2 = jnp.arange(H2 * W2).reshape(1, H2, W2, 1)
    nxt_order = window_partition(idx2, ws2).reshape(-1)
    i1, j1 = nxt_order // W2, nxt_order % W2
    sels = []
    for di, dj in ((0, 0), (1, 0), (0, 1), (1, 1)):                    # timm x0,x1,x2,x3
        raster0 = (2 * i1 + di) * W + (2 * j1 + dj)
        sels.append(jax.nn.one_hot(inv_std[raster0], L, dtype=jnp.float32))
    return jnp.stack(sels)                                             # (4, L2, L)


def _trunc_normal(key, shape, std=0.02):
    return std * jax.random.truncated_normal(key, -2.0, 2.0, shape, jnp.float32)


def init_params(key):
    keys = iter(jax.random.split(key, 64))
    N = WINDOW * WINDOW
    rel_idx = relative_position_index(WINDOW).reshape(-1)
    params = {
        "patch_w": _trunc_normal(next(keys), (PATCH * PATCH * IN_CH, EMBED)),
        "patch_b": jnp.zeros((EMBED,), jnp.float32),
        "patch_norm_g": jnp.ones((EMBED,), jnp.float32),
        "patch_norm_b": jnp.zeros((EMBED,), jnp.float32),
        "stages": [],
    }
    dims = [EMBED * (2 ** i) for i in range(len(DEPTHS))]
    Hp = IMG // PATCH
    for si, (depth, heads) in enumerate(zip(DEPTHS, HEADS)):
        C = dims[si]
        Hs = Hp // (2 ** si)
        stage = {"blocks": []}
        for bi in range(depth):
            table = _trunc_normal(next(keys), ((2 * WINDOW - 1) ** 2, heads))
            blk = {
                "norm1_g": jnp.ones((C,)), "norm1_b": jnp.zeros((C,)),
                "qkv_w": _trunc_normal(next(keys), (C, 3 * C)),
                "qkv_b": jnp.zeros((3 * C,)),
                "proj_w": _trunc_normal(next(keys), (C, C)),
                "proj_b": jnp.zeros((C,)),
                # relative-position bias gathered once at init (constant per window size)
                "rel_bias": table[rel_idx].reshape(N, N, heads).transpose(2, 0, 1),
                "norm2_g": jnp.ones((C,)), "norm2_b": jnp.zeros((C,)),
                "fc1_w": _trunc_normal(next(keys), (C, 4 * C)),
                "fc1_b": jnp.zeros((4 * C,)),
                "fc2_w": _trunc_normal(next(keys), (4 * C, C)),
                "fc2_b": jnp.zeros((C,)),
            }
            # timm: shift only on odd blocks and only when resolution > window
            shift = WINDOW // 2 if (bi % 2 == 1 and Hs > WINDOW) else 0
            if shift > 0:
                blk["attn_mask"] = compute_attn_mask(Hs, Hs, WINDOW, shift)
                pmat, ipmat = shifted_perm_matrices(Hs, Hs, WINDOW, shift)
                blk["perm_mat"], blk["inv_perm_mat"] = pmat, ipmat
            stage["blocks"].append(blk)
        if si < len(DEPTHS) - 1:
            stage["merge"] = {
                "norm_g": jnp.ones((4 * C,)), "norm_b": jnp.zeros((4 * C,)),
                "red_w": _trunc_normal(next(keys), (4 * C, 2 * C)),
                "sel": merge_select_matrices(Hs, Hs, WINDOW),
            }
        params["stages"].append(stage)
    Cf = dims[-1]
    params["norm_g"] = jnp.ones((Cf,))
    params["norm_b"] = jnp.zeros((Cf,))
    params["fc_w"] = _trunc_normal(next(keys), (Cf, OUT_DIM))
    params["fc_b"] = jnp.zeros((OUT_DIM,))
    return params


if __name__ == "__main__":
    key = jax.random.PRNGKey(0)
    pkey, xkey = jax.random.split(key)
    params = init_params(pkey)
    x = jax.random.normal(xkey, (2, IN_CH, IMG, IMG), jnp.float32)

    fwd = jax.jit(swin_tiny_forward)
    out = fwd(params, x)
    jax.block_until_ready(out)
    assert out.shape == (2, OUT_DIM)
    assert bool(jnp.all(jnp.isfinite(out)))
    print("KERNEL_OK")
</pallas_src>

<mosaic_0001>
module attributes {stable_mosaic.version = 11 : i64} {
  func.func @_swin_forward_kernel(%arg0: i32, %arg1: memref<1x64x48xf32, #tpu.memory_space<vmem>>, %arg2: memref<48x16xf32, #tpu.memory_space<vmem>>, %arg3: memref<1x16xf32, #tpu.memory_space<vmem>>, %arg4: memref<1x16xf32, #tpu.memory_space<vmem>>, %arg5: memref<1x16xf32, #tpu.memory_space<vmem>>, %arg6: memref<1x16xf32, #tpu.memory_space<vmem>>, %arg7: memref<1x16xf32, #tpu.memory_space<vmem>>, %arg8: memref<16x48xf32, #tpu.memory_space<vmem>>, %arg9: memref<1x48xf32, #tpu.memory_space<vmem>>, %arg10: memref<2x16x16xf32, #tpu.memory_space<vmem>>, %arg11: memref<16x16xf32, #tpu.memory_space<vmem>>, %arg12: memref<1x16xf32, #tpu.memory_space<vmem>>, %arg13: memref<1x16xf32, #tpu.memory_space<vmem>>, %arg14: memref<1x16xf32, #tpu.memory_space<vmem>>, %arg15: memref<16x64xf32, #tpu.memory_space<vmem>>, %arg16: memref<1x64xf32, #tpu.memory_space<vmem>>, %arg17: memref<64x16xf32, #tpu.memory_space<vmem>>, %arg18: memref<1x16xf32, #tpu.memory_space<vmem>>, %arg19: memref<1x16xf32, #tpu.memory_space<vmem>>, %arg20: memref<1x16xf32, #tpu.memory_space<vmem>>, %arg21: memref<16x48xf32, #tpu.memory_space<vmem>>, %arg22: memref<1x48xf32, #tpu.memory_space<vmem>>, %arg23: memref<2x16x16xf32, #tpu.memory_space<vmem>>, %arg24: memref<16x16xf32, #tpu.memory_space<vmem>>, %arg25: memref<1x16xf32, #tpu.memory_space<vmem>>, %arg26: memref<1x16xf32, #tpu.memory_space<vmem>>, %arg27: memref<1x16xf32, #tpu.memory_space<vmem>>, %arg28: memref<16x64xf32, #tpu.memory_space<vmem>>, %arg29: memref<1x64xf32, #tpu.memory_space<vmem>>, %arg30: memref<64x16xf32, #tpu.memory_space<vmem>>, %arg31: memref<1x16xf32, #tpu.memory_space<vmem>>, %arg32: memref<4x16x16xf32, #tpu.memory_space<vmem>>, %arg33: memref<64x64xf32, #tpu.memory_space<vmem>>, %arg34: memref<64x64xf32, #tpu.memory_space<vmem>>, %arg35: memref<1x64xf32, #tpu.memory_space<vmem>>, %arg36: memref<1x64xf32, #tpu.memory_space<vmem>>, %arg37: memref<64x32xf32, #tpu.memory_space<vmem>>, %arg38: memref<4x16x64xf32, #tpu.memory_space<vmem>>, %arg39: memref<1x32xf32, #tpu.memory_space<vmem>>, %arg40: memref<1x32xf32, #tpu.memory_space<vmem>>, %arg41: memref<32x96xf32, #tpu.memory_space<vmem>>, %arg42: memref<1x96xf32, #tpu.memory_space<vmem>>, %arg43: memref<4x16x16xf32, #tpu.memory_space<vmem>>, %arg44: memref<32x32xf32, #tpu.memory_space<vmem>>, %arg45: memref<1x32xf32, #tpu.memory_space<vmem>>, %arg46: memref<1x32xf32, #tpu.memory_space<vmem>>, %arg47: memref<1x32xf32, #tpu.memory_space<vmem>>, %arg48: memref<32x128xf32, #tpu.memory_space<vmem>>, %arg49: memref<1x128xf32, #tpu.memory_space<vmem>>, %arg50: memref<128x32xf32, #tpu.memory_space<vmem>>, %arg51: memref<1x32xf32, #tpu.memory_space<vmem>>, %arg52: memref<1x32xf32, #tpu.memory_space<vmem>>, %arg53: memref<1x32xf32, #tpu.memory_space<vmem>>, %arg54: memref<32x96xf32, #tpu.memory_space<vmem>>, %arg55: memref<1x96xf32, #tpu.memory_space<vmem>>, %arg56: memref<4x16x16xf32, #tpu.memory_space<vmem>>, %arg57: memref<32x32xf32, #tpu.memory_space<vmem>>, %arg58: memref<1x32xf32, #tpu.memory_space<vmem>>, %arg59: memref<1x32xf32, #tpu.memory_space<vmem>>, %arg60: memref<1x32xf32, #tpu.memory_space<vmem>>, %arg61: memref<32x128xf32, #tpu.memory_space<vmem>>, %arg62: memref<1x128xf32, #tpu.memory_space<vmem>>, %arg63: memref<128x32xf32, #tpu.memory_space<vmem>>, %arg64: memref<1x32xf32, #tpu.memory_space<vmem>>, %arg65: memref<1x32xf32, #tpu.memory_space<vmem>>, %arg66: memref<1x32xf32, #tpu.memory_space<vmem>>, %arg67: memref<32x1xf32, #tpu.memory_space<vmem>>, %arg68: memref<1x1xf32, #tpu.memory_space<vmem>>, %arg69: memref<1x1x32xf32, #tpu.memory_space<vmem>>, %arg70: memref<1x1x1xf32, #tpu.memory_space<vmem>>) attributes {dimension_semantics = [#tpu.dimension_semantics<parallel>], iteration_bounds = array<i64: 2>, scalar_prefetch = 0 : i64, scratch_operands = 0 : i64, tpu.core_type = #tpu.core_type<tc>, window_params = [{transform_indices = @transform_0, window_bounds = array<i64: 1, 64, 48>}, {pipeline_mode = #tpu.pipeline_mode<synchronous>, transform_indices = @transform_1, window_bounds = array<i64: 48, 16>}, {pipeline_mode = #tpu.pipeline_mode<synchronous>, transform_indices = @transform_2, window_bounds = array<i64: 1, 16>}, {pipeline_mode = #tpu.pipeline_mode<synchronous>, transform_indices = @transform_3, window_bounds = array<i64: 1, 16>}, {pipeline_mode = #tpu.pipeline_mode<synchronous>, transform_indices = @transform_4, window_bounds = array<i64: 1, 16>}, {pipeline_mode = #tpu.pipeline_mode<synchronous>, transform_indices = @transform_5, window_bounds = array<i64: 1, 16>}, {pipeline_mode = #tpu.pipeline_mode<synchronous>, transform_indices = @transform_6, window_bounds = array<i64: 1, 16>}, {pipeline_mode = #tpu.pipeline_mode<synchronous>, transform_indices = @transform_7, window_bounds = array<i64: 16, 48>}, {pipeline_mode = #tpu.pipeline_mode<synchronous>, transform_indices = @transform_8, window_bounds = array<i64: 1, 48>}, {pipeline_mode = #tpu.pipeline_mode<synchronous>, transform_indices = @transform_9, window_bounds = array<i64: 2, 16, 16>}, {pipeline_mode = #tpu.pipeline_mode<synchronous>, transform_indices = @transform_10, window_bounds = array<i64: 16, 16>}, {pipeline_mode = #tpu.pipeline_mode<synchronous>, transform_indices = @transform_11, window_bounds = array<i64: 1, 16>}, {pipeline_mode = #tpu.pipeline_mode<synchronous>, transform_indices = @transform_12, window_bounds = array<i64: 1, 16>}, {pipeline_mode = #tpu.pipeline_mode<synchronous>, transform_indices = @transform_13, window_bounds = array<i64: 1, 16>}, {pipeline_mode = #tpu.pipeline_mode<synchronous>, transform_indices = @transform_14, window_bounds = array<i64: 16, 64>}, {pipeline_mode = #tpu.pipeline_mode<synchronous>, transform_indices = @transform_15, window_bounds = array<i64: 1, 64>}, {pipeline_mode = #tpu.pipeline_mode<synchronous>, transform_indices = @transform_16, window_bounds = array<i64: 64, 16>}, {pipeline_mode = #tpu.pipeline_mode<synchronous>, transform_indices = @transform_17, window_bounds = array<i64: 1, 16>}, {pipeline_mode = #tpu.pipeline_mode<synchronous>, transform_indices = @transform_18, window_bounds = array<i64: 1, 16>}, {pipeline_mode = #tpu.pipeline_mode<synchronous>, transform_indices = @transform_19, window_bounds = array<i64: 1, 16>}, {pipeline_mode = #tpu.pipeline_mode<synchronous>, transform_indices = @transform_20, window_bounds = array<i64: 16, 48>}, {pipeline_mode = #tpu.pipeline_mode<synchronous>, transform_indices = @transform_21, window_bounds = array<i64: 1, 48>}, {pipeline_mode = #tpu.pipeline_mode<synchronous>, transform_indices = @transform_22, window_bounds = array<i64: 2, 16, 16>}, {pipeline_mode = #tpu.pipeline_mode<synchronous>, transform_indices = @transform_23, window_bounds = array<i64: 16, 16>}, {pipeline_mode = #tpu.pipeline_mode<synchronous>, transform_indices = @transform_24, window_bounds = array<i64: 1, 16>}, {pipeline_mode = #tpu.pipeline_mode<synchronous>, transform_indices = @transform_25, window_bounds = array<i64: 1, 16>}, {pipeline_mode = #tpu.pipeline_mode<synchronous>, transform_indices = @transform_26, window_bounds = array<i64: 1, 16>}, {pipeline_mode = #tpu.pipeline_mode<synchronous>, transform_indices = @transform_27, window_bounds = array<i64: 16, 64>}, {pipeline_mode = #tpu.pipeline_mode<synchronous>, transform_indices = @transform_28, window_bounds = array<i64: 1, 64>}, {pipeline_mode = #tpu.pipeline_mode<synchronous>, transform_indices = @transform_29, window_bounds = array<i64: 64, 16>}, {pipeline_mode = #tpu.pipeline_mode<synchronous>, transform_indices = @transform_30, window_bounds = array<i64: 1, 16>}, {pipeline_mode = #tpu.pipeline_mode<synchronous>, transform_indices = @transform_31, window_bounds = array<i64: 4, 16, 16>}, {pipeline_mode = #tpu.pipeline_mode<synchronous>, transform_indices = @transform_32, window_bounds = array<i64: 64, 64>}, {pipeline_mode = #tpu.pipeline_mode<synchronous>, transform_indices = @transform_33, window_bounds = array<i64: 64, 64>}, {pipeline_mode = #tpu.pipeline_mode<synchronous>, transform_indices = @transform_34, window_bounds = array<i64: 1, 64>}, {pipeline_mode = #tpu.pipeline_mode<synchronous>, transform_indices = @transform_35, window_bounds = array<i64: 1, 64>}, {pipeline_mode = #tpu.pipeline_mode<synchronous>, transform_indices = @transform_36, window_bounds = array<i64: 64, 32>}, {pipeline_mode = #tpu.pipeline_mode<synchronous>, transform_indices = @transform_37, window_bounds = array<i64: 4, 16, 64>}, {pipeline_mode = #tpu.pipeline_mode<synchronous>, transform_indices = @transform_38, window_bounds = array<i64: 1, 32>}, {pipeline_mode = #tpu.pipeline_mode<synchronous>, transform_indices = @transform_39, window_bounds = array<i64: 1, 32>}, {pipeline_mode = #tpu.pipeline_mode<synchronous>, transform_indices = @transform_40, window_bounds = array<i64: 32, 96>}, {pipeline_mode = #tpu.pipeline_mode<synchronous>, transform_indices = @transform_41, window_bounds = array<i64: 1, 96>}, {pipeline_mode = #tpu.pipeline_mode<synchronous>, transform_indices = @transform_42, window_bounds = array<i64: 4, 16, 16>}, {pipeline_mode = #tpu.pipeline_mode<synchronous>, transform_indices = @transform_43, window_bounds = array<i64: 32, 32>}, {pipeline_mode = #tpu.pipeline_mode<synchronous>, transform_indices = @transform_44, window_bounds = array<i64: 1, 32>}, {pipeline_mode = #tpu.pipeline_mode<synchronous>, transform_indices = @transform_45, window_bounds = array<i64: 1, 32>}, {pipeline_mode = #tpu.pipeline_mode<synchronous>, transform_indices = @transform_46, window_bounds = array<i64: 1, 32>}, {pipeline_mode = #tpu.pipeline_mode<synchronous>, transform_indices = @transform_47, window_bounds = array<i64: 32, 128>}, {pipeline_mode = #tpu.pipeline_mode<synchronous>, transform_indices = @transform_48, window_bounds = array<i64: 1, 128>}, {pipeline_mode = #tpu.pipeline_mode<synchronous>, transform_indices = @transform_49, window_bounds = array<i64: 128, 32>}, {pipeline_mode = #tpu.pipeline_mode<synchronous>, transform_indices = @transform_50, window_bounds = array<i64: 1, 32>}, {pipeline_mode = #tpu.pipeline_mode<synchronous>, transform_indices = @transform_51, window_bounds = array<i64: 1, 32>}, {pipeline_mode = #tpu.pipeline_mode<synchronous>, transform_indices = @transform_52, window_bounds = array<i64: 1, 32>}, {pipeline_mode = #tpu.pipeline_mode<synchronous>, transform_indices = @transform_53, window_bounds = array<i64: 32, 96>}, {pipeline_mode = #tpu.pipeline_mode<synchronous>, transform_indices = @transform_54, window_bounds = array<i64: 1, 96>}, {pipeline_mode = #tpu.pipeline_mode<synchronous>, transform_indices = @transform_55, window_bounds = array<i64: 4, 16, 16>}, {pipeline_mode = #tpu.pipeline_mode<synchronous>, transform_indices = @transform_56, window_bounds = array<i64: 32, 32>}, {pipeline_mode = #tpu.pipeline_mode<synchronous>, transform_indices = @transform_57, window_bounds = array<i64: 1, 32>}, {pipeline_mode = #tpu.pipeline_mode<synchronous>, transform_indices = @transform_58, window_bounds = array<i64: 1, 32>}, {pipeline_mode = #tpu.pipeline_mode<synchronous>, transform_indices = @transform_59, window_bounds = array<i64: 1, 32>}, {pipeline_mode = #tpu.pipeline_mode<synchronous>, transform_indices = @transform_60, window_bounds = array<i64: 32, 128>}, {pipeline_mode = #tpu.pipeline_mode<synchronous>, transform_indices = @transform_61, window_bounds = array<i64: 1, 128>}, {pipeline_mode = #tpu.pipeline_mode<synchronous>, transform_indices = @transform_62, window_bounds = array<i64: 128, 32>}, {pipeline_mode = #tpu.pipeline_mode<synchronous>, transform_indices = @transform_63, window_bounds = array<i64: 1, 32>}, {pipeline_mode = #tpu.pipeline_mode<synchronous>, transform_indices = @transform_64, window_bounds = array<i64: 1, 32>}, {pipeline_mode = #tpu.pipeline_mode<synchronous>, transform_indices = @transform_65, window_bounds = array<i64: 1, 32>}, {pipeline_mode = #tpu.pipeline_mode<synchronous>, transform_indices = @transform_66, window_bounds = array<i64: 32, 1>}, {pipeline_mode = #tpu.pipeline_mode<synchronous>, transform_indices = @transform_67, window_bounds = array<i64: 1, 1>}, {transform_indices = @transform_68, window_bounds = array<i64: 1, 1, 32>}, {transform_indices = @transform_69, window_bounds = array<i64: 1, 1, 1>}]} {
    %c0 = arith.constant 0 : index
    %c0_0 = arith.constant 0 : index
    %c0_1 = arith.constant 0 : index
    %0 = vector.load %arg1[%c0, %c0_0, %c0_1] : memref<1x64x48xf32, #tpu.memory_space<vmem>>, vector<1x64x48xf32>
    %1 = vector.shape_cast %0 : vector<1x64x48xf32> to vector<64x48xf32>
    %c0_2 = arith.constant 0 : index
    %c0_3 = arith.constant 0 : index
    %2 = vector.load %arg2[%c0_2, %c0_3] : memref<48x16xf32, #tpu.memory_space<vmem>>, vector<48x16xf32>
    %c0_4 = arith.constant 0 : index
    %c0_5 = arith.constant 0 : index
    %3 = vector.load %arg3[%c0_4, %c0_5] : memref<1x16xf32, #tpu.memory_space<vmem>>, vector<1x16xf32>
    %c0_6 = arith.constant 0 : index
    %c0_7 = arith.constant 0 : index
    %4 = vector.load %arg4[%c0_6, %c0_7] : memref<1x16xf32, #tpu.memory_space<vmem>>, vector<1x16xf32>
    %c0_8 = arith.constant 0 : index
    %c0_9 = arith.constant 0 : index
    %5 = vector.load %arg5[%c0_8, %c0_9] : memref<1x16xf32, #tpu.memory_space<vmem>>, vector<1x16xf32>
    %cst = arith.constant dense<0.000000e+00> : vector<64x16xf32>
    %6 = tpu.matmul %1, %2, %cst {dimension_numbers = #tpu.dot_dimension_numbers<[1], [0], [0], [1], [0, 0, 1, 1], [], []>} : vector<64x48xf32>, vector<48x16xf32>, vector<64x16xf32> -> vector<64x16xf32>
    %7 = vector.broadcast %3 : vector<1x16xf32> to vector<64x16xf32>
    %8 = arith.addf %6, %7 : vector<64x16xf32>
    %cst_10 = arith.constant dense<0.000000e+00> : vector<64xf32>
    %9 = vector.multi_reduction <add>, %8, %cst_10 [1] : vector<64x16xf32> to vector<64xf32>
    %10 = vector.shape_cast %9 : vector<64xf32> to vector<64x1xf32>
    %cst_11 = arith.constant 1.600000e+01 : f32
    %11 = vector.broadcast %cst_11 : f32 to vector<64x1xf32>
    %12 = arith.divf %10, %11 : vector<64x1xf32>
    %13 = vector.broadcast %12 : vector<64x1xf32> to vector<64x16xf32>
    %14 = arith.subf %8, %13 : vector<64x16xf32>
    %15 = arith.mulf %14, %14 : vector<64x16xf32>
    %cst_12 = arith.constant dense<0.000000e+00> : vector<64xf32>
    %16 = vector.multi_reduction <add>, %15, %cst_12 [1] : vector<64x16xf32> to vector<64xf32>
    %17 = vector.shape_cast %16 : vector<64xf32> to vector<64x1xf32>
    %cst_13 = arith.constant 1.600000e+01 : f32
    %18 = vector.broadcast %cst_13 : f32 to vector<64x1xf32>
    %19 = arith.divf %17, %18 : vector<64x1xf32>
    %cst_14 = arith.constant 9.99999974E-6 : f32
    %20 = vector.broadcast %cst_14 : f32 to vector<64x1xf32>
    %21 = arith.addf %19, %20 : vector<64x1xf32>
    %22 = math.rsqrt %21 : vector<64x1xf32>
    %23 = vector.broadcast %22 : vector<64x1xf32> to vector<64x16xf32>
    %24 = arith.mulf %14, %23 : vector<64x16xf32>
    %25 = vector.broadcast %4 : vector<1x16xf32> to vector<64x16xf32>
    %26 = arith.mulf %24, %25 : vector<64x16xf32>
    %27 = vector.broadcast %5 : vector<1x16xf32> to vector<64x16xf32>
    %28 = arith.addf %26, %27 : vector<64x16xf32>
    %c0_15 = arith.constant 0 : index
    %c0_16 = arith.constant 0 : index
    %29 = vector.load %arg6[%c0_15, %c0_16] : memref<1x16xf32, #tpu.memory_space<vmem>>, vector<1x16xf32>
    %c0_17 = arith.constant 0 : index
    %c0_18 = arith.constant 0 : index
    %30 = vector.load %arg7[%c0_17, %c0_18] : memref<1x16xf32, #tpu.memory_space<vmem>>, vector<1x16xf32>
    %c0_19 = arith.constant 0 : index
    %c0_20 = arith.constant 0 : index
    %31 = vector.load %arg8[%c0_19, %c0_20] : memref<16x48xf32, #tpu.memory_space<vmem>>, vector<16x48xf32>
    %c0_21 = arith.constant 0 : index
    %c0_22 = arith.constant 0 : index
    %32 = vector.load %arg9[%c0_21, %c0_22] : memref<1x48xf32, #tpu.memory_space<vmem>>, vector<1x48xf32>
    %c0_23 = arith.constant 0 : index
    %c0_24 = arith.constant 0 : index
    %c0_25 = arith.constant 0 : index
    %33 = vector.load %arg10[%c0_23, %c0_24, %c0_25] : memref<2x16x16xf32, #tpu.memory_space<vmem>>, vector<2x16x16xf32>
    %c0_26 = arith.constant 0 : index
    %c0_27 = arith.constant 0 : index
    %34 = vector.load %arg11[%c0_26, %c0_27] : memref<16x16xf32, #tpu.memory_space<vmem>>, vector<16x16xf32>
    %c0_28 = arith.constant 0 : index
    %c0_29 = arith.constant 0 : index
    %35 = vector.load %arg12[%c0_28, %c0_29] : memref<1x16xf32, #tpu.memory_space<vmem>>, vector<1x16xf32>
    %c0_30 = arith.constant 0 : index
    %c0_31 = arith.constant 0 : index
    %36 = vector.load %arg13[%c0_30, %c0_31] : memref<1x16xf32, #tpu.memory_space<vmem>>, vector<1x16xf32>
    %c0_32 = arith.constant 0 : index
    %c0_33 = arith.constant 0 : index
    %37 = vector.load %arg14[%c0_32, %c0_33] : memref<1x16xf32, #tpu.memory_space<vmem>>, vector<1x16xf32>
    %c0_34 = arith.constant 0 : index
    %c0_35 = arith.constant 0 : index
    %38 = vector.load %arg15[%c0_34, %c0_35] : memref<16x64xf32, #tpu.memory_space<vmem>>, vector<16x64xf32>
    %c0_36 = arith.constant 0 : index
    %c0_37 = arith.constant 0 : index
    %39 = vector.load %arg16[%c0_36, %c0_37] : memref<1x64xf32, #tpu.memory_space<vmem>>, vector<1x64xf32>
    %c0_38 = arith.constant 0 : index
    %c0_39 = arith.constant 0 : index
    %40 = vector.load %arg17[%c0_38, %c0_39] : memref<64x16xf32, #tpu.memory_space<vmem>>, vector<64x16xf32>
    %c0_40 = arith.constant 0 : index
    %c0_41 = arith.constant 0 : index
    %41 = vector.load %arg18[%c0_40, %c0_41] : memref<1x16xf32, #tpu.memory_space<vmem>>, vector<1x16xf32>
    %cst_42 = arith.constant dense<0.000000e+00> : vector<64xf32>
    %42 = vector.multi_reduction <add>, %28, %cst_42 [1] : vector<64x16xf32> to vector<64xf32>
    %43 = vector.shape_cast %42 : vector<64xf32> to vector<64x1xf32>
    %cst_43 = arith.constant 1.600000e+01 : f32
    %44 = vector.broadcast %cst_43 : f32 to vector<64x1xf32>
    %45 = arith.divf %43, %44 : vector<64x1xf32>
    %46 = vector.broadcast %45 : vector<64x1xf32> to vector<64x16xf32>
    %47 = arith.subf %28, %46 : vector<64x16xf32>
    %48 = arith.mulf %47, %47 : vector<64x16xf32>
    %cst_44 = arith.constant dense<0.000000e+00> : vector<64xf32>
    %49 = vector.multi_reduction <add>, %48, %cst_44 [1] : vector<64x16xf32> to vector<64xf32>
    %50 = vector.shape_cast %49 : vector<64xf32> to vector<64x1xf32>
    %cst_45 = arith.constant 1.600000e+01 : f32
    %51 = vector.broadcast %cst_45 : f32 to vector<64x1xf32>
    %52 = arith.divf %50, %51 : vector<64x1xf32>
    %cst_46 = arith.constant 9.99999974E-6 : f32
    %53 = vector.broadcast %cst_46 : f32 to vector<64x1xf32>
    %54 = arith.addf %52, %53 : vector<64x1xf32>
    %55 = math.rsqrt %54 : vector<64x1xf32>
    %56 = vector.broadcast %55 : vector<64x1xf32> to vector<64x16xf32>
    %57 = arith.mulf %47, %56 : vector<64x16xf32>
    %58 = vector.broadcast %29 : vector<1x16xf32> to vector<64x16xf32>
    %59 = arith.mulf %57, %58 : vector<64x16xf32>
    %60 = vector.broadcast %30 : vector<1x16xf32> to vector<64x16xf32>
    %61 = arith.addf %59, %60 : vector<64x16xf32>
    %cst_47 = arith.constant dense<0.000000e+00> : vector<64x48xf32>
    %62 = tpu.matmul %61, %31, %cst_47 {dimension_numbers = #tpu.dot_dimension_numbers<[1], [0], [0], [1], [0, 0, 1, 1], [], []>} : vector<64x16xf32>, vector<16x48xf32>, vector<64x48xf32> -> vector<64x48xf32>
    %63 = vector.broadcast %32 : vector<1x48xf32> to vector<64x48xf32>
    %64 = arith.addf %62, %63 : vector<64x48xf32>
    %65 = vector.shape_cast %64 : vector<64x48xf32> to vector<4x16x48xf32>
    %66 = vector.extract_strided_slice %65 {offsets = [0, 0, 0], sizes = [4, 16, 8], strides = [1, 1, 1]} : vector<4x16x48xf32> to vector<4x16x8xf32>
    %67 = vector.extract_strided_slice %65 {offsets = [0, 0, 8], sizes = [4, 16, 8], strides = [1, 1, 1]} : vector<4x16x48xf32> to vector<4x16x8xf32>
    %68 = vector.shape_cast %66 : vector<4x16x8xf32> to vector<1x4x16x8xf32>
    %69 = vector.shape_cast %67 : vector<4x16x8xf32> to vector<1x4x16x8xf32>
    %70 = tpu.concatenate %68, %69 in 0 : vector<1x4x16x8xf32>, vector<1x4x16x8xf32> -> vector<2x4x16x8xf32>
    %71 = vector.extract_strided_slice %65 {offsets = [0, 0, 16], sizes = [4, 16, 8], strides = [1, 1, 1]} : vector<4x16x48xf32> to vector<4x16x8xf32>
    %72 = vector.extract_strided_slice %65 {offsets = [0, 0, 24], sizes = [4, 16, 8], strides = [1, 1, 1]} : vector<4x16x48xf32> to vector<4x16x8xf32>
    %73 = vector.shape_cast %71 : vector<4x16x8xf32> to vector<1x4x16x8xf32>
    %74 = vector.shape_cast %72 : vector<4x16x8xf32> to vector<1x4x16x8xf32>
    %75 = tpu.concatenate %73, %74 in 0 : vector<1x4x16x8xf32>, vector<1x4x16x8xf32> -> vector<2x4x16x8xf32>
    %76 = vector.extract_strided_slice %65 {offsets = [0, 0, 32], sizes = [4, 16, 8], strides = [1, 1, 1]} : vector<4x16x48xf32> to vector<4x16x8xf32>
    %77 = vector.extract_strided_slice %65 {offsets = [0, 0, 40], sizes = [4, 16, 8], strides = [1, 1, 1]} : vector<4x16x48xf32> to vector<4x16x8xf32>
    %78 = vector.shape_cast %76 : vector<4x16x8xf32> to vector<1x4x16x8xf32>
    %79 = vector.shape_cast %77 : vector<4x16x8xf32> to vector<1x4x16x8xf32>
    %80 = tpu.concatenate %78, %79 in 0 : vector<1x4x16x8xf32>, vector<1x4x16x8xf32> -> vector<2x4x16x8xf32>
    %cst_48 = arith.constant 0.353553385 : f32
    %81 = vector.broadcast %cst_48 : f32 to vector<2x4x16x8xf32>
    %82 = arith.mulf %70, %81 : vector<2x4x16x8xf32>
    %83 = vector.shape_cast %82 : vector<2x4x16x8xf32> to vector<8x16x8xf32>
    %84 = vector.shape_cast %75 : vector<2x4x16x8xf32> to vector<8x16x8xf32>
    %85 = vector.shape_cast %80 : vector<2x4x16x8xf32> to vector<8x16x8xf32>
    "tpu.trace_start"() <{level = 10 : i32, message = "bnd,bmd->bnm"}> : () -> ()
    %cst_49 = arith.constant dense<0.000000e+00> : vector<8x16x16xf32>
    %86 = tpu.matmul %83, %84, %cst_49 {dimension_numbers = #tpu.dot_dimension_numbers<[2], [2], [1], [1], [0, 0, 0, 1, 1, 1], [0], [0]>} : vector<8x16x8xf32>, vector<8x16x8xf32>, vector<8x16x16xf32> -> vector<8x16x16xf32>
    "tpu.trace_stop"() : () -> ()
    %87 = vector.shape_cast %86 : vector<8x16x16xf32> to vector<2x4x16x16xf32>
    %88 = vector.shape_cast %33 : vector<2x16x16xf32> to vector<2x1x16x16xf32>
    %89 = vector.broadcast %88 : vector<2x1x16x16xf32> to vector<2x4x16x16xf32>
    %90 = arith.addf %87, %89 : vector<2x4x16x16xf32>
    %91 = vector.shape_cast %90 : vector<2x4x16x16xf32> to vector<8x16x16xf32>
    %cst_50 = arith.constant dense<0xFF800000> : vector<8x16xf32>
    %92 = vector.multi_reduction <maximumf>, %91, %cst_50 [2] : vector<8x16x16xf32> to vector<8x16xf32>
    %93 = vector.shape_cast %92 : vector<8x16xf32> to vector<8x16x1xf32>
    %94 = vector.broadcast %93 : vector<8x16x1xf32> to vector<8x16x16xf32>
    %95 = arith.subf %91, %94 : vector<8x16x16xf32>
    %96 = math.exp %95 : vector<8x16x16xf32>
    %cst_51 = arith.constant dense<0.000000e+00> : vector<8x16xf32>
    %97 = vector.multi_reduction <add>, %96, %cst_51 [2] : vector<8x16x16xf32> to vector<8x16xf32>
    %98 = vector.shape_cast %97 : vector<8x16xf32> to vector<8x16x1xf32>
    %99 = tpu.reciprocal %98 {approx = true} : vector<8x16x1xf32> -> vector<8x16x1xf32>
    %100 = vector.broadcast %99 : vector<8x16x1xf32> to vector<8x16x16xf32>
    %101 = arith.mulf %96, %100 : vector<8x16x16xf32>
    "tpu.trace_start"() <{level = 10 : i32, message = "bnm,bmd->bnd"}> : () -> ()
    %cst_52 = arith.constant dense<0.000000e+00> : vector<8x16x8xf32>
    %102 = tpu.matmul %101, %85, %cst_52 {dimension_numbers = #tpu.dot_dimension_numbers<[2], [1], [1], [2], [0, 0, 0, 1, 1, 2], [0], [0]>} : vector<8x16x16xf32>, vector<8x16x8xf32>, vector<8x16x8xf32> -> vector<8x16x8xf32>
    "tpu.trace_stop"() : () -> ()
    %103 = vector.extract_strided_slice %102 {offsets = [0, 0, 0], sizes = [4, 16, 8], strides = [1, 1, 1]} : vector<8x16x8xf32> to vector<4x16x8xf32>
    %104 = vector.shape_cast %103 : vector<4x16x8xf32> to vector<64x8xf32>
    %105 = vector.extract_strided_slice %34 {offsets = [0, 0], sizes = [8, 16], strides = [1, 1]} : vector<16x16xf32> to vector<8x16xf32>
    %cst_53 = arith.constant dense<0.000000e+00> : vector<64x16xf32>
    %106 = tpu.matmul %104, %105, %cst_53 {dimension_numbers = #tpu.dot_dimension_numbers<[1], [0], [0], [1], [0, 0, 1, 1], [], []>} : vector<64x8xf32>, vector<8x16xf32>, vector<64x16xf32> -> vector<64x16xf32>
    %107 = vector.extract_strided_slice %102 {offsets = [4, 0, 0], sizes = [4, 16, 8], strides = [1, 1, 1]} : vector<8x16x8xf32> to vector<4x16x8xf32>
    %108 = vector.shape_cast %107 : vector<4x16x8xf32> to vector<64x8xf32>
    %109 = vector.extract_strided_slice %34 {offsets = [8, 0], sizes = [8, 16], strides = [1, 1]} : vector<16x16xf32> to vector<8x16xf32>
    %cst_54 = arith.constant dense<0.000000e+00> : vector<64x16xf32>
    %110 = tpu.matmul %108, %109, %cst_54 {dimension_numbers = #tpu.dot_dimension_numbers<[1], [0], [0], [1], [0, 0, 1, 1], [], []>} : vector<64x8xf32>, vector<8x16xf32>, vector<64x16xf32> -> vector<64x16xf32>
    %111 = arith.addf %106, %110 : vector<64x16xf32>
    %112 = arith.addf %28, %111 : vector<64x16xf32>
    %113 = vector.broadcast %35 : vector<1x16xf32> to vector<64x16xf32>
    %114 = arith.addf %112, %113 : vector<64x16xf32>
    %cst_55 = arith.constant dense<0.000000e+00> : vector<64xf32>
    %115 = vector.multi_reduction <add>, %114, %cst_55 [1] : vector<64x16xf32> to vector<64xf32>
    %116 = vector.shape_cast %115 : vector<64xf32> to vector<64x1xf32>
    %cst_56 = arith.constant 1.600000e+01 : f32
    %117 = vector.broadcast %cst_56 : f32 to vector<64x1xf32>
    %118 = arith.divf %116, %117 : vector<64x1xf32>
    %119 = vector.broadcast %118 : vector<64x1xf32> to vector<64x16xf32>
    %120 = arith.subf %114, %119 : vector<64x16xf32>
    %121 = arith.mulf %120, %120 : vector<64x16xf32>
    %cst_57 = arith.constant dense<0.000000e+00> : vector<64xf32>
    %122 = vector.multi_reduction <add>, %121, %cst_57 [1] : vector<64x16xf32> to vector<64xf32>
    %123 = vector.shape_cast %122 : vector<64xf32> to vector<64x1xf32>
    %cst_58 = arith.constant 1.600000e+01 : f32
    %124 = vector.broadcast %cst_58 : f32 to vector<64x1xf32>
    %125 = arith.divf %123, %124 : vector<64x1xf32>
    %cst_59 = arith.constant 9.99999974E-6 : f32
    %126 = vector.broadcast %cst_59 : f32 to vector<64x1xf32>
    %127 = arith.addf %125, %126 : vector<64x1xf32>
    %128 = math.rsqrt %127 : vector<64x1xf32>
    %129 = vector.broadcast %128 : vector<64x1xf32> to vector<64x16xf32>
    %130 = arith.mulf %120, %129 : vector<64x16xf32>
    %131 = vector.broadcast %36 : vector<1x16xf32> to vector<64x16xf32>
    %132 = arith.mulf %130, %131 : vector<64x16xf32>
    %133 = vector.broadcast %37 : vector<1x16xf32> to vector<64x16xf32>
    %134 = arith.addf %132, %133 : vector<64x16xf32>
    %cst_60 = arith.constant dense<0.000000e+00> : vector<64x64xf32>
    %135 = tpu.matmul %134, %38, %cst_60 {dimension_numbers = #tpu.dot_dimension_numbers<[1], [0], [0], [1], [0, 0, 1, 1], [], []>} : vector<64x16xf32>, vector<16x64xf32>, vector<64x64xf32> -> vector<64x64xf32>
    %136 = vector.broadcast %39 : vector<1x64xf32> to vector<64x64xf32>
    %137 = arith.addf %135, %136 : vector<64x64xf32>
    %138 = arith.mulf %137, %137 : vector<64x64xf32>
    %139 = arith.mulf %137, %138 : vector<64x64xf32>
    %cst_61 = arith.constant 4.471500e-02 : f32
    %140 = vector.broadcast %cst_61 : f32 to vector<64x64xf32>
    %141 = arith.mulf %140, %139 : vector<64x64xf32>
    %142 = arith.addf %137, %141 : vector<64x64xf32>
    %cst_62 = arith.constant 0.797884583 : f32
    %143 = vector.broadcast %cst_62 : f32 to vector<64x64xf32>
    %144 = arith.mulf %143, %142 : vector<64x64xf32>
    %145 = math.tanh %144 : vector<64x64xf32>
    %cst_63 = arith.constant 1.000000e+00 : f32
    %146 = vector.broadcast %cst_63 : f32 to vector<64x64xf32>
    %147 = arith.addf %146, %145 : vector<64x64xf32>
    %cst_64 = arith.constant 5.000000e-01 : f32
    %148 = vector.broadcast %cst_64 : f32 to vector<64x64xf32>
    %149 = arith.mulf %148, %147 : vector<64x64xf32>
    %150 = arith.mulf %137, %149 : vector<64x64xf32>
    %cst_65 = arith.constant dense<0.000000e+00> : vector<64x16xf32>
    %151 = tpu.matmul %150, %40, %cst_65 {dimension_numbers = #tpu.dot_dimension_numbers<[1], [0], [0], [1], [0, 0, 1, 1], [], []>} : vector<64x64xf32>, vector<64x16xf32>, vector<64x16xf32> -> vector<64x16xf32>
    %152 = vector.broadcast %41 : vector<1x16xf32> to vector<64x16xf32>
    %153 = arith.addf %151, %152 : vector<64x16xf32>
    %154 = arith.addf %114, %153 : vector<64x16xf32>
    %c0_66 = arith.constant 0 : index
    %c0_67 = arith.constant 0 : index
    %155 = vector.load %arg19[%c0_66, %c0_67] : memref<1x16xf32, #tpu.memory_space<vmem>>, vector<1x16xf32>
    %c0_68 = arith.constant 0 : index
    %c0_69 = arith.constant 0 : index
    %156 = vector.load %arg20[%c0_68, %c0_69] : memref<1x16xf32, #tpu.memory_space<vmem>>, vector<1x16xf32>
    %c0_70 = arith.constant 0 : index
    %c0_71 = arith.constant 0 : index
    %157 = vector.load %arg21[%c0_70, %c0_71] : memref<16x48xf32, #tpu.memory_space<vmem>>, vector<16x48xf32>
    %c0_72 = arith.constant 0 : index
    %c0_73 = arith.constant 0 : index
    %158 = vector.load %arg22[%c0_72, %c0_73] : memref<1x48xf32, #tpu.memory_space<vmem>>, vector<1x48xf32>
    %c0_74 = arith.constant 0 : index
    %c0_75 = arith.constant 0 : index
    %c0_76 = arith.constant 0 : index
    %159 = vector.load %arg23[%c0_74, %c0_75, %c0_76] : memref<2x16x16xf32, #tpu.memory_space<vmem>>, vector<2x16x16xf32>
    %c0_77 = arith.constant 0 : index
    %c0_78 = arith.constant 0 : index
    %160 = vector.load %arg24[%c0_77, %c0_78] : memref<16x16xf32, #tpu.memory_space<vmem>>, vector<16x16xf32>
    %c0_79 = arith.constant 0 : index
    %c0_80 = arith.constant 0 : index
    %161 = vector.load %arg25[%c0_79, %c0_80] : memref<1x16xf32, #tpu.memory_space<vmem>>, vector<1x16xf32>
    %c0_81 = arith.constant 0 : index
    %c0_82 = arith.constant 0 : index
    %162 = vector.load %arg26[%c0_81, %c0_82] : memref<1x16xf32, #tpu.memory_space<vmem>>, vector<1x16xf32>
    %c0_83 = arith.constant 0 : index
    %c0_84 = arith.constant 0 : index
    %163 = vector.load %arg27[%c0_83, %c0_84] : memref<1x16xf32, #tpu.memory_space<vmem>>, vector<1x16xf32>
    %c0_85 = arith.constant 0 : index
    %c0_86 = arith.constant 0 : index
    %164 = vector.load %arg28[%c0_85, %c0_86] : memref<16x64xf32, #tpu.memory_space<vmem>>, vector<16x64xf32>
    %c0_87 = arith.constant 0 : index
    %c0_88 = arith.constant 0 : index
    %165 = vector.load %arg29[%c0_87, %c0_88] : memref<1x64xf32, #tpu.memory_space<vmem>>, vector<1x64xf32>
    %c0_89 = arith.constant 0 : index
    %c0_90 = arith.constant 0 : index
    %166 = vector.load %arg30[%c0_89, %c0_90] : memref<64x16xf32, #tpu.memory_space<vmem>>, vector<64x16xf32>
    %c0_91 = arith.constant 0 : index
    %c0_92 = arith.constant 0 : index
    %167 = vector.load %arg31[%c0_91, %c0_92] : memref<1x16xf32, #tpu.memory_space<vmem>>, vector<1x16xf32>
    %c0_93 = arith.constant 0 : index
    %c0_94 = arith.constant 0 : index
    %c0_95 = arith.constant 0 : index
    %168 = vector.load %arg32[%c0_93, %c0_94, %c0_95] : memref<4x16x16xf32, #tpu.memory_space<vmem>>, vector<4x16x16xf32>
    %169 = vector.shape_cast %168 : vector<4x16x16xf32> to vector<4x16x16xf32>
    %c0_96 = arith.constant 0 : index
    %c0_97 = arith.constant 0 : index
    %170 = vector.load %arg33[%c0_96, %c0_97] : memref<64x64xf32, #tpu.memory_space<vmem>>, vector<64x64xf32>
    %c0_98 = arith.constant 0 : index
    %c0_99 = arith.constant 0 : index
    %171 = vector.load %arg34[%c0_98, %c0_99] : memref<64x64xf32, #tpu.memory_space<vmem>>, vector<64x64xf32>
    %cst_100 = arith.constant dense<0.000000e+00> : vector<64x16xf32>
    %172 = tpu.matmul %170, %154, %cst_100 {dimension_numbers = #tpu.dot_dimension_numbers<[1], [0], [0], [1], [0, 0, 1, 1], [], []>} : vector<64x64xf32>, vector<64x16xf32>, vector<64x16xf32> -> vector<64x16xf32>
    %cst_101 = arith.constant dense<0.000000e+00> : vector<64xf32>
    %173 = vector.multi_reduction <add>, %172, %cst_101 [1] : vector<64x16xf32> to vector<64xf32>
    %174 = vector.shape_cast %173 : vector<64xf32> to vector<64x1xf32>
    %cst_102 = arith.constant 1.600000e+01 : f32
    %175 = vector.broadcast %cst_102 : f32 to vector<64x1xf32>
    %176 = arith.divf %174, %175 : vector<64x1xf32>
    %177 = vector.broadcast %176 : vector<64x1xf32> to vector<64x16xf32>
    %178 = arith.subf %172, %177 : vector<64x16xf32>
    %179 = arith.mulf %178, %178 : vector<64x16xf32>
    %cst_103 = arith.constant dense<0.000000e+00> : vector<64xf32>
    %180 = vector.multi_reduction <add>, %179, %cst_103 [1] : vector<64x16xf32> to vector<64xf32>
    %181 = vector.shape_cast %180 : vector<64xf32> to vector<64x1xf32>
    %cst_104 = arith.constant 1.600000e+01 : f32
    %182 = vector.broadcast %cst_104 : f32 to vector<64x1xf32>
    %183 = arith.divf %181, %182 : vector<64x1xf32>
    %cst_105 = arith.constant 9.99999974E-6 : f32
    %184 = vector.broadcast %cst_105 : f32 to vector<64x1xf32>
    %185 = arith.addf %183, %184 : vector<64x1xf32>
    %186 = math.rsqrt %185 : vector<64x1xf32>
    %187 = vector.broadcast %186 : vector<64x1xf32> to vector<64x16xf32>
    %188 = arith.mulf %178, %187 : vector<64x16xf32>
    %189 = vector.broadcast %155 : vector<1x16xf32> to vector<64x16xf32>
    %190 = arith.mulf %188, %189 : vector<64x16xf32>
    %191 = vector.broadcast %156 : vector<1x16xf32> to vector<64x16xf32>
    %192 = arith.addf %190, %191 : vector<64x16xf32>
    %cst_106 = arith.constant dense<0.000000e+00> : vector<64x48xf32>
    %193 = tpu.matmul %192, %157, %cst_106 {dimension_numbers = #tpu.dot_dimension_numbers<[1], [0], [0], [1], [0, 0, 1, 1], [], []>} : vector<64x16xf32>, vector<16x48xf32>, vector<64x48xf32> -> vector<64x48xf32>
    %194 = vector.broadcast %158 : vector<1x48xf32> to vector<64x48xf32>
    %195 = arith.addf %193, %194 : vector<64x48xf32>
    %196 = vector.shape_cast %195 : vector<64x48xf32> to vector<4x16x48xf32>
    %197 = vector.extract_strided_slice %196 {offsets = [0, 0, 0], sizes = [4, 16, 8], strides = [1, 1, 1]} : vector<4x16x48xf32> to vector<4x16x8xf32>
    %198 = vector.extract_strided_slice %196 {offsets = [0, 0, 8], sizes = [4, 16, 8], strides = [1, 1, 1]} : vector<4x16x48xf32> to vector<4x16x8xf32>
    %199 = vector.shape_cast %197 : vector<4x16x8xf32> to vector<1x4x16x8xf32>
    %200 = vector.shape_cast %198 : vector<4x16x8xf32> to vector<1x4x16x8xf32>
    %201 = tpu.concatenate %199, %200 in 0 : vector<1x4x16x8xf32>, vector<1x4x16x8xf32> -> vector<2x4x16x8xf32>
    %202 = vector.extract_strided_slice %196 {offsets = [0, 0, 16], sizes = [4, 16, 8], strides = [1, 1, 1]} : vector<4x16x48xf32> to vector<4x16x8xf32>
    %203 = vector.extract_strided_slice %196 {offsets = [0, 0, 24], sizes = [4, 16, 8], strides = [1, 1, 1]} : vector<4x16x48xf32> to vector<4x16x8xf32>
    %204 = vector.shape_cast %202 : vector<4x16x8xf32> to vector<1x4x16x8xf32>
    %205 = vector.shape_cast %203 : vector<4x16x8xf32> to vector<1x4x16x8xf32>
    %206 = tpu.concatenate %204, %205 in 0 : vector<1x4x16x8xf32>, vector<1x4x16x8xf32> -> vector<2x4x16x8xf32>
    %207 = vector.extract_strided_slice %196 {offsets = [0, 0, 32], sizes = [4, 16, 8], strides = [1, 1, 1]} : vector<4x16x48xf32> to vector<4x16x8xf32>
    %208 = vector.extract_strided_slice %196 {offsets = [0, 0, 40], sizes = [4, 16, 8], strides = [1, 1, 1]} : vector<4x16x48xf32> to vector<4x16x8xf32>
    %209 = vector.shape_cast %207 : vector<4x16x8xf32> to vector<1x4x16x8xf32>
    %210 = vector.shape_cast %208 : vector<4x16x8xf32> to vector<1x4x16x8xf32>
    %211 = tpu.concatenate %209, %210 in 0 : vector<1x4x16x8xf32>, vector<1x4x16x8xf32> -> vector<2x4x16x8xf32>
    %cst_107 = arith.constant 0.353553385 : f32
    %212 = vector.broadcast %cst_107 : f32 to vector<2x4x16x8xf32>
    %213 = arith.mulf %201, %212 : vector<2x4x16x8xf32>
    %214 = vector.shape_cast %213 : vector<2x4x16x8xf32> to vector<8x16x8xf32>
    %215 = vector.shape_cast %206 : vector<2x4x16x8xf32> to vector<8x16x8xf32>
    %216 = vector.shape_cast %211 : vector<2x4x16x8xf32> to vector<8x16x8xf32>
    "tpu.trace_start"() <{level = 10 : i32, message = "bnd,bmd->bnm"}> : () -> ()
    %cst_108 = arith.constant dense<0.000000e+00> : vector<8x16x16xf32>
    %217 = tpu.matmul %214, %215, %cst_108 {dimension_numbers = #tpu.dot_dimension_numbers<[2], [2], [1], [1], [0, 0, 0, 1, 1, 1], [0], [0]>} : vector<8x16x8xf32>, vector<8x16x8xf32>, vector<8x16x16xf32> -> vector<8x16x16xf32>
    "tpu.trace_stop"() : () -> ()
    %218 = vector.shape_cast %217 : vector<8x16x16xf32> to vector<2x4x16x16xf32>
    %219 = vector.shape_cast %159 : vector<2x16x16xf32> to vector<2x1x16x16xf32>
    %220 = vector.broadcast %219 : vector<2x1x16x16xf32> to vector<2x4x16x16xf32>
    %221 = arith.addf %218, %220 : vector<2x4x16x16xf32>
    %222 = vector.shape_cast %169 : vector<4x16x16xf32> to vector<1x4x16x16xf32>
    %223 = vector.broadcast %222 : vector<1x4x16x16xf32> to vector<2x4x16x16xf32>
    %224 = arith.addf %221, %223 : vector<2x4x16x16xf32>
    %225 = vector.shape_cast %224 : vector<2x4x16x16xf32> to vector<8x16x16xf32>
    %cst_109 = arith.constant dense<0xFF800000> : vector<8x16xf32>
    %226 = vector.multi_reduction <maximumf>, %225, %cst_109 [2] : vector<8x16x16xf32> to vector<8x16xf32>
    %227 = vector.shape_cast %226 : vector<8x16xf32> to vector<8x16x1xf32>
    %228 = vector.broadcast %227 : vector<8x16x1xf32> to vector<8x16x16xf32>
    %229 = arith.subf %225, %228 : vector<8x16x16xf32>
    %230 = math.exp %229 : vector<8x16x16xf32>
    %cst_110 = arith.constant dense<0.000000e+00> : vector<8x16xf32>
    %231 = vector.multi_reduction <add>, %230, %cst_110 [2] : vector<8x16x16xf32> to vector<8x16xf32>
    %232 = vector.shape_cast %231 : vector<8x16xf32> to vector<8x16x1xf32>
    %233 = tpu.reciprocal %232 {approx = true} : vector<8x16x1xf32> -> vector<8x16x1xf32>
    %234 = vector.broadcast %233 : vector<8x16x1xf32> to vector<8x16x16xf32>
    %235 = arith.mulf %230, %234 : vector<8x16x16xf32>
    "tpu.trace_start"() <{level = 10 : i32, message = "bnm,bmd->bnd"}> : () -> ()
    %cst_111 = arith.constant dense<0.000000e+00> : vector<8x16x8xf32>
    %236 = tpu.matmul %235, %216, %cst_111 {dimension_numbers = #tpu.dot_dimension_numbers<[2], [1], [1], [2], [0, 0, 0, 1, 1, 2], [0], [0]>} : vector<8x16x16xf32>, vector<8x16x8xf32>, vector<8x16x8xf32> -> vector<8x16x8xf32>
    "tpu.trace_stop"() : () -> ()
    %237 = vector.extract_strided_slice %236 {offsets = [0, 0, 0], sizes = [4, 16, 8], strides = [1, 1, 1]} : vector<8x16x8xf32> to vector<4x16x8xf32>
    %238 = vector.shape_cast %237 : vector<4x16x8xf32> to vector<64x8xf32>
    %239 = vector.extract_strided_slice %160 {offsets = [0, 0], sizes = [8, 16], strides = [1, 1]} : vector<16x16xf32> to vector<8x16xf32>
    %cst_112 = arith.constant dense<0.000000e+00> : vector<64x16xf32>
    %240 = tpu.matmul %238, %239, %cst_112 {dimension_numbers = #tpu.dot_dimension_numbers<[1], [0], [0], [1], [0, 0, 1, 1], [], []>} : vector<64x8xf32>, vector<8x16xf32>, vector<64x16xf32> -> vector<64x16xf32>
    %241 = vector.extract_strided_slice %236 {offsets = [4, 0, 0], sizes = [4, 16, 8], strides = [1, 1, 1]} : vector<8x16x8xf32> to vector<4x16x8xf32>
    %242 = vector.shape_cast %241 : vector<4x16x8xf32> to vector<64x8xf32>
    %243 = vector.extract_strided_slice %160 {offsets = [8, 0], sizes = [8, 16], strides = [1, 1]} : vector<16x16xf32> to vector<8x16xf32>
    %cst_113 = arith.constant dense<0.000000e+00> : vector<64x16xf32>
    %244 = tpu.matmul %242, %243, %cst_113 {dimension_numbers = #tpu.dot_dimension_numbers<[1], [0], [0], [1], [0, 0, 1, 1], [], []>} : vector<64x8xf32>, vector<8x16xf32>, vector<64x16xf32> -> vector<64x16xf32>
    %245 = arith.addf %240, %244 : vector<64x16xf32>
    %246 = arith.addf %172, %245 : vector<64x16xf32>
    %247 = vector.broadcast %161 : vector<1x16xf32> to vector<64x16xf32>
    %248 = arith.addf %246, %247 : vector<64x16xf32>
    %cst_114 = arith.constant dense<0.000000e+00> : vector<64xf32>
    %249 = vector.multi_reduction <add>, %248, %cst_114 [1] : vector<64x16xf32> to vector<64xf32>
    %250 = vector.shape_cast %249 : vector<64xf32> to vector<64x1xf32>
    %cst_115 = arith.constant 1.600000e+01 : f32
    %251 = vector.broadcast %cst_115 : f32 to vector<64x1xf32>
    %252 = arith.divf %250, %251 : vector<64x1xf32>
    %253 = vector.broadcast %252 : vector<64x1xf32> to vector<64x16xf32>
    %254 = arith.subf %248, %253 : vector<64x16xf32>
    %255 = arith.mulf %254, %254 : vector<64x16xf32>
    %cst_116 = arith.constant dense<0.000000e+00> : vector<64xf32>
    %256 = vector.multi_reduction <add>, %255, %cst_116 [1] : vector<64x16xf32> to vector<64xf32>
    %257 = vector.shape_cast %256 : vector<64xf32> to vector<64x1xf32>
    %cst_117 = arith.constant 1.600000e+01 : f32
    %258 = vector.broadcast %cst_117 : f32 to vector<64x1xf32>
    %259 = arith.divf %257, %258 : vector<64x1xf32>
    %cst_118 = arith.constant 9.99999974E-6 : f32
    %260 = vector.broadcast %cst_118 : f32 to vector<64x1xf32>
    %261 = arith.addf %259, %260 : vector<64x1xf32>
    %262 = math.rsqrt %261 : vector<64x1xf32>
    %263 = vector.broadcast %262 : vector<64x1xf32> to vector<64x16xf32>
    %264 = arith.mulf %254, %263 : vector<64x16xf32>
    %265 = vector.broadcast %162 : vector<1x16xf32> to vector<64x16xf32>
    %266 = arith.mulf %264, %265 : vector<64x16xf32>
    %267 = vector.broadcast %163 : vector<1x16xf32> to vector<64x16xf32>
    %268 = arith.addf %266, %267 : vector<64x16xf32>
    %cst_119 = arith.constant dense<0.000000e+00> : vector<64x64xf32>
    %269 = tpu.matmul %268, %164, %cst_119 {dimension_numbers = #tpu.dot_dimension_numbers<[1], [0], [0], [1], [0, 0, 1, 1], [], []>} : vector<64x16xf32>, vector<16x64xf32>, vector<64x64xf32> -> vector<64x64xf32>
    %270 = vector.broadcast %165 : vector<1x64xf32> to vector<64x64xf32>
    %271 = arith.addf %269, %270 : vector<64x64xf32>
    %272 = arith.mulf %271, %271 : vector<64x64xf32>
    %273 = arith.mulf %271, %272 : vector<64x64xf32>
    %cst_120 = arith.constant 4.471500e-02 : f32
    %274 = vector.broadcast %cst_120 : f32 to vector<64x64xf32>
    %275 = arith.mulf %274, %273 : vector<64x64xf32>
    %276 = arith.addf %271, %275 : vector<64x64xf32>
    %cst_121 = arith.constant 0.797884583 : f32
    %277 = vector.broadcast %cst_121 : f32 to vector<64x64xf32>
    %278 = arith.mulf %277, %276 : vector<64x64xf32>
    %279 = math.tanh %278 : vector<64x64xf32>
    %cst_122 = arith.constant 1.000000e+00 : f32
    %280 = vector.broadcast %cst_122 : f32 to vector<64x64xf32>
    %281 = arith.addf %280, %279 : vector<64x64xf32>
    %cst_123 = arith.constant 5.000000e-01 : f32
    %282 = vector.broadcast %cst_123 : f32 to vector<64x64xf32>
    %283 = arith.mulf %282, %281 : vector<64x64xf32>
    %284 = arith.mulf %271, %283 : vector<64x64xf32>
    %cst_124 = arith.constant dense<0.000000e+00> : vector<64x16xf32>
    %285 = tpu.matmul %284, %166, %cst_124 {dimension_numbers = #tpu.dot_dimension_numbers<[1], [0], [0], [1], [0, 0, 1, 1], [], []>} : vector<64x64xf32>, vector<64x16xf32>, vector<64x16xf32> -> vector<64x16xf32>
    %286 = vector.broadcast %167 : vector<1x16xf32> to vector<64x16xf32>
    %287 = arith.addf %285, %286 : vector<64x16xf32>
    %288 = arith.addf %248, %287 : vector<64x16xf32>
    %cst_125 = arith.constant dense<0.000000e+00> : vector<64x16xf32>
    %289 = tpu.matmul %171, %288, %cst_125 {dimension_numbers = #tpu.dot_dimension_numbers<[1], [0], [0], [1], [0, 0, 1, 1], [], []>} : vector<64x64xf32>, vector<64x16xf32>, vector<64x16xf32> -> vector<64x16xf32>
    %c0_126 = arith.constant 0 : index
    %c0_127 = arith.constant 0 : index
    %290 = vector.load %arg35[%c0_126, %c0_127] : memref<1x64xf32, #tpu.memory_space<vmem>>, vector<1x64xf32>
    %c0_128 = arith.constant 0 : index
    %c0_129 = arith.constant 0 : index
    %291 = vector.load %arg36[%c0_128, %c0_129] : memref<1x64xf32, #tpu.memory_space<vmem>>, vector<1x64xf32>
    %c0_130 = arith.constant 0 : index
    %c0_131 = arith.constant 0 : index
    %292 = vector.load %arg37[%c0_130, %c0_131] : memref<64x32xf32, #tpu.memory_space<vmem>>, vector<64x32xf32>
    %c0_132 = arith.constant 0 : index
    %c0_133 = arith.constant 0 : index
    %c0_134 = arith.constant 0 : index
    %293 = vector.load %arg38[%c0_132, %c0_133, %c0_134] : memref<4x16x64xf32, #tpu.memory_space<vmem>>, vector<4x16x64xf32>
    %294 = vector.extract_strided_slice %293 {offsets = [0, 0, 0], sizes = [1, 16, 64], strides = [1, 1, 1]} : vector<4x16x64xf32> to vector<1x16x64xf32>
    %295 = vector.shape_cast %294 : vector<1x16x64xf32> to vector<16x64xf32>
    %cst_135 = arith.constant dense<0.000000e+00> : vector<16x16xf32>
    %296 = tpu.matmul %295, %289, %cst_135 {dimension_numbers = #tpu.dot_dimension_numbers<[1], [0], [0], [1], [0, 0, 1, 1], [], []>} : vector<16x64xf32>, vector<64x16xf32>, vector<16x16xf32> -> vector<16x16xf32>
    %297 = vector.extract_strided_slice %293 {offsets = [1, 0, 0], sizes = [1, 16, 64], strides = [1, 1, 1]} : vector<4x16x64xf32> to vector<1x16x64xf32>
    %298 = vector.shape_cast %297 : vector<1x16x64xf32> to vector<16x64xf32>
    %cst_136 = arith.constant dense<0.000000e+00> : vector<16x16xf32>
    %299 = tpu.matmul %298, %289, %cst_136 {dimension_numbers = #tpu.dot_dimension_numbers<[1], [0], [0], [1], [0, 0, 1, 1], [], []>} : vector<16x64xf32>, vector<64x16xf32>, vector<16x16xf32> -> vector<16x16xf32>
    %300 = vector.extract_strided_slice %293 {offsets = [2, 0, 0], sizes = [1, 16, 64], strides = [1, 1, 1]} : vector<4x16x64xf32> to vector<1x16x64xf32>
    %301 = vector.shape_cast %300 : vector<1x16x64xf32> to vector<16x64xf32>
    %cst_137 = arith.constant dense<0.000000e+00> : vector<16x16xf32>
    %302 = tpu.matmul %301, %289, %cst_137 {dimension_numbers = #tpu.dot_dimension_numbers<[1], [0], [0], [1], [0, 0, 1, 1], [], []>} : vector<16x64xf32>, vector<64x16xf32>, vector<16x16xf32> -> vector<16x16xf32>
    %303 = vector.extract_strided_slice %293 {offsets = [3, 0, 0], sizes = [1, 16, 64], strides = [1, 1, 1]} : vector<4x16x64xf32> to vector<1x16x64xf32>
    %304 = vector.shape_cast %303 : vector<1x16x64xf32> to vector<16x64xf32>
    %cst_138 = arith.constant dense<0.000000e+00> : vector<16x16xf32>
    %305 = tpu.matmul %304, %289, %cst_138 {dimension_numbers = #tpu.dot_dimension_numbers<[1], [0], [0], [1], [0, 0, 1, 1], [], []>} : vector<16x64xf32>, vector<64x16xf32>, vector<16x16xf32> -> vector<16x16xf32>
    %cst_139 = arith.constant dense<0.000000e+00> : vector<16xf32>
    %306 = vector.multi_reduction <add>, %296, %cst_139 [1] : vector<16x16xf32> to vector<16xf32>
    %307 = vector.shape_cast %306 : vector<16xf32> to vector<16x1xf32>
    %cst_140 = arith.constant 0.000000e+00 : f32
    %308 = vector.broadcast %cst_140 : f32 to vector<16x1xf32>
    %309 = arith.addf %308, %307 : vector<16x1xf32>
    %cst_141 = arith.constant dense<0.000000e+00> : vector<16xf32>
    %310 = vector.multi_reduction <add>, %299, %cst_141 [1] : vector<16x16xf32> to vector<16xf32>
    %311 = vector.shape_cast %310 : vector<16xf32> to vector<16x1xf32>
    %312 = arith.addf %309, %311 : vector<16x1xf32>
    %cst_142 = arith.constant dense<0.000000e+00> : vector<16xf32>
    %313 = vector.multi_reduction <add>, %302, %cst_142 [1] : vector<16x16xf32> to vector<16xf32>
    %314 = vector.shape_cast %313 : vector<16xf32> to vector<16x1xf32>
    %315 = arith.addf %312, %314 : vector<16x1xf32>
    %cst_143 = arith.constant dense<0.000000e+00> : vector<16xf32>
    %316 = vector.multi_reduction <add>, %305, %cst_143 [1] : vector<16x16xf32> to vector<16xf32>
    %317 = vector.shape_cast %316 : vector<16xf32> to vector<16x1xf32>
    %318 = arith.addf %315, %317 : vector<16x1xf32>
    %cst_144 = arith.constant 1.562500e-02 : f32
    %319 = vector.broadcast %cst_144 : f32 to vector<16x1xf32>
    %320 = arith.mulf %318, %319 : vector<16x1xf32>
    %321 = arith.mulf %296, %296 : vector<16x16xf32>
    %cst_145 = arith.constant dense<0.000000e+00> : vector<16xf32>
    %322 = vector.multi_reduction <add>, %321, %cst_145 [1] : vector<16x16xf32> to vector<16xf32>
    %323 = vector.shape_cast %322 : vector<16xf32> to vector<16x1xf32>
    %cst_146 = arith.constant 0.000000e+00 : f32
    %324 = vector.broadcast %cst_146 : f32 to vector<16x1xf32>
    %325 = arith.addf %324, %323 : vector<16x1xf32>
    %326 = arith.mulf %299, %299 : vector<16x16xf32>
    %cst_147 = arith.constant dense<0.000000e+00> : vector<16xf32>
    %327 = vector.multi_reduction <add>, %326, %cst_147 [1] : vector<16x16xf32> to vector<16xf32>
    %328 = vector.shape_cast %327 : vector<16xf32> to vector<16x1xf32>
    %329 = arith.addf %325, %328 : vector<16x1xf32>
    %330 = arith.mulf %302, %302 : vector<16x16xf32>
    %cst_148 = arith.constant dense<0.000000e+00> : vector<16xf32>
    %331 = vector.multi_reduction <add>, %330, %cst_148 [1] : vector<16x16xf32> to vector<16xf32>
    %332 = vector.shape_cast %331 : vector<16xf32> to vector<16x1xf32>
    %333 = arith.addf %329, %332 : vector<16x1xf32>
    %334 = arith.mulf %305, %305 : vector<16x16xf32>
    %cst_149 = arith.constant dense<0.000000e+00> : vector<16xf32>
    %335 = vector.multi_reduction <add>, %334, %cst_149 [1] : vector<16x16xf32> to vector<16xf32>
    %336 = vector.shape_cast %335 : vector<16xf32> to vector<16x1xf32>
    %337 = arith.addf %333, %336 : vector<16x1xf32>
    %cst_150 = arith.constant 1.562500e-02 : f32
    %338 = vector.broadcast %cst_150 : f32 to vector<16x1xf32>
    %339 = arith.mulf %337, %338 : vector<16x1xf32>
    %340 = arith.mulf %320, %320 : vector<16x1xf32>
    %341 = arith.subf %339, %340 : vector<16x1xf32>
    %cst_151 = arith.constant 9.99999974E-6 : f32
    %342 = vector.broadcast %cst_151 : f32 to vector<16x1xf32>
    %343 = arith.addf %341, %342 : vector<16x1xf32>
    %344 = math.rsqrt %343 : vector<16x1xf32>
    %345 = vector.broadcast %320 : vector<16x1xf32> to vector<16x16xf32>
    %346 = arith.subf %296, %345 : vector<16x16xf32>
    %347 = vector.broadcast %344 : vector<16x1xf32> to vector<16x16xf32>
    %348 = arith.mulf %346, %347 : vector<16x16xf32>
    %349 = vector.extract_strided_slice %290 {offsets = [0, 0], sizes = [1, 16], strides = [1, 1]} : vector<1x64xf32> to vector<1x16xf32>
    %350 = vector.broadcast %349 : vector<1x16xf32> to vector<16x16xf32>
    %351 = arith.mulf %348, %350 : vector<16x16xf32>
    %352 = vector.extract_strided_slice %291 {offsets = [0, 0], sizes = [1, 16], strides = [1, 1]} : vector<1x64xf32> to vector<1x16xf32>
    %353 = vector.broadcast %352 : vector<1x16xf32> to vector<16x16xf32>
    %354 = arith.addf %351, %353 : vector<16x16xf32>
    %355 = vector.extract_strided_slice %292 {offsets = [0, 0], sizes = [16, 32], strides = [1, 1]} : vector<64x32xf32> to vector<16x32xf32>
    %cst_152 = arith.constant dense<0.000000e+00> : vector<16x32xf32>
    %356 = tpu.matmul %354, %355, %cst_152 {dimension_numbers = #tpu.dot_dimension_numbers<[1], [0], [0], [1], [0, 0, 1, 1], [], []>} : vector<16x16xf32>, vector<16x32xf32>, vector<16x32xf32> -> vector<16x32xf32>
    %357 = vector.broadcast %320 : vector<16x1xf32> to vector<16x16xf32>
    %358 = arith.subf %299, %357 : vector<16x16xf32>
    %359 = vector.broadcast %344 : vector<16x1xf32> to vector<16x16xf32>
    %360 = arith.mulf %358, %359 : vector<16x16xf32>
    %361 = vector.extract_strided_slice %290 {offsets = [0, 16], sizes = [1, 16], strides = [1, 1]} : vector<1x64xf32> to vector<1x16xf32>
    %362 = vector.broadcast %361 : vector<1x16xf32> to vector<16x16xf32>
    %363 = arith.mulf %360, %362 : vector<16x16xf32>
    %364 = vector.extract_strided_slice %291 {offsets = [0, 16], sizes = [1, 16], strides = [1, 1]} : vector<1x64xf32> to vector<1x16xf32>
    %365 = vector.broadcast %364 : vector<1x16xf32> to vector<16x16xf32>
    %366 = arith.addf %363, %365 : vector<16x16xf32>
    %367 = vector.extract_strided_slice %292 {offsets = [16, 0], sizes = [16, 32], strides = [1, 1]} : vector<64x32xf32> to vector<16x32xf32>
    %cst_153 = arith.constant dense<0.000000e+00> : vector<16x32xf32>
    %368 = tpu.matmul %366, %367, %cst_153 {dimension_numbers = #tpu.dot_dimension_numbers<[1], [0], [0], [1], [0, 0, 1, 1], [], []>} : vector<16x16xf32>, vector<16x32xf32>, vector<16x32xf32> -> vector<16x32xf32>
    %369 = arith.addf %356, %368 : vector<16x32xf32>
    %370 = vector.broadcast %320 : vector<16x1xf32> to vector<16x16xf32>
    %371 = arith.subf %302, %370 : vector<16x16xf32>
    %372 = vector.broadcast %344 : vector<16x1xf32> to vector<16x16xf32>
    %373 = arith.mulf %371, %372 : vector<16x16xf32>
    %374 = vector.extract_strided_slice %290 {offsets = [0, 32], sizes = [1, 16], strides = [1, 1]} : vector<1x64xf32> to vector<1x16xf32>
    %375 = vector.broadcast %374 : vector<1x16xf32> to vector<16x16xf32>
    %376 = arith.mulf %373, %375 : vector<16x16xf32>
    %377 = vector.extract_strided_slice %291 {offsets = [0, 32], sizes = [1, 16], strides = [1, 1]} : vector<1x64xf32> to vector<1x16xf32>
    %378 = vector.broadcast %377 : vector<1x16xf32> to vector<16x16xf32>
    %379 = arith.addf %376, %378 : vector<16x16xf32>
    %380 = vector.extract_strided_slice %292 {offsets = [32, 0], sizes = [16, 32], strides = [1, 1]} : vector<64x32xf32> to vector<16x32xf32>
    %cst_154 = arith.constant dense<0.000000e+00> : vector<16x32xf32>
    %381 = tpu.matmul %379, %380, %cst_154 {dimension_numbers = #tpu.dot_dimension_numbers<[1], [0], [0], [1], [0, 0, 1, 1], [], []>} : vector<16x16xf32>, vector<16x32xf32>, vector<16x32xf32> -> vector<16x32xf32>
    %382 = arith.addf %369, %381 : vector<16x32xf32>
    %383 = vector.broadcast %320 : vector<16x1xf32> to vector<16x16xf32>
    %384 = arith.subf %305, %383 : vector<16x16xf32>
    %385 = vector.broadcast %344 : vector<16x1xf32> to vector<16x16xf32>
    %386 = arith.mulf %384, %385 : vector<16x16xf32>
    %387 = vector.extract_strided_slice %290 {offsets = [0, 48], sizes = [1, 16], strides = [1, 1]} : vector<1x64xf32> to vector<1x16xf32>
    %388 = vector.broadcast %387 : vector<1x16xf32> to vector<16x16xf32>
    %389 = arith.mulf %386, %388 : vector<16x16xf32>
    %390 = vector.extract_strided_slice %291 {offsets = [0, 48], sizes = [1, 16], strides = [1, 1]} : vector<1x64xf32> to vector<1x16xf32>
    %391 = vector.broadcast %390 : vector<1x16xf32> to vector<16x16xf32>
    %392 = arith.addf %389, %391 : vector<16x16xf32>
    %393 = vector.extract_strided_slice %292 {offsets = [48, 0], sizes = [16, 32], strides = [1, 1]} : vector<64x32xf32> to vector<16x32xf32>
    %cst_155 = arith.constant dense<0.000000e+00> : vector<16x32xf32>
    %394 = tpu.matmul %392, %393, %cst_155 {dimension_numbers = #tpu.dot_dimension_numbers<[1], [0], [0], [1], [0, 0, 1, 1], [], []>} : vector<16x16xf32>, vector<16x32xf32>, vector<16x32xf32> -> vector<16x32xf32>
    %395 = arith.addf %382, %394 : vector<16x32xf32>
    %c0_156 = arith.constant 0 : index
    %c0_157 = arith.constant 0 : index
    %396 = vector.load %arg39[%c0_156, %c0_157] : memref<1x32xf32, #tpu.memory_space<vmem>>, vector<1x32xf32>
    %c0_158 = arith.constant 0 : index
    %c0_159 = arith.constant 0 : index
    %397 = vector.load %arg40[%c0_158, %c0_159] : memref<1x32xf32, #tpu.memory_space<vmem>>, vector<1x32xf32>
    %c0_160 = arith.constant 0 : index
    %c0_161 = arith.constant 0 : index
    %398 = vector.load %arg41[%c0_160, %c0_161] : memref<32x96xf32, #tpu.memory_space<vmem>>, vector<32x96xf32>
    %c0_162 = arith.constant 0 : index
    %c0_163 = arith.constant 0 : index
    %399 = vector.load %arg42[%c0_162, %c0_163] : memref<1x96xf32, #tpu.memory_space<vmem>>, vector<1x96xf32>
    %c0_164 = arith.constant 0 : index
    %c0_165 = arith.constant 0 : index
    %c0_166 = arith.constant 0 : index
    %400 = vector.load %arg43[%c0_164, %c0_165, %c0_166] : memref<4x16x16xf32, #tpu.memory_space<vmem>>, vector<4x16x16xf32>
    %c0_167 = arith.constant 0 : index
    %c0_168 = arith.constant 0 : index
    %401 = vector.load %arg44[%c0_167, %c0_168] : memref<32x32xf32, #tpu.memory_space<vmem>>, vector<32x32xf32>
    %c0_169 = arith.constant 0 : index
    %c0_170 = arith.constant 0 : index
    %402 = vector.load %arg45[%c0_169, %c0_170] : memref<1x32xf32, #tpu.memory_space<vmem>>, vector<1x32xf32>
    %c0_171 = arith.constant 0 : index
    %c0_172 = arith.constant 0 : index
    %403 = vector.load %arg46[%c0_171, %c0_172] : memref<1x32xf32, #tpu.memory_space<vmem>>, vector<1x32xf32>
    %c0_173 = arith.constant 0 : index
    %c0_174 = arith.constant 0 : index
    %404 = vector.load %arg47[%c0_173, %c0_174] : memref<1x32xf32, #tpu.memory_space<vmem>>, vector<1x32xf32>
    %c0_175 = arith.constant 0 : index
    %c0_176 = arith.constant 0 : index
    %405 = vector.load %arg48[%c0_175, %c0_176] : memref<32x128xf32, #tpu.memory_space<vmem>>, vector<32x128xf32>
    %c0_177 = arith.constant 0 : index
    %c0_178 = arith.constant 0 : index
    %406 = vector.load %arg49[%c0_177, %c0_178] : memref<1x128xf32, #tpu.memory_space<vmem>>, vector<1x128xf32>
    %c0_179 = arith.constant 0 : index
    %c0_180 = arith.constant 0 : index
    %407 = vector.load %arg50[%c0_179, %c0_180] : memref<128x32xf32, #tpu.memory_space<vmem>>, vector<128x32xf32>
    %c0_181 = arith.constant 0 : index
    %c0_182 = arith.constant 0 : index
    %408 = vector.load %arg51[%c0_181, %c0_182] : memref<1x32xf32, #tpu.memory_space<vmem>>, vector<1x32xf32>
    %cst_183 = arith.constant dense<0.000000e+00> : vector<16xf32>
    %409 = vector.multi_reduction <add>, %395, %cst_183 [1] : vector<16x32xf32> to vector<16xf32>
    %410 = vector.shape_cast %409 : vector<16xf32> to vector<16x1xf32>
    %cst_184 = arith.constant 3.200000e+01 : f32
    %411 = vector.broadcast %cst_184 : f32 to vector<16x1xf32>
    %412 = arith.divf %410, %411 : vector<16x1xf32>
    %413 = vector.broadcast %412 : vector<16x1xf32> to vector<16x32xf32>
    %414 = arith.subf %395, %413 : vector<16x32xf32>
    %415 = arith.mulf %414, %414 : vector<16x32xf32>
    %cst_185 = arith.constant dense<0.000000e+00> : vector<16xf32>
    %416 = vector.multi_reduction <add>, %415, %cst_185 [1] : vector<16x32xf32> to vector<16xf32>
    %417 = vector.shape_cast %416 : vector<16xf32> to vector<16x1xf32>
    %cst_186 = arith.constant 3.200000e+01 : f32
    %418 = vector.broadcast %cst_186 : f32 to vector<16x1xf32>
    %419 = arith.divf %417, %418 : vector<16x1xf32>
    %cst_187 = arith.constant 9.99999974E-6 : f32
    %420 = vector.broadcast %cst_187 : f32 to vector<16x1xf32>
    %421 = arith.addf %419, %420 : vector<16x1xf32>
    %422 = math.rsqrt %421 : vector<16x1xf32>
    %423 = vector.broadcast %422 : vector<16x1xf32> to vector<16x32xf32>
    %424 = arith.mulf %414, %423 : vector<16x32xf32>
    %425 = vector.broadcast %396 : vector<1x32xf32> to vector<16x32xf32>
    %426 = arith.mulf %424, %425 : vector<16x32xf32>
    %427 = vector.broadcast %397 : vector<1x32xf32> to vector<16x32xf32>
    %428 = arith.addf %426, %427 : vector<16x32xf32>
    %cst_188 = arith.constant dense<0.000000e+00> : vector<16x96xf32>
    %429 = tpu.matmul %428, %398, %cst_188 {dimension_numbers = #tpu.dot_dimension_numbers<[1], [0], [0], [1], [0, 0, 1, 1], [], []>} : vector<16x32xf32>, vector<32x96xf32>, vector<16x96xf32> -> vector<16x96xf32>
    %430 = vector.broadcast %399 : vector<1x96xf32> to vector<16x96xf32>
    %431 = arith.addf %429, %430 : vector<16x96xf32>
    %432 = vector.shape_cast %431 : vector<16x96xf32> to vector<1x16x96xf32>
    %433 = vector.extract_strided_slice %432 {offsets = [0, 0, 0], sizes = [1, 16, 8], strides = [1, 1, 1]} : vector<1x16x96xf32> to vector<1x16x8xf32>
    %434 = vector.extract_strided_slice %432 {offsets = [0, 0, 8], sizes = [1, 16, 8], strides = [1, 1, 1]} : vector<1x16x96xf32> to vector<1x16x8xf32>
    %435 = vector.extract_strided_slice %432 {offsets = [0, 0, 16], sizes = [1, 16, 8], strides = [1, 1, 1]} : vector<1x16x96xf32> to vector<1x16x8xf32>
    %436 = vector.extract_strided_slice %432 {offsets = [0, 0, 24], sizes = [1, 16, 8], strides = [1, 1, 1]} : vector<1x16x96xf32> to vector<1x16x8xf32>
    %437 = vector.shape_cast %433 : vector<1x16x8xf32> to vector<1x1x16x8xf32>
    %438 = vector.shape_cast %434 : vector<1x16x8xf32> to vector<1x1x16x8xf32>
    %439 = vector.shape_cast %435 : vector<1x16x8xf32> to vector<1x1x16x8xf32>
    %440 = vector.shape_cast %436 : vector<1x16x8xf32> to vector<1x1x16x8xf32>
    %441 = tpu.concatenate %437, %438, %439, %440 in 0 : vector<1x1x16x8xf32>, vector<1x1x16x8xf32>, vector<1x1x16x8xf32>, vector<1x1x16x8xf32> -> vector<4x1x16x8xf32>
    %442 = vector.extract_strided_slice %432 {offsets = [0, 0, 32], sizes = [1, 16, 8], strides = [1, 1, 1]} : vector<1x16x96xf32> to vector<1x16x8xf32>
    %443 = vector.extract_strided_slice %432 {offsets = [0, 0, 40], sizes = [1, 16, 8], strides = [1, 1, 1]} : vector<1x16x96xf32> to vector<1x16x8xf32>
    %444 = vector.extract_strided_slice %432 {offsets = [0, 0, 48], sizes = [1, 16, 8], strides = [1, 1, 1]} : vector<1x16x96xf32> to vector<1x16x8xf32>
    %445 = vector.extract_strided_slice %432 {offsets = [0, 0, 56], sizes = [1, 16, 8], strides = [1, 1, 1]} : vector<1x16x96xf32> to vector<1x16x8xf32>
    %446 = vector.shape_cast %442 : vector<1x16x8xf32> to vector<1x1x16x8xf32>
    %447 = vector.shape_cast %443 : vector<1x16x8xf32> to vector<1x1x16x8xf32>
    %448 = vector.shape_cast %444 : vector<1x16x8xf32> to vector<1x1x16x8xf32>
    %449 = vector.shape_cast %445 : vector<1x16x8xf32> to vector<1x1x16x8xf32>
    %450 = tpu.concatenate %446, %447, %448, %449 in 0 : vector<1x1x16x8xf32>, vector<1x1x16x8xf32>, vector<1x1x16x8xf32>, vector<1x1x16x8xf32> -> vector<4x1x16x8xf32>
    %451 = vector.extract_strided_slice %432 {offsets = [0, 0, 64], sizes = [1, 16, 8], strides = [1, 1, 1]} : vector<1x16x96xf32> to vector<1x16x8xf32>
    %452 = vector.extract_strided_slice %432 {offsets = [0, 0, 72], sizes = [1, 16, 8], strides = [1, 1, 1]} : vector<1x16x96xf32> to vector<1x16x8xf32>
    %453 = vector.extract_strided_slice %432 {offsets = [0, 0, 80], sizes = [1, 16, 8], strides = [1, 1, 1]} : vector<1x16x96xf32> to vector<1x16x8xf32>
    %454 = vector.extract_strided_slice %432 {offsets = [0, 0, 88], sizes = [1, 16, 8], strides = [1, 1, 1]} : vector<1x16x96xf32> to vector<1x16x8xf32>
    %455 = vector.shape_cast %451 : vector<1x16x8xf32> to vector<1x1x16x8xf32>
    %456 = vector.shape_cast %452 : vector<1x16x8xf32> to vector<1x1x16x8xf32>
    %457 = vector.shape_cast %453 : vector<1x16x8xf32> to vector<1x1x16x8xf32>
    %458 = vector.shape_cast %454 : vector<1x16x8xf32> to vector<1x1x16x8xf32>
    %459 = tpu.concatenate %455, %456, %457, %458 in 0 : vector<1x1x16x8xf32>, vector<1x1x16x8xf32>, vector<1x1x16x8xf32>, vector<1x1x16x8xf32> -> vector<4x1x16x8xf32>
    %cst_189 = arith.constant 0.353553385 : f32
    %460 = vector.broadcast %cst_189 : f32 to vector<4x1x16x8xf32>
    %461 = arith.mulf %441, %460 : vector<4x1x16x8xf32>
    %462 = vector.shape_cast %461 : vector<4x1x16x8xf32> to vector<4x16x8xf32>
    %463 = vector.shape_cast %450 : vector<4x1x16x8xf32> to vector<4x16x8xf32>
    %464 = vector.shape_cast %459 : vector<4x1x16x8xf32> to vector<4x16x8xf32>
    "tpu.trace_start"() <{level = 10 : i32, message = "bnd,bmd->bnm"}> : () -> ()
    %cst_190 = arith.constant dense<0.000000e+00> : vector<4x16x16xf32>
    %465 = tpu.matmul %462, %463, %cst_190 {dimension_numbers = #tpu.dot_dimension_numbers<[2], [2], [1], [1], [0, 0, 0, 1, 1, 1], [0], [0]>} : vector<4x16x8xf32>, vector<4x16x8xf32>, vector<4x16x16xf32> -> vector<4x16x16xf32>
    "tpu.trace_stop"() : () -> ()
    %466 = vector.shape_cast %465 : vector<4x16x16xf32> to vector<4x1x16x16xf32>
    %467 = vector.shape_cast %400 : vector<4x16x16xf32> to vector<4x1x16x16xf32>
    %468 = arith.addf %466, %467 : vector<4x1x16x16xf32>
    %469 = vector.shape_cast %468 : vector<4x1x16x16xf32> to vector<4x16x16xf32>
    %cst_191 = arith.constant dense<0xFF800000> : vector<4x16xf32>
    %470 = vector.multi_reduction <maximumf>, %469, %cst_191 [2] : vector<4x16x16xf32> to vector<4x16xf32>
    %471 = vector.shape_cast %470 : vector<4x16xf32> to vector<4x16x1xf32>
    %472 = vector.broadcast %471 : vector<4x16x1xf32> to vector<4x16x16xf32>
    %473 = arith.subf %469, %472 : vector<4x16x16xf32>
    %474 = math.exp %473 : vector<4x16x16xf32>
    %cst_192 = arith.constant dense<0.000000e+00> : vector<4x16xf32>
    %475 = vector.multi_reduction <add>, %474, %cst_192 [2] : vector<4x16x16xf32> to vector<4x16xf32>
    %476 = vector.shape_cast %475 : vector<4x16xf32> to vector<4x16x1xf32>
    %477 = tpu.reciprocal %476 {approx = true} : vector<4x16x1xf32> -> vector<4x16x1xf32>
    %478 = vector.broadcast %477 : vector<4x16x1xf32> to vector<4x16x16xf32>
    %479 = arith.mulf %474, %478 : vector<4x16x16xf32>
    "tpu.trace_start"() <{level = 10 : i32, message = "bnm,bmd->bnd"}> : () -> ()
    %cst_193 = arith.constant dense<0.000000e+00> : vector<4x16x8xf32>
    %480 = tpu.matmul %479, %464, %cst_193 {dimension_numbers = #tpu.dot_dimension_numbers<[2], [1], [1], [2], [0, 0, 0, 1, 1, 2], [0], [0]>} : vector<4x16x16xf32>, vector<4x16x8xf32>, vector<4x16x8xf32> -> vector<4x16x8xf32>
    "tpu.trace_stop"() : () -> ()
    %481 = vector.extract_strided_slice %480 {offsets = [0, 0, 0], sizes = [1, 16, 8], strides = [1, 1, 1]} : vector<4x16x8xf32> to vector<1x16x8xf32>
    %482 = vector.shape_cast %481 : vector<1x16x8xf32> to vector<16x8xf32>
    %483 = vector.extract_strided_slice %401 {offsets = [0, 0], sizes = [8, 32], strides = [1, 1]} : vector<32x32xf32> to vector<8x32xf32>
    %cst_194 = arith.constant dense<0.000000e+00> : vector<16x32xf32>
    %484 = tpu.matmul %482, %483, %cst_194 {dimension_numbers = #tpu.dot_dimension_numbers<[1], [0], [0], [1], [0, 0, 1, 1], [], []>} : vector<16x8xf32>, vector<8x32xf32>, vector<16x32xf32> -> vector<16x32xf32>
    %485 = vector.extract_strided_slice %480 {offsets = [1, 0, 0], sizes = [1, 16, 8], strides = [1, 1, 1]} : vector<4x16x8xf32> to vector<1x16x8xf32>
    %486 = vector.shape_cast %485 : vector<1x16x8xf32> to vector<16x8xf32>
    %487 = vector.extract_strided_slice %401 {offsets = [8, 0], sizes = [8, 32], strides = [1, 1]} : vector<32x32xf32> to vector<8x32xf32>
    %cst_195 = arith.constant dense<0.000000e+00> : vector<16x32xf32>
    %488 = tpu.matmul %486, %487, %cst_195 {dimension_numbers = #tpu.dot_dimension_numbers<[1], [0], [0], [1], [0, 0, 1, 1], [], []>} : vector<16x8xf32>, vector<8x32xf32>, vector<16x32xf32> -> vector<16x32xf32>
    %489 = arith.addf %484, %488 : vector<16x32xf32>
    %490 = vector.extract_strided_slice %480 {offsets = [2, 0, 0], sizes = [1, 16, 8], strides = [1, 1, 1]} : vector<4x16x8xf32> to vector<1x16x8xf32>
    %491 = vector.shape_cast %490 : vector<1x16x8xf32> to vector<16x8xf32>
    %492 = vector.extract_strided_slice %401 {offsets = [16, 0], sizes = [8, 32], strides = [1, 1]} : vector<32x32xf32> to vector<8x32xf32>
    %cst_196 = arith.constant dense<0.000000e+00> : vector<16x32xf32>
    %493 = tpu.matmul %491, %492, %cst_196 {dimension_numbers = #tpu.dot_dimension_numbers<[1], [0], [0], [1], [0, 0, 1, 1], [], []>} : vector<16x8xf32>, vector<8x32xf32>, vector<16x32xf32> -> vector<16x32xf32>
    %494 = arith.addf %489, %493 : vector<16x32xf32>
    %495 = vector.extract_strided_slice %480 {offsets = [3, 0, 0], sizes = [1, 16, 8], strides = [1, 1, 1]} : vector<4x16x8xf32> to vector<1x16x8xf32>
    %496 = vector.shape_cast %495 : vector<1x16x8xf32> to vector<16x8xf32>
    %497 = vector.extract_strided_slice %401 {offsets = [24, 0], sizes = [8, 32], strides = [1, 1]} : vector<32x32xf32> to vector<8x32xf32>
    %cst_197 = arith.constant dense<0.000000e+00> : vector<16x32xf32>
    %498 = tpu.matmul %496, %497, %cst_197 {dimension_numbers = #tpu.dot_dimension_numbers<[1], [0], [0], [1], [0, 0, 1, 1], [], []>} : vector<16x8xf32>, vector<8x32xf32>, vector<16x32xf32> -> vector<16x32xf32>
    %499 = arith.addf %494, %498 : vector<16x32xf32>
    %500 = arith.addf %395, %499 : vector<16x32xf32>
    %501 = vector.broadcast %402 : vector<1x32xf32> to vector<16x32xf32>
    %502 = arith.addf %500, %501 : vector<16x32xf32>
    %cst_198 = arith.constant dense<0.000000e+00> : vector<16xf32>
    %503 = vector.multi_reduction <add>, %502, %cst_198 [1] : vector<16x32xf32> to vector<16xf32>
    %504 = vector.shape_cast %503 : vector<16xf32> to vector<16x1xf32>
    %cst_199 = arith.constant 3.200000e+01 : f32
    %505 = vector.broadcast %cst_199 : f32 to vector<16x1xf32>
    %506 = arith.divf %504, %505 : vector<16x1xf32>
    %507 = vector.broadcast %506 : vector<16x1xf32> to vector<16x32xf32>
    %508 = arith.subf %502, %507 : vector<16x32xf32>
    %509 = arith.mulf %508, %508 : vector<16x32xf32>
    %cst_200 = arith.constant dense<0.000000e+00> : vector<16xf32>
    %510 = vector.multi_reduction <add>, %509, %cst_200 [1] : vector<16x32xf32> to vector<16xf32>
    %511 = vector.shape_cast %510 : vector<16xf32> to vector<16x1xf32>
    %cst_201 = arith.constant 3.200000e+01 : f32
    %512 = vector.broadcast %cst_201 : f32 to vector<16x1xf32>
    %513 = arith.divf %511, %512 : vector<16x1xf32>
    %cst_202 = arith.constant 9.99999974E-6 : f32
    %514 = vector.broadcast %cst_202 : f32 to vector<16x1xf32>
    %515 = arith.addf %513, %514 : vector<16x1xf32>
    %516 = math.rsqrt %515 : vector<16x1xf32>
    %517 = vector.broadcast %516 : vector<16x1xf32> to vector<16x32xf32>
    %518 = arith.mulf %508, %517 : vector<16x32xf32>
    %519 = vector.broadcast %403 : vector<1x32xf32> to vector<16x32xf32>
    %520 = arith.mulf %518, %519 : vector<16x32xf32>
    %521 = vector.broadcast %404 : vector<1x32xf32> to vector<16x32xf32>
    %522 = arith.addf %520, %521 : vector<16x32xf32>
    %cst_203 = arith.constant dense<0.000000e+00> : vector<16x128xf32>
    %523 = tpu.matmul %522, %405, %cst_203 {dimension_numbers = #tpu.dot_dimension_numbers<[1], [0], [0], [1], [0, 0, 1, 1], [], []>} : vector<16x32xf32>, vector<32x128xf32>, vector<16x128xf32> -> vector<16x128xf32>
    %524 = vector.broadcast %406 : vector<1x128xf32> to vector<16x128xf32>
    %525 = arith.addf %523, %524 : vector<16x128xf32>
    %526 = arith.mulf %525, %525 : vector<16x128xf32>
    %527 = arith.mulf %525, %526 : vector<16x128xf32>
    %cst_204 = arith.constant 4.471500e-02 : f32
    %528 = vector.broadcast %cst_204 : f32 to vector<16x128xf32>
    %529 = arith.mulf %528, %527 : vector<16x128xf32>
    %530 = arith.addf %525, %529 : vector<16x128xf32>
    %cst_205 = arith.constant 0.797884583 : f32
    %531 = vector.broadcast %cst_205 : f32 to vector<16x128xf32>
    %532 = arith.mulf %531, %530 : vector<16x128xf32>
    %533 = math.tanh %532 : vector<16x128xf32>
    %cst_206 = arith.constant 1.000000e+00 : f32
    %534 = vector.broadcast %cst_206 : f32 to vector<16x128xf32>
    %535 = arith.addf %534, %533 : vector<16x128xf32>
    %cst_207 = arith.constant 5.000000e-01 : f32
    %536 = vector.broadcast %cst_207 : f32 to vector<16x128xf32>
    %537 = arith.mulf %536, %535 : vector<16x128xf32>
    %538 = arith.mulf %525, %537 : vector<16x128xf32>
    %cst_208 = arith.constant dense<0.000000e+00> : vector<16x32xf32>
    %539 = tpu.matmul %538, %407, %cst_208 {dimension_numbers = #tpu.dot_dimension_numbers<[1], [0], [0], [1], [0, 0, 1, 1], [], []>} : vector<16x128xf32>, vector<128x32xf32>, vector<16x32xf32> -> vector<16x32xf32>
    %540 = vector.broadcast %408 : vector<1x32xf32> to vector<16x32xf32>
    %541 = arith.addf %539, %540 : vector<16x32xf32>
    %542 = arith.addf %502, %541 : vector<16x32xf32>
    %c0_209 = arith.constant 0 : index
    %c0_210 = arith.constant 0 : index
    %543 = vector.load %arg52[%c0_209, %c0_210] : memref<1x32xf32, #tpu.memory_space<vmem>>, vector<1x32xf32>
    %c0_211 = arith.constant 0 : index
    %c0_212 = arith.constant 0 : index
    %544 = vector.load %arg53[%c0_211, %c0_212] : memref<1x32xf32, #tpu.memory_space<vmem>>, vector<1x32xf32>
    %c0_213 = arith.constant 0 : index
    %c0_214 = arith.constant 0 : index
    %545 = vector.load %arg54[%c0_213, %c0_214] : memref<32x96xf32, #tpu.memory_space<vmem>>, vector<32x96xf32>
    %c0_215 = arith.constant 0 : index
    %c0_216 = arith.constant 0 : index
    %546 = vector.load %arg55[%c0_215, %c0_216] : memref<1x96xf32, #tpu.memory_space<vmem>>, vector<1x96xf32>
    %c0_217 = arith.constant 0 : index
    %c0_218 = arith.constant 0 : index
    %c0_219 = arith.constant 0 : index
    %547 = vector.load %arg56[%c0_217, %c0_218, %c0_219] : memref<4x16x16xf32, #tpu.memory_space<vmem>>, vector<4x16x16xf32>
    %c0_220 = arith.constant 0 : index
    %c0_221 = arith.constant 0 : index
    %548 = vector.load %arg57[%c0_220, %c0_221] : memref<32x32xf32, #tpu.memory_space<vmem>>, vector<32x32xf32>
    %c0_222 = arith.constant 0 : index
    %c0_223 = arith.constant 0 : index
    %549 = vector.load %arg58[%c0_222, %c0_223] : memref<1x32xf32, #tpu.memory_space<vmem>>, vector<1x32xf32>
    %c0_224 = arith.constant 0 : index
    %c0_225 = arith.constant 0 : index
    %550 = vector.load %arg59[%c0_224, %c0_225] : memref<1x32xf32, #tpu.memory_space<vmem>>, vector<1x32xf32>
    %c0_226 = arith.constant 0 : index
    %c0_227 = arith.constant 0 : index
    %551 = vector.load %arg60[%c0_226, %c0_227] : memref<1x32xf32, #tpu.memory_space<vmem>>, vector<1x32xf32>
    %c0_228 = arith.constant 0 : index
    %c0_229 = arith.constant 0 : index
    %552 = vector.load %arg61[%c0_228, %c0_229] : memref<32x128xf32, #tpu.memory_space<vmem>>, vector<32x128xf32>
    %c0_230 = arith.constant 0 : index
    %c0_231 = arith.constant 0 : index
    %553 = vector.load %arg62[%c0_230, %c0_231] : memref<1x128xf32, #tpu.memory_space<vmem>>, vector<1x128xf32>
    %c0_232 = arith.constant 0 : index
    %c0_233 = arith.constant 0 : index
    %554 = vector.load %arg63[%c0_232, %c0_233] : memref<128x32xf32, #tpu.memory_space<vmem>>, vector<128x32xf32>
    %c0_234 = arith.constant 0 : index
    %c0_235 = arith.constant 0 : index
    %555 = vector.load %arg64[%c0_234, %c0_235] : memref<1x32xf32, #tpu.memory_space<vmem>>, vector<1x32xf32>
    %cst_236 = arith.constant dense<0.000000e+00> : vector<16xf32>
    %556 = vector.multi_reduction <add>, %542, %cst_236 [1] : vector<16x32xf32> to vector<16xf32>
    %557 = vector.shape_cast %556 : vector<16xf32> to vector<16x1xf32>
    %cst_237 = arith.constant 3.200000e+01 : f32
    %558 = vector.broadcast %cst_237 : f32 to vector<16x1xf32>
    %559 = arith.divf %557, %558 : vector<16x1xf32>
    %560 = vector.broadcast %559 : vector<16x1xf32> to vector<16x32xf32>
    %561 = arith.subf %542, %560 : vector<16x32xf32>
    %562 = arith.mulf %561, %561 : vector<16x32xf32>
    %cst_238 = arith.constant dense<0.000000e+00> : vector<16xf32>
    %563 = vector.multi_reduction <add>, %562, %cst_238 [1] : vector<16x32xf32> to vector<16xf32>
    %564 = vector.shape_cast %563 : vector<16xf32> to vector<16x1xf32>
    %cst_239 = arith.constant 3.200000e+01 : f32
    %565 = vector.broadcast %cst_239 : f32 to vector<16x1xf32>
    %566 = arith.divf %564, %565 : vector<16x1xf32>
    %cst_240 = arith.constant 9.99999974E-6 : f32
    %567 = vector.broadcast %cst_240 : f32 to vector<16x1xf32>
    %568 = arith.addf %566, %567 : vector<16x1xf32>
    %569 = math.rsqrt %568 : vector<16x1xf32>
    %570 = vector.broadcast %569 : vector<16x1xf32> to vector<16x32xf32>
    %571 = arith.mulf %561, %570 : vector<16x32xf32>
    %572 = vector.broadcast %543 : vector<1x32xf32> to vector<16x32xf32>
    %573 = arith.mulf %571, %572 : vector<16x32xf32>
    %574 = vector.broadcast %544 : vector<1x32xf32> to vector<16x32xf32>
    %575 = arith.addf %573, %574 : vector<16x32xf32>
    %cst_241 = arith.constant dense<0.000000e+00> : vector<16x96xf32>
    %576 = tpu.matmul %575, %545, %cst_241 {dimension_numbers = #tpu.dot_dimension_numbers<[1], [0], [0], [1], [0, 0, 1, 1], [], []>} : vector<16x32xf32>, vector<32x96xf32>, vector<16x96xf32> -> vector<16x96xf32>
    %577 = vector.broadcast %546 : vector<1x96xf32> to vector<16x96xf32>
    %578 = arith.addf %576, %577 : vector<16x96xf32>
    %579 = vector.shape_cast %578 : vector<16x96xf32> to vector<1x16x96xf32>
    %580 = vector.extract_strided_slice %579 {offsets = [0, 0, 0], sizes = [1, 16, 8], strides = [1, 1, 1]} : vector<1x16x96xf32> to vector<1x16x8xf32>
    %581 = vector.extract_strided_slice %579 {offsets = [0, 0, 8], sizes = [1, 16, 8], strides = [1, 1, 1]} : vector<1x16x96xf32> to vector<1x16x8xf32>
    %582 = vector.extract_strided_slice %579 {offsets = [0, 0, 16], sizes = [1, 16, 8], strides = [1, 1, 1]} : vector<1x16x96xf32> to vector<1x16x8xf32>
    %583 = vector.extract_strided_slice %579 {offsets = [0, 0, 24], sizes = [1, 16, 8], strides = [1, 1, 1]} : vector<1x16x96xf32> to vector<1x16x8xf32>
    %584 = vector.shape_cast %580 : vector<1x16x8xf32> to vector<1x1x16x8xf32>
    %585 = vector.shape_cast %581 : vector<1x16x8xf32> to vector<1x1x16x8xf32>
    %586 = vector.shape_cast %582 : vector<1x16x8xf32> to vector<1x1x16x8xf32>
    %587 = vector.shape_cast %583 : vector<1x16x8xf32> to vector<1x1x16x8xf32>
    %588 = tpu.concatenate %584, %585, %586, %587 in 0 : vector<1x1x16x8xf32>, vector<1x1x16x8xf32>, vector<1x1x16x8xf32>, vector<1x1x16x8xf32> -> vector<4x1x16x8xf32>
    %589 = vector.extract_strided_slice %579 {offsets = [0, 0, 32], sizes = [1, 16, 8], strides = [1, 1, 1]} : vector<1x16x96xf32> to vector<1x16x8xf32>
    %590 = vector.extract_strided_slice %579 {offsets = [0, 0, 40], sizes = [1, 16, 8], strides = [1, 1, 1]} : vector<1x16x96xf32> to vector<1x16x8xf32>
    %591 = vector.extract_strided_slice %579 {offsets = [0, 0, 48], sizes = [1, 16, 8], strides = [1, 1, 1]} : vector<1x16x96xf32> to vector<1x16x8xf32>
    %592 = vector.extract_strided_slice %579 {offsets = [0, 0, 56], sizes = [1, 16, 8], strides = [1, 1, 1]} : vector<1x16x96xf32> to vector<1x16x8xf32>
    %593 = vector.shape_cast %589 : vector<1x16x8xf32> to vector<1x1x16x8xf32>
    %594 = vector.shape_cast %590 : vector<1x16x8xf32> to vector<1x1x16x8xf32>
    %595 = vector.shape_cast %591 : vector<1x16x8xf32> to vector<1x1x16x8xf32>
    %596 = vector.shape_cast %592 : vector<1x16x8xf32> to vector<1x1x16x8xf32>
    %597 = tpu.concatenate %593, %594, %595, %596 in 0 : vector<1x1x16x8xf32>, vector<1x1x16x8xf32>, vector<1x1x16x8xf32>, vector<1x1x16x8xf32> -> vector<4x1x16x8xf32>
    %598 = vector.extract_strided_slice %579 {offsets = [0, 0, 64], sizes = [1, 16, 8], strides = [1, 1, 1]} : vector<1x16x96xf32> to vector<1x16x8xf32>
    %599 = vector.extract_strided_slice %579 {offsets = [0, 0, 72], sizes = [1, 16, 8], strides = [1, 1, 1]} : vector<1x16x96xf32> to vector<1x16x8xf32>
    %600 = vector.extract_strided_slice %579 {offsets = [0, 0, 80], sizes = [1, 16, 8], strides = [1, 1, 1]} : vector<1x16x96xf32> to vector<1x16x8xf32>
    %601 = vector.extract_strided_slice %579 {offsets = [0, 0, 88], sizes = [1, 16, 8], strides = [1, 1, 1]} : vector<1x16x96xf32> to vector<1x16x8xf32>
    %602 = vector.shape_cast %598 : vector<1x16x8xf32> to vector<1x1x16x8xf32>
    %603 = vector.shape_cast %599 : vector<1x16x8xf32> to vector<1x1x16x8xf32>
    %604 = vector.shape_cast %600 : vector<1x16x8xf32> to vector<1x1x16x8xf32>
    %605 = vector.shape_cast %601 : vector<1x16x8xf32> to vector<1x1x16x8xf32>
    %606 = tpu.concatenate %602, %603, %604, %605 in 0 : vector<1x1x16x8xf32>, vector<1x1x16x8xf32>, vector<1x1x16x8xf32>, vector<1x1x16x8xf32> -> vector<4x1x16x8xf32>
    %cst_242 = arith.constant 0.353553385 : f32
    %607 = vector.broadcast %cst_242 : f32 to vector<4x1x16x8xf32>
    %608 = arith.mulf %588, %607 : vector<4x1x16x8xf32>
    %609 = vector.shape_cast %608 : vector<4x1x16x8xf32> to vector<4x16x8xf32>
    %610 = vector.shape_cast %597 : vector<4x1x16x8xf32> to vector<4x16x8xf32>
    %611 = vector.shape_cast %606 : vector<4x1x16x8xf32> to vector<4x16x8xf32>
    "tpu.trace_start"() <{level = 10 : i32, message = "bnd,bmd->bnm"}> : () -> ()
    %cst_243 = arith.constant dense<0.000000e+00> : vector<4x16x16xf32>
    %612 = tpu.matmul %609, %610, %cst_243 {dimension_numbers = #tpu.dot_dimension_numbers<[2], [2], [1], [1], [0, 0, 0, 1, 1, 1], [0], [0]>} : vector<4x16x8xf32>, vector<4x16x8xf32>, vector<4x16x16xf32> -> vector<4x16x16xf32>
    "tpu.trace_stop"() : () -> ()
    %613 = vector.shape_cast %612 : vector<4x16x16xf32> to vector<4x1x16x16xf32>
    %614 = vector.shape_cast %547 : vector<4x16x16xf32> to vector<4x1x16x16xf32>
    %615 = arith.addf %613, %614 : vector<4x1x16x16xf32>
    %616 = vector.shape_cast %615 : vector<4x1x16x16xf32> to vector<4x16x16xf32>
    %cst_244 = arith.constant dense<0xFF800000> : vector<4x16xf32>
    %617 = vector.multi_reduction <maximumf>, %616, %cst_244 [2] : vector<4x16x16xf32> to vector<4x16xf32>
    %618 = vector.shape_cast %617 : vector<4x16xf32> to vector<4x16x1xf32>
    %619 = vector.broadcast %618 : vector<4x16x1xf32> to vector<4x16x16xf32>
    %620 = arith.subf %616, %619 : vector<4x16x16xf32>
    %621 = math.exp %620 : vector<4x16x16xf32>
    %cst_245 = arith.constant dense<0.000000e+00> : vector<4x16xf32>
    %622 = vector.multi_reduction <add>, %621, %cst_245 [2] : vector<4x16x16xf32> to vector<4x16xf32>
    %623 = vector.shape_cast %622 : vector<4x16xf32> to vector<4x16x1xf32>
    %624 = tpu.reciprocal %623 {approx = true} : vector<4x16x1xf32> -> vector<4x16x1xf32>
    %625 = vector.broadcast %624 : vector<4x16x1xf32> to vector<4x16x16xf32>
    %626 = arith.mulf %621, %625 : vector<4x16x16xf32>
    "tpu.trace_start"() <{level = 10 : i32, message = "bnm,bmd->bnd"}> : () -> ()
    %cst_246 = arith.constant dense<0.000000e+00> : vector<4x16x8xf32>
    %627 = tpu.matmul %626, %611, %cst_246 {dimension_numbers = #tpu.dot_dimension_numbers<[2], [1], [1], [2], [0, 0, 0, 1, 1, 2], [0], [0]>} : vector<4x16x16xf32>, vector<4x16x8xf32>, vector<4x16x8xf32> -> vector<4x16x8xf32>
    "tpu.trace_stop"() : () -> ()
    %628 = vector.extract_strided_slice %627 {offsets = [0, 0, 0], sizes = [1, 16, 8], strides = [1, 1, 1]} : vector<4x16x8xf32> to vector<1x16x8xf32>
    %629 = vector.shape_cast %628 : vector<1x16x8xf32> to vector<16x8xf32>
    %630 = vector.extract_strided_slice %548 {offsets = [0, 0], sizes = [8, 32], strides = [1, 1]} : vector<32x32xf32> to vector<8x32xf32>
    %cst_247 = arith.constant dense<0.000000e+00> : vector<16x32xf32>
    %631 = tpu.matmul %629, %630, %cst_247 {dimension_numbers = #tpu.dot_dimension_numbers<[1], [0], [0], [1], [0, 0, 1, 1], [], []>} : vector<16x8xf32>, vector<8x32xf32>, vector<16x32xf32> -> vector<16x32xf32>
    %632 = vector.extract_strided_slice %627 {offsets = [1, 0, 0], sizes = [1, 16, 8], strides = [1, 1, 1]} : vector<4x16x8xf32> to vector<1x16x8xf32>
    %633 = vector.shape_cast %632 : vector<1x16x8xf32> to vector<16x8xf32>
    %634 = vector.extract_strided_slice %548 {offsets = [8, 0], sizes = [8, 32], strides = [1, 1]} : vector<32x32xf32> to vector<8x32xf32>
    %cst_248 = arith.constant dense<0.000000e+00> : vector<16x32xf32>
    %635 = tpu.matmul %633, %634, %cst_248 {dimension_numbers = #tpu.dot_dimension_numbers<[1], [0], [0], [1], [0, 0, 1, 1], [], []>} : vector<16x8xf32>, vector<8x32xf32>, vector<16x32xf32> -> vector<16x32xf32>
    %636 = arith.addf %631, %635 : vector<16x32xf32>
    %637 = vector.extract_strided_slice %627 {offsets = [2, 0, 0], sizes = [1, 16, 8], strides = [1, 1, 1]} : vector<4x16x8xf32> to vector<1x16x8xf32>
    %638 = vector.shape_cast %637 : vector<1x16x8xf32> to vector<16x8xf32>
    %639 = vector.extract_strided_slice %548 {offsets = [16, 0], sizes = [8, 32], strides = [1, 1]} : vector<32x32xf32> to vector<8x32xf32>
    %cst_249 = arith.constant dense<0.000000e+00> : vector<16x32xf32>
    %640 = tpu.matmul %638, %639, %cst_249 {dimension_numbers = #tpu.dot_dimension_numbers<[1], [0], [0], [1], [0, 0, 1, 1], [], []>} : vector<16x8xf32>, vector<8x32xf32>, vector<16x32xf32> -> vector<16x32xf32>
    %641 = arith.addf %636, %640 : vector<16x32xf32>
    %642 = vector.extract_strided_slice %627 {offsets = [3, 0, 0], sizes = [1, 16, 8], strides = [1, 1, 1]} : vector<4x16x8xf32> to vector<1x16x8xf32>
    %643 = vector.shape_cast %642 : vector<1x16x8xf32> to vector<16x8xf32>
    %644 = vector.extract_strided_slice %548 {offsets = [24, 0], sizes = [8, 32], strides = [1, 1]} : vector<32x32xf32> to vector<8x32xf32>
    %cst_250 = arith.constant dense<0.000000e+00> : vector<16x32xf32>
    %645 = tpu.matmul %643, %644, %cst_250 {dimension_numbers = #tpu.dot_dimension_numbers<[1], [0], [0], [1], [0, 0, 1, 1], [], []>} : vector<16x8xf32>, vector<8x32xf32>, vector<16x32xf32> -> vector<16x32xf32>
    %646 = arith.addf %641, %645 : vector<16x32xf32>
    %647 = arith.addf %542, %646 : vector<16x32xf32>
    %648 = vector.broadcast %549 : vector<1x32xf32> to vector<16x32xf32>
    %649 = arith.addf %647, %648 : vector<16x32xf32>
    %cst_251 = arith.constant dense<0.000000e+00> : vector<16xf32>
    %650 = vector.multi_reduction <add>, %649, %cst_251 [1] : vector<16x32xf32> to vector<16xf32>
    %651 = vector.shape_cast %650 : vector<16xf32> to vector<16x1xf32>
    %cst_252 = arith.constant 3.200000e+01 : f32
    %652 = vector.broadcast %cst_252 : f32 to vector<16x1xf32>
    %653 = arith.divf %651, %652 : vector<16x1xf32>
    %654 = vector.broadcast %653 : vector<16x1xf32> to vector<16x32xf32>
    %655 = arith.subf %649, %654 : vector<16x32xf32>
    %656 = arith.mulf %655, %655 : vector<16x32xf32>
    %cst_253 = arith.constant dense<0.000000e+00> : vector<16xf32>
    %657 = vector.multi_reduction <add>, %656, %cst_253 [1] : vector<16x32xf32> to vector<16xf32>
    %658 = vector.shape_cast %657 : vector<16xf32> to vector<16x1xf32>
    %cst_254 = arith.constant 3.200000e+01 : f32
    %659 = vector.broadcast %cst_254 : f32 to vector<16x1xf32>
    %660 = arith.divf %658, %659 : vector<16x1xf32>
    %cst_255 = arith.constant 9.99999974E-6 : f32
    %661 = vector.broadcast %cst_255 : f32 to vector<16x1xf32>
    %662 = arith.addf %660, %661 : vector<16x1xf32>
    %663 = math.rsqrt %662 : vector<16x1xf32>
    %664 = vector.broadcast %663 : vector<16x1xf32> to vector<16x32xf32>
    %665 = arith.mulf %655, %664 : vector<16x32xf32>
    %666 = vector.broadcast %550 : vector<1x32xf32> to vector<16x32xf32>
    %667 = arith.mulf %665, %666 : vector<16x32xf32>
    %668 = vector.broadcast %551 : vector<1x32xf32> to vector<16x32xf32>
    %669 = arith.addf %667, %668 : vector<16x32xf32>
    %cst_256 = arith.constant dense<0.000000e+00> : vector<16x128xf32>
    %670 = tpu.matmul %669, %552, %cst_256 {dimension_numbers = #tpu.dot_dimension_numbers<[1], [0], [0], [1], [0, 0, 1, 1], [], []>} : vector<16x32xf32>, vector<32x128xf32>, vector<16x128xf32> -> vector<16x128xf32>
    %671 = vector.broadcast %553 : vector<1x128xf32> to vector<16x128xf32>
    %672 = arith.addf %670, %671 : vector<16x128xf32>
    %673 = arith.mulf %672, %672 : vector<16x128xf32>
    %674 = arith.mulf %672, %673 : vector<16x128xf32>
    %cst_257 = arith.constant 4.471500e-02 : f32
    %675 = vector.broadcast %cst_257 : f32 to vector<16x128xf32>
    %676 = arith.mulf %675, %674 : vector<16x128xf32>
    %677 = arith.addf %672, %676 : vector<16x128xf32>
    %cst_258 = arith.constant 0.797884583 : f32
    %678 = vector.broadcast %cst_258 : f32 to vector<16x128xf32>
    %679 = arith.mulf %678, %677 : vector<16x128xf32>
    %680 = math.tanh %679 : vector<16x128xf32>
    %cst_259 = arith.constant 1.000000e+00 : f32
    %681 = vector.broadcast %cst_259 : f32 to vector<16x128xf32>
    %682 = arith.addf %681, %680 : vector<16x128xf32>
    %cst_260 = arith.constant 5.000000e-01 : f32
    %683 = vector.broadcast %cst_260 : f32 to vector<16x128xf32>
    %684 = arith.mulf %683, %682 : vector<16x128xf32>
    %685 = arith.mulf %672, %684 : vector<16x128xf32>
    %cst_261 = arith.constant dense<0.000000e+00> : vector<16x32xf32>
    %686 = tpu.matmul %685, %554, %cst_261 {dimension_numbers = #tpu.dot_dimension_numbers<[1], [0], [0], [1], [0, 0, 1, 1], [], []>} : vector<16x128xf32>, vector<128x32xf32>, vector<16x32xf32> -> vector<16x32xf32>
    %687 = vector.broadcast %555 : vector<1x32xf32> to vector<16x32xf32>
    %688 = arith.addf %686, %687 : vector<16x32xf32>
    %689 = arith.addf %649, %688 : vector<16x32xf32>
    %c0_262 = arith.constant 0 : index
    %c0_263 = arith.constant 0 : index
    %690 = vector.load %arg65[%c0_262, %c0_263] : memref<1x32xf32, #tpu.memory_space<vmem>>, vector<1x32xf32>
    %c0_264 = arith.constant 0 : index
    %c0_265 = arith.constant 0 : index
    %691 = vector.load %arg66[%c0_264, %c0_265] : memref<1x32xf32, #tpu.memory_space<vmem>>, vector<1x32xf32>
    %c0_266 = arith.constant 0 : index
    %c0_267 = arith.constant 0 : index
    %692 = vector.load %arg67[%c0_266, %c0_267] : memref<32x1xf32, #tpu.memory_space<vmem>>, vector<32x1xf32>
    %c0_268 = arith.constant 0 : index
    %c0_269 = arith.constant 0 : index
    %693 = vector.load %arg68[%c0_268, %c0_269] : memref<1x1xf32, #tpu.memory_space<vmem>>, vector<1x1xf32>
    %cst_270 = arith.constant dense<0.000000e+00> : vector<16xf32>
    %694 = vector.multi_reduction <add>, %689, %cst_270 [1] : vector<16x32xf32> to vector<16xf32>
    %695 = vector.shape_cast %694 : vector<16xf32> to vector<16x1xf32>
    %cst_271 = arith.constant 3.200000e+01 : f32
    %696 = vector.broadcast %cst_271 : f32 to vector<16x1xf32>
    %697 = arith.divf %695, %696 : vector<16x1xf32>
    %698 = vector.broadcast %697 : vector<16x1xf32> to vector<16x32xf32>
    %699 = arith.subf %689, %698 : vector<16x32xf32>
    %700 = arith.mulf %699, %699 : vector<16x32xf32>
    %cst_272 = arith.constant dense<0.000000e+00> : vector<16xf32>
    %701 = vector.multi_reduction <add>, %700, %cst_272 [1] : vector<16x32xf32> to vector<16xf32>
    %702 = vector.shape_cast %701 : vector<16xf32> to vector<16x1xf32>
    %cst_273 = arith.constant 3.200000e+01 : f32
    %703 = vector.broadcast %cst_273 : f32 to vector<16x1xf32>
    %704 = arith.divf %702, %703 : vector<16x1xf32>
    %cst_274 = arith.constant 9.99999974E-6 : f32
    %705 = vector.broadcast %cst_274 : f32 to vector<16x1xf32>
    %706 = arith.addf %704, %705 : vector<16x1xf32>
    %707 = math.rsqrt %706 : vector<16x1xf32>
    %708 = vector.broadcast %707 : vector<16x1xf32> to vector<16x32xf32>
    %709 = arith.mulf %699, %708 : vector<16x32xf32>
    %710 = vector.broadcast %690 : vector<1x32xf32> to vector<16x32xf32>
    %711 = arith.mulf %709, %710 : vector<16x32xf32>
    %712 = vector.broadcast %691 : vector<1x32xf32> to vector<16x32xf32>
    %713 = arith.addf %711, %712 : vector<16x32xf32>
    %cst_275 = arith.constant dense<0.000000e+00> : vector<32xf32>
    %714 = vector.multi_reduction <add>, %713, %cst_275 [0] : vector<16x32xf32> to vector<32xf32>
    %715 = vector.shape_cast %714 : vector<32xf32> to vector<1x32xf32>
    %cst_276 = arith.constant 1.600000e+01 : f32
    %716 = vector.broadcast %cst_276 : f32 to vector<1x32xf32>
    %717 = arith.divf %715, %716 : vector<1x32xf32>
    %cst_277 = arith.constant dense<0.000000e+00> : vector<1x1xf32>
    %718 = tpu.matmul %717, %692, %cst_277 {dimension_numbers = #tpu.dot_dimension_numbers<[1], [0], [0], [1], [0, 0, 1, 1], [], []>} : vector<1x32xf32>, vector<32x1xf32>, vector<1x1xf32> -> vector<1x1xf32>
    %719 = arith.addf %718, %693 : vector<1x1xf32>
    %720 = vector.shape_cast %717 : vector<1x32xf32> to vector<1x1x32xf32>
    %c0_278 = arith.constant 0 : index
    %c0_279 = arith.constant 0 : index
    %c0_280 = arith.constant 0 : index
    %721 = vector.load %arg69[%c0_278, %c0_279, %c0_280] : memref<1x1x32xf32, #tpu.memory_space<vmem>>, vector<1x1x32xf32>
    tpu.vector_store %arg69[%c0_278, %c0_279, %c0_280], %720 {strides = array<i32>} : memref<1x1x32xf32, #tpu.memory_space<vmem>>, vector<1x1x32xf32>,
    %722 = vector.shape_cast %719 : vector<1x1xf32> to vector<1x1x1xf32>
    %c0_281 = arith.constant 0 : index
    %c0_282 = arith.constant 0 : index
    %c0_283 = arith.constant 0 : index
    %723 = vector.load %arg70[%c0_281, %c0_282, %c0_283] : memref<1x1x1xf32, #tpu.memory_space<vmem>>, vector<1x1x1xf32>
    tpu.vector_store %arg70[%c0_281, %c0_282, %c0_283], %722 {strides = array<i32>} : memref<1x1x1xf32, #tpu.memory_space<vmem>>, vector<1x1x1xf32>,
    return
  }
  func.func @transform_0(%arg0: i32) -> (i32, i32, i32) {
    %c0_i32 = arith.constant 0 : i32
    %c0_i32_0 = arith.constant 0 : i32
    %c0_i32_1 = arith.constant 0 : i32
    return %arg0, %c0_i32, %c0_i32_0 : i32, i32, i32
  }
  func.func @transform_1(%arg0: i32) -> (i32, i32) {
    %c0_i32 = arith.constant 0 : i32
    %c0_i32_0 = arith.constant 0 : i32
    %c0_i32_1 = arith.constant 0 : i32
    return %c0_i32, %c0_i32_0 : i32, i32
  }
  func.func @transform_2(%arg0: i32) -> (i32, i32) {
    %c0_i32 = arith.constant 0 : i32
    %c0_i32_0 = arith.constant 0 : i32
    %c0_i32_1 = arith.constant 0 : i32
    return %c0_i32, %c0_i32_0 : i32, i32
  }
  func.func @transform_3(%arg0: i32) -> (i32, i32) {
    %c0_i32 = arith.constant 0 : i32
    %c0_i32_0 = arith.constant 0 : i32
    %c0_i32_1 = arith.constant 0 : i32
    return %c0_i32, %c0_i32_0 : i32, i32
  }
  func.func @transform_4(%arg0: i32) -> (i32, i32) {
    %c0_i32 = arith.constant 0 : i32
    %c0_i32_0 = arith.constant 0 : i32
    %c0_i32_1 = arith.constant 0 : i32
    return %c0_i32, %c0_i32_0 : i32, i32
  }
  func.func @transform_5(%arg0: i32) -> (i32, i32) {
    %c0_i32 = arith.constant 0 : i32
    %c0_i32_0 = arith.constant 0 : i32
    %c0_i32_1 = arith.constant 0 : i32
    return %c0_i32, %c0_i32_0 : i32, i32
  }
  func.func @transform_6(%arg0: i32) -> (i32, i32) {
    %c0_i32 = arith.constant 0 : i32
    %c0_i32_0 = arith.constant 0 : i32
    %c0_i32_1 = arith.constant 0 : i32
    return %c0_i32, %c0_i32_0 : i32, i32
  }
  func.func @transform_7(%arg0: i32) -> (i32, i32) {
    %c0_i32 = arith.constant 0 : i32
    %c0_i32_0 = arith.constant 0 : i32
    %c0_i32_1 = arith.constant 0 : i32
    return %c0_i32, %c0_i32_0 : i32, i32
  }
  func.func @transform_8(%arg0: i32) -> (i32, i32) {
    %c0_i32 = arith.constant 0 : i32
    %c0_i32_0 = arith.constant 0 : i32
    %c0_i32_1 = arith.constant 0 : i32
    return %c0_i32, %c0_i32_0 : i32, i32
  }
  func.func @transform_9(%arg0: i32) -> (i32, i32, i32) {
    %c0_i32 = arith.constant 0 : i32
    %c0_i32_0 = arith.constant 0 : i32
    %c0_i32_1 = arith.constant 0 : i32
    %c0_i32_2 = arith.constant 0 : i32
    return %c0_i32, %c0_i32_0, %c0_i32_1 : i32, i32, i32
  }
  func.func @transform_10(%arg0: i32) -> (i32, i32) {
    %c0_i32 = arith.constant 0 : i32
    %c0_i32_0 = arith.constant 0 : i32
    %c0_i32_1 = arith.constant 0 : i32
    return %c0_i32, %c0_i32_0 : i32, i32
  }
  func.func @transform_11(%arg0: i32) -> (i32, i32) {
    %c0_i32 = arith.constant 0 : i32
    %c0_i32_0 = arith.constant 0 : i32
    %c0_i32_1 = arith.constant 0 : i32
    return %c0_i32, %c0_i32_0 : i32, i32
  }
  func.func @transform_12(%arg0: i32) -> (i32, i32) {
    %c0_i32 = arith.constant 0 : i32
    %c0_i32_0 = arith.constant 0 : i32
    %c0_i32_1 = arith.constant 0 : i32
    return %c0_i32, %c0_i32_0 : i32, i32
  }
  func.func @transform_13(%arg0: i32) -> (i32, i32) {
    %c0_i32 = arith.constant 0 : i32
    %c0_i32_0 = arith.constant 0 : i32
    %c0_i32_1 = arith.constant 0 : i32
    return %c0_i32, %c0_i32_0 : i32, i32
  }
  func.func @transform_14(%arg0: i32) -> (i32, i32) {
    %c0_i32 = arith.constant 0 : i32
    %c0_i32_0 = arith.constant 0 : i32
    %c0_i32_1 = arith.constant 0 : i32
    return %c0_i32, %c0_i32_0 : i32, i32
  }
  func.func @transform_15(%arg0: i32) -> (i32, i32) {
    %c0_i32 = arith.constant 0 : i32
    %c0_i32_0 = arith.constant 0 : i32
    %c0_i32_1 = arith.constant 0 : i32
    return %c0_i32, %c0_i32_0 : i32, i32
  }
  func.func @transform_16(%arg0: i32) -> (i32, i32) {
    %c0_i32 = arith.constant 0 : i32
    %c0_i32_0 = arith.constant 0 : i32
    %c0_i32_1 = arith.constant 0 : i32
    return %c0_i32, %c0_i32_0 : i32, i32
  }
  func.func @transform_17(%arg0: i32) -> (i32, i32) {
    %c0_i32 = arith.constant 0 : i32
    %c0_i32_0 = arith.constant 0 : i32
    %c0_i32_1 = arith.constant 0 : i32
    return %c0_i32, %c0_i32_0 : i32, i32
  }
  func.func @transform_18(%arg0: i32) -> (i32, i32) {
    %c0_i32 = arith.constant 0 : i32
    %c0_i32_0 = arith.constant 0 : i32
    %c0_i32_1 = arith.constant 0 : i32
    return %c0_i32, %c0_i32_0 : i32, i32
  }
  func.func @transform_19(%arg0: i32) -> (i32, i32) {
    %c0_i32 = arith.constant 0 : i32
    %c0_i32_0 = arith.constant 0 : i32
    %c0_i32_1 = arith.constant 0 : i32
    return %c0_i32, %c0_i32_0 : i32, i32
  }
  func.func @transform_20(%arg0: i32) -> (i32, i32) {
    %c0_i32 = arith.constant 0 : i32
    %c0_i32_0 = arith.constant 0 : i32
    %c0_i32_1 = arith.constant 0 : i32
    return %c0_i32, %c0_i32_0 : i32, i32
  }
  func.func @transform_21(%arg0: i32) -> (i32, i32) {
    %c0_i32 = arith.constant 0 : i32
    %c0_i32_0 = arith.constant 0 : i32
    %c0_i32_1 = arith.constant 0 : i32
    return %c0_i32, %c0_i32_0 : i32, i32
  }
  func.func @transform_22(%arg0: i32) -> (i32, i32, i32) {
    %c0_i32 = arith.constant 0 : i32
    %c0_i32_0 = arith.constant 0 : i32
    %c0_i32_1 = arith.constant 0 : i32
    %c0_i32_2 = arith.constant 0 : i32
    return %c0_i32, %c0_i32_0, %c0_i32_1 : i32, i32, i32
  }
  func.func @transform_23(%arg0: i32) -> (i32, i32) {
    %c0_i32 = arith.constant 0 : i32
    %c0_i32_0 = arith.constant 0 : i32
    %c0_i32_1 = arith.constant 0 : i32
    return %c0_i32, %c0_i32_0 : i32, i32
  }
  func.func @transform_24(%arg0: i32) -> (i32, i32) {
    %c0_i32 = arith.constant 0 : i32
    %c0_i32_0 = arith.constant 0 : i32
    %c0_i32_1 = arith.constant 0 : i32
    return %c0_i32, %c0_i32_0 : i32, i32
  }
  func.func @transform_25(%arg0: i32) -> (i32, i32) {
    %c0_i32 = arith.constant 0 : i32
    %c0_i32_0 = arith.constant 0 : i32
    %c0_i32_1 = arith.constant 0 : i32
    return %c0_i32, %c0_i32_0 : i32, i32
  }
  func.func @transform_26(%arg0: i32) -> (i32, i32) {
    %c0_i32 = arith.constant 0 : i32
    %c0_i32_0 = arith.constant 0 : i32
    %c0_i32_1 = arith.constant 0 : i32
    return %c0_i32, %c0_i32_0 : i32, i32
  }
  func.func @transform_27(%arg0: i32) -> (i32, i32) {
    %c0_i32 = arith.constant 0 : i32
    %c0_i32_0 = arith.constant 0 : i32
    %c0_i32_1 = arith.constant 0 : i32
    return %c0_i32, %c0_i32_0 : i32, i32
  }
  func.func @transform_28(%arg0: i32) -> (i32, i32) {
    %c0_i32 = arith.constant 0 : i32
    %c0_i32_0 = arith.constant 0 : i32
    %c0_i32_1 = arith.constant 0 : i32
    return %c0_i32, %c0_i32_0 : i32, i32
  }
  func.func @transform_29(%arg0: i32) -> (i32, i32) {
    %c0_i32 = arith.constant 0 : i32
    %c0_i32_0 = arith.constant 0 : i32
    %c0_i32_1 = arith.constant 0 : i32
    return %c0_i32, %c0_i32_0 : i32, i32
  }
  func.func @transform_30(%arg0: i32) -> (i32, i32) {
    %c0_i32 = arith.constant 0 : i32
    %c0_i32_0 = arith.constant 0 : i32
    %c0_i32_1 = arith.constant 0 : i32
    return %c0_i32, %c0_i32_0 : i32, i32
  }
  func.func @transform_31(%arg0: i32) -> (i32, i32, i32) {
    %c0_i32 = arith.constant 0 : i32
    %c0_i32_0 = arith.constant 0 : i32
    %c0_i32_1 = arith.constant 0 : i32
    %c0_i32_2 = arith.constant 0 : i32
    return %c0_i32, %c0_i32_0, %c0_i32_1 : i32, i32, i32
  }
  func.func @transform_32(%arg0: i32) -> (i32, i32) {
    %c0_i32 = arith.constant 0 : i32
    %c0_i32_0 = arith.constant 0 : i32
    %c0_i32_1 = arith.constant 0 : i32
    return %c0_i32, %c0_i32_0 : i32, i32
  }
  func.func @transform_33(%arg0: i32) -> (i32, i32) {
    %c0_i32 = arith.constant 0 : i32
    %c0_i32_0 = arith.constant 0 : i32
    %c0_i32_1 = arith.constant 0 : i32
    return %c0_i32, %c0_i32_0 : i32, i32
  }
  func.func @transform_34(%arg0: i32) -> (i32, i32) {
    %c0_i32 = arith.constant 0 : i32
    %c0_i32_0 = arith.constant 0 : i32
    %c0_i32_1 = arith.constant 0 : i32
    return %c0_i32, %c0_i32_0 : i32, i32
  }
  func.func @transform_35(%arg0: i32) -> (i32, i32) {
    %c0_i32 = arith.constant 0 : i32
    %c0_i32_0 = arith.constant 0 : i32
    %c0_i32_1 = arith.constant 0 : i32
    return %c0_i32, %c0_i32_0 : i32, i32
  }
  func.func @transform_36(%arg0: i32) -> (i32, i32) {
    %c0_i32 = arith.constant 0 : i32
    %c0_i32_0 = arith.constant 0 : i32
    %c0_i32_1 = arith.constant 0 : i32
    return %c0_i32, %c0_i32_0 : i32, i32
  }
  func.func @transform_37(%arg0: i32) -> (i32, i32, i32) {
    %c0_i32 = arith.constant 0 : i32
    %c0_i32_0 = arith.constant 0 : i32
    %c0_i32_1 = arith.constant 0 : i32
    %c0_i32_2 = arith.constant 0 : i32
    return %c0_i32, %c0_i32_0, %c0_i32_1 : i32, i32, i32
  }
  func.func @transform_38(%arg0: i32) -> (i32, i32) {
    %c0_i32 = arith.constant 0 : i32
    %c0_i32_0 = arith.constant 0 : i32
    %c0_i32_1 = arith.constant 0 : i32
    return %c0_i32, %c0_i32_0 : i32, i32
  }
  func.func @transform_39(%arg0: i32) -> (i32, i32) {
    %c0_i32 = arith.constant 0 : i32
    %c0_i32_0 = arith.constant 0 : i32
    %c0_i32_1 = arith.constant 0 : i32
    return %c0_i32, %c0_i32_0 : i32, i32
  }
  func.func @transform_40(%arg0: i32) -> (i32, i32) {
    %c0_i32 = arith.constant 0 : i32
    %c0_i32_0 = arith.constant 0 : i32
    %c0_i32_1 = arith.constant 0 : i32
    return %c0_i32, %c0_i32_0 : i32, i32
  }
  func.func @transform_41(%arg0: i32) -> (i32, i32) {
    %c0_i32 = arith.constant 0 : i32
    %c0_i32_0 = arith.constant 0 : i32
    %c0_i32_1 = arith.constant 0 : i32
    return %c0_i32, %c0_i32_0 : i32, i32
  }
  func.func @transform_42(%arg0: i32) -> (i32, i32, i32) {
    %c0_i32 = arith.constant 0 : i32
    %c0_i32_0 = arith.constant 0 : i32
    %c0_i32_1 = arith.constant 0 : i32
    %c0_i32_2 = arith.constant 0 : i32
    return %c0_i32, %c0_i32_0, %c0_i32_1 : i32, i32, i32
  }
  func.func @transform_43(%arg0: i32) -> (i32, i32) {
    %c0_i32 = arith.constant 0 : i32
    %c0_i32_0 = arith.constant 0 : i32
    %c0_i32_1 = arith.constant 0 : i32
    return %c0_i32, %c0_i32_0 : i32, i32
  }
  func.func @transform_44(%arg0: i32) -> (i32, i32) {
    %c0_i32 = arith.constant 0 : i32
    %c0_i32_0 = arith.constant 0 : i32
    %c0_i32_1 = arith.constant 0 : i32
    return %c0_i32, %c0_i32_0 : i32, i32
  }
  func.func @transform_45(%arg0: i32) -> (i32, i32) {
    %c0_i32 = arith.constant 0 : i32
    %c0_i32_0 = arith.constant 0 : i32
    %c0_i32_1 = arith.constant 0 : i32
    return %c0_i32, %c0_i32_0 : i32, i32
  }
  func.func @transform_46(%arg0: i32) -> (i32, i32) {
    %c0_i32 = arith.constant 0 : i32
    %c0_i32_0 = arith.constant 0 : i32
    %c0_i32_1 = arith.constant 0 : i32
    return %c0_i32, %c0_i32_0 : i32, i32
  }
  func.func @transform_47(%arg0: i32) -> (i32, i32) {
    %c0_i32 = arith.constant 0 : i32
    %c0_i32_0 = arith.constant 0 : i32
    %c0_i32_1 = arith.constant 0 : i32
    return %c0_i32, %c0_i32_0 : i32, i32
  }
  func.func @transform_48(%arg0: i32) -> (i32, i32) {
    %c0_i32 = arith.constant 0 : i32
    %c0_i32_0 = arith.constant 0 : i32
    %c0_i32_1 = arith.constant 0 : i32
    return %c0_i32, %c0_i32_0 : i32, i32
  }
  func.func @transform_49(%arg0: i32) -> (i32, i32) {
    %c0_i32 = arith.constant 0 : i32
    %c0_i32_0 = arith.constant 0 : i32
    %c0_i32_1 = arith.constant 0 : i32
    return %c0_i32, %c0_i32_0 : i32, i32
  }
  func.func @transform_50(%arg0: i32) -> (i32, i32) {
    %c0_i32 = arith.constant 0 : i32
    %c0_i32_0 = arith.constant 0 : i32
    %c0_i32_1 = arith.constant 0 : i32
    return %c0_i32, %c0_i32_0 : i32, i32
  }
  func.func @transform_51(%arg0: i32) -> (i32, i32) {
    %c0_i32 = arith.constant 0 : i32
    %c0_i32_0 = arith.constant 0 : i32
    %c0_i32_1 = arith.constant 0 : i32
    return %c0_i32, %c0_i32_0 : i32, i32
  }
  func.func @transform_52(%arg0: i32) -> (i32, i32) {
    %c0_i32 = arith.constant 0 : i32
    %c0_i32_0 = arith.constant 0 : i32
    %c0_i32_1 = arith.constant 0 : i32
    return %c0_i32, %c0_i32_0 : i32, i32
  }
  func.func @transform_53(%arg0: i32) -> (i32, i32) {
    %c0_i32 = arith.constant 0 : i32
    %c0_i32_0 = arith.constant 0 : i32
    %c0_i32_1 = arith.constant 0 : i32
    return %c0_i32, %c0_i32_0 : i32, i32
  }
  func.func @transform_54(%arg0: i32) -> (i32, i32) {
    %c0_i32 = arith.constant 0 : i32
    %c0_i32_0 = arith.constant 0 : i32
    %c0_i32_1 = arith.constant 0 : i32
    return %c0_i32, %c0_i32_0 : i32, i32
  }
  func.func @transform_55(%arg0: i32) -> (i32, i32, i32) {
    %c0_i32 = arith.constant 0 : i32
    %c0_i32_0 = arith.constant 0 : i32
    %c0_i32_1 = arith.constant 0 : i32
    %c0_i32_2 = arith.constant 0 : i32
    return %c0_i32, %c0_i32_0, %c0_i32_1 : i32, i32, i32
  }
  func.func @transform_56(%arg0: i32) -> (i32, i32) {
    %c0_i32 = arith.constant 0 : i32
    %c0_i32_0 = arith.constant 0 : i32
    %c0_i32_1 = arith.constant 0 : i32
    return %c0_i32, %c0_i32_0 : i32, i32
  }
  func.func @transform_57(%arg0: i32) -> (i32, i32) {
    %c0_i32 = arith.constant 0 : i32
    %c0_i32_0 = arith.constant 0 : i32
    %c0_i32_1 = arith.constant 0 : i32
    return %c0_i32, %c0_i32_0 : i32, i32
  }
  func.func @transform_58(%arg0: i32) -> (i32, i32) {
    %c0_i32 = arith.constant 0 : i32
    %c0_i32_0 = arith.constant 0 : i32
    %c0_i32_1 = arith.constant 0 : i32
    return %c0_i32, %c0_i32_0 : i32, i32
  }
  func.func @transform_59(%arg0: i32) -> (i32, i32) {
    %c0_i32 = arith.constant 0 : i32
    %c0_i32_0 = arith.constant 0 : i32
    %c0_i32_1 = arith.constant 0 : i32
    return %c0_i32, %c0_i32_0 : i32, i32
  }
  func.func @transform_60(%arg0: i32) -> (i32, i32) {
    %c0_i32 = arith.constant 0 : i32
    %c0_i32_0 = arith.constant 0 : i32
    %c0_i32_1 = arith.constant 0 : i32
    return %c0_i32, %c0_i32_0 : i32, i32
  }
  func.func @transform_61(%arg0: i32) -> (i32, i32) {
    %c0_i32 = arith.constant 0 : i32
    %c0_i32_0 = arith.constant 0 : i32
    %c0_i32_1 = arith.constant 0 : i32
    return %c0_i32, %c0_i32_0 : i32, i32
  }
  func.func @transform_62(%arg0: i32) -> (i32, i32) {
    %c0_i32 = arith.constant 0 : i32
    %c0_i32_0 = arith.constant 0 : i32
    %c0_i32_1 = arith.constant 0 : i32
    return %c0_i32, %c0_i32_0 : i32, i32
  }
  func.func @transform_63(%arg0: i32) -> (i32, i32) {
    %c0_i32 = arith.constant 0 : i32
    %c0_i32_0 = arith.constant 0 : i32
    %c0_i32_1 = arith.constant 0 : i32
    return %c0_i32, %c0_i32_0 : i32, i32
  }
  func.func @transform_64(%arg0: i32) -> (i32, i32) {
    %c0_i32 = arith.constant 0 : i32
    %c0_i32_0 = arith.constant 0 : i32
    %c0_i32_1 = arith.constant 0 : i32
    return %c0_i32, %c0_i32_0 : i32, i32
  }
  func.func @transform_65(%arg0: i32) -> (i32, i32) {
    %c0_i32 = arith.constant 0 : i32
    %c0_i32_0 = arith.constant 0 : i32
    %c0_i32_1 = arith.constant 0 : i32
    return %c0_i32, %c0_i32_0 : i32, i32
  }
  func.func @transform_66(%arg0: i32) -> (i32, i32) {
    %c0_i32 = arith.constant 0 : i32
    %c0_i32_0 = arith.constant 0 : i32
    %c0_i32_1 = arith.constant 0 : i32
    return %c0_i32, %c0_i32_0 : i32, i32
  }
  func.func @transform_67(%arg0: i32) -> (i32, i32) {
    %c0_i32 = arith.constant 0 : i32
    %c0_i32_0 = arith.constant 0 : i32
    %c0_i32_1 = arith.constant 0 : i32
    return %c0_i32, %c0_i32_0 : i32, i32
  }
  func.func @transform_68(%arg0: i32) -> (i32, i32, i32) {
    %c0_i32 = arith.constant 0 : i32
    %c0_i32_0 = arith.constant 0 : i32
    %c0_i32_1 = arith.constant 0 : i32
    return %arg0, %c0_i32, %c0_i32_0 : i32, i32, i32
  }
  func.func @transform_69(%arg0: i32) -> (i32, i32, i32) {
    %c0_i32 = arith.constant 0 : i32
    %c0_i32_0 = arith.constant 0 : i32
    %c0_i32_1 = arith.constant 0 : i32
    return %arg0, %c0_i32, %c0_i32_0 : i32, i32, i32
  }
}

</mosaic_0001>

<bundles_post_ra>
// kernel: swin_tiny_forward.1
= control target key start
LH: loop header
LB: loop body
LE: loop exit
PB: predicated region body
PF: predicated region fallthrough
CT: control target
= control target key end

     0   :  { %s16948_s6 = smov 1   ;;  %s16949_s10 = smov 2   ;;  %s19705_s0 = inlined_call_operand.smem [shape: u32[70], index: -1, kind: input, shape index: {}] }
   0x1   :  { %s17061_s5 = sld [smem:[%s19705_s0]]   ;;  %s16950_s14 = smov 3  }
   0x2   :  { %s17066_s9 = sld [smem:[%s19705_s0 + %s16948_s6]]   ;;  %s16951_s18 = smov 4  }
   0x3   :  { %s17071_s13 = sld [smem:[%s19705_s0 + %s16949_s10]]   ;;  %s16952_s22 = smov 5  }
   0x4   :  { %s17076_s17 = sld [smem:[%s19705_s0 + %s16950_s14]]   ;;  %s16953_s26 = smov 6  }
   0x5   :  { %s17081_s21 = sld [smem:[%s19705_s0 + %s16951_s18]]   ;;  %s16954_s30 = smov 7  }
   0x6   :  { %s17086_s25 = sld [smem:[%s19705_s0 + %s16952_s22]]   ;;  %s16955_s4 = smov 8  }
   0x7   :  { %19801 = sst [smem:[#allocation60_spill]] %s17061_s5  ;;  %s16956_s10 = smov 9  }
   0x8   :  { %19802 = sst [smem:[#allocation61_spill]] %s17066_s9  ;;  %s16957_s15 = smov 10  }
   0x9   :  { %19803 = sst [smem:[#allocation62_spill]] %s17071_s13  ;;  %s16958_s20 = smov 11  }
   0xa   :  { %19804 = sst [smem:[#allocation63_spill]] %s17076_s17  ;;  %s16960_s1 = smov 13  }
   0xb   :  { %19805 = sst [smem:[#allocation64_spill]] %s17081_s21  ;;  %s16961_s7 = smov 14  }
   0xc   :  { %19806 = sst [smem:[#allocation65_spill]] %s17086_s25  ;;  %s16963_s22 = smov 16  }
   0xd   :  { %s17091_s29 = sld [smem:[%s19705_s0 + %s16953_s26]]   ;;  %s16959_s26 = smov 12  }
   0xe   :  { %s17096_s3 = sld [smem:[%s19705_s0 + %s16954_s30]]   ;;  %s16964_s28 = smov 17  }
   0xf   :  { %s17101_s8 = sld [smem:[%s19705_s0 + %s16955_s4]]   ;;  %s17015_s23 = smov 68  }
  0x10   :  { %s17106_s14 = sld [smem:[%s19705_s0 + %s16956_s10]]  }
  0x11   :  { %s17111_s19 = sld [smem:[%s19705_s0 + %s16957_s15]]   ;;  %s16962_s15 = smov 15  }
  0x12   :  { %s17116_s24 = sld [smem:[%s19705_s0 + %s16958_s20]]  }
  0x13   :  { %19807 = sst [smem:[#allocation66_spill]] %s17091_s29 }
  0x14   :  { %19808 = sst [smem:[#allocation67_spill]] %s17096_s3 }
  0x15   :  { %19809 = sst [smem:[#allocation68_spill]] %s17101_s8 }
  0x16   :  { %19810 = sst [smem:[#allocation69_spill]] %s17106_s14 }
  0x17   :  { %19811 = sst [smem:[#allocation70_spill]] %s17111_s19 }
  0x18   :  { %19812 = sst [smem:[#allocation71_spill]] %s17116_s24 }
  0x19   :  { %s17121_s30 = sld [smem:[%s19705_s0 + %s16959_s26]]  }
  0x1a   :  { %s17126_s6 = sld [smem:[%s19705_s0 + %s16960_s1]]   ;;  %s17016_s1 = smov 69  }
  0x1b   :  { %s17131_s12 = sld [smem:[%s19705_s0 + %s16961_s7]]   ;;  %s16965_s7 = smov 18  }
  0x1c   :  { %s17136_s20 = sld [smem:[%s19705_s0 + %s16962_s15]]   ;;  %s16966_s15 = smov 19  }
  0x1d   :  { %s17141_s27 = sld [smem:[%s19705_s0 + %s16963_s22]]   ;;  %s16967_s22 = smov 20  }
  0x1e   :  { %s17146_s4 = sld [smem:[%s19705_s0 + %s16964_s28]]   ;;  %s16968_s28 = smov 21  }
  0x1f   :  { %19813 = sst [smem:[#allocation72_spill]] %s17121_s30 }
  0x20   :  { %19814 = sst [smem:[#allocation73_spill]] %s17126_s6 }
  0x21   :  { %19815 = sst [smem:[#allocation74_spill]] %s17131_s12 }
  0x22   :  { %19816 = sst [smem:[#allocation75_spill]] %s17136_s20 }
  0x23   :  { %19817 = sst [smem:[#allocation76_spill]] %s17141_s27 }
  0x24   :  { %19818 = sst [smem:[#allocation77_spill]] %s17146_s4 }
  0x25   :  { %s17151_s6 = sld [smem:[%s19705_s0 + %s16965_s7]]   ;;  %s16969_s7 = smov 22  }
  0x26   :  { %s17156_s20 = sld [smem:[%s19705_s0 + %s16966_s15]]   ;;  %s16970_s15 = smov 23  }
  0x27   :  { %s17161_s27 = sld [smem:[%s19705_s0 + %s16967_s22]]   ;;  %s16971_s22 = smov 24  }
  0x28   :  { %s17166_s4 = sld [smem:[%s19705_s0 + %s16968_s28]]   ;;  %s16972_s28 = smov 25  }
  0x29   :  { %s17186_s30 = sld [smem:[%s19705_s0 + %s16972_s28]]   ;;  %s16976_s28 = smov 29  }
  0x2a   :  { %s17206_s24 = sld [smem:[%s19705_s0 + %s16976_s28]]   ;;  %s16980_s28 = smov 33  }
  0x2b   :  { %19819 = sst [smem:[#allocation78_spill]] %s17151_s6 }
  0x2c   :  { %19820 = sst [smem:[#allocation79_spill]] %s17156_s20 }
  0x2d   :  { %19821 = sst [smem:[#allocation80_spill]] %s17161_s27 }
  0x2e   :  { %19822 = sst [smem:[#allocation81_spill]] %s17166_s4 }
  0x2f   :  { %s17171_s6 = sld [smem:[%s19705_s0 + %s16969_s7]]   ;;  %s16973_s7 = smov 26  }
  0x30   :  { %s17176_s20 = sld [smem:[%s19705_s0 + %s16970_s15]]   ;;  %s16974_s15 = smov 27  }
  0x31   :  { %s17181_s27 = sld [smem:[%s19705_s0 + %s16971_s22]]   ;;  %s16975_s22 = smov 28  }
  0x32   :  { %s17201_s12 = sld [smem:[%s19705_s0 + %s16975_s22]]   ;;  %s16979_s22 = smov 32  }
  0x33   :  { %19829 = sst [smem:[#allocation88_spill]] %s17206_s24 }
  0x34   :  { %s17221_s14 = sld [smem:[%s19705_s0 + %s16979_s22]]   ;;  %s16983_s22 = smov 36  }
  0x35   :  { %19823 = sst [smem:[#allocation82_spill]] %s17171_s6 }
  0x36   :  { %19824 = sst [smem:[#allocation83_spill]] %s17176_s20 }
  0x37   :  { %19825 = sst [smem:[#allocation84_spill]] %s17181_s27 }
  0x38   :  { %s17191_s6 = sld [smem:[%s19705_s0 + %s16973_s7]]   ;;  %s16977_s7 = smov 30  }
  0x39   :  { %s17196_s20 = sld [smem:[%s19705_s0 + %s16974_s15]]   ;;  %s16978_s15 = smov 31  }
  0x3a   :  { %19828 = sst [smem:[#allocation87_spill]] %s17201_s12 }
  0x3b   :  { %s17211_s19 = sld [smem:[%s19705_s0 + %s16977_s7]]   ;;  %s16981_s7 = smov 34  }
  0x3c   :  { %19831 = sst [smem:[#allocation90_spill]] %s17221_s14 }
  0x3d   :  { %s17226_s24 = sld [smem:[%s19705_s0 + %s16980_s28]]   ;;  %s16984_s28 = smov 37  }
  0x3e   :  { %19826 = sst [smem:[#allocation85_spill]] %s17191_s6 }
  0x3f   :  { %19827 = sst [smem:[#allocation86_spill]] %s17196_s20 }
  0x40   :  { %s17216_s20 = sld [smem:[%s19705_s0 + %s16978_s15]]   ;;  %s16982_s15 = smov 35  }
  0x41   :  { %s17231_s8 = sld [smem:[%s19705_s0 + %s16981_s7]]   ;;  %s16985_s7 = smov 38  }
  0x42   :  { %s17241_s14 = sld [smem:[%s19705_s0 + %s16983_s22]]   ;;  %s16987_s22 = smov 40  }
  0x43   :  { %19832 = sst [smem:[#allocation91_spill]] %s17226_s24 }
  0x44   :  { %s17246_s24 = sld [smem:[%s19705_s0 + %s16984_s28]]   ;;  %s16988_s28 = smov 41  }
  0x45   :  { %s17251_s29 = sld [smem:[%s19705_s0 + %s16985_s7]]   ;;  %s16989_s7 = smov 42  }
  0x46   :  { %19830 = sst [smem:[#allocation89_spill]] %s17216_s20 }
  0x47   :  { %19833 = sst [smem:[#allocation92_spill]] %s17231_s8 }
  0x48   :  { %s17236_s20 = sld [smem:[%s19705_s0 + %s16982_s15]]   ;;  %s16986_s15 = smov 39  }
  0x49   :  { %19834 = sst [smem:[#allocation93_spill]] %s17241_s14 }
  0x4a   :  { %19835 = sst [smem:[#allocation94_spill]] %s17246_s24 }
  0x4b   :  { %19836 = sst [smem:[#allocation95_spill]] %s17251_s29 }
  0x4c   :  { %s17256_s25 = sld [smem:[%s19705_s0 + %s16986_s15]]   ;;  %s16990_s15 = smov 43  }
  0x4d   :  { %s17261_s14 = sld [smem:[%s19705_s0 + %s16987_s22]]   ;;  %s16991_s22 = smov 44  }
  0x4e   :  { %s17266_s24 = sld [smem:[%s19705_s0 + %s16988_s28]]   ;;  %s16992_s28 = smov 45  }
  0x4f   :  { %s17271_s3 = sld [smem:[%s19705_s0 + %s16989_s7]]   ;;  %s16993_s7 = smov 46  }
  0x50   :  { %s17276_s21 = sld [smem:[%s19705_s0 + %s16990_s15]]   ;;  %s16994_s15 = smov 47  }
  0x51   :  { %s17286_s17 = sld [smem:[%s19705_s0 + %s16992_s28]]   ;;  %s16996_s28 = smov 49  }
  0x52   :  { %s17306_s9 = sld [smem:[%s19705_s0 + %s16996_s28]]   ;;  %s17000_s28 = smov 53  }
  0x53   :  { %19837 = sst [smem:[#allocation96_spill]] %s17261_s14 }
  0x54   :  { %19838 = sst [smem:[#allocation97_spill]] %s17266_s24 }
  0x55   :  { %19839 = sst [smem:[#allocation98_spill]] %s17271_s3 }
  0x56   :  { %19840 = sst [smem:[#allocation99_spill]] %s17276_s21 }
  0x57   :  { %s17281_s14 = sld [smem:[%s19705_s0 + %s16991_s22]]   ;;  %s16995_s22 = smov 48  }
  0x58   :  { %19842 = sst [smem:[#allocation101_spill]] %s17286_s17 }
  0x59   :  { %s17291_s3 = sld [smem:[%s19705_s0 + %s16993_s7]]   ;;  %s16997_s7 = smov 50  }
  0x5a   :  { %s17296_s21 = sld [smem:[%s19705_s0 + %s16994_s15]]   ;;  %s16998_s15 = smov 51  }
  0x5b   :  { %s17301_s13 = sld [smem:[%s19705_s0 + %s16995_s22]]   ;;  %s16999_s22 = smov 52  }
  0x5c   :  { %19846 = sst [smem:[#allocation105_spill]] %s17306_s9 }
  0x5d   :  { %19841 = sst [smem:[#allocation100_spill]] %s17281_s14 }
  0x5e   :  { %s17311_s5 = sld [smem:[%s19705_s0 + %s16997_s7]]   ;;  %s17001_s7 = smov 54  }
  0x5f   :  { %19843 = sst [smem:[#allocation102_spill]] %s17291_s3 }
  0x60   :  { %19844 = sst [smem:[#allocation103_spill]] %s17296_s21 }
  0x61   :  { %19845 = sst [smem:[#allocation104_spill]] %s17301_s13 }
  0x62   :  { %s17316_s21 = sld [smem:[%s19705_s0 + %s16998_s15]]   ;;  %s17002_s15 = smov 55  }
  0x63   :  { %s17321_s13 = sld [smem:[%s19705_s0 + %s16999_s22]]   ;;  %s17003_s22 = smov 56  }
  0x64   :  { %19847 = sst [smem:[#allocation106_spill]] %s17311_s5 }
  0x65   :  { %s17326_s9 = sld [smem:[%s19705_s0 + %s17000_s28]]   ;;  %s17004_s28 = smov 57  }
  0x66   :  { %s17331_s17 = sld [smem:[%s19705_s0 + %s17001_s7]]   ;;  %s17005_s7 = smov 58  }
  0x67   :  { %s17341_s24 = sld [smem:[%s19705_s0 + %s17003_s22]]   ;;  %s17007_s22 = smov 60  }
  0x68   :  { %19848 = sst [smem:[#allocation107_spill]] %s17316_s21 }
  0x69   :  { %19849 = sst [smem:[#allocation108_spill]] %s17321_s13 }
  0x6a   :  { %s17336_s21 = sld [smem:[%s19705_s0 + %s17002_s15]]   ;;  %s17006_s15 = smov 59  }
  0x6b   :  { %19850 = sst [smem:[#allocation109_spill]] %s17326_s9 }
  0x6c   :  { %19851 = sst [smem:[#allocation110_spill]] %s17331_s17 }
  0x6d   :  { %19853 = sst [smem:[#allocation112_spill]] %s17341_s24 }
  0x6e   :  { %s17346_s9 = sld [smem:[%s19705_s0 + %s17004_s28]]   ;;  %s17008_s28 = smov 61  }
  0x6f   :  { %s17351_s17 = sld [smem:[%s19705_s0 + %s17005_s7]]   ;;  %s17009_s7 = smov 62  }
  0x70   :  { %19852 = sst [smem:[#allocation111_spill]] %s17336_s21 }
  0x71   :  { %s17356_s21 = sld [smem:[%s19705_s0 + %s17006_s15]]   ;;  %s17010_s15 = smov 63  }
  0x72   :  { %s17361_s24 = sld [smem:[%s19705_s0 + %s17007_s22]]   ;;  %s17011_s22 = smov 64  }
  0x73   :  { %s17366_s29 = sld [smem:[%s19705_s0 + %s17008_s28]]   ;;  %s17012_s28 = smov 65  }
  0x74   :  { %19854 = sst [smem:[#allocation113_spill]] %s17346_s9 }
  0x75   :  { %19855 = sst [smem:[#allocation114_spill]] %s17351_s17 }
  0x76   :  { %s17371_s17 = sld [smem:[%s19705_s0 + %s17009_s7]]   ;;  %s17013_s7 = smov 66  }
  0x77   :  { %s17376_s8 = sld [smem:[%s19705_s0 + %s17010_s15]]   ;;  %s17014_s15 = smov 67  }
  0x78   :  { %19856 = sst [smem:[#allocation115_spill]] %s17361_s24 }
  0x79   :  { %19857 = sst [smem:[#allocation116_spill]] %s17366_s29 }
  0x7a   :  { %s17381_s24 = sld [smem:[%s19705_s0 + %s17011_s22]]  }
  0x7b   :  { %s17386_s29 = sld [smem:[%s19705_s0 + %s17012_s28]]  }
  0x7c   :  { %19858 = sst [smem:[#allocation117_spill]] %s17371_s17 }
  0x7d   :  { %19859 = sst [smem:[#allocation118_spill]] %s17376_s8 }
  0x7e   :  { %s17391_s17 = sld [smem:[%s19705_s0 + %s17013_s7]]  }
  0x7f   :  { %s12850_s12 = sld [smem:[%s19705_s0 + %s17014_s15]]  }
  0x80   :  { %19860 = sst [smem:[#allocation119_spill]] %s17381_s24 }
  0x81   :  { %19861 = sst [smem:[#allocation120_spill]] %s17386_s29 }
  0x82   :  { %s17399_s24 = sld [smem:[%s19705_s0 + %s17015_s23]]  }
  0x83   :  { %s17404_s29 = sld [smem:[%s19705_s0 + %s17016_s1]]  }
  0x85   :  { %v145_v0 = vstv %s12850_s12 }
  0x86   :  { %146 = vst [vmem:[#allocation2] sm:$0x1] %v145_v0 }
  0x87   :  { %147 = vsyncpa [#allocation4], 0 }
  0x88   :  { %148 = vsyncpa [#allocation7], 0 }
  0x89   :  { %149 = vsyncpa [#allocation10], 0 }
  0x8a   :  { %150 = vsyncpa [#allocation13], 0 }
  0x8b   :  { %151 = vsyncpa [#allocation16], 0 }
  0x8c   :  { %152 = vsyncpa [#allocation19], 0 }
  0x8d   :  { %153 = vsyncpa [#allocation22], 0 }
  0x8e   :  { %154 = vsyncpa [#allocation25], 0 }
  0x8f   :  { %155 = vsyncpa [#allocation28], 0 }
  0x90   :  { %156 = vsyncpa [#allocation31], 0 }
  0x91   :  { %157 = vsyncpa [#allocation34], 0 }
  0x92   :  { %158 = vsyncpa [#allocation37], 0 }
  0x93   :  { %159 = vsyncpa [#allocation40], 0 }
  0x94   :  { %160 = vsyncpa [#allocation43], 0 }
  0x95   :  { %161 = vsyncpa [#allocation5], 0 }
  0x96   :  { %163 = vsyncpa [#allocation5 + $0x1], 0  ;;  %s17406_s0 = smov 0   ;;  %s17408_s12 = smov 0  }
  0x97   :  { %s17410_s7 = smov 0   ;;  %s17412_s10 = smov 0  }
  0x98 LB: > { %s19862_s14 = sld [smem:[#allocation100_spill]]  ;;  %s19864_s9 = sld [smem:[#allocation113_spill]]  ;;  %s16934_s0 = sphi %s17406_s0, %s19979_s0   ;;  %s16946_s10 = sphi %s17412_s10, %s19976_s10   ;;  %s16942_s7 = sphi %s17410_s7, %s19978_s7   ;;  %s16938_s12 = sphi %s17408_s12, %s19980_s12  }
  0x99   : > { %s19863_s13 = sld [smem:[#allocation108_spill]]  ;;  %s19865_s8 = sld [smem:[#allocation118_spill]] }
  0x9a   : > { %s19866_s5 = sld [smem:[#allocation106_spill]]  ;;  %s19867_s4 = sld [smem:[#allocation81_spill]] }
  0x9b   : > { %s19868_s3 = sld [smem:[#allocation102_spill]]  ;;  %s19869_s27 = sld [smem:[#allocation84_spill]] }
  0x9c   : > { %s19870_s6 = sld [smem:[#allocation85_spill]]  ;;  %19871 = sst [smem:[#allocation121_spill]] %s16942_s7 }
  0x9d   : > { %s17427_s11 = sadd.s32 4294967295, %s16946_s10   ;;  %s12854_s15 = sadd.s32 4294967294, %s16946_s10  }
  0x9e   : > { %s17431_s16 = sadd.s32 1, %s16946_s10   ;;  %s1609_s18 = sadd.s32 1, %s16942_s7 }
  0x9f   : > { %19872 = sst [smem:[#allocation122_spill]] %s17431_s16  ;;  %s1606_s23 = ssub.s32 %s16946_s10, %s17431_s16 }
  0xa0   : > { %p1619_p0 = scmp.ne.s32.totalorder %s16942_s7, %s16938_s12  ;;  %p1607_p1 = scmp.eq.s32.totalorder %s1606_s23, 0 }
  0xa1   : > { %p1620_p2 = scmp.eq.s32.totalorder %s17427_s11, 1  ;;  %p1625_p3 = scmp.ne.s32.totalorder %s16938_s12, %s16934_s0 }
  0xa2   : > { %p1626_p4 = scmp.eq.s32.totalorder %s12854_s15, 1  ;;  %p12855_p7 = scmp.ge.s32.totalorder %s16946_s10, 1 }
  0xa3   : > { %s17442_s22 = scalar_select %p1607_p1, %s16942_s7, %s1609_s18  }
  0xa4   : > { %p17444_p5 = por %p1620_p2, %p1619_p0  ;;  %p17448_p6 = por %p1626_p4, %p1625_p3 }
  0xa5   : > { %19873 = sst [smem:[#allocation123_spill]] %s17442_s22  ;;  %p1659_p8 = scmp.lt.s32.totalorder %s16946_s10, 3 }
  0xa6   : > { %s19874_s26 = scalar_select %p17444_p5, 1, 0 }
  0xa7   : > { %s19875_s1 = scalar_select %p17448_p6, 1, 0 }
  0xa8   : > { %p19748_p9 = scmp.eq.s32.totalorder %s17427_s11, 0  ;;  %p17455_p10 = pnand %p12855_p7, %p1659_p8 }
  0xa9   : > { %19876 = sst [smem:[#allocation124_spill]] %s19875_s1  ;;  %s17017_s2 = smov [#allocation6]  }
  0xaa   : > { %s19877_s28 = scalar_select %p17455_p10, 1, 0 }
  0xab   : > { %s1749_s15 = sshll.u32 %s17017_s2, 4  ;;  %p15252_p11 = pneg %p17455_p10  ;;  %s1750_s15 = int_to_ptr.vmem [resolvable:$true] %s1749_s15 }
  0xac   : > { %s17018_s18 = smov [#allocation9]   ;;  %s17019_s7 = smov [#allocation12]  }
  0xad   : > { %s1771_s23 = sshll.u32 %s17018_s18, 4  ;;  %p17463_p12 = pnand %p19748_p9, %p15252_p11  ;;  %s17467_s23 = int_to_ptr.vmem [resolvable:$true] %s1771_s23 }
  0xae   : > { %s1799_s16 = sshll.u32 %s17019_s7, 4  ;;  %s16100_s1 = scalar_lea.hbm %s19869_s27, 16  ;;  %s17469_s16 = int_to_ptr.vmem [resolvable:$true] %s1799_s16 }
  0xaf   : > { %p16101_p13 = scmp.ne.s32.totalorder %s19869_s27, %s16100_s1  ;;  %p17475_p0 = pneg %p17463_p12 }
  0xb0   : > { %p16107_p3 = scmp.lt.u32.totalorder %s16100_s1, %s19869_s27 }
  0xb1   : > { %p16103_p1 = pnand %p17475_p0, %p16101_p13 }
  0xb3   : > { %p16104_p2 = pneg %p16103_p1 }
  0xb5   : > { %p16109_p4 = pnand %p16107_p3, %p16104_p2 }
  0xb7   : > { %16112 = shalt.err (!%p16109_p4)
}
  0xb8   : > { %s16113_s18 = scalar_lea.vmem %s1750_s15, 16  ;;  %s16120_s7 = scalar_lea.vmem %s1750_s15, 32 }
  0xb9   : > { %p16114_p7 = scmp.ne.s32.totalorder %s1750_s15, %s16113_s18  ;;  %p16121_p9 = scmp.lt.s32.totalorder %s1750_s15, %s1750_s15 }
  0xba   : > { %p16122_p6 = scmp.lt.s32.totalorder %s16120_s7, %s16113_s18 }
  0xbb   : > { %p16116_p8 = pnand %p16114_p7, %p17475_p0 }
  0xbc   : > { %p16123_p5 = por %p16122_p6, %p16121_p9 }
  0xbd   : > { %p16117_p11 = pneg %p16116_p8 }
  0xbf   : > { %p16124_p10 = pnand %p16123_p5, %p16117_p11 }
  0xc1   : > { %16127 = shalt.err (!%p16124_p10)
}
  0xc2   : > { %15258 = dma.hbm_to_vmem [thread:$0]  (!%p17463_p12), %s19869_s27, 16, %s1750_s15, [#allocation7]  }
  0xc3   : > { %s16128_s1 = scalar_lea.hbm %s19870_s6, 16 }
  0xc4   : > { %p16129_p13 = scmp.ne.s32.totalorder %s19870_s6, %s16128_s1  ;;  %p16135_p3 = scmp.lt.u32.totalorder %s16128_s1, %s19870_s6 }
  0xc6   : > { %p16131_p1 = pnand %p16129_p13, %p17475_p0 }
  0xc8   : > { %p16132_p2 = pneg %p16131_p1 }
  0xca   : > { %p16137_p4 = pnand %p16135_p3, %p16132_p2 }
  0xcc   : > { %16140 = shalt.err (!%p16137_p4)
}
  0xcd   : > { %s16141_s18 = scalar_lea.vmem %s17467_s23, 16  ;;  %s16148_s7 = scalar_lea.vmem %s17467_s23, 32 }
  0xce   : > { %p16142_p5 = scmp.ne.s32.totalorder %s17467_s23, %s16141_s18  ;;  %p16149_p10 = scmp.lt.s32.totalorder %s17467_s23, %s17467_s23 }
  0xcf   : > { %p16150_p7 = scmp.lt.s32.totalorder %s16148_s7, %s16141_s18 }
  0xd0   : > { %p16144_p6 = pnand %p16142_p5, %p17475_p0 }
  0xd1   : > { %p16151_p8 = por %p16150_p7, %p16149_p10 }
  0xd2   : > { %p16145_p9 = pneg %p16144_p6 }
  0xd4   : > { %p16152_p11 = pnand %p16151_p8, %p16145_p9 }
  0xd6   : > { %16155 = shalt.err (!%p16152_p11)
}
  0xd7   : > { %15264 = dma.hbm_to_vmem [thread:$0]  (!%p17463_p12), %s19870_s6, 16, %s17467_s23, [#allocation10]  }
  0xd8   : > { %s16156_s15 = scalar_lea.hbm %s17211_s19, 16 }
  0xd9   : > { %p16157_p13 = scmp.ne.s32.totalorder %s17211_s19, %s16156_s15  ;;  %p16163_p3 = scmp.lt.u32.totalorder %s16156_s15, %s17211_s19 }
  0xdb   : > { %p16159_p1 = pnand %p16157_p13, %p17475_p0 }
  0xdd   : > { %p16160_p2 = pneg %p16159_p1 }
  0xdf   : > { %p16165_p4 = pnand %p16163_p3, %p16160_p2 }
  0xe1   : > { %16168 = shalt.err (!%p16165_p4)
}
  0xe2   : > { %s16169_s1 = scalar_lea.vmem %s17469_s16, 16  ;;  %s16176_s18 = scalar_lea.vmem %s17469_s16, 32 }
  0xe3   : > { %p16170_p5 = scmp.ne.s32.totalorder %s17469_s16, %s16169_s1  ;;  %p16177_p10 = scmp.lt.s32.totalorder %s17469_s16, %s17469_s16 }
  0xe4   : > { %p16178_p7 = scmp.lt.s32.totalorder %s16176_s18, %s16169_s1 }
  0xe5   : > { %p16172_p6 = pnand %p16170_p5, %p17475_p0 }
  0xe6   : > { %p16179_p8 = por %p16178_p7, %p16177_p10 }
  0xe7   : > { %p16173_p9 = pneg %p16172_p6 }
  0xe9   : > { %p16180_p11 = pnand %p16179_p8, %p16173_p9 }
  0xeb   : > { %16183 = shalt.err (!%p16180_p11)
}
  0xec   : > { %15270 = dma.hbm_to_vmem [thread:$0]  (!%p17463_p12), %s17211_s19, 16, %s17469_s16, [#allocation13]  }
  0xed   : > { %s17020_s23 = smov [#allocation15]   ;;  %s17021_s15 = smov [#allocation18]  }
  0xee   : > { %s1830_s7 = sshll.u32 %s17020_s23, 4  ;;  %s1858_s6 = sshll.u32 %s17021_s15, 4  ;;  %s1831_s7 = int_to_ptr.vmem [resolvable:$true] %s1830_s7  ;;  %s1859_s6 = int_to_ptr.vmem [resolvable:$true] %s1858_s6 }
  0xef   : > { %s16184_s27 = scalar_lea.hbm %s17236_s20, 16 }
  0xf0   : > { %p16185_p13 = scmp.ne.s32.totalorder %s17236_s20, %s16184_s27  ;;  %p16191_p3 = scmp.lt.u32.totalorder %s16184_s27, %s17236_s20 }
  0xf2   : > { %p16187_p1 = pnand %p16185_p13, %p17475_p0 }
  0xf4   : > { %p16188_p2 = pneg %p16187_p1 }
  0xf6   : > { %p16193_p4 = pnand %p16191_p3, %p16188_p2 }
  0xf8   : > { %16196 = shalt.err (!%p16193_p4)
}
  0xf9   : > { %s16197_s1 = scalar_lea.vmem %s1831_s7, 16  ;;  %s16204_s16 = scalar_lea.vmem %s1831_s7, 32 }
  0xfa   : > { %p16198_p5 = scmp.ne.s32.totalorder %s1831_s7, %s16197_s1  ;;  %p16205_p10 = scmp.lt.s32.totalorder %s1831_s7, %s1831_s7 }
  0xfb   : > { %p16206_p7 = scmp.lt.s32.totalorder %s16204_s16, %s16197_s1 }
  0xfc   : > { %p16200_p6 = pnand %p16198_p5, %p17475_p0 }
  0xfd   : > { %p16207_p8 = por %p16206_p7, %p16205_p10 }
  0xfe   : > { %p16201_p9 = pneg %p16200_p6 }
 0x100   : > { %p16208_p11 = pnand %p16207_p8, %p16201_p9 }
 0x102   : > { %16211 = shalt.err (!%p16208_p11)
}
 0x103   : > { %15276 = dma.hbm_to_vmem [thread:$0]  (!%p17463_p12), %s17236_s20, 16, %s1831_s7, [#allocation16]  }
 0x104   : > { %s16212_s27 = scalar_lea.hbm %s17256_s25, 16 }
 0x105   : > { %p16213_p13 = scmp.ne.s32.totalorder %s17256_s25, %s16212_s27  ;;  %p16219_p3 = scmp.lt.u32.totalorder %s16212_s27, %s17256_s25 }
 0x107   : > { %p16215_p1 = pnand %p16213_p13, %p17475_p0 }
 0x109   : > { %p16216_p2 = pneg %p16215_p1 }
 0x10b   : > { %p16221_p4 = pnand %p16219_p3, %p16216_p2 }
 0x10d   : > { %16224 = shalt.err (!%p16221_p4)
}
 0x10e   : > { %s16225_s18 = scalar_lea.vmem %s1859_s6, 16  ;;  %s16232_s23 = scalar_lea.vmem %s1859_s6, 32 }
 0x10f   : > { %p16226_p5 = scmp.ne.s32.totalorder %s1859_s6, %s16225_s18  ;;  %p16233_p10 = scmp.lt.s32.totalorder %s1859_s6, %s1859_s6 }
 0x110   : > { %p16234_p7 = scmp.lt.s32.totalorder %s16232_s23, %s16225_s18 }
 0x111   : > { %p16228_p6 = pnand %p16226_p5, %p17475_p0 }
 0x112   : > { %p16235_p8 = por %p16234_p7, %p16233_p10 }
 0x113   : > { %p16229_p9 = pneg %p16228_p6 }
 0x115   : > { %p16236_p11 = pnand %p16235_p8, %p16229_p9 }
 0x117   : > { %16239 = shalt.err (!%p16236_p11)
}
 0x118   : > { %15282 = dma.hbm_to_vmem [thread:$0]  (!%p17463_p12), %s17256_s25, 16, %s1859_s6, [#allocation19]  }
 0x119   : > { %s17022_s7 = smov [#allocation21]   ;;  %s17023_s1 = smov [#allocation24]  }
 0x11a   : > { %s1889_s15 = sshll.u32 %s17022_s7, 4  ;;  %s1911_s16 = sshll.u32 %s17023_s1, 4  ;;  %s1890_s15 = int_to_ptr.vmem [resolvable:$true] %s1889_s15  ;;  %s1912_s16 = int_to_ptr.vmem [resolvable:$true] %s1911_s16 }
 0x11b   : > { %s16240_s27 = scalar_lea.hbm %s19862_s14, 16 }
 0x11c   : > { %p16241_p13 = scmp.ne.s32.totalorder %s19862_s14, %s16240_s27  ;;  %p16247_p3 = scmp.lt.u32.totalorder %s16240_s27, %s19862_s14 }
 0x11e   : > { %p16243_p1 = pnand %p16241_p13, %p17475_p0 }
 0x120   : > { %p16244_p2 = pneg %p16243_p1 }
 0x122   : > { %p16249_p4 = pnand %p16247_p3, %p16244_p2 }
 0x124   : > { %16252 = shalt.err (!%p16249_p4)
}
 0x125   : > { %s16253_s18 = scalar_lea.vmem %s1890_s15, 16  ;;  %s16260_s6 = scalar_lea.vmem %s1890_s15, 32 }
 0x126   : > { %p16254_p5 = scmp.ne.s32.totalorder %s1890_s15, %s16253_s18  ;;  %p16261_p10 = scmp.lt.s32.totalorder %s1890_s15, %s1890_s15 }
 0x127   : > { %p16262_p7 = scmp.lt.s32.totalorder %s16260_s6, %s16253_s18 }
 0x128   : > { %p16256_p6 = pnand %p16254_p5, %p17475_p0 }
 0x129   : > { %p16263_p8 = por %p16262_p7, %p16261_p10 }
 0x12a   : > { %p16257_p9 = pneg %p16256_p6 }
 0x12c   : > { %p16264_p11 = pnand %p16263_p8, %p16257_p9 }
 0x12e   : > { %16267 = shalt.err (!%p16264_p11)
}
 0x12f   : > { %15288 = dma.hbm_to_vmem [thread:$0]  (!%p17463_p12), %s19862_s14, 16, %s1890_s15, [#allocation22]  }
 0x130   : > { %s16268_s23 = scalar_lea.hbm %s19868_s3, 16 }
 0x131   : > { %p16269_p13 = scmp.ne.s32.totalorder %s19868_s3, %s16268_s23  ;;  %p16275_p3 = scmp.lt.u32.totalorder %s16268_s23, %s19868_s3 }
 0x133   : > { %p16271_p1 = pnand %p16269_p13, %p17475_p0 }
 0x135   : > { %p16272_p2 = pneg %p16271_p1 }
 0x137   : > { %p16277_p4 = pnand %p16275_p3, %p16272_p2 }
 0x139   : > { %16280 = shalt.err (!%p16277_p4)
}
 0x13a   : > { %s16281_s7 = scalar_lea.vmem %s1912_s16, 16  ;;  %s16288_s1 = scalar_lea.vmem %s1912_s16, 32 }
 0x13b   : > { %p16282_p5 = scmp.ne.s32.totalorder %s1912_s16, %s16281_s7  ;;  %p16289_p10 = scmp.lt.s32.totalorder %s1912_s16, %s1912_s16 }
 0x13c   : > { %p16290_p7 = scmp.lt.s32.totalorder %s16288_s1, %s16281_s7 }
 0x13d   : > { %p16284_p6 = pnand %p16282_p5, %p17475_p0 }
 0x13e   : > { %p16291_p8 = por %p16290_p7, %p16289_p10 }
 0x13f   : > { %p16285_p9 = pneg %p16284_p6 }
 0x141   : > { %p16292_p11 = pnand %p16291_p8, %p16285_p9 }
 0x143   : > { %16295 = shalt.err (!%p16292_p11)
}
 0x144   : > { %15294 = dma.hbm_to_vmem [thread:$0]  (!%p17463_p12), %s19868_s3, 16, %s1912_s16, [#allocation25]  }
 0x145   : > { %s17024_s15 = smov [#allocation27]   ;;  %s17025_s18 = smov [#allocation30]  }
 0x146   : > { %s1939_s27 = sshll.u32 %s17024_s15, 4  ;;  %s1961_s6 = sshll.u32 %s17025_s18, 4  ;;  %s1940_s27 = int_to_ptr.vmem [resolvable:$true] %s1939_s27  ;;  %s1962_s6 = int_to_ptr.vmem [resolvable:$true] %s1961_s6 }
 0x147   : > { %s16296_s23 = scalar_lea.hbm %s19866_s5, 16 }
 0x148   : > { %p16297_p13 = scmp.ne.s32.totalorder %s19866_s5, %s16296_s23  ;;  %p16303_p3 = scmp.lt.u32.totalorder %s16296_s23, %s19866_s5 }
 0x14a   : > { %p16299_p1 = pnand %p16297_p13, %p17475_p0 }
 0x14c   : > { %p16300_p2 = pneg %p16299_p1 }
 0x14e   : > { %p16305_p4 = pnand %p16303_p3, %p16300_p2 }
 0x150   : > { %16308 = shalt.err (!%p16305_p4)
}
 0x151   : > { %s16309_s7 = scalar_lea.vmem %s1940_s27, 16  ;;  %s16316_s16 = scalar_lea.vmem %s1940_s27, 32 }
 0x152   : > { %p16310_p5 = scmp.ne.s32.totalorder %s1940_s27, %s16309_s7  ;;  %p16317_p10 = scmp.lt.s32.totalorder %s1940_s27, %s1940_s27 }
 0x153   : > { %p16318_p7 = scmp.lt.s32.totalorder %s16316_s16, %s16309_s7 }
 0x154   : > { %p16312_p6 = pnand %p16310_p5, %p17475_p0 }
 0x155   : > { %p16319_p8 = por %p16318_p7, %p16317_p10 }
 0x156   : > { %p16313_p9 = pneg %p16312_p6 }
 0x158   : > { %p16320_p11 = pnand %p16319_p8, %p16313_p9 }
 0x15a   : > { %16323 = shalt.err (!%p16320_p11)
}
 0x15b   : > { %15300 = dma.hbm_to_vmem [thread:$0]  (!%p17463_p12), %s19866_s5, 16, %s1940_s27, [#allocation28]  }
 0x15c   : > { %s16324_s1 = scalar_lea.hbm %s19863_s13, 16 }
 0x15d   : > { %p16325_p13 = scmp.ne.s32.totalorder %s19863_s13, %s16324_s1  ;;  %p16331_p3 = scmp.lt.u32.totalorder %s16324_s1, %s19863_s13 }
 0x15f   : > { %p16327_p1 = pnand %p16325_p13, %p17475_p0 }
 0x161   : > { %p16328_p2 = pneg %p16327_p1 }
 0x163   : > { %p16333_p4 = pnand %p16331_p3, %p16328_p2 }
 0x165   : > { %16336 = shalt.err (!%p16333_p4)
}
 0x166   : > { %s16337_s15 = scalar_lea.vmem %s1962_s6, 16  ;;  %s16344_s18 = scalar_lea.vmem %s1962_s6, 32 }
 0x167   : > { %p16338_p5 = scmp.ne.s32.totalorder %s1962_s6, %s16337_s15  ;;  %p16345_p10 = scmp.lt.s32.totalorder %s1962_s6, %s1962_s6 }
 0x168   : > { %p16346_p7 = scmp.lt.s32.totalorder %s16344_s18, %s16337_s15 }
 0x169   : > { %p16340_p6 = pnand %p16338_p5, %p17475_p0 }
 0x16a   : > { %p16347_p8 = por %p16346_p7, %p16345_p10 }
 0x16b   : > { %p16341_p9 = pneg %p16340_p6 }
 0x16d   : > { %p16348_p11 = pnand %p16347_p8, %p16341_p9 }
 0x16f   : > { %16351 = shalt.err (!%p16348_p11)
}
 0x170   : > { %15306 = dma.hbm_to_vmem [thread:$0]  (!%p17463_p12), %s19863_s13, 16, %s1962_s6, [#allocation31]  }
 0x171   : > { %s17026_s27 = smov [#allocation33]   ;;  %s17027_s7 = smov [#allocation36]  }
 0x172   : > { %s1992_s23 = sshll.u32 %s17026_s27, 4  ;;  %s2014_s16 = sshll.u32 %s17027_s7, 4  ;;  %s1993_s23 = int_to_ptr.vmem [resolvable:$true] %s1992_s23  ;;  %s2015_s16 = int_to_ptr.vmem [resolvable:$true] %s2014_s16 }
 0x173   : > { %s16352_s1 = scalar_lea.hbm %s19864_s9, 16 }
 0x174   : > { %p16353_p13 = scmp.ne.s32.totalorder %s19864_s9, %s16352_s1  ;;  %p16359_p3 = scmp.lt.u32.totalorder %s16352_s1, %s19864_s9 }
 0x176   : > { %p16355_p1 = pnand %p16353_p13, %p17475_p0 }
 0x178   : > { %p16356_p2 = pneg %p16355_p1 }
 0x17a   : > { %p16361_p4 = pnand %p16359_p3, %p16356_p2 }
 0x17c   : > { %16364 = shalt.err (!%p16361_p4)
}
 0x17d   : > { %s16365_s15 = scalar_lea.vmem %s1993_s23, 16  ;;  %s16372_s6 = scalar_lea.vmem %s1993_s23, 32 }
 0x17e   : > { %p16366_p5 = scmp.ne.s32.totalorder %s1993_s23, %s16365_s15  ;;  %p16373_p10 = scmp.lt.s32.totalorder %s1993_s23, %s1993_s23 }
 0x17f   : > { %p16374_p7 = scmp.lt.s32.totalorder %s16372_s6, %s16365_s15 }
 0x180   : > { %p16368_p6 = pnand %p16366_p5, %p17475_p0 }
 0x181   : > { %p16375_p8 = por %p16374_p7, %p16373_p10 }
 0x182   : > { %p16369_p9 = pneg %p16368_p6 }
 0x184   : > { %p16376_p11 = pnand %p16375_p8, %p16369_p9 }
 0x186   : > { %16379 = shalt.err (!%p16376_p11)
}
 0x187   : > { %15312 = dma.hbm_to_vmem [thread:$0]  (!%p17463_p12), %s19864_s9, 16, %s1993_s23, [#allocation34]  }
 0x188   : > { %s16380_s18 = scalar_lea.hbm %s17356_s21, 16 }
 0x189   : > { %p16381_p13 = scmp.ne.s32.totalorder %s17356_s21, %s16380_s18  ;;  %p16387_p3 = scmp.lt.u32.totalorder %s16380_s18, %s17356_s21 }
 0x18b   : > { %p16383_p1 = pnand %p16381_p13, %p17475_p0 }
 0x18d   : > { %p16384_p2 = pneg %p16383_p1 }
 0x18f   : > { %p16389_p4 = pnand %p16387_p3, %p16384_p2 }
 0x191   : > { %16392 = shalt.err (!%p16389_p4)
}
 0x192   : > { %s16393_s27 = scalar_lea.vmem %s2015_s16, 16  ;;  %s16400_s7 = scalar_lea.vmem %s2015_s16, 32 }
 0x193   : > { %p16394_p5 = scmp.ne.s32.totalorder %s2015_s16, %s16393_s27  ;;  %p16401_p10 = scmp.lt.s32.totalorder %s2015_s16, %s2015_s16 }
 0x194   : > { %p16402_p7 = scmp.lt.s32.totalorder %s16400_s7, %s16393_s27 }
 0x195   : > { %p16396_p6 = pnand %p16394_p5, %p17475_p0 }
 0x196   : > { %p16403_p8 = por %p16402_p7, %p16401_p10 }
 0x197   : > { %p16397_p9 = pneg %p16396_p6 }
 0x199   : > { %p16404_p11 = pnand %p16403_p8, %p16397_p9 }
 0x19b   : > { %16407 = shalt.err (!%p16404_p11)
}
 0x19c   : > { %15318 = dma.hbm_to_vmem [thread:$0]  (!%p17463_p12), %s17356_s21, 16, %s2015_s16, [#allocation37]  }
 0x19d   : > { %s17028_s23 = smov [#allocation39]   ;;  %s17029_s15 = smov [#allocation3]  }
 0x19e   : > { %s2042_s1 = sshll.u32 %s17028_s23, 4  ;;  %s1732_s6 = sshll.u32 %s17029_s15, 4  ;;  %s2043_s1 = int_to_ptr.vmem [resolvable:$true] %s2042_s1  ;;  %s1733_s6 = int_to_ptr.vmem [resolvable:$true] %s1732_s6 }
 0x19f   : > { %s16408_s18 = scalar_lea.hbm %s19865_s8, 16 }
 0x1a0   : > { %p16409_p13 = scmp.ne.s32.totalorder %s19865_s8, %s16408_s18  ;;  %p16415_p3 = scmp.lt.u32.totalorder %s16408_s18, %s19865_s8 }
 0x1a2   : > { %p16411_p1 = pnand %p16409_p13, %p17475_p0 }
 0x1a4   : > { %p16412_p2 = pneg %p16411_p1 }
 0x1a6   : > { %p16417_p4 = pnand %p16415_p3, %p16412_p2 }
 0x1a8   : > { %16420 = shalt.err (!%p16417_p4)
}
 0x1a9   : > { %s16421_s27 = scalar_lea.vmem %s2043_s1, 16  ;;  %s16428_s16 = scalar_lea.vmem %s2043_s1, 32 }
 0x1aa   : > { %p16422_p5 = scmp.ne.s32.totalorder %s2043_s1, %s16421_s27  ;;  %p16429_p10 = scmp.lt.s32.totalorder %s2043_s1, %s2043_s1 }
 0x1ab   : > { %p16430_p7 = scmp.lt.s32.totalorder %s16428_s16, %s16421_s27 }
 0x1ac   : > { %p16424_p6 = pnand %p16422_p5, %p17475_p0 }
 0x1ad   : > { %p16431_p8 = por %p16430_p7, %p16429_p10 }
 0x1ae   : > { %p16425_p9 = pneg %p16424_p6 }
 0x1b0   : > { %p16432_p11 = pnand %p16431_p8, %p16425_p9 }
 0x1b2   : > { %16435 = shalt.err (!%p16432_p11)
}
 0x1b3   : > { %15324 = dma.hbm_to_vmem [thread:$0]  (!%p17463_p12), %s19865_s8, 16, %s2043_s1, [#allocation40]  }
 0x1b4   : > { %s16436_s7 = scalar_lea.hbm %s19867_s4, 16 }
 0x1b5   : > { %p16437_p13 = scmp.ne.s32.totalorder %s19867_s4, %s16436_s7  ;;  %p16443_p3 = scmp.lt.u32.totalorder %s16436_s7, %s19867_s4 }
 0x1b7   : > { %p16439_p1 = pnand %p16437_p13, %p17475_p0 }
 0x1b9   : > { %p16440_p2 = pneg %p16439_p1 }
 0x1bb   : > { %p16445_p4 = pnand %p16443_p3, %p16440_p2 }
 0x1bd   : > { %16448 = shalt.err (!%p16445_p4)
}
 0x1be   : > { %s16449_s23 = scalar_lea.vmem %s1733_s6, 16  ;;  %s16456_s15 = scalar_lea.vmem %s1733_s6, 32 }
 0x1bf   : > { %p16450_p5 = scmp.ne.s32.totalorder %s1733_s6, %s16449_s23  ;;  %p16457_p10 = scmp.lt.s32.totalorder %s1733_s6, %s1733_s6 }
 0x1c0   : > { %p16458_p7 = scmp.lt.s32.totalorder %s16456_s15, %s16449_s23 }
 0x1c1   : > { %p16452_p6 = pnand %p16450_p5, %p17475_p0 }
 0x1c2   : > { %p16459_p8 = por %p16458_p7, %p16457_p10 }
 0x1c3   : > { %p16453_p9 = pneg %p16452_p6 }
 0x1c5   : > { %p16460_p11 = pnand %p16459_p8, %p16453_p9 }
 0x1c7   : > { %16463 = shalt.err (!%p16460_p11)
}
 0x1c8   : > { %15255 = dma.hbm_to_vmem [thread:$0]  (!%p17463_p12), %s19867_s4, 16, %s1733_s6, [#allocation4]  }
 0x1c9   : > { %s17030_s1 = smov [#allocation8]   ;;  %s17031_s27 = smov [#allocation11]  }
 0x1ca   : > { %s1760_s18 = sshll.u32 %s17030_s1, 4  ;;  %s1785_s16 = sshll.u32 %s17031_s27, 4  ;;  %s1761_s18 = int_to_ptr.vmem [resolvable:$true] %s1760_s18  ;;  %s1786_s16 = int_to_ptr.vmem [resolvable:$true] %s1785_s16 }
 0x1cb   : > { %s16464_s7 = scalar_lea.hbm %s17186_s30, 16 }
 0x1cc   : > { %p16465_p13 = scmp.ne.s32.totalorder %s17186_s30, %s16464_s7  ;;  %p16471_p3 = scmp.lt.u32.totalorder %s16464_s7, %s17186_s30 }
 0x1ce   : > { %p16467_p1 = pnand %p16465_p13, %p17475_p0 }
 0x1d0   : > { %p16468_p2 = pneg %p16467_p1 }
 0x1d2   : > { %p16473_p4 = pnand %p16471_p3, %p16468_p2 }
 0x1d4   : > { %16476 = shalt.err (!%p16473_p4)
}
 0x1d5   : > { %s16477_s23 = scalar_lea.vmem %s1761_s18, 16  ;;  %s16484_s6 = scalar_lea.vmem %s1761_s18, 32 }
 0x1d6   : > { %p16478_p5 = scmp.ne.s32.totalorder %s1761_s18, %s16477_s23  ;;  %p16485_p10 = scmp.lt.s32.totalorder %s1761_s18, %s1761_s18 }
 0x1d7   : > { %p16486_p7 = scmp.lt.s32.totalorder %s16484_s6, %s16477_s23 }
 0x1d8   : > { %p16480_p6 = pnand %p16478_p5, %p17475_p0 }
 0x1d9   : > { %p16487_p8 = por %p16486_p7, %p16485_p10 }
 0x1da   : > { %p16481_p9 = pneg %p16480_p6 }
 0x1dc   : > { %p16488_p11 = pnand %p16487_p8, %p16481_p9 }
 0x1de   : > { %16491 = shalt.err (!%p16488_p11)
}
 0x1df   : > { %s19880_s15 = sld [smem:[#allocation87_spill]] }
 0x1e0   : > { %15261 = dma.hbm_to_vmem [thread:$0]  (!%p17463_p12), %s17186_s30, 16, %s1761_s18, [#allocation7]  }
 0x1e5   : > { %s16492_s1 = scalar_lea.hbm %s19880_s15, 16 }
 0x1e6   : > { %p16493_p13 = scmp.ne.s32.totalorder %s19880_s15, %s16492_s1  ;;  %p16499_p3 = scmp.lt.u32.totalorder %s16492_s1, %s19880_s15 }
 0x1e8   : > { %p16495_p1 = pnand %p16493_p13, %p17475_p0 }
 0x1ea   : > { %p16496_p2 = pneg %p16495_p1 }
 0x1ec   : > { %p16501_p4 = pnand %p16499_p3, %p16496_p2 }
 0x1ee   : > { %16504 = shalt.err (!%p16501_p4)
}
 0x1ef   : > { %s16505_s27 = scalar_lea.vmem %s1786_s16, 16  ;;  %s16512_s7 = scalar_lea.vmem %s1786_s16, 32 }
 0x1f0   : > { %p16506_p5 = scmp.ne.s32.totalorder %s1786_s16, %s16505_s27  ;;  %p16513_p10 = scmp.lt.s32.totalorder %s1786_s16, %s1786_s16 }
 0x1f1   : > { %p16514_p7 = scmp.lt.s32.totalorder %s16512_s7, %s16505_s27 }
 0x1f2   : > { %p16508_p6 = pnand %p16506_p5, %p17475_p0 }
 0x1f3   : > { %p16515_p8 = por %p16514_p7, %p16513_p10 }
 0x1f4   : > { %p16509_p9 = pneg %p16508_p6 }
 0x1f6   : > { %p16516_p11 = pnand %p16515_p8, %p16509_p9 }
 0x1f8   : > { %16519 = shalt.err (!%p16516_p11)
}
 0x1f9   : > { %s19881_s18 = sld [smem:[#allocation92_spill]]  ;;  %s17032_s23 = smov [#allocation14]  }
 0x1fa   : > { %15267 = dma.hbm_to_vmem [thread:$0]  (!%p17463_p12), %s19880_s15, 16, %s1786_s16, [#allocation10]  }
 0x1fb   : > { %s1819_s6 = sshll.u32 %s17032_s23, 4  ;;  %s17033_s1 = smov [#allocation17]   ;;  %s1820_s6 = int_to_ptr.vmem [resolvable:$true] %s1819_s6 }
 0x1fc   : > { %s1847_s3 = sshll.u32 %s17033_s1, 4  ;;  %s1848_s3 = int_to_ptr.vmem [resolvable:$true] %s1847_s3 }
 0x1ff   : > { %s16520_s4 = scalar_lea.hbm %s19881_s18, 16 }
 0x200   : > { %p16521_p13 = scmp.ne.s32.totalorder %s19881_s18, %s16520_s4  ;;  %p16527_p3 = scmp.lt.u32.totalorder %s16520_s4, %s19881_s18 }
 0x202   : > { %p16523_p1 = pnand %p16521_p13, %p17475_p0 }
 0x204   : > { %p16524_p2 = pneg %p16523_p1 }
 0x206   : > { %p16529_p4 = pnand %p16527_p3, %p16524_p2 }
 0x208   : > { %16532 = shalt.err (!%p16529_p4)
}
 0x209   : > { %s16533_s27 = scalar_lea.vmem %s1820_s6, 16  ;;  %s16540_s16 = scalar_lea.vmem %s1820_s6, 32 }
 0x20a   : > { %p16534_p5 = scmp.ne.s32.totalorder %s1820_s6, %s16533_s27  ;;  %p16541_p10 = scmp.lt.s32.totalorder %s1820_s6, %s1820_s6 }
 0x20b   : > { %p16542_p7 = scmp.lt.s32.totalorder %s16540_s16, %s16533_s27 }
 0x20c   : > { %p16536_p6 = pnand %p16534_p5, %p17475_p0 }
 0x20d   : > { %p16543_p8 = por %p16542_p7, %p16541_p10 }
 0x20e   : > { %p16537_p9 = pneg %p16536_p6 }
 0x210   : > { %p16544_p11 = pnand %p16543_p8, %p16537_p9 }
 0x212   : > { %16547 = shalt.err (!%p16544_p11)
}
 0x213   : > { %s19882_s7 = sld [smem:[#allocation95_spill]] }
 0x214   : > { %15273 = dma.hbm_to_vmem [thread:$0]  (!%p17463_p12), %s19881_s18, 16, %s1820_s6, [#allocation13]  }
 0x219   : > { %s19883_s23 = smov %s19882_s7  ;;  %s16548_s4 = scalar_lea.hbm %s19882_s7, 16 }
 0x21a   : > { %p16549_p13 = scmp.ne.s32.totalorder %s19883_s23, %s16548_s4  ;;  %p16555_p3 = scmp.lt.u32.totalorder %s16548_s4, %s19883_s23 }
 0x21c   : > { %p16551_p1 = pnand %p16549_p13, %p17475_p0 }
 0x21e   : > { %p16552_p2 = pneg %p16551_p1 }
 0x220   : > { %p16557_p4 = pnand %p16555_p3, %p16552_p2 }
 0x222   : > { %16560 = shalt.err (!%p16557_p4)
}
 0x223   : > { %s16561_s1 = scalar_lea.vmem %s1848_s3, 16  ;;  %s16568_s27 = scalar_lea.vmem %s1848_s3, 32 }
 0x224   : > { %p16562_p5 = scmp.ne.s32.totalorder %s1848_s3, %s16561_s1  ;;  %p16569_p10 = scmp.lt.s32.totalorder %s1848_s3, %s1848_s3 }
 0x225   : > { %p16570_p7 = scmp.lt.s32.totalorder %s16568_s27, %s16561_s1 }
 0x226   : > { %p16564_p6 = pnand %p16562_p5, %p17475_p0 }
 0x227   : > { %p16571_p8 = por %p16570_p7, %p16569_p10 }
 0x228   : > { %p16565_p9 = pneg %p16564_p6 }
 0x22a   : > { %p16572_p11 = pnand %p16571_p8, %p16565_p9 }
 0x22c   : > { %16575 = shalt.err (!%p16572_p11)
}
 0x22d   : > { %s19884_s6 = sld [smem:[#allocation97_spill]]  ;;  %s17034_s16 = smov [#allocation20]  }
 0x22e   : > { %15279 = dma.hbm_to_vmem [thread:$0]  (!%p17463_p12), %s19883_s23, 16, %s1848_s3, [#allocation16]  }
 0x22f   : > { %s1872_s7 = sshll.u32 %s17034_s16, 4  ;;  %s17035_s4 = smov [#allocation23]   ;;  %s1873_s7 = int_to_ptr.vmem [resolvable:$true] %s1872_s7 }
 0x230   : > { %s1900_s5 = sshll.u32 %s17035_s4, 4  ;;  %s1901_s5 = int_to_ptr.vmem [resolvable:$true] %s1900_s5 }
 0x233   : > { %s16576_s8 = scalar_lea.hbm %s19884_s6, 16 }
 0x234   : > { %p16577_p13 = scmp.ne.s32.totalorder %s19884_s6, %s16576_s8  ;;  %p16583_p3 = scmp.lt.u32.totalorder %s16576_s8, %s19884_s6 }
 0x236   : > { %p16579_p1 = pnand %p16577_p13, %p17475_p0 }
 0x238   : > { %p16580_p2 = pneg %p16579_p1 }
 0x23a   : > { %p16585_p4 = pnand %p16583_p3, %p16580_p2 }
 0x23c   : > { %16588 = shalt.err (!%p16585_p4)
}
 0x23d   : > { %s16589_s1 = scalar_lea.vmem %s1873_s7, 16  ;;  %s16596_s3 = scalar_lea.vmem %s1873_s7, 32 }
 0x23e   : > { %p16590_p5 = scmp.ne.s32.totalorder %s1873_s7, %s16589_s1  ;;  %p16597_p10 = scmp.lt.s32.totalorder %s1873_s7, %s1873_s7 }
 0x23f   : > { %p16598_p7 = scmp.lt.s32.totalorder %s16596_s3, %s16589_s1 }
 0x240   : > { %p16592_p6 = pnand %p16590_p5, %p17475_p0 }
 0x241   : > { %p16599_p8 = por %p16598_p7, %p16597_p10 }
 0x242   : > { %p16593_p9 = pneg %p16592_p6 }
 0x244   : > { %p16600_p11 = pnand %p16599_p8, %p16593_p9 }
 0x246   : > { %16603 = shalt.err (!%p16600_p11)
}
 0x247   : > { %s19885_s27 = sld [smem:[#allocation101_spill]] }
 0x248   : > { %15285 = dma.hbm_to_vmem [thread:$0]  (!%p17463_p12), %s19884_s6, 16, %s1873_s7, [#allocation19]  }
 0x24d   : > { %s16604_s8 = scalar_lea.hbm %s19885_s27, 16 }
 0x24e   : > { %p16605_p13 = scmp.ne.s32.totalorder %s19885_s27, %s16604_s8  ;;  %p16611_p3 = scmp.lt.u32.totalorder %s16604_s8, %s19885_s27 }
 0x250   : > { %p16607_p1 = pnand %p16605_p13, %p17475_p0 }
 0x252   : > { %p16608_p2 = pneg %p16607_p1 }
 0x254   : > { %p16613_p4 = pnand %p16611_p3, %p16608_p2 }
 0x256   : > { %16616 = shalt.err (!%p16613_p4)
}
 0x257   : > { %s16617_s16 = scalar_lea.vmem %s1901_s5, 16  ;;  %s16624_s4 = scalar_lea.vmem %s1901_s5, 32 }
 0x258   : > { %p16618_p5 = scmp.ne.s32.totalorder %s1901_s5, %s16617_s16  ;;  %p16625_p10 = scmp.lt.s32.totalorder %s1901_s5, %s1901_s5 }
 0x259   : > { %p16626_p7 = scmp.lt.s32.totalorder %s16624_s4, %s16617_s16 }
 0x25a   : > { %p16620_p6 = pnand %p16618_p5, %p17475_p0 }
 0x25b   : > { %p16627_p8 = por %p16626_p7, %p16625_p10 }
 0x25c   : > { %p16621_p9 = pneg %p16620_p6 }
 0x25e   : > { %p16628_p11 = pnand %p16627_p8, %p16621_p9 }
 0x260   : > { %16631 = shalt.err (!%p16628_p11)
}
 0x261   : > { %s19886_s7 = sld [smem:[#allocation104_spill]]  ;;  %s17036_s3 = smov [#allocation26]  }
 0x262   : > { %15291 = dma.hbm_to_vmem [thread:$0]  (!%p17463_p12), %s19885_s27, 16, %s1901_s5, [#allocation22]  }
 0x263   : > { %s1925_s8 = sshll.u32 %s17036_s3, 4  ;;  %s17037_s6 = smov [#allocation29]   ;;  %s1926_s8 = int_to_ptr.vmem [resolvable:$true] %s1925_s8 }
 0x264   : > { %s1950_s9 = sshll.u32 %s17037_s6, 4  ;;  %s1951_s9 = int_to_ptr.vmem [resolvable:$true] %s1950_s9 }
 0x267   : > { %s19887_s1 = smov %s19886_s7  ;;  %s16632_s13 = scalar_lea.hbm %s19886_s7, 16 }
 0x268   : > { %p16633_p13 = scmp.ne.s32.totalorder %s19887_s1, %s16632_s13  ;;  %p16639_p3 = scmp.lt.u32.totalorder %s16632_s13, %s19887_s1 }
 0x26a   : > { %p16635_p1 = pnand %p16633_p13, %p17475_p0 }
 0x26c   : > { %p16636_p2 = pneg %p16635_p1 }
 0x26e   : > { %p16641_p4 = pnand %p16639_p3, %p16636_p2 }
 0x270   : > { %16644 = shalt.err (!%p16641_p4)
}
 0x271   : > { %s16645_s16 = scalar_lea.vmem %s1926_s8, 16  ;;  %s16652_s5 = scalar_lea.vmem %s1926_s8, 32 }
 0x272   : > { %p16646_p5 = scmp.ne.s32.totalorder %s1926_s8, %s16645_s16  ;;  %p16653_p10 = scmp.lt.s32.totalorder %s1926_s8, %s1926_s8 }
 0x273   : > { %p16654_p7 = scmp.lt.s32.totalorder %s16652_s5, %s16645_s16 }
 0x274   : > { %p16648_p6 = pnand %p16646_p5, %p17475_p0 }
 0x275   : > { %p16655_p8 = por %p16654_p7, %p16653_p10 }
 0x276   : > { %p16649_p9 = pneg %p16648_p6 }
 0x278   : > { %p16656_p11 = pnand %p16655_p8, %p16649_p9 }
 0x27a   : > { %16659 = shalt.err (!%p16656_p11)
}
 0x27b   : > { %s19888_s6 = sld [smem:[#allocation107_spill]] }
 0x27c   : > { %15297 = dma.hbm_to_vmem [thread:$0]  (!%p17463_p12), %s19887_s1, 16, %s1926_s8, [#allocation25]  }
 0x281   : > { %s16660_s13 = scalar_lea.hbm %s19888_s6, 16 }
 0x282   : > { %p16661_p13 = scmp.ne.s32.totalorder %s19888_s6, %s16660_s13  ;;  %p16667_p3 = scmp.lt.u32.totalorder %s16660_s13, %s19888_s6 }
 0x284   : > { %p16663_p1 = pnand %p16661_p13, %p17475_p0 }
 0x286   : > { %p16664_p2 = pneg %p16663_p1 }
 0x288   : > { %p16669_p4 = pnand %p16667_p3, %p16664_p2 }
 0x28a   : > { %16672 = shalt.err (!%p16669_p4)
}
 0x28b   : > { %s16673_s4 = scalar_lea.vmem %s1951_s9, 16  ;;  %s16680_s7 = scalar_lea.vmem %s1951_s9, 32 }
 0x28c   : > { %p16674_p5 = scmp.ne.s32.totalorder %s1951_s9, %s16673_s4  ;;  %p16681_p10 = scmp.lt.s32.totalorder %s1951_s9, %s1951_s9 }
 0x28d   : > { %p16682_p7 = scmp.lt.s32.totalorder %s16680_s7, %s16673_s4 }
 0x28e   : > { %p16676_p6 = pnand %p16674_p5, %p17475_p0 }
 0x28f   : > { %p16683_p8 = por %p16682_p7, %p16681_p10 }
 0x290   : > { %p16677_p9 = pneg %p16676_p6 }
 0x292   : > { %p16684_p11 = pnand %p16683_p8, %p16677_p9 }
 0x294   : > { %16687 = shalt.err (!%p16684_p11)
}
 0x295   : > { %s19889_s3 = sld [smem:[#allocation110_spill]]  ;;  %s17038_s8 = smov [#allocation32]  }
 0x296   : > { %15303 = dma.hbm_to_vmem [thread:$0]  (!%p17463_p12), %s19888_s6, 16, %s1951_s9, [#allocation28]  }
 0x297   : > { %s1975_s16 = sshll.u32 %s17038_s8, 4  ;;  %s17039_s5 = smov [#allocation35]   ;;  %s1976_s16 = int_to_ptr.vmem [resolvable:$true] %s1975_s16 }
 0x298   : > { %s2003_s13 = sshll.u32 %s17039_s5, 4  ;;  %s2004_s13 = int_to_ptr.vmem [resolvable:$true] %s2003_s13 }
 0x29b   : > { %s16688_s1 = scalar_lea.hbm %s19889_s3, 16 }
 0x29c   : > { %p16689_p13 = scmp.ne.s32.totalorder %s19889_s3, %s16688_s1  ;;  %p16695_p3 = scmp.lt.u32.totalorder %s16688_s1, %s19889_s3 }
 0x29e   : > { %p16691_p1 = pnand %p16689_p13, %p17475_p0 }
 0x2a0   : > { %p16692_p2 = pneg %p16691_p1 }
 0x2a2   : > { %p16697_p4 = pnand %p16695_p3, %p16692_p2 }
 0x2a4   : > { %16700 = shalt.err (!%p16697_p4)
}
 0x2a5   : > { %s16701_s4 = scalar_lea.vmem %s1976_s16, 16  ;;  %s16708_s9 = scalar_lea.vmem %s1976_s16, 32 }
 0x2a6   : > { %p16702_p5 = scmp.ne.s32.totalorder %s1976_s16, %s16701_s4  ;;  %p16709_p10 = scmp.lt.s32.totalorder %s1976_s16, %s1976_s16 }
 0x2a7   : > { %p16710_p7 = scmp.lt.s32.totalorder %s16708_s9, %s16701_s4 }
 0x2a8   : > { %p16704_p6 = pnand %p16702_p5, %p17475_p0 }
 0x2a9   : > { %p16711_p8 = por %p16710_p7, %p16709_p10 }
 0x2aa   : > { %p16705_p9 = pneg %p16704_p6 }
 0x2ac   : > { %p16712_p11 = pnand %p16711_p8, %p16705_p9 }
 0x2ae   : > { %16715 = shalt.err (!%p16712_p11)
}
 0x2af   : > { %s19890_s7 = sld [smem:[#allocation114_spill]] }
 0x2b0   : > { %15309 = dma.hbm_to_vmem [thread:$0]  (!%p17463_p12), %s19889_s3, 16, %s1976_s16, [#allocation31]  }
 0x2b5   : > { %s19891_s8 = smov %s19890_s7  ;;  %s16716_s1 = scalar_lea.hbm %s19890_s7, 16 }
 0x2b6   : > { %p16717_p13 = scmp.ne.s32.totalorder %s19891_s8, %s16716_s1  ;;  %p16723_p3 = scmp.lt.u32.totalorder %s16716_s1, %s19891_s8 }
 0x2b8   : > { %p16719_p1 = pnand %p16717_p13, %p17475_p0 }
 0x2ba   : > { %p16720_p2 = pneg %p16719_p1 }
 0x2bc   : > { %p16725_p4 = pnand %p16723_p3, %p16720_p2 }
 0x2be   : > { %16728 = shalt.err (!%p16725_p4)
}
 0x2bf   : > { %s16729_s5 = scalar_lea.vmem %s2004_s13, 16  ;;  %s16736_s4 = scalar_lea.vmem %s2004_s13, 32 }
 0x2c0   : > { %p16730_p5 = scmp.ne.s32.totalorder %s2004_s13, %s16729_s5  ;;  %p16737_p10 = scmp.lt.s32.totalorder %s2004_s13, %s2004_s13 }
 0x2c1   : > { %p16738_p7 = scmp.lt.s32.totalorder %s16736_s4, %s16729_s5 }
 0x2c2   : > { %p16732_p6 = pnand %p16730_p5, %p17475_p0 }
 0x2c3   : > { %p16739_p8 = por %p16738_p7, %p16737_p10 }
 0x2c4   : > { %p16733_p9 = pneg %p16732_p6 }
 0x2c6   : > { %p16740_p11 = pnand %p16739_p8, %p16733_p9 }
 0x2c8   : > { %16743 = shalt.err (!%p16740_p11)
}
 0x2c9   : > { %s19892_s16 = sld [smem:[#allocation116_spill]]  ;;  %s17040_s9 = smov [#allocation38]  }
 0x2ca   : > { %15315 = dma.hbm_to_vmem [thread:$0]  (!%p17463_p12), %s19891_s8, 16, %s2004_s13, [#allocation34]  }
 0x2cb   : > { %s2028_s7 = sshll.u32 %s17040_s9, 4  ;;  %s17041_s1 = smov [#allocation41]   ;;  %s2029_s7 = int_to_ptr.vmem [resolvable:$true] %s2028_s7 }
 0x2cc   : > { %s2053_s3 = sshll.u32 %s17041_s1, 4  ;;  %s2054_s3 = int_to_ptr.vmem [resolvable:$true] %s2053_s3 }
 0x2cf   : > { %s16744_s6 = scalar_lea.hbm %s19892_s16, 16 }
 0x2d0   : > { %p16745_p13 = scmp.ne.s32.totalorder %s19892_s16, %s16744_s6  ;;  %p16751_p3 = scmp.lt.u32.totalorder %s16744_s6, %s19892_s16 }
 0x2d2   : > { %p16747_p1 = pnand %p16745_p13, %p17475_p0 }
 0x2d4   : > { %p16748_p2 = pneg %p16747_p1 }
 0x2d6   : > { %p16753_p4 = pnand %p16751_p3, %p16748_p2 }
 0x2d8   : > { %16756 = shalt.err (!%p16753_p4)
}
 0x2d9   : > { %s16757_s5 = scalar_lea.vmem %s2029_s7, 16  ;;  %s16764_s13 = scalar_lea.vmem %s2029_s7, 32 }
 0x2da   : > { %p16758_p5 = scmp.ne.s32.totalorder %s2029_s7, %s16757_s5  ;;  %p16765_p10 = scmp.lt.s32.totalorder %s2029_s7, %s2029_s7 }
 0x2db   : > { %p16766_p7 = scmp.lt.s32.totalorder %s16764_s13, %s16757_s5 }
 0x2dc   : > { %p16760_p6 = pnand %p16758_p5, %p17475_p0 }
 0x2dd   : > { %p16767_p8 = por %p16766_p7, %p16765_p10 }
 0x2de   : > { %p16761_p9 = pneg %p16760_p6 }
 0x2e0   : > { %p16768_p11 = pnand %p16767_p8, %p16761_p9 }
 0x2e2   : > { %16771 = shalt.err (!%p16768_p11)
}
 0x2e3   : > { %s19893_s4 = sld [smem:[#allocation119_spill]] }
 0x2e4   : > { %15321 = dma.hbm_to_vmem [thread:$0]  (!%p17463_p12), %s19892_s16, 16, %s2029_s7, [#allocation37]  }
 0x2e9   : > { %s16772_s6 = scalar_lea.hbm %s19893_s4, 16 }
 0x2ea   : > { %p16773_p13 = scmp.ne.s32.totalorder %s19893_s4, %s16772_s6  ;;  %p16779_p3 = scmp.lt.u32.totalorder %s16772_s6, %s19893_s4 }
 0x2ec   : > { %p16775_p1 = pnand %p16773_p13, %p17475_p0 }
 0x2ee   : > { %p16776_p2 = pneg %p16775_p1 }
 0x2f0   : > { %p16781_p4 = pnand %p16779_p3, %p16776_p2 }
 0x2f2   : > { %16784 = shalt.err (!%p16781_p4)
}
 0x2f3   : > { %s16785_s9 = scalar_lea.vmem %s2054_s3, 16  ;;  %s16792_s1 = scalar_lea.vmem %s2054_s3, 32 }
 0x2f4   : > { %p16786_p5 = scmp.ne.s32.totalorder %s2054_s3, %s16785_s9  ;;  %p16793_p10 = scmp.lt.s32.totalorder %s2054_s3, %s2054_s3 }
 0x2f5   : > { %p16794_p7 = scmp.lt.s32.totalorder %s16792_s1, %s16785_s9 }
 0x2f6   : > { %p16788_p6 = pnand %p16786_p5, %p17475_p0 }
 0x2f7   : > { %p16795_p8 = por %p16794_p7, %p16793_p10 }
 0x2f8   : > { %p16789_p9 = pneg %p16788_p6 }
 0x2fa   : > { %p16796_p11 = pnand %p16795_p8, %p16789_p9 }
 0x2fc   : > { %16799 = shalt.err (!%p16796_p11)
}
 0x2fd   : > { %s19894_s7 = sld [smem:[#allocation120_spill]]  ;;  %s17042_s13 = smov [#allocation42]  }
 0x2fe   : > { %15327 = dma.hbm_to_vmem [thread:$0]  (!%p17463_p12), %s19893_s4, 16, %s2054_s3, [#allocation40]  }
 0x2ff   : > { %s2064_s6 = sshll.u32 %s17042_s13, 4  ;;  %s2065_s6 = int_to_ptr.vmem [resolvable:$true] %s2064_s6 }
 0x303   : > { %s19895_s5 = smov %s19894_s7  ;;  %s16800_s8 = scalar_lea.hbm %s19894_s7, 16 }
 0x304   : > { %p16801_p13 = scmp.ne.s32.totalorder %s19895_s5, %s16800_s8  ;;  %p16807_p3 = scmp.lt.u32.totalorder %s16800_s8, %s19895_s5 }
 0x306   : > { %p16803_p1 = pnand %p16801_p13, %p17475_p0 }
 0x308   : > { %p16804_p2 = pneg %p16803_p1 }
 0x30a   : > { %p16809_p4 = pnand %p16807_p3, %p16804_p2 }
 0x30c   : > { %16812 = shalt.err (!%p16809_p4)
}
 0x30d   : > { %s16813_s9 = scalar_lea.vmem %s2065_s6, 16  ;;  %s16820_s1 = scalar_lea.vmem %s2065_s6, 32 }
 0x30e   : > { %p16814_p5 = scmp.ne.s32.totalorder %s2065_s6, %s16813_s9  ;;  %p16821_p10 = scmp.lt.s32.totalorder %s2065_s6, %s2065_s6 }
 0x30f   : > { %p16822_p7 = scmp.lt.s32.totalorder %s16820_s1, %s16813_s9 }
 0x310   : > { %p16816_p6 = pnand %p16814_p5, %p17475_p0 }
 0x311   : > { %p16823_p8 = por %p16822_p7, %p16821_p10 }
 0x312   : > { %p16817_p9 = pneg %p16816_p6 }
 0x314   : > { %p16824_p11 = pnand %p16823_p8, %p16817_p9 }
 0x316   : > { %16827 = shalt.err (!%p16824_p11)
}
 0x317   : > { %15330 = dma.hbm_to_vmem [thread:$0]  (!%p17463_p12), %s19895_s5, 16, %s2065_s6, [#allocation43]  }
 0x318   : > { %p19896_p13 = scmp.ne.s32.totalorder %s19877_s28, 0 }
 0x319   : > { %p19897_p1 = scmp.eq.s32.totalorder (!%p19896_p13), %s17427_s11, 0 }
 0x31a   : > { %2091 = sbr.rel (%p19896_p13) target bundleno = 13303 (0x33f7), region = 292 }
 0x321   : > { %16873 = dma.done.wait (%p19897_p1), [#allocation4], 16   ;;  %p19898_p2 = pmov %p19897_p1 }
 0x322   : > { %p19899_p0 = pmov %p19897_p1 }
 0x323   : > { %16875 = vsyncadd (%p19898_p2), [#allocation4], 4294967280 }
 0x324   : > { %16877 = dma.done.wait (%p19899_p0), [#allocation7], 32   ;;  %p19900_p3 = pmov %p19899_p0 }
 0x325   : > { %p19901_p4 = pmov %p19899_p0 }
 0x326   : > { %16879 = vsyncadd (%p19900_p3), [#allocation7], 4294967264 }
 0x327   : > { %16881 = dma.done.wait (%p19901_p4), [#allocation10], 32   ;;  %p19902_p12 = pmov %p19899_p0 }
 0x328   : > { %p19903_p5 = pmov %p19899_p0 }
 0x329   : > { %16883 = vsyncadd (%p19902_p12), [#allocation10], 4294967264 }
 0x32a   : > { %16885 = dma.done.wait (%p19903_p5), [#allocation13], 32   ;;  %p19904_p6 = pmov %p19899_p0 }
 0x32b   : > { %p19905_p9 = pmov %p19899_p0 }
 0x32c   : > { %16887 = vsyncadd (%p19904_p6), [#allocation13], 4294967264 }
 0x32d   : > { %16889 = dma.done.wait (%p19905_p9), [#allocation16], 32   ;;  %p19906_p10 = pmov %p19899_p0 }
 0x32e   : > { %p19907_p7 = pmov %p19899_p0 }
 0x32f   : > { %16891 = vsyncadd (%p19906_p10), [#allocation16], 4294967264 }
 0x330   : > { %16893 = dma.done.wait (%p19907_p7), [#allocation19], 32   ;;  %p19908_p8 = pmov %p19899_p0 }
 0x331   : > { %p19909_p11 = pmov %p19899_p0 }
 0x332   : > { %16895 = vsyncadd (%p19908_p8), [#allocation19], 4294967264 }
 0x333   : > { %16897 = dma.done.wait (%p19909_p11), [#allocation22], 32   ;;  %p19910_p13 = pmov %p19899_p0 }
 0x334   : > { %p19911_p1 = pmov %p19899_p0 }
 0x335   : > { %16899 = vsyncadd (%p19910_p13), [#allocation22], 4294967264 }
 0x336   : > { %16901 = dma.done.wait (%p19911_p1), [#allocation25], 32   ;;  %p19912_p2 = pmov %p19899_p0 }
 0x338   : > { %16903 = vsyncadd (%p19912_p2), [#allocation25], 4294967264 }
 0x339   : > { %16905 = dma.done.wait (%p19899_p0), [#allocation28], 32   ;;  %p19913_p3 = pmov %p19899_p0 }
 0x33a   : > { %p19914_p4 = pmov %p19899_p0 }
 0x33b   : > { %16907 = vsyncadd (%p19913_p3), [#allocation28], 4294967264 }
 0x33c   : > { %16909 = dma.done.wait (%p19914_p4), [#allocation31], 32   ;;  %p19915_p12 = pmov %p19899_p0 }
 0x33d   : > { %p19916_p5 = pmov %p19899_p0 }
 0x33e   : > { %16911 = vsyncadd (%p19915_p12), [#allocation31], 4294967264 }
 0x33f   : > { %16913 = dma.done.wait (%p19916_p5), [#allocation34], 32   ;;  %p19917_p6 = pmov %p19899_p0 }
 0x340   : > { %p19918_p9 = pmov %p19899_p0 }
 0x341   : > { %16915 = vsyncadd (%p19917_p6), [#allocation34], 4294967264 }
 0x342   : > { %16917 = dma.done.wait (%p19918_p9), [#allocation37], 32   ;;  %p19919_p10 = pmov %p19899_p0 }
 0x343   : > { %p19920_p7 = pmov %p19899_p0 }
 0x344   : > { %16919 = vsyncadd (%p19919_p10), [#allocation37], 4294967264 }
 0x345   : > { %16921 = dma.done.wait (%p19920_p7), [#allocation40], 32   ;;  %p19921_p8 = pmov %p19899_p0 }
 0x346   : > { %p19922_p11 = pmov %p19899_p0 }
 0x347   : > { %16923 = vsyncadd (%p19921_p8), [#allocation40], 4294967264 }
 0x348   : > { %16925 = dma.done.wait (%p19922_p11), [#allocation43], 16   ;;  %p19923_p13 = pmov %p19899_p0 }
 0x349   : > { %s19924_s22 = sld [smem:[#allocation60_spill]]  ;;  %s19925_s28 = sld [smem:[#allocation61_spill]]  ;;  %vm2380_vm0 = vcmask 392192   ;;  %vm2510_vm1 = vcmask 130048   ;;  %vm2989_vm2 = vcmask 64512   ;;  %vm5211_vm4 = vcmask 523264  }
 0x34a   : > { %16927 = vsyncadd (%p19923_p13), [#allocation43], 4294967280  ;;  %p2349_p1 = scmp.lt.s32.totalorder %s17427_s11, 1  ;;  %s19926_s7 = sld [smem:[#allocation62_spill]]  ;;  %vm9210_vm5 = vcmask 261120   ;;  %vm17050_vm6 = vmmov 0  }
 0x34b   : > { %s19927_s13 = sld [smem:[#allocation63_spill]]  ;;  %s19928_s6 = sld [smem:[#allocation64_spill]]  ;;  %vm18068_vm3 = vmpackc.low %vm2989_vm2, %vm2989_vm2  ;;  %vm12438_vm7 = vcmask 253952  }
 0x34c   : > { %s17809_s2 = scalar_select %p2349_p1, %s17427_s11, 1 }
 0x34d   : > { %s19929_s9 = sld [smem:[#allocation67_spill]]  ;;  %s19930_s1 = sld [smem:[#allocation65_spill]] }
 0x34e   : > { %s13243_s3 = sshll.u32 %s17809_s2, 6  ;;  %s19952_s4 = sld [smem:[#allocation82_spill]] }
 0x34f   : > { %s17813_s8 = scalar_lea.vmem %s19924_s22, %s13243_s3  ;;  %v2365_v1 = vld [vmem:[%s19925_s28] sm:$0xff]  ;;  %v2366_v2 = vld [vmem:[%s19925_s28 + $0x8] sm:$0xff]  ;;  %v2367_v3 = vld [vmem:[%s19925_s28 + $0x10] sm:$0xff]  ;;  %s19931_s22 = sld [smem:[#allocation66_spill]] }
 0x350   : > { %v14596_v4 = vpack.c.bf16 %v2366_v2, %v2365_v1  ;;  %v2368_v5 = vld [vmem:[%s19925_s28 + $0x18] sm:$0xff]  ;;  %v2369_v7 = vld [vmem:[%s19925_s28 + $0x20] sm:$0xff]  ;;  %v2370_v8 = vld [vmem:[%s19925_s28 + $0x28] sm:$0xff]  ;;  %s19932_s3 = sld [smem:[#allocation68_spill]]  ;;  %s19953_s5 = sld [smem:[#allocation89_spill]] }
 0x351   : > { %v14600_v6 = vpack.c.bf16 %v2368_v5, %v2367_v3  ;;  %v2357_v9 = vld [vmem:[%s17813_s8] sm:$0xff]  ;;  %v14604_v10 = vpack.c.bf16 %v2370_v8, %v2369_v7  ;;  %v2358_v11 = vld [vmem:[%s17813_s8 + $0x8] sm:$0xff]  ;;  %v2359_v12 = vld [vmem:[%s17813_s8 + $0x10] sm:$0xff]  ;;  %p19973_p0 = scmp.ne.s32.totalorder %s19874_s26, 0 }
 0x352   : > { %14597 = vmatprep.subr.bf16.mxu0 %v14596_v4  ;;  %13747 = vmatprep.mubr.msk.f32.mxu0 %vm2380_vm0, %v2357_v9  ;;  %v2360_v13 = vld [vmem:[%s17813_s8 + $0x18] sm:$0xff]  ;;  %v2361_v14 = vld [vmem:[%s17813_s8 + $0x20] sm:$0xff]  ;;  %v2362_v15 = vld [vmem:[%s17813_s8 + $0x28] sm:$0xff] }
 0x353   : > { %14599 = vmatpush3.bf16.msra.mxu0 %v14596_v4  ;;  %v2363_v16 = vld [vmem:[%s17813_s8 + $0x30] sm:$0xff]  ;;  %v2364_v17 = vld [vmem:[%s17813_s8 + $0x38] sm:$0xff]  ;;  %v12912_v18 = vld [vmem:[%s19926_s7] ss:$0 sm:$0xff]  ;;  %s19768_s8 = smov 120   ;;  %s19766_s7 = smov 112  }
 0x354   : > { %14601 = vmatprep.subr.bf16.mxu0 %v14600_v6 }
 0x357   : > { %14603 = vmatpush3.bf16.msra.mxu0 %v14600_v6 }
 0x358   : > { %14605 = vmatprep.subr.bf16.mxu0 %v14604_v10 }
 0x35b   : > { %14607 = vmatpush3.bf16.msra.mxu0 %v14604_v10 }
 0x35e   : > { %13748 = vmatmul.mubr.msk.f32.vlgmr.msra.gmra.mrb[0].mxu0 %vm2380_vm0, %v2358_v11 }
 0x35f   : > { %13750 = vmatprep.mubr.msk.f32.mxu0 %vm2380_vm0, %v2359_v12 }
 0x362   : > { %13751 = vmatmul.mubr.msk.f32.gmra.mrb[2].mxu0 %vm2380_vm0, %v2360_v13 }
 0x363   : > { %13753 = vmatprep.mubr.msk.f32.mxu0 %vm2380_vm0, %v2361_v14 }
 0x366   : > { %13754 = vmatmul.mubr.msk.f32.gmra.mrb[4].mxu0 %vm2380_vm0, %v2362_v15 }
 0x367   : > { %13756 = vmatprep.mubr.msk.f32.mxu0 %vm2380_vm0, %v2363_v16 }
 0x36a   : > { %13757 = vmatmul.mubr.msk.f32.gmra.mrb[6].mxu0 %vm2380_vm0, %v2364_v17 }
 0x431   : > { %v13749_v19 = vpop.f32.mrb[0].mxu0 }
 0x432   : > { %v2471_v20 = vpop.f32.mrb[1].mxu0  ;;  %v2477_v22 = vadd.f32 %v13749_v19, %v12912_v18 }
 0x433   : > { %v2472_v21 = vadd.f32 %v12912_v18, %v2471_v20 }
 0x434   : > { %v2514_v30 = vsel %vm2510_vm1, %v2477_v22, 0.0 }
 0x435   : > { %v13752_v23 = vpop.f32.mrb[2].mxu0  ;;  %v2511_v24 = vsel %vm2510_vm1, %v2472_v21, 0.0 }
 0x436   : > { %v2481_v25 = vpop.f32.mrb[3].mxu0  ;;  %2512 = vadd.xlane.f32.xlu0 %v2511_v24  ;;  %v2487_v27 = vadd.f32 %v13752_v23, %v12912_v18 }
 0x437   : > { %v2482_v26 = vadd.f32 %v12912_v18, %v2481_v25 }
 0x438   : > { %v2520_v35 = vsel %vm2510_vm1, %v2487_v27, 0.0 }
 0x439   : > { %v13755_v28 = vpop.f32.mrb[4].mxu0  ;;  %v2517_v29 = vsel %vm2510_vm1, %v2482_v26, 0.0 }
 0x43a   : > { %v2491_v31 = vpop.f32.mrb[5].mxu0  ;;  %2518 = vadd.xlane.f32.xlu1 %v2517_v29  ;;  %2515 = vadd.xlane.f32.xlu0 %v2514_v30  ;;  %v2497_v32 = vadd.f32 %v13755_v28, %v12912_v18 }
 0x43b   : > { %v2492_v33 = vadd.f32 %v12912_v18, %v2491_v31 }
 0x43c   : > { %v2526_v40 = vsel %vm2510_vm1, %v2497_v32, 0.0 }
 0x43d   : > { %v13758_v34 = vpop.f32.mrb[6].mxu0  ;;  %v2523_v36 = vsel %vm2510_vm1, %v2492_v33, 0.0 }
 0x43e   : > { %v2501_v37 = vpop.f32.mrb[7].mxu0  ;;  %2521 = vadd.xlane.f32.xlu1 %v2520_v35  ;;  %2524 = vadd.xlane.f32.xlu0 %v2523_v36  ;;  %v2507_v38 = vadd.f32 %v13758_v34, %v12912_v18 }
 0x43f   : > { %v2502_v39 = vadd.f32 %v12912_v18, %v2501_v37 }
 0x440   : > { %v2532_v42 = vsel %vm2510_vm1, %v2507_v38, 0.0 }
 0x441   : > { %v2529_v41 = vsel %vm2510_vm1, %v2502_v39, 0.0 }
 0x442   : > { %2527 = vadd.xlane.f32.xlu1 %v2526_v40  ;;  %2530 = vadd.xlane.f32.xlu0 %v2529_v41  ;;  %v12921_v41 = vld [vmem:[%s19927_s13] ss:$0 sm:$0xff]  ;;  %s19764_s13 = smov 96  }
 0x446   : > { %2533 = vadd.xlane.f32.xlu1 %v2532_v42 }
 0x4c3   : > { %v2513_v43 = vpop.xlane.xlu0 %2512 }
 0x4c4   : > { %v2536_v44 = vmul.f32 0.0625, %v2513_v43 }
 0x4c6   : > { %v17846_v45 = vsub.f32 %v2472_v21, %v2536_v44 }
 0x4c7   : > { %v2519_v46 = vpop.xlane.xlu1 %2518  ;;  %v2516_v47 = vpop.xlane.xlu0 %2515 }
 0x4c8   : > { %v2538_v48 = vmul.f32 0.0625, %v2519_v46  ;;  %v2537_v49 = vmul.f32 0.0625, %v2516_v47  ;;  %v2552_v50 = vmul.f32 %v17846_v45, %v17846_v45  ;;  %v12922_v46 = vld [vmem:[%s19928_s6] ss:$0 sm:$0xff]  ;;  %s19935_s6 = sld [smem:[#allocation69_spill]] }
 0x4ca   : > { %v17850_v51 = vsub.f32 %v2482_v26, %v2538_v48  ;;  %v17852_v52 = vsub.f32 %v2477_v22, %v2537_v49  ;;  %v2560_v53 = vsel %vm2510_vm1, %v2552_v50, 0.0 }
 0x4cb   : > { %v2522_v54 = vpop.xlane.xlu1 %2521  ;;  %2561 = vadd.xlane.f32.xlu0 %v2560_v53  ;;  %v2525_v55 = vpop.xlane.xlu0 %2524 }
 0x4cc   : > { %v2539_v56 = vmul.f32 0.0625, %v2522_v54  ;;  %v2540_v57 = vmul.f32 0.0625, %v2525_v55  ;;  %v2554_v58 = vmul.f32 %v17850_v51, %v17850_v51  ;;  %v2553_v59 = vmul.f32 %v17852_v52, %v17852_v52 }
 0x4ce   : > { %v17859_v60 = vsub.f32 %v2487_v27, %v2539_v56  ;;  %v17861_v61 = vsub.f32 %v2492_v33, %v2540_v57  ;;  %v2566_v62 = vsel %vm2510_vm1, %v2554_v58, 0.0  ;;  %v2563_v63 = vsel %vm2510_vm1, %v2553_v59, 0.0 }
 0x4cf   : > { %v2528_v0 = vpop.xlane.xlu1 %2527  ;;  %2567 = vadd.xlane.f32.xlu0 %v2566_v62  ;;  %2564 = vadd.xlane.f32.xlu1 %v2563_v63  ;;  %v2531_v1 = vpop.xlane.xlu0 %2530 }
 0x4d0   : > { %v2541_v2 = vmul.f32 0.0625, %v2528_v0  ;;  %v2542_v3 = vmul.f32 0.0625, %v2531_v1  ;;  %v2555_v4 = vmul.f32 %v17859_v60, %v17859_v60  ;;  %v2556_v5 = vmul.f32 %v17861_v61, %v17861_v61 }
 0x4d2   : > { %v17869_v6 = vsub.f32 %v2497_v32, %v2541_v2  ;;  %v17871_v7 = vsub.f32 %v2502_v39, %v2542_v3  ;;  %v2569_v8 = vsel %vm2510_vm1, %v2555_v4, 0.0  ;;  %v2572_v9 = vsel %vm2510_vm1, %v2556_v5, 0.0 }
 0x4d3   : > { %v2534_v10 = vpop.xlane.xlu1 %2533  ;;  %2570 = vadd.xlane.f32.xlu1 %v2569_v8  ;;  %2573 = vadd.xlane.f32.xlu0 %v2572_v9 }
 0x4d4   : > { %v2543_v11 = vmul.f32 0.0625, %v2534_v10  ;;  %v2557_v12 = vmul.f32 %v17869_v6, %v17869_v6  ;;  %v2558_v13 = vmul.f32 %v17871_v7, %v17871_v7 }
 0x4d6   : > { %v17879_v14 = vsub.f32 %v2507_v38, %v2543_v11  ;;  %v2575_v15 = vsel %vm2510_vm1, %v2557_v12, 0.0  ;;  %v2578_v16 = vsel %vm2510_vm1, %v2558_v13, 0.0 }
 0x4d7   : > { %2576 = vadd.xlane.f32.xlu1 %v2575_v15  ;;  %2579 = vadd.xlane.f32.xlu0 %v2578_v16 }
 0x4d8   : > { %v2559_v17 = vmul.f32 %v17879_v14, %v17879_v14 }
 0x4da   : > { %v2581_v18 = vsel %vm2510_vm1, %v2559_v17, 0.0 }
 0x4db   : > { %2582 = vadd.xlane.f32.xlu1 %v2581_v18 }
 0x558   : > { %v2562_v19 = vpop.xlane.xlu0 %2561 }
 0x559   : > { %v2584_v20 = vmul.f32 0.0625, %v2562_v19 }
 0x55b   : > { %v2592_v21 = vadd.f32 1e-05, %v2584_v20 }
 0x55c   : > { %v2565_v22 = vpop.xlane.xlu1 %2564  ;;  %v2568_v23 = vpop.xlane.xlu0 %2567 }
 0x55d   : > { %15764 = vrsqrt.f32 %v2592_v21  ;;  %v2585_v24 = vmul.f32 0.0625, %v2565_v22  ;;  %v2586_v25 = vmul.f32 0.0625, %v2568_v23 }
 0x55f   : > { %v2593_v26 = vadd.f32 1e-05, %v2585_v24  ;;  %v2594_v27 = vadd.f32 1e-05, %v2586_v25 }
 0x560   : > { %v2571_v28 = vpop.xlane.xlu1 %2570  ;;  %v2574_v29 = vpop.xlane.xlu0 %2573 }
 0x561   : > { %15766 = vrsqrt.f32 %v2593_v26  ;;  %v2587_v30 = vmul.f32 0.0625, %v2571_v28  ;;  %v2588_v31 = vmul.f32 0.0625, %v2574_v29 }
 0x562   : > { %15768 = vrsqrt.f32 %v2594_v27 }
 0x563   : > { %v2595_v32 = vadd.f32 1e-05, %v2587_v30  ;;  %v2596_v33 = vadd.f32 1e-05, %v2588_v31 }
 0x564   : > { %v2577_v34 = vpop.xlane.xlu1 %2576  ;;  %v2580_v35 = vpop.xlane.xlu0 %2579 }
 0x565   : > { %15770 = vrsqrt.f32 %v2595_v32  ;;  %v2589_v36 = vmul.f32 0.0625, %v2577_v34  ;;  %v2590_v37 = vmul.f32 0.0625, %v2580_v35 }
 0x566   : > { %15772 = vrsqrt.f32 %v2596_v33 }
 0x567   : > { %v15765_v38 = vpop.eup %15764  ;;  %v2597_v39 = vadd.f32 1e-05, %v2589_v36  ;;  %v2598_v40 = vadd.f32 1e-05, %v2590_v37 }
 0x568   : > { %v2583_v42 = vpop.xlane.xlu1 %2582  ;;  %v2608_v43 = vmul.f32 %v15765_v38, %v17846_v45 }
 0x569   : > { %15774 = vrsqrt.f32 %v2597_v39  ;;  %v2591_v44 = vmul.f32 0.0625, %v2583_v42 }
 0x56a   : > { %15776 = vrsqrt.f32 %v2598_v40  ;;  %v2622_v47 = vmul.f32 %v12921_v41, %v2608_v43 }
 0x56b   : > { %v15767_v48 = vpop.eup %15766  ;;  %v2599_v49 = vadd.f32 1e-05, %v2591_v44 }
 0x56c   : > { %v15769_v50 = vpop.eup %15768  ;;  %v17889_v53 = vadd.f32 %v12922_v46, %v2622_v47  ;;  %v2609_v54 = vmul.f32 %v15767_v48, %v17852_v52 }
 0x56d   : > { %15778 = vrsqrt.f32 %v2599_v49  ;;  %v2610_v55 = vmul.f32 %v15769_v50, %v17850_v51 }
 0x56e   : > { %v2670_v56 = vsel %vm2510_vm1, %v17889_v53, 0.0  ;;  %v2623_v57 = vmul.f32 %v12921_v41, %v2609_v54 }
 0x56f   : > { %v15771_v45 = vpop.eup %15770  ;;  %2671 = vadd.xlane.f32.xlu0 %v2670_v56  ;;  %v2624_v58 = vmul.f32 %v12921_v41, %v2610_v55 }
 0x570   : > { %v15773_v59 = vpop.eup %15772  ;;  %v17895_v62 = vadd.f32 %v12922_v46, %v2623_v57  ;;  %v2611_v63 = vmul.f32 %v15771_v45, %v17859_v60 }
 0x571   : > { %v17898_v0 = vadd.f32 %v12922_v46, %v2624_v58  ;;  %v2612_v1 = vmul.f32 %v15773_v59, %v17861_v61 }
 0x572   : > { %v2673_v52 = vsel %vm2510_vm1, %v17895_v62, 0.0  ;;  %v2625_v51 = vmul.f32 %v12921_v41, %v2611_v63 }
 0x573   : > { %v15775_v2 = vpop.eup %15774  ;;  %2674 = vadd.xlane.f32.xlu1 %v2673_v52  ;;  %v2676_v3 = vsel %vm2510_vm1, %v17898_v0, 0.0  ;;  %v2626_v4 = vmul.f32 %v12921_v41, %v2612_v1 }
 0x574   : > { %v15777_v5 = vpop.eup %15776  ;;  %2677 = vadd.xlane.f32.xlu0 %v2676_v3  ;;  %v17905_v8 = vadd.f32 %v12922_v46, %v2625_v51  ;;  %v2613_v60 = vmul.f32 %v15775_v2, %v17869_v6  ;;  %v2646_v2 = vld [vmem:[%s19929_s9] sm:$0xff]  ;;  %v2647_v3 = vld [vmem:[%s19929_s9 + $0x8] sm:$0xff]  ;;  %s17052_s9 = smov [#allocation44]  }
 0x575   : > { %v17908_v9 = vadd.f32 %v12922_v46, %v2626_v4  ;;  %v2614_v61 = vmul.f32 %v15777_v5, %v17871_v7  ;;  %v14608_v4 = vpack.c.bf16 %v2647_v3, %v2646_v2 }
 0x576   : > { %v2679_v10 = vsel %vm2510_vm1, %v17905_v8, 0.0  ;;  %v2627_v11 = vmul.f32 %v12921_v41, %v2613_v60 }
 0x577   : > { %v15779_v12 = vpop.eup %15778  ;;  %2680 = vadd.xlane.f32.xlu1 %v2679_v10  ;;  %v2682_v13 = vsel %vm2510_vm1, %v17908_v9, 0.0  ;;  %v2628_v15 = vmul.f32 %v12921_v41, %v2614_v61  ;;  %14609 = vmatprep.subr.bf16.mxu0 %v14608_v4 }
 0x578   : > { %2683 = vadd.xlane.f32.xlu0 %v2682_v13  ;;  %v17915_v16 = vadd.f32 %v12922_v46, %v2627_v11  ;;  %v2615_v17 = vmul.f32 %v15779_v12, %v17879_v14  ;;  %15110 = vmatprep.subr.bf16.mxu1 %v14608_v4 }
 0x579   : > { %v17918_v6 = vadd.f32 %v12922_v46, %v2628_v15  ;;  %14611 = vmatpush3.bf16.msra.mxu0 %v14608_v4  ;;  %15111 = vmatpush3.bf16.msra.mxu1 %v14608_v4 }
 0x57a   : > { %v2685_v7 = vsel %vm2510_vm1, %v17915_v16, 0.0  ;;  %v2629_v18 = vmul.f32 %v12921_v41, %v2615_v17 }
 0x57b   : > { %2686 = vadd.xlane.f32.xlu1 %v2685_v7  ;;  %v2688_v19 = vsel %vm2510_vm1, %v17918_v6, 0.0 }
 0x57c   : > { %2689 = vadd.xlane.f32.xlu0 %v2688_v19  ;;  %v17924_v20 = vadd.f32 %v12922_v46, %v2629_v18 }
 0x57e   : > { %v2691_v21 = vsel %vm2510_vm1, %v17924_v20, 0.0 }
 0x57f   : > { %2692 = vadd.xlane.f32.xlu1 %v2691_v21 }
 0x5fc   : > { %v2672_v22 = vpop.xlane.xlu0 %2671 }
 0x5fd   : > { %v2694_v23 = vmul.f32 0.0625, %v2672_v22 }
 0x5ff   : > { %v17929_v14 = vsub.f32 %v17889_v53, %v2694_v23 }
 0x600   : > { %v2675_v24 = vpop.xlane.xlu1 %2674 }
 0x601   : > { %v2695_v25 = vmul.f32 0.0625, %v2675_v24  ;;  %v2678_v26 = vpop.xlane.xlu0 %2677  ;;  %v2710_v27 = vmul.f32 %v17929_v14, %v17929_v14 }
 0x602   : > { %v2696_v28 = vmul.f32 0.0625, %v2678_v26 }
 0x603   : > { %v17934_v29 = vsub.f32 %v17895_v62, %v2695_v25  ;;  %v2718_v30 = vsel %vm2510_vm1, %v2710_v27, 0.0 }
 0x604   : > { %v17938_v31 = vsub.f32 %v17898_v0, %v2696_v28  ;;  %v2681_v32 = vpop.xlane.xlu1 %2680  ;;  %2719 = vadd.xlane.f32.xlu0 %v2718_v30  ;;  %v12923_v30 = vld [vmem:[%s19930_s1] ss:$0 sm:$0xff]  ;;  %s19936_s1 = sld [smem:[#allocation70_spill]] }
 0x605   : > { %v2697_v33 = vmul.f32 0.0625, %v2681_v32  ;;  %v2684_v34 = vpop.xlane.xlu0 %2683  ;;  %v2711_v35 = vmul.f32 %v17934_v29, %v17934_v29 }
 0x606   : > { %v2698_v36 = vmul.f32 0.0625, %v2684_v34  ;;  %v2712_v37 = vmul.f32 %v17938_v31, %v17938_v31 }
 0x607   : > { %v17945_v38 = vsub.f32 %v17905_v8, %v2697_v33  ;;  %v2721_v39 = vsel %vm2510_vm1, %v2711_v35, 0.0 }
 0x608   : > { %v17949_v40 = vsub.f32 %v17908_v9, %v2698_v36  ;;  %2722 = vadd.xlane.f32.xlu1 %v2721_v39  ;;  %v2687_v41 = vpop.xlane.xlu1 %2686  ;;  %v2724_v42 = vsel %vm2510_vm1, %v2712_v37, 0.0  ;;  %v12924_v37 = vld [vmem:[%s19931_s22] ss:$0 sm:$0xff]  ;;  %s19937_s22 = sld [smem:[#allocation71_spill]] }
 0x609   : > { %v2699_v43 = vmul.f32 0.0625, %v2687_v41  ;;  %2725 = vadd.xlane.f32.xlu0 %v2724_v42  ;;  %v2690_v44 = vpop.xlane.xlu0 %2689  ;;  %v2713_v46 = vmul.f32 %v17945_v38, %v17945_v38 }
 0x60a   : > { %v2700_v47 = vmul.f32 0.0625, %v2690_v44  ;;  %v2714_v48 = vmul.f32 %v17949_v40, %v17949_v40 }
 0x60b   : > { %v17957_v49 = vsub.f32 %v17915_v16, %v2699_v43  ;;  %v2727_v50 = vsel %vm2510_vm1, %v2713_v46, 0.0 }
 0x60c   : > { %v17961_v54 = vsub.f32 %v17918_v6, %v2700_v47  ;;  %2728 = vadd.xlane.f32.xlu1 %v2727_v50  ;;  %v2693_v55 = vpop.xlane.xlu1 %2692  ;;  %v2730_v56 = vsel %vm2510_vm1, %v2714_v48, 0.0 }
 0x60d   : > { %v2701_v57 = vmul.f32 0.0625, %v2693_v55  ;;  %2731 = vadd.xlane.f32.xlu0 %v2730_v56  ;;  %v2715_v45 = vmul.f32 %v17957_v49, %v17957_v49 }
 0x60e   : > { %v2716_v58 = vmul.f32 %v17961_v54, %v17961_v54 }
 0x60f   : > { %v17969_v59 = vsub.f32 %v17924_v20, %v2701_v57  ;;  %v2733_v63 = vsel %vm2510_vm1, %v2715_v45, 0.0 }
 0x610   : > { %2734 = vadd.xlane.f32.xlu1 %v2733_v63  ;;  %v2736_v1 = vsel %vm2510_vm1, %v2716_v58, 0.0 }
 0x611   : > { %2737 = vadd.xlane.f32.xlu0 %v2736_v1  ;;  %v2717_v52 = vmul.f32 %v17969_v59, %v17969_v59 }
 0x613   : > { %v2739_v51 = vsel %vm2510_vm1, %v2717_v52, 0.0 }
 0x614   : > { %2740 = vadd.xlane.f32.xlu1 %v2739_v51 }
 0x691   : > { %v2720_v5 = vpop.xlane.xlu0 %2719 }
 0x692   : > { %v2742_v60 = vmul.f32 0.0625, %v2720_v5 }
 0x694   : > { %v2750_v61 = vadd.f32 1e-05, %v2742_v60 }
 0x695   : > { %v2723_v10 = vpop.xlane.xlu1 %2722 }
 0x696   : > { %15780 = vrsqrt.f32 %v2750_v61  ;;  %v2743_v11 = vmul.f32 0.0625, %v2723_v10  ;;  %v2726_v12 = vpop.xlane.xlu0 %2725 }
 0x697   : > { %v2744_v13 = vmul.f32 0.0625, %v2726_v12 }
 0x698   : > { %v2751_v15 = vadd.f32 1e-05, %v2743_v11 }
 0x699   : > { %v2752_v17 = vadd.f32 1e-05, %v2744_v13  ;;  %v2729_v7 = vpop.xlane.xlu1 %2728 }
 0x69a   : > { %15782 = vrsqrt.f32 %v2751_v15  ;;  %v2745_v18 = vmul.f32 0.0625, %v2729_v7  ;;  %v2732_v19 = vpop.xlane.xlu0 %2731 }
 0x69b   : > { %15784 = vrsqrt.f32 %v2752_v17  ;;  %v2746_v21 = vmul.f32 0.0625, %v2732_v19 }
 0x69c   : > { %v2753_v22 = vadd.f32 1e-05, %v2745_v18 }
 0x69d   : > { %v2754_v23 = vadd.f32 1e-05, %v2746_v21  ;;  %v2735_v24 = vpop.xlane.xlu1 %2734 }
 0x69e   : > { %15786 = vrsqrt.f32 %v2753_v22  ;;  %v2747_v25 = vmul.f32 0.0625, %v2735_v24  ;;  %v2738_v26 = vpop.xlane.xlu0 %2737 }
 0x69f   : > { %15788 = vrsqrt.f32 %v2754_v23  ;;  %v2748_v27 = vmul.f32 0.0625, %v2738_v26 }
 0x6a0   : > { %v15781_v28 = vpop.eup %15780  ;;  %v2755_v32 = vadd.f32 1e-05, %v2747_v25 }
 0x6a1   : > { %v2756_v33 = vadd.f32 1e-05, %v2748_v27  ;;  %v2741_v34 = vpop.xlane.xlu1 %2740  ;;  %v2766_v35 = vmul.f32 %v15781_v28, %v17929_v14 }
 0x6a2   : > { %15790 = vrsqrt.f32 %v2755_v32  ;;  %v2749_v36 = vmul.f32 0.0625, %v2741_v34 }
 0x6a3   : > { %15792 = vrsqrt.f32 %v2756_v33  ;;  %v2780_v39 = vmul.f32 %v12923_v30, %v2766_v35 }
 0x6a4   : > { %v15783_v41 = vpop.eup %15782  ;;  %v2757_v42 = vadd.f32 1e-05, %v2749_v36 }
 0x6a5   : > { %v15785_v43 = vpop.eup %15784  ;;  %v2767_v44 = vmul.f32 %v15783_v41, %v17934_v29  ;;  %v2794_v46 = vadd.f32 %v12924_v37, %v2780_v39 }
 0x6a6   : > { %15794 = vrsqrt.f32 %v2757_v42  ;;  %v2768_v47 = vmul.f32 %v15785_v43, %v17938_v31 }
 0x6a7   : > { %v2781_v48 = vmul.f32 %v12923_v30, %v2767_v44  ;;  %13763 = vmatprep.mubr.msk.f32.mxu0 %vm2510_vm1, %v2794_v46 }
 0x6a8   : > { %v15787_v50 = vpop.eup %15786  ;;  %v2782_v55 = vmul.f32 %v12923_v30, %v2768_v47 }
 0x6a9   : > { %v15789_v14 = vpop.eup %15788  ;;  %v2795_v56 = vadd.f32 %v12924_v37, %v2781_v48  ;;  %v2769_v57 = vmul.f32 %v15787_v50, %v17945_v38 }
 0x6aa   : > { %v2796_v45 = vadd.f32 %v12924_v37, %v2782_v55  ;;  %v2770_v58 = vmul.f32 %v15789_v14, %v17949_v40 }
 0x6ab   : > { %13764 = vmatmul.mubr.msk.f32.vlgmr.msra.gmra.mrb[8].mxu0 %vm2510_vm1, %v2795_v56  ;;  %v2783_v63 = vmul.f32 %v12923_v30, %v2769_v57 }
 0x6ac   : > { %v15791_v29 = vpop.eup %15790  ;;  %13766 = vmatprep.mubr.msk.f32.mxu0 %vm2510_vm1, %v2796_v45  ;;  %v2784_v1 = vmul.f32 %v12923_v30, %v2770_v58 }
 0x6ad   : > { %v15793_v31 = vpop.eup %15792  ;;  %v2797_v52 = vadd.f32 %v12924_v37, %v2783_v63  ;;  %v2771_v51 = vmul.f32 %v15791_v29, %v17957_v49 }
 0x6ae   : > { %v2798_v2 = vadd.f32 %v12924_v37, %v2784_v1  ;;  %v2772_v3 = vmul.f32 %v15793_v31, %v17961_v54  ;;  %v12925_v54 = vld [vmem:[%s19932_s3] ss:$0 sm:$0xff]  ;;  %s19938_s3 = sld [smem:[#allocation74_spill]] }
 0x6af   : > { %13767 = vmatmul.mubr.msk.f32.gmra.mrb[10].mxu0 %vm2510_vm1, %v2797_v52  ;;  %v2785_v38 = vmul.f32 %v12923_v30, %v2771_v51 }
 0x6b0   : > { %v15795_v4 = vpop.eup %15794  ;;  %13769 = vmatprep.mubr.msk.f32.mxu1 %vm2510_vm1, %v2798_v2  ;;  %v2786_v40 = vmul.f32 %v12923_v30, %v2772_v3 }
 0x6b1   : > { %v2799_v5 = vadd.f32 %v12924_v37, %v2785_v38  ;;  %v2773_v60 = vmul.f32 %v15795_v4, %v17969_v59 }
 0x6b2   : > { %v2800_v61 = vadd.f32 %v12924_v37, %v2786_v40 }
 0x6b3   : > { %13770 = vmatmul.mubr.msk.f32.vlgmr.msra.gmra.mrb[0].mxu1 %vm2510_vm1, %v2799_v5  ;;  %v2787_v10 = vmul.f32 %v12923_v30, %v2773_v60 }
 0x6b4   : > { %13772 = vmatprep.mubr.msk.f32.mxu1 %vm2510_vm1, %v2800_v61 }
 0x6b5   : > { %v2801_v49 = vadd.f32 %v12924_v37, %v2787_v10 }
 0x6b7   : > { %13773 = vmatmul.mubr.msk.f32.gmra.mrb[2].mxu1 %vm2510_vm1, %v2801_v49 }
 0x77e   : > { %v13765_v11 = vpop.f32.mrb[8].mxu0 }
 0x77f   : > { %v17997_v12 = vadd.f32 %v13765_v11, %v12925_v54  ;;  %v2898_v13 = vpop.f32.mrb[9].mxu0 }
 0x780   : > { %v2899_v15 = vadd.f32 %v12925_v54, %v2898_v13 }
 0x781   : > { %2947 = vrot.lane.b32.xlu1 %v17997_v12, %s19768_s8  ;;  %v2970_v60 = vmul.f32 0.35355338, %v17997_v12 }
 0x782   : > { %2945 = vrot.lane.b32.xlu0 %v2899_v15, %s19768_s8  ;;  %v13768_v59 = vpop.f32.mrb[10].mxu0  ;;  %v2969_v17 = vmul.f32 0.35355338, %v2899_v15  ;;  %v15524_v7 = vpack.i.bf16 %v17997_v12, %v2899_v15 }
 0x783   : > { %v18003_v18 = vadd.f32 %v13768_v59, %v12925_v54  ;;  %v2908_v19 = vpop.f32.mrb[11].mxu0 }
 0x784   : > { %v2909_v21 = vadd.f32 %v12925_v54, %v2908_v19  ;;  %13779 = vmatprep.mubr.msk.f32.mxu1 %vm2989_vm2, %v2969_v17 }
 0x785   : > { %2951 = vrot.lane.b32.xlu1 %v18003_v18, %s19768_s8  ;;  %v2972_v10 = vmul.f32 0.35355338, %v18003_v18 }
 0x786   : > { %v13771_v22 = vpop.f32.mrb[0].mxu1  ;;  %v2971_v23 = vmul.f32 0.35355338, %v2909_v21  ;;  %v15529_v24 = vpack.i.bf16 %v18003_v18, %v2909_v21 }
 0x787   : > { %v18009_v25 = vadd.f32 %v13771_v22, %v12925_v54  ;;  %v2918_v26 = vpop.f32.mrb[1].mxu1 }
 0x788   : > { %v18011_v27 = vadd.f32 %v12925_v54, %v2918_v26  ;;  %13786 = vmatprep.mubr.msk.f32.mxu0 %vm2989_vm2, %v2971_v23 }
 0x789   : > { %2949 = vrot.lane.b32.xlu1 %v2909_v21, %s19768_s8 }
 0x78a   : > { %2953 = vrot.lane.b32.xlu0 %v18011_v27, %s19768_s8  ;;  %v13774_v28 = vpop.f32.mrb[2].mxu1  ;;  %v15534_v30 = vpack.i.bf16 %v18009_v25, %v18011_v27  ;;  %v2973_v61 = vmul.f32 0.35355338, %v18011_v27 }
 0x78b   : > { %v18019_v32 = vadd.f32 %v13774_v28, %v12925_v54  ;;  %v2928_v33 = vpop.f32.mrb[3].mxu1 }
 0x78c   : > { %v2929_v34 = vadd.f32 %v12925_v54, %v2928_v33  ;;  %v2974_v54 = vmul.f32 0.35355338, %v18009_v25 }
 0x78d   : > { %2955 = vrot.lane.b32.xlu1 %v18009_v25, %s19768_s8  ;;  %v2976_v12 = vmul.f32 0.35355338, %v18019_v32 }
 0x78e   : > { %2957 = vrot.lane.b32.xlu0 %v2929_v34, %s19768_s8  ;;  %v15539_v35 = vpack.i.bf16 %v18019_v32, %v2929_v34  ;;  %v2975_v49 = vmul.f32 0.35355338, %v2929_v34 }
 0x791   : > { %2959 = vrot.lane.b32.xlu1 %v18019_v32, %s19768_s8 }
 0x792   : > { %15525 = vrot.lane.b32.xlu0 %v15524_v7, %s19766_s7 }
 0x795   : > { %15530 = vrot.lane.b32.xlu1 %v15529_v24, %s19766_s7 }
 0x796   : > { %15535 = vrot.lane.b32.xlu0 %v15534_v30, %s19766_s7 }
 0x799   : > { %15540 = vrot.lane.b32.xlu1 %v15539_v35, %s19766_s7 }
 0x7f3   : > { %v18031_v36 = vpop.permute.xlu1 %2947 }
 0x7f4   : > { %v2946_v37 = vpop.permute.xlu0 %2945  ;;  %v2978_v23 = vmul.f32 0.35355338, %v18031_v36 }
 0x7f5   : > { %v18034_v39 = vpack.i.bf16 %v18031_v36, %v2946_v37  ;;  %v2977_v11 = vmul.f32 0.35355338, %v2946_v37 }
 0x7f7   : > { %v18036_v41 = vpop.permute.xlu1 %2951  ;;  %15545 = vrot.lane.b32.xlu0 %v18034_v39, %s19766_s7 }
 0x7f8   : > { %v2980_v37 = vmul.f32 0.35355338, %v18036_v41 }
 0x7fb   : > { %v2950_v42 = vpop.permute.xlu1 %2949 }
 0x7fc   : > { %v18040_v43 = vpop.permute.xlu0 %2953  ;;  %v18043_v44 = vpack.i.bf16 %v18036_v41, %v2950_v42  ;;  %v2979_v13 = vmul.f32 0.35355338, %v2950_v42 }
 0x7fd   : > { %v2981_v25 = vmul.f32 0.35355338, %v18040_v43 }
 0x7fe   : > { %15550 = vrot.lane.b32.xlu1 %v18043_v44, %s19766_s7 }
 0x7ff   : > { %v18047_v46 = vpop.permute.xlu1 %2955 }
 0x800   : > { %v18049_v47 = vpop.permute.xlu0 %2957  ;;  %v18053_v48 = vpack.i.bf16 %v18047_v46, %v18040_v43  ;;  %v2982_v41 = vmul.f32 0.35355338, %v18047_v46  ;;  %v2650_v46 = vld [vmem:[%s19935_s6 + $0x8] sm:$0xff] }
 0x802   : > { %15555 = vrot.lane.b32.xlu0 %v18053_v48, %s19766_s7 }
 0x803   : > { %v18057_v50 = vpop.permute.xlu1 %2959 }
 0x804   : > { %v15526_v55 = vpop.permute.xlu0 %15525  ;;  %v18061_v14 = vpack.i.bf16 %v18057_v50, %v18049_v47 }
 0x805   : > { %v15528_v56 = vunpack.i.h.bf16 %v15526_v55  ;;  %v15527_v57 = vunpack.i.l.bf16 %v15526_v55 }
 0x806   : > { %15565 = vrot.lane.b32.xlu0 %v15524_v7, %s19764_s13  ;;  %15560 = vrot.lane.b32.xlu1 %v18061_v14, %s19766_s7  ;;  %s19944_s7 = sld [smem:[#allocation77_spill]] }
 0x807   : > { %v14612_v58 = vpack.c.bf16 %v15528_v56, %v15527_v57  ;;  %v15531_v63 = vpop.permute.xlu1 %15530  ;;  %v2983_v56 = vmul.f32 0.35355338, %v18049_v47 }
 0x808   : > { %v15533_v29 = vunpack.i.h.bf16 %v15531_v63  ;;  %v15532_v1 = vunpack.i.l.bf16 %v15531_v63  ;;  %v15536_v31 = vpop.permute.xlu0 %15535 }
 0x809   : > { %v15538_v52 = vunpack.i.h.bf16 %v15536_v31  ;;  %v15537_v51 = vunpack.i.l.bf16 %v15536_v31  ;;  %14614 = vmatprep.subr.msk.bf16.mxu1 %vm18068_vm3, %v14612_v58  ;;  %v2984_v31 = vmul.f32 0.35355338, %v18057_v50 }
 0x80a   : > { %v14618_v2 = vpack.c.bf16 %v15533_v29, %v15532_v1  ;;  %15570 = vrot.lane.b32.xlu1 %v15529_v24, %s19764_s13  ;;  %14617 = vmatpush3.bf16.xpose.msk.msra.mxu1 %vm18068_vm3, %v14612_v58 }
 0x80b   : > { %v14624_v3 = vpack.c.bf16 %v15538_v52, %v15537_v51  ;;  %v15541_v38 = vpop.permute.xlu1 %15540  ;;  %v2649_v51 = vld [vmem:[%s19935_s6] sm:$0xff] }
 0x80c   : > { %v15543_v4 = vunpack.i.h.bf16 %v15541_v38  ;;  %v15542_v40 = vunpack.i.l.bf16 %v15541_v38  ;;  %14620 = vmatprep.subr.msk.bf16.mxu0 %vm18068_vm3, %v14618_v2 }
 0x80d   : > { %14623 = vmatpush3.bf16.xpose.msk.msra.mxu0 %vm18068_vm3, %v14618_v2  ;;  %14626 = vmatprep.subr.msk.bf16.mxu1 %vm18068_vm3, %v14624_v3 }
 0x80e   : > { %v14630_v5 = vpack.c.bf16 %v15543_v4, %v15542_v40  ;;  %15575 = vrot.lane.b32.xlu1 %v15534_v30, %s19764_s13 }
 0x810   : > { %14632 = vmatprep.subr.msk.bf16.mxu0 %vm18068_vm3, %v14630_v5 }
 0x811   : > { %13780 = vmatmul.mubr.msk.f32.vlgmr.msra.gmra.mrb[4].mxu1 %vm2989_vm2, %v2970_v60 }
 0x812   : > { %15580 = vrot.lane.b32.xlu1 %v15539_v35, %s19764_s13  ;;  %14629 = vmatpush3.bf16.xpose.msk.msra.mxu1 %vm18068_vm3, %v14624_v3 }
 0x813   : > { %13793 = vmatprep.mubr.msk.f32.mxu1 %vm2989_vm2, %v2973_v61 }
 0x814   : > { %13787 = vmatmul.mubr.msk.f32.vlgmr.msra.gmra.mrb[12].mxu0 %vm2989_vm2, %v2972_v10 }
 0x815   : > { %14635 = vmatpush3.bf16.xpose.msk.msra.mxu0 %vm18068_vm3, %v14630_v5  ;;  %13800 = vmatprep.mubr.msk.f32.mxu0 %vm2989_vm2, %v2975_v49 }
 0x819   : > { %13794 = vmatmul.mubr.msk.f32.vlgmr.msra.gmra.mrb[6].mxu1 %vm2989_vm2, %v2974_v54 }
 0x81a   : > { %13807 = vmatprep.mubr.msk.f32.mxu1 %vm2989_vm2, %v2977_v11 }
 0x81c   : > { %13801 = vmatmul.mubr.msk.f32.vlgmr.msra.gmra.mrb[14].mxu0 %vm2989_vm2, %v2976_v12 }
 0x81d   : > { %13814 = vmatprep.mubr.msk.f32.mxu0 %vm2989_vm2, %v2979_v13 }
 0x869   : > { %v15546_v15 = vpop.permute.xlu0 %15545 }
 0x86a   : > { %v15548_v59 = vunpack.i.h.bf16 %v15546_v15  ;;  %v15547_v17 = vunpack.i.l.bf16 %v15546_v15 }
 0x86c   : > { %v14636_v7 = vpack.c.bf16 %v15548_v59, %v15547_v17 }
 0x86e   : > { %14638 = vmatprep.subr.msk.bf16.mxu1 %vm18068_vm3, %v14636_v7 }
 0x86f   : > { %14641 = vmatpush3.bf16.xpose.msk.msra.mxu1 %vm18068_vm3, %v14636_v7 }
 0x870   : > { %v15551_v18 = vpop.permute.xlu1 %15550 }
 0x871   : > { %v15553_v19 = vunpack.i.h.bf16 %v15551_v18  ;;  %v15552_v21 = vunpack.i.l.bf16 %v15551_v18 }
 0x873   : > { %v14642_v22 = vpack.c.bf16 %v15553_v19, %v15552_v21 }
 0x874   : > { %v15556_v24 = vpop.permute.xlu0 %15555 }
 0x875   : > { %v15558_v26 = vunpack.i.h.bf16 %v15556_v24  ;;  %v15557_v27 = vunpack.i.l.bf16 %v15556_v24  ;;  %14644 = vmatprep.subr.msk.bf16.mxu0 %vm18068_vm3, %v14642_v22  ;;  %v2652_v24 = vld [vmem:[%s19935_s6 + $0x18] sm:$0xff] }
 0x876   : > { %13808 = vmatmul.mubr.msk.f32.vlgmr.msra.gmra.mrb[8].mxu1 %vm2989_vm2, %v2978_v23  ;;  %14647 = vmatpush3.bf16.xpose.msk.msra.mxu0 %vm18068_vm3, %v14642_v22 }
 0x877   : > { %v14648_v28 = vpack.c.bf16 %v15558_v26, %v15557_v27  ;;  %13821 = vmatprep.mubr.msk.f32.mxu1 %vm2989_vm2, %v2981_v25  ;;  %v2651_v26 = vld [vmem:[%s19935_s6 + $0x10] sm:$0xff] }
 0x878   : > { %v15561_v30 = vpop.permute.xlu1 %15560  ;;  %v15566_v32 = vpop.permute.xlu0 %15565 }
 0x879   : > { %v15563_v33 = vunpack.i.h.bf16 %v15561_v30  ;;  %v15562_v34 = vunpack.i.l.bf16 %v15561_v30  ;;  %v15568_v35 = vunpack.i.h.bf16 %v15566_v32  ;;  %v15567_v36 = vunpack.i.l.bf16 %v15566_v32  ;;  %14650 = vmatprep.subr.msk.bf16.mxu1 %vm18068_vm3, %v14648_v28 }
 0x87a   : > { %14653 = vmatpush3.bf16.xpose.msk.msra.mxu1 %vm18068_vm3, %v14648_v28 }
 0x87b   : > { %v14654_v42 = vpack.c.bf16 %v15563_v33, %v15562_v34  ;;  %v14660_v43 = vpack.c.bf16 %v15568_v35, %v15567_v36 }
 0x87c   : > { %v15571_v55 = vpop.permute.xlu1 %15570 }
 0x87d   : > { %v15573_v57 = vunpack.i.h.bf16 %v15571_v55  ;;  %v15572_v58 = vunpack.i.l.bf16 %v15571_v55  ;;  %13815 = vmatmul.mubr.msk.f32.vlgmr.msra.gmra.mrb[16].mxu0 %vm2989_vm2, %v2980_v37  ;;  %14656 = vmatprep.subr.msk.bf16.mxu0 %vm18068_vm3, %v14654_v42 }
 0x87e   : > { %14661 = vmatprep.subr.bf16.mxu1 %v14660_v43  ;;  %14659 = vmatpush3.bf16.xpose.msk.msra.mxu0 %vm18068_vm3, %v14654_v42 }
 0x87f   : > { %13828 = vmatprep.mubr.msk.f32.mxu0 %vm2989_vm2, %v2983_v56  ;;  %v18130_v1 = vpack.c.bf16 %v15573_v57, %v15572_v58 }
 0x880   : > { %v15576_v63 = vpop.permute.xlu1 %15575 }
 0x881   : > { %v15578_v29 = vunpack.i.h.bf16 %v15576_v63  ;;  %v15577_v47 = vunpack.i.l.bf16 %v15576_v63  ;;  %13822 = vmatmul.mubr.msk.f32.vlgmr.msra.gmra.mrb[10].mxu1 %vm2989_vm2, %v2982_v41 }
 0x882   : > { %14663 = vmatpush3.bf16.msra.mxu1 %v14660_v43 }
 0x883   : > { %14665 = vmatprep.subr.bf16.mxu1 %v18130_v1  ;;  %v14668_v52 = vpack.c.bf16 %v15578_v29, %v15577_v47 }
 0x885   : > { %13829 = vmatmul.mubr.msk.f32.vlgmr.msra.gmra.mrb[18].mxu0 %vm2989_vm2, %v2984_v31  ;;  %14669 = vmatprep.subr.bf16.mxu0 %v14668_v52 }
 0x886   : > { %14671 = vmatpush3.bf16.msra.mxu0 %v14668_v52 }
 0x8e4   : > { %v13781_v2 = vpop.f32.mrb[4].mxu1 }
 0x8e5   : > { %v18137_v3 = vadd.f32 %v13781_v2, %v2650_v46  ;;  %v3066_v38 = vpop.f32.mrb[5].mxu1  ;;  %v18207_v2 = vpop.permute.xlu1 %15580 }
 0x8e6   : > { %v18139_v4 = vadd.f32 %v3066_v38, %v2649_v51 }
 0x8e7   : > { %v13788_v40 = vpop.f32.mrb[12].mxu0  ;;  %v3717_v5 = vsel %vm2510_vm1, %v18137_v3, -inf }
 0x8e8   : > { %v18143_v50 = vadd.f32 %v13788_v40, %v2650_v46  ;;  %v3155_v60 = vpop.f32.mrb[13].mxu0  ;;  %3718 = vmax.xlane.f32.xlu1 %v3717_v5  ;;  %v3714_v61 = vsel %vm2510_vm1, %v18139_v4, -inf }
 0x8e9   : > { %3715 = vmax.xlane.f32.xlu0 %v3714_v61  ;;  %v18147_v10 = vadd.f32 %v3155_v60, %v2649_v51 }
 0x8ea   : > { %v3723_v54 = vsel %vm2510_vm1, %v18143_v50, -inf }
 0x8eb   : > { %v3720_v7 = vsel %vm2510_vm1, %v18147_v10, -inf }
 0x8ec   : > { %v13795_v49 = vpop.f32.mrb[6].mxu1 }
 0x8ed   : > { %v18151_v11 = vadd.f32 %v13795_v49, %v2650_v46  ;;  %3724 = vmax.xlane.f32.xlu0 %v3723_v54  ;;  %v3244_v12 = vpop.f32.mrb[7].mxu1 }
 0x8ee   : > { %v18155_v59 = vadd.f32 %v3244_v12, %v2649_v51 }
 0x8ef   : > { %v13802_v13 = vpop.f32.mrb[14].mxu0  ;;  %v3729_v15 = vsel %vm2510_vm1, %v18151_v11, -inf }
 0x8f0   : > { %v3333_v17 = vpop.f32.mrb[15].mxu0  ;;  %3730 = vmax.xlane.f32.xlu1 %v3729_v15  ;;  %v18159_v18 = vadd.f32 %v13802_v13, %v2650_v46  ;;  %v3726_v19 = vsel %vm2510_vm1, %v18155_v59, -inf }
 0x8f1   : > { %3721 = vmax.xlane.f32.xlu0 %v3720_v7  ;;  %v18163_v21 = vadd.f32 %v3333_v17, %v2649_v51 }
 0x8f2   : > { %v3735_v22 = vsel %vm2510_vm1, %v18159_v18, -inf }
 0x8f3   : > { %v3732_v23 = vsel %vm2510_vm1, %v18163_v21, -inf }
 0x8f5   : > { %3727 = vmax.xlane.f32.xlu0 %v3726_v19 }
 0x8f9   : > { %3736 = vmax.xlane.f32.xlu0 %v3735_v22 }
 0x8fd   : > { %3733 = vmax.xlane.f32.xlu0 %v3732_v23 }
 0x949   : > { %v13809_v25 = vpop.f32.mrb[8].mxu1 }
 0x94a   : > { %v18171_v27 = vadd.f32 %v13809_v25, %v2652_v24  ;;  %v3422_v28 = vpop.f32.mrb[9].mxu1 }
 0x94b   : > { %v18173_v30 = vadd.f32 %v3422_v28, %v2651_v26 }
 0x94c   : > { %v3741_v32 = vsel %vm2510_vm1, %v18171_v27, -inf }
 0x94d   : > { %3742 = vmax.xlane.f32.xlu1 %v3741_v32  ;;  %v3738_v34 = vsel %vm2510_vm1, %v18173_v30, -inf }
 0x950   : > { %v13816_v33 = vpop.f32.mrb[16].mxu0 }
 0x951   : > { %v18179_v35 = vadd.f32 %v13816_v33, %v2652_v24  ;;  %v3511_v36 = vpop.f32.mrb[17].mxu0  ;;  %3739 = vmax.xlane.f32.xlu1 %v3738_v34 }
 0x952   : > { %v18181_v37 = vadd.f32 %v3511_v36, %v2651_v26 }
 0x953   : > { %v3747_v42 = vsel %vm2510_vm1, %v18179_v35, -inf }
 0x954   : > { %v13823_v43 = vpop.f32.mrb[10].mxu1  ;;  %v3744_v55 = vsel %vm2510_vm1, %v18181_v37, -inf }
 0x955   : > { %v18187_v56 = vadd.f32 %v13823_v43, %v2652_v24  ;;  %3745 = vmax.xlane.f32.xlu0 %v3744_v55  ;;  %3748 = vmax.xlane.f32.xlu1 %v3747_v42  ;;  %v3600_v57 = vpop.f32.mrb[11].mxu1 }
 0x956   : > { %v18189_v58 = vadd.f32 %v3600_v57, %v2651_v26 }
 0x957   : > { %v3753_v41 = vsel %vm2510_vm1, %v18187_v56, -inf }
 0x958   : > { %v13830_v63 = vpop.f32.mrb[18].mxu0  ;;  %v3750_v29 = vsel %vm2510_vm1, %v18189_v58, -inf }
 0x959   : > { %v18195_v47 = vadd.f32 %v13830_v63, %v2652_v24  ;;  %v3689_v31 = vpop.f32.mrb[19].mxu0  ;;  %3754 = vmax.xlane.f32.xlu1 %v3753_v41  ;;  %3751 = vmax.xlane.f32.xlu0 %v3750_v29 }
 0x95a   : > { %v18197_v52 = vadd.f32 %v3689_v31, %v2651_v26 }
 0x95b   : > { %v3759_v46 = vsel %vm2510_vm1, %v18195_v47, -inf }
 0x95c   : > { %v3756_v51 = vsel %vm2510_vm1, %v18197_v52, -inf }
 0x95d   : > { %3760 = vmax.xlane.f32.xlu1 %v3759_v46  ;;  %3757 = vmax.xlane.f32.xlu0 %v3756_v51 }
 0x96e   : > { %15590 = vrot.lane.b32.xlu1 %v18043_v44, %s19764_s13 }
 0x973   : > { %15585 = vrot.lane.b32.xlu0 %v18034_v39, %s19764_s13 }
 0x975   : > { %v3719_v40 = vpop.xlane.xlu1 %3718 }
 0x976   : > { %v3716_v38 = vpop.xlane.xlu0 %3715  ;;  %v3763_v60 = vsub.f32 %v18137_v3, %v3719_v40 }
 0x977   : > { %v3762_v61 = vsub.f32 %v18139_v4, %v3716_v38 }
 0x978   : > { %v3780_v12 = vmul.f32 1.442695, %v3763_v60 }
 0x979   : > { %v3778_v15 = vmul.f32 1.442695, %v3762_v61 }
 0x97a   : > { %v3725_v5 = vpop.xlane.xlu0 %3724  ;;  %15796 = vpow2.f32 %v3780_v12 }
 0x97b   : > { %v3765_v13 = vsub.f32 %v18143_v50, %v3725_v5  ;;  %15798 = vpow2.f32 %v3778_v15 }
 0x97d   : > { %v3731_v49 = vpop.xlane.xlu1 %3730  ;;  %v3784_v39 = vmul.f32 1.442695, %v3765_v13 }
 0x97e   : > { %v3722_v54 = vpop.xlane.xlu0 %3721  ;;  %v3767_v44 = vsub.f32 %v18151_v11, %v3731_v49 }
 0x97f   : > { %v3764_v7 = vsub.f32 %v18147_v10, %v3722_v54  ;;  %15800 = vpow2.f32 %v3784_v39 }
 0x980   : > { %v3788_v19 = vmul.f32 1.442695, %v3767_v44 }
 0x981   : > { %v3782_v4 = vmul.f32 1.442695, %v3764_v7 }
 0x982   : > { %v3728_v17 = vpop.xlane.xlu0 %3727  ;;  %15802 = vpow2.f32 %v3788_v19 }
 0x983   : > { %v3766_v22 = vsub.f32 %v18155_v59, %v3728_v17  ;;  %15804 = vpow2.f32 %v3782_v4 }
 0x984   : > { %v18217_v26 = vpop.eup %15796 }
 0x985   : > { %v3786_v23 = vmul.f32 1.442695, %v3766_v22  ;;  %v18219_v10 = vpop.eup %15798  ;;  %v3813_v32 = vsel %vm2510_vm1, %v18217_v26, 0.0 }
 0x986   : > { %v3737_v3 = vpop.xlane.xlu0 %3736 }
 0x987   : > { %v3769_v24 = vsub.f32 %v18159_v18, %v3737_v3  ;;  %15806 = vpow2.f32 %v3786_v23  ;;  %v3810_v18 = vsel %vm2510_vm1, %v18219_v10, 0.0 }
 0x989   : > { %v3792_v11 = vmul.f32 1.442695, %v3769_v24  ;;  %v18221_v59 = vpop.eup %15800 }
 0x98a   : > { %v3734_v50 = vpop.xlane.xlu0 %3733  ;;  %v3819_v36 = vsel %vm2510_vm1, %v18221_v59, 0.0 }
 0x98b   : > { %v3768_v25 = vsub.f32 %v18163_v21, %v3734_v50  ;;  %15808 = vpow2.f32 %v3792_v11 }
 0x98c   : > { %v18227_v33 = vpop.eup %15802 }
 0x98d   : > { %v3790_v28 = vmul.f32 1.442695, %v3768_v25  ;;  %v18229_v21 = vpop.eup %15804  ;;  %v3825_v34 = vsel %vm2510_vm1, %v18227_v33, 0.0 }
 0x98e   : > { %v3816_v55 = vsel %vm2510_vm1, %v18229_v21, 0.0 }
 0x98f   : > { %15810 = vpow2.f32 %v3790_v28 }
 0x991   : > { %v18235_v42 = vpop.eup %15806 }
 0x992   : > { %3814 = vadd.xlane.f32.xlu1 %v3813_v32  ;;  %3811 = vadd.xlane.f32.xlu0 %v3810_v18  ;;  %v3822_v43 = vsel %vm2510_vm1, %v18235_v42, 0.0 }
 0x995   : > { %v18241_v57 = vpop.eup %15808 }
 0x996   : > { %3826 = vadd.xlane.f32.xlu1 %v3825_v34  ;;  %3820 = vadd.xlane.f32.xlu0 %v3819_v36  ;;  %v3831_v41 = vsel %vm2510_vm1, %v18241_v57, 0.0 }
 0x999   : > { %v18245_v63 = vpop.eup %15810 }
 0x99a   : > { %3823 = vadd.xlane.f32.xlu1 %v3822_v43  ;;  %3817 = vadd.xlane.f32.xlu0 %v3816_v55  ;;  %v3828_v29 = vsel %vm2510_vm1, %v18245_v63, 0.0 }
 0x99e   : > { %3832 = vadd.xlane.f32.xlu0 %v3831_v41 }
 0x9a2   : > { %3829 = vadd.xlane.f32.xlu0 %v3828_v29 }
 0x9da   : > { %v3743_v31 = vpop.xlane.xlu1 %3742 }
 0x9db   : > { %v3771_v46 = vsub.f32 %v18171_v27, %v3743_v31 }
 0x9dd   : > { %v3796_v51 = vmul.f32 1.442695, %v3771_v46 }
 0x9de   : > { %v3740_v38 = vpop.xlane.xlu1 %3739 }
 0x9df   : > { %15812 = vpow2.f32 %v3796_v51  ;;  %v3770_v40 = vsub.f32 %v18173_v30, %v3740_v38 }
 0x9e1   : > { %v3794_v5 = vmul.f32 1.442695, %v3770_v40 }
 0x9e2   : > { %v3746_v60 = vpop.xlane.xlu0 %3745  ;;  %v3749_v61 = vpop.xlane.xlu1 %3748 }
 0x9e3   : > { %15814 = vpow2.f32 %v3794_v5  ;;  %v3772_v49 = vsub.f32 %v18181_v37, %v3746_v60  ;;  %v3773_v54 = vsub.f32 %v18179_v35, %v3749_v61 }
 0x9e5   : > { %v3798_v12 = vmul.f32 1.442695, %v3772_v49  ;;  %v3800_v13 = vmul.f32 1.442695, %v3773_v54 }
 0x9e6   : > { %v3755_v15 = vpop.xlane.xlu1 %3754  ;;  %v3752_v44 = vpop.xlane.xlu0 %3751 }
 0x9e7   : > { %15816 = vpow2.f32 %v3798_v12  ;;  %v3775_v27 = vsub.f32 %v18187_v56, %v3755_v15  ;;  %v3774_v17 = vsub.f32 %v18189_v58, %v3752_v44  ;;  %v15582_v12 = vunpack.i.l.bf16 %v18207_v2 }
 0x9e8   : > { %15818 = vpow2.f32 %v3800_v13 }
 0x9e9   : > { %v18255_v39 = vpop.eup %15812  ;;  %v3804_v30 = vmul.f32 1.442695, %v3775_v27  ;;  %v3802_v7 = vmul.f32 1.442695, %v3774_v17 }
 0x9ea   : > { %v3761_v19 = vpop.xlane.xlu1 %3760  ;;  %v3758_v22 = vpop.xlane.xlu0 %3757  ;;  %v3837_v37 = vsel %vm2510_vm1, %v18255_v39, 0.0 }
 0x9eb   : > { %15820 = vpow2.f32 %v3804_v30  ;;  %v3777_v35 = vsub.f32 %v18195_v47, %v3761_v19  ;;  %v3776_v3 = vsub.f32 %v18197_v52, %v3758_v22  ;;  %3838 = vadd.xlane.f32.xlu1 %v3837_v37 }
 0x9ec   : > { %15822 = vpow2.f32 %v3802_v7 }
 0x9ed   : > { %v18261_v56 = vpop.eup %15814  ;;  %v3808_v58 = vmul.f32 1.442695, %v3777_v35  ;;  %v3806_v4 = vmul.f32 1.442695, %v3776_v3 }
 0x9ee   : > { %v15586_v23 = vpop.permute.xlu0 %15585  ;;  %v3834_v24 = vsel %vm2510_vm1, %v18261_v56, 0.0  ;;  %v15591_v46 = vpop.permute.xlu1 %15590 }
 0x9ef   : > { %15824 = vpow2.f32 %v3808_v58  ;;  %v15588_v50 = vunpack.i.h.bf16 %v15586_v23  ;;  %3835 = vadd.xlane.f32.xlu1 %v3834_v24  ;;  %v15587_v11 = vunpack.i.l.bf16 %v15586_v23  ;;  %v15593_v19 = vunpack.i.h.bf16 %v15591_v46 }
 0x9f0   : > { %15826 = vpow2.f32 %v3806_v4  ;;  %v15592_v22 = vunpack.i.l.bf16 %v15591_v46 }
 0x9f1   : > { %v18265_v25 = vpop.eup %15816  ;;  %v14676_v28 = vpack.c.bf16 %v15588_v50, %v15587_v11 }
 0x9f2   : > { %v18267_v47 = vpop.eup %15818  ;;  %v3840_v52 = vsel %vm2510_vm1, %v18265_v25, 0.0 }
 0x9f3   : > { %v3843_v32 = vsel %vm2510_vm1, %v18267_v47, 0.0  ;;  %3841 = vadd.xlane.f32.xlu0 %v3840_v52  ;;  %14677 = vmatprep.subr.bf16.mxu0 %v14676_v28 }
 0x9f4   : > { %3844 = vadd.xlane.f32.xlu1 %v3843_v32 }
 0x9f5   : > { %v18273_v18 = vpop.eup %15820 }
 0x9f6   : > { %v18275_v34 = vpop.eup %15822  ;;  %v3849_v36 = vsel %vm2510_vm1, %v18273_v18, 0.0 }
 0x9f7   : > { %v3846_v43 = vsel %vm2510_vm1, %v18275_v34, 0.0 }
 0x9f8   : > { %3850 = vadd.xlane.f32.xlu1 %v3849_v36  ;;  %3847 = vadd.xlane.f32.xlu0 %v3846_v43 }
 0x9f9   : > { %v18281_v55 = vpop.eup %15824 }
 0x9fa   : > { %v18283_v41 = vpop.eup %15826  ;;  %v3855_v29 = vsel %vm2510_vm1, %v18281_v55, 0.0 }
 0x9fb   : > { %v3852_v31 = vsel %vm2510_vm1, %v18283_v41, 0.0 }
 0x9fc   : > { %3856 = vadd.xlane.f32.xlu1 %v3855_v29  ;;  %3853 = vadd.xlane.f32.xlu0 %v3852_v31 }
 0xa0d   : > { %15600 = vrot.lane.b32.xlu1 %v18061_v14, %s19764_s13  ;;  %v15583_v14 = vunpack.i.h.bf16 %v18207_v2 }
 0xa0f   : > { %v14672_v44 = vpack.c.bf16 %v15583_v14, %v15582_v12 }
 0xa12   : > { %15595 = vrot.lane.b32.xlu0 %v18053_v48, %s19764_s13  ;;  %s19940_s13 = sld [smem:[#allocation73_spill]] }
 0xa1f   : > { %v3815_v51 = vpop.xlane.xlu1 %3814  ;;  %v3812_v38 = vpop.xlane.xlu0 %3811 }
 0xa20   : > { %15828 = vrcp.f32 %v3815_v51 }
 0xa21   : > { %15830 = vrcp.f32 %v3812_v38 }
 0xa23   : > { %v3827_v40 = vpop.xlane.xlu1 %3826  ;;  %v3821_v5 = vpop.xlane.xlu0 %3820 }
 0xa24   : > { %15832 = vrcp.f32 %v3827_v40 }
 0xa25   : > { %15834 = vrcp.f32 %v3821_v5 }
 0xa27   : > { %v3824_v60 = vpop.xlane.xlu1 %3823  ;;  %v3818_v61 = vpop.xlane.xlu0 %3817 }
 0xa28   : > { %15836 = vrcp.f32 %v3824_v60 }
 0xa29   : > { %15838 = vrcp.f32 %v3818_v61 }
 0xa2a   : > { %v15829_v49 = vpop.eup %15828 }
 0xa2b   : > { %v15831_v54 = vpop.eup %15830  ;;  %v3833_v48 = vpop.xlane.xlu0 %3832  ;;  %v3875_v13 = vmul.f32 %v15829_v49, %v18217_v26 }
 0xa2c   : > { %v3874_v15 = vmul.f32 %v15831_v54, %v18219_v10  ;;  %15840 = vrcp.f32 %v3833_v48 }
 0xa2e   : > { %13835 = vmatprep.mubr.msk.f32.mxu1 %vm2510_vm1, %v3874_v15  ;;  %v15833_v17 = vpop.eup %15832 }
 0xa2f   : > { %13836 = vmatmul.mubr.msk.f32.vlgmr.msra.gmra.mrb[12].mxu1 %vm2510_vm1, %v3875_v13  ;;  %v3830_v27 = vpop.xlane.xlu0 %3829  ;;  %v15835_v30 = vpop.eup %15834  ;;  %v3879_v37 = vmul.f32 %v15833_v17, %v18227_v33  ;;  %v2654_v13 = vld [vmem:[%s19936_s1 + $0x8] sm:$0xff] }
 0xa30   : > { %14667 = vmatpush3.bf16.msra.mxu1 %v18130_v1  ;;  %15842 = vrcp.f32 %v3830_v27  ;;  %v3877_v35 = vmul.f32 %v15835_v30, %v18221_v59  ;;  %v14680_v1 = vpack.c.bf16 %v15593_v19, %v15592_v22 }
 0xa31   : > { %14673 = vmatprep.subr.bf16.mxu1 %v14672_v44 }
 0xa32   : > { %v15837_v7 = vpop.eup %15836 }
 0xa33   : > { %v15839_v2 = vpop.eup %15838  ;;  %v3878_v26 = vmul.f32 %v15837_v7, %v18235_v42 }
 0xa34   : > { %v3876_v10 = vmul.f32 %v15839_v2, %v18229_v21 }
 0xa35   : > { %13849 = vmatprep.mubr.msk.f32.mxu0 %vm2510_vm1, %v3878_v26 }
 0xa36   : > { %13842 = vmatprep.mubr.msk.f32.mxu1 %vm2510_vm1, %v3876_v10  ;;  %13850 = vmatmul.mubr.msk.f32.vlgmr.msra.gmra.mrb[20].mxu0 %vm2510_vm1, %v3879_v37  ;;  %v15841_v3 = vpop.eup %15840 }
 0xa37   : > { %13843 = vmatmul.mubr.msk.f32.vlgmr.msra.gmra.mrb[14].mxu1 %vm2510_vm1, %v3877_v35  ;;  %14679 = vmatpush3.bf16.msra.mxu0 %v14676_v28  ;;  %v3881_v33 = vmul.f32 %v15841_v3, %v18241_v57 }
 0xa38   : > { %14675 = vmatpush3.bf16.msra.mxu1 %v14672_v44 }
 0xa39   : > { %14681 = vmatprep.subr.bf16.mxu1 %v14680_v1 }
 0xa3a   : > { %v15843_v42 = vpop.eup %15842 }
 0xa3b   : > { %v3880_v21 = vmul.f32 %v15843_v42, %v18245_v63 }
 0xa3d   : > { %13856 = vmatprep.mubr.msk.f32.mxu1 %vm2510_vm1, %v3880_v21 }
 0xa3e   : > { %13857 = vmatmul.mubr.msk.f32.vlgmr.msra.gmra.mrb[16].mxu1 %vm2510_vm1, %v3881_v33 }
 0xa3f   : > { %14683 = vmatpush3.bf16.msra.mxu1 %v14680_v1  ;;  %v12998_v1 = vld [vmem:[%s19937_s22] ss:$0 sm:$0xff]  ;;  %s19939_s22 = sld [smem:[#allocation72_spill]] }
 0xa78   : > { %v3839_v59 = vpop.xlane.xlu1 %3838 }
 0xa79   : > { %15844 = vrcp.f32 %v3839_v59 }
 0xa7c   : > { %v3836_v58 = vpop.xlane.xlu1 %3835 }
 0xa7d   : > { %15846 = vrcp.f32 %v3836_v58 }
 0xa80   : > { %v3842_v4 = vpop.xlane.xlu0 %3841 }
 0xa81   : > { %v3845_v23 = vpop.xlane.xlu1 %3844  ;;  %15848 = vrcp.f32 %v3842_v4 }
 0xa82   : > { %15850 = vrcp.f32 %v3845_v23 }
 0xa83   : > { %v15845_v11 = vpop.eup %15844 }
 0xa84   : > { %v3883_v32 = vmul.f32 %v15845_v11, %v18255_v39 }
 0xa85   : > { %v3851_v24 = vpop.xlane.xlu1 %3850  ;;  %v3848_v50 = vpop.xlane.xlu0 %3847 }
 0xa86   : > { %15852 = vrcp.f32 %v3851_v24 }
 0xa87   : > { %v15847_v63 = vpop.eup %15846  ;;  %15854 = vrcp.f32 %v3848_v50 }
 0xa88   : > { %v3882_v57 = vmul.f32 %v15847_v63, %v18261_v56 }
 0xa89   : > { %v3857_v52 = vpop.xlane.xlu1 %3856  ;;  %v3854_v28 = vpop.xlane.xlu0 %3853 }
 0xa8a   : > { %15856 = vrcp.f32 %v3857_v52  ;;  %13863 = vmatprep.mubr.msk.f32.mxu0 %vm2510_vm1, %v3882_v57 }
 0xa8b   : > { %v15849_v36 = vpop.eup %15848  ;;  %15858 = vrcp.f32 %v3854_v28  ;;  %13864 = vmatmul.mubr.msk.f32.vlgmr.msra.gmra.mrb[22].mxu0 %vm2510_vm1, %v3883_v32 }
 0xa8c   : > { %v15851_v43 = vpop.eup %15850  ;;  %v3884_v29 = vmul.f32 %v15849_v36, %v18265_v25 }
 0xa8d   : > { %v15601_v31 = vpop.permute.xlu1 %15600  ;;  %v15596_v46 = vpop.permute.xlu0 %15595  ;;  %v3885_v51 = vmul.f32 %v15851_v43, %v18267_v47 }
 0xa8e   : > { %v15603_v38 = vunpack.i.h.bf16 %v15601_v31  ;;  %v15602_v56 = vunpack.i.l.bf16 %v15601_v31  ;;  %v15598_v40 = vunpack.i.h.bf16 %v15596_v46  ;;  %v15597_v5 = vunpack.i.l.bf16 %v15596_v46  ;;  %13870 = vmatprep.mubr.msk.f32.mxu1 %vm2510_vm1, %v3884_v29 }
 0xa8f   : > { %13871 = vmatmul.mubr.msk.f32.vlgmr.msra.gmra.mrb[18].mxu1 %vm2510_vm1, %v3885_v51 }
 0xa90   : > { %v15853_v39 = vpop.eup %15852  ;;  %v14684_v60 = vpack.c.bf16 %v15598_v40, %v15597_v5  ;;  %v14688_v61 = vpack.c.bf16 %v15603_v38, %v15602_v56 }
 0xa91   : > { %v15855_v49 = vpop.eup %15854  ;;  %v3887_v54 = vmul.f32 %v15853_v39, %v18273_v18 }
 0xa92   : > { %14685 = vmatprep.subr.bf16.mxu0 %v14684_v60  ;;  %14689 = vmatprep.subr.bf16.mxu1 %v14688_v61  ;;  %v3886_v25 = vmul.f32 %v15855_v49, %v18275_v34  ;;  %v2653_v34 = vld [vmem:[%s19936_s1] sm:$0xff]  ;;  %s19947_s1 = sld [smem:[#allocation78_spill]] }
 0xa93   : > { %14687 = vmatpush3.bf16.msra.mxu0 %v14684_v60  ;;  %14691 = vmatpush3.bf16.msra.mxu1 %v14688_v61 }
 0xa94   : > { %v15857_v47 = vpop.eup %15856  ;;  %13877 = vmatprep.mubr.msk.f32.mxu0 %vm2510_vm1, %v3886_v25  ;;  %13887 = vmatprep.subr.mxu0 %v2654_v13 }
 0xa95   : > { %v15859_v14 = vpop.eup %15858  ;;  %v3889_v12 = vmul.f32 %v15857_v47, %v18281_v55 }
 0xa96   : > { %13878 = vmatmul.mubr.msk.f32.vlgmr.msra.gmra.mrb[24].mxu0 %vm2510_vm1, %v3887_v54  ;;  %v3888_v48 = vmul.f32 %v15859_v14, %v18283_v41 }
 0xa97   : > { %13888 = vmatpush3.msra.mxu0 %v2654_v13 }
 0xa98   : > { %13884 = vmatprep.mubr.msk.f32.mxu1 %vm2510_vm1, %v3888_v48  ;;  %13901 = vmatprep.subr.mxu0 %v2653_v34 }
 0xa99   : > { %13885 = vmatmul.mubr.msk.f32.vlgmr.msra.gmra.mrb[20].mxu1 %vm2510_vm1, %v3889_v12 }
 0xb02   : > { %v13837_v15 = vpop.f32.mrb[12].mxu1 }
 0xb03   : > { %v3968_v44 = vpop.f32.mrb[13].mxu1 }
 0xb09   : > { %v13851_v27 = vpop.f32.mrb[20].mxu0 }
 0xb0a   : > { %v13844_v18 = vpop.f32.mrb[14].mxu1  ;;  %v4142_v17 = vpop.f32.mrb[21].mxu0 }
 0xb0b   : > { %v4055_v30 = vpop.f32.mrb[15].mxu1 }
 0xb11   : > { %v13858_v55 = vpop.f32.mrb[16].mxu1 }
 0xb12   : > { %v4229_v7 = vpop.f32.mrb[17].mxu1 }
 0xb5e   : > { %v13865_v2 = vpop.f32.mrb[22].mxu0 }
 0xb5f   : > { %v4316_v19 = vpop.f32.mrb[23].mxu0 }
 0xb60   : > { %13889 = vmatprep.mubr.msk.f32.mxu0 %vm2989_vm2, %v4316_v19 }
 0xb61   : > { %13890 = vmatmul.mubr.msk.f32.vlgmr.msra.gmra.mrb[26].mxu0 %vm2989_vm2, %v13865_v2 }
 0xb62   : > { %v13872_v41 = vpop.f32.mrb[18].mxu1  ;;  %13902 = vmatpush3.msra.mxu0 %v2653_v34 }
 0xb63   : > { %v4403_v22 = vpop.f32.mrb[19].mxu1 }
 0xb64   : > { %13892 = vmatprep.mubr.msk.f32.mxu0 %vm2989_vm2, %v4403_v22 }
 0xb65   : > { %13893 = vmatmul.mubr.msk.f32.gmra.mrb[28].mxu0 %vm2989_vm2, %v13872_v41 }
 0xb69   : > { %v13879_v26 = vpop.f32.mrb[24].mxu0 }
 0xb6a   : > { %v4490_v10 = vpop.f32.mrb[25].mxu0 }
 0xb6b   : > { %13895 = vmatprep.mubr.msk.f32.mxu0 %vm2989_vm2, %v4490_v10 }
 0xb6c   : > { %v13886_v37 = vpop.f32.mrb[20].mxu1  ;;  %13896 = vmatmul.mubr.msk.f32.gmra.mrb[30].mxu0 %vm2989_vm2, %v13879_v26 }
 0xb6d   : > { %v4577_v35 = vpop.f32.mrb[21].mxu1 }
 0xb6e   : > { %13898 = vmatprep.mubr.msk.f32.mxu0 %vm2989_vm2, %v4577_v35 }
 0xb70   : > { %13899 = vmatmul.mubr.msk.f32.gmra.mrb[32].mxu0 %vm2989_vm2, %v13886_v37 }
 0xb71   : > { %13903 = vmatprep.mubr.msk.f32.mxu0 %vm2989_vm2, %v3968_v44 }
 0xb74   : > { %13904 = vmatmul.mubr.msk.f32.vlgmr.msra.gmra.mrb[26].mxu0 %vm2989_vm2, %v13837_v15 }
 0xb75   : > { %13906 = vmatprep.mubr.msk.f32.mxu0 %vm2989_vm2, %v4055_v30 }
 0xb78   : > { %13907 = vmatmul.mubr.msk.f32.gmra.mrb[28].mxu0 %vm2989_vm2, %v13844_v18 }
 0xb79   : > { %13909 = vmatprep.mubr.msk.f32.mxu0 %vm2989_vm2, %v4142_v17 }
 0xb7c   : > { %13910 = vmatmul.mubr.msk.f32.gmra.mrb[30].mxu0 %vm2989_vm2, %v13851_v27 }
 0xb7d   : > { %13912 = vmatprep.mubr.msk.f32.mxu0 %vm2989_vm2, %v4229_v7 }
 0xb80   : > { %13913 = vmatmul.mubr.msk.f32.gmra.mrb[32].mxu0 %vm2989_vm2, %v13858_v55 }
 0xc47   : > { %v13905_v3 = vpop.f32.mrb[26].mxu0 }
 0xc48   : > { %v4845_v42 = vadd.f32 %v13905_v3, %v17895_v62  ;;  %v4805_v21 = vpop.f32.mrb[27].mxu0 }
 0xc49   : > { %v4844_v33 = vadd.f32 %v4805_v21, %v17889_v53 }
 0xc4a   : > { %v18349_v59 = vadd.f32 %v12998_v1, %v4845_v42 }
 0xc4b   : > { %v18351_v58 = vadd.f32 %v12998_v1, %v4844_v33  ;;  %v13908_v4 = vpop.f32.mrb[28].mxu0 }
 0xc4c   : > { %v4847_v23 = vadd.f32 %v13908_v4, %v17905_v8  ;;  %v4815_v24 = vpop.f32.mrb[29].mxu0  ;;  %v4869_v50 = vsel %vm2510_vm1, %v18349_v59, 0.0 }
 0xc4d   : > { %v4846_v11 = vadd.f32 %v4815_v24, %v17898_v0  ;;  %4870 = vadd.xlane.f32.xlu1 %v4869_v50  ;;  %v4866_v62 = vsel %vm2510_vm1, %v18351_v58, 0.0 }
 0xc4e   : > { %v18359_v63 = vadd.f32 %v12998_v1, %v4847_v23  ;;  %4867 = vadd.xlane.f32.xlu0 %v4866_v62  ;;  %v2658_v62 = vld [vmem:[%s19938_s3] sm:$0xff] }
 0xc4f   : > { %v13911_v53 = vpop.f32.mrb[30].mxu0  ;;  %v18364_v28 = vadd.f32 %v12998_v1, %v4846_v11 }
 0xc50   : > { %v4849_v57 = vadd.f32 %v13911_v53, %v17915_v16  ;;  %v4825_v52 = vpop.f32.mrb[31].mxu0  ;;  %v4875_v8 = vsel %vm2510_vm1, %v18359_v63, 0.0  ;;  %v2659_v53 = vld [vmem:[%s19938_s3 + $0x8] sm:$0xff]  ;;  %s19951_s3 = smov 96  }
 0xc51   : > { %v4848_v32 = vadd.f32 %v4825_v52, %v17908_v9  ;;  %v4872_v51 = vsel %vm2510_vm1, %v18364_v28, 0.0 }
 0xc52   : > { %v18367_v36 = vadd.f32 %v12998_v1, %v4849_v57  ;;  %4876 = vadd.xlane.f32.xlu0 %v4875_v8  ;;  %v14692_v57 = vpack.c.bf16 %v2659_v53, %v2658_v62 }
 0xc53   : > { %v13914_v0 = vpop.f32.mrb[32].mxu0  ;;  %v18372_v46 = vadd.f32 %v12998_v1, %v4848_v32 }
 0xc54   : > { %v4851_v43 = vadd.f32 %v13914_v0, %v17924_v20  ;;  %v4835_v29 = vpop.f32.mrb[33].mxu0  ;;  %v4881_v31 = vsel %vm2510_vm1, %v18367_v36, 0.0  ;;  %14693 = vmatprep.subr.bf16.mxu1 %v14692_v57 }
 0xc55   : > { %v4850_v16 = vadd.f32 %v4835_v29, %v17918_v6  ;;  %4882 = vadd.xlane.f32.xlu1 %v4881_v31  ;;  %v4878_v20 = vsel %vm2510_vm1, %v18372_v46, 0.0  ;;  %14695 = vmatpush3.bf16.msra.mxu1 %v14692_v57 }
 0xc56   : > { %v18377_v38 = vadd.f32 %v12998_v1, %v4851_v43  ;;  %4873 = vadd.xlane.f32.xlu0 %v4872_v51 }
 0xc57   : > { %v18381_v56 = vadd.f32 %v12998_v1, %v4850_v16 }
 0xc58   : > { %v4887_v9 = vsel %vm2510_vm1, %v18377_v38, 0.0 }
 0xc59   : > { %4888 = vadd.xlane.f32.xlu1 %v4887_v9  ;;  %v4884_v6 = vsel %vm2510_vm1, %v18381_v56, 0.0 }
 0xc5a   : > { %4879 = vadd.xlane.f32.xlu0 %v4878_v20 }
 0xc5e   : > { %4885 = vadd.xlane.f32.xlu0 %v4884_v6 }
 0xcda   : > { %v4871_v40 = vpop.xlane.xlu1 %4870 }
 0xcdb   : > { %v4891_v5 = vmul.f32 0.0625, %v4871_v40  ;;  %v4868_v39 = vpop.xlane.xlu0 %4867 }
 0xcdc   : > { %v4890_v60 = vmul.f32 0.0625, %v4868_v39 }
 0xcdd   : > { %v18388_v61 = vsub.f32 %v18349_v59, %v4891_v5 }
 0xcde   : > { %v18391_v49 = vsub.f32 %v18351_v58, %v4890_v60 }
 0xcdf   : > { %v4877_v25 = vpop.xlane.xlu0 %4876  ;;  %v4907_v47 = vmul.f32 %v18388_v61, %v18388_v61 }
 0xce0   : > { %v4893_v54 = vmul.f32 0.0625, %v4877_v25  ;;  %v4906_v14 = vmul.f32 %v18391_v49, %v18391_v49 }
 0xce1   : > { %v4917_v12 = vsel %vm2510_vm1, %v4907_v47, 0.0 }
 0xce2   : > { %v18399_v48 = vsub.f32 %v18359_v63, %v4893_v54  ;;  %v4883_v13 = vpop.xlane.xlu1 %4882  ;;  %4918 = vadd.xlane.f32.xlu1 %v4917_v12  ;;  %v4914_v34 = vsel %vm2510_vm1, %v4906_v14, 0.0  ;;  %v12999_v12 = vld [vmem:[%s19939_s22] ss:$0 sm:$0xff]  ;;  %s19942_s22 = sld [smem:[#allocation75_spill]] }
 0xce3   : > { %v4895_v15 = vmul.f32 0.0625, %v4883_v13  ;;  %v4874_v44 = vpop.xlane.xlu0 %4873  ;;  %4915 = vadd.xlane.f32.xlu0 %v4914_v34 }
 0xce4   : > { %v4892_v27 = vmul.f32 0.0625, %v4874_v44  ;;  %v4909_v18 = vmul.f32 %v18399_v48, %v18399_v48 }
 0xce5   : > { %v18405_v17 = vsub.f32 %v18367_v36, %v4895_v15 }
 0xce6   : > { %v18408_v30 = vsub.f32 %v18364_v28, %v4892_v27  ;;  %v4889_v55 = vpop.xlane.xlu1 %4888  ;;  %v4923_v7 = vsel %vm2510_vm1, %v4909_v18, 0.0 }
 0xce7   : > { %v4897_v2 = vmul.f32 0.0625, %v4889_v55  ;;  %v4880_v19 = vpop.xlane.xlu0 %4879  ;;  %4924 = vadd.xlane.f32.xlu1 %v4923_v7  ;;  %v4911_v41 = vmul.f32 %v18405_v17, %v18405_v17  ;;  %v13000_v7 = vld [vmem:[%s19940_s13] ss:$0 sm:$0xff]  ;;  %s19941_s13 = sld [smem:[#allocation76_spill]] }
 0xce8   : > { %v4894_v22 = vmul.f32 0.0625, %v4880_v19  ;;  %v4908_v26 = vmul.f32 %v18408_v30, %v18408_v30 }
 0xce9   : > { %v18416_v10 = vsub.f32 %v18377_v38, %v4897_v2  ;;  %v4929_v37 = vsel %vm2510_vm1, %v4911_v41, 0.0 }
 0xcea   : > { %v18420_v35 = vsub.f32 %v18372_v46, %v4894_v22  ;;  %v4920_v1 = vsel %vm2510_vm1, %v4908_v26, 0.0 }
 0xceb   : > { %4930 = vadd.xlane.f32.xlu1 %v4929_v37  ;;  %4921 = vadd.xlane.f32.xlu0 %v4920_v1  ;;  %v4886_v3 = vpop.xlane.xlu0 %4885  ;;  %v4913_v42 = vmul.f32 %v18416_v10, %v18416_v10 }
 0xcec   : > { %v4896_v21 = vmul.f32 0.0625, %v4886_v3  ;;  %v4910_v33 = vmul.f32 %v18420_v35, %v18420_v35 }
 0xced   : > { %v4935_v4 = vsel %vm2510_vm1, %v4913_v42, 0.0 }
 0xcee   : > { %v18429_v23 = vsub.f32 %v18381_v56, %v4896_v21  ;;  %v4926_v24 = vsel %vm2510_vm1, %v4910_v33, 0.0 }
 0xcef   : > { %4936 = vadd.xlane.f32.xlu1 %v4935_v4  ;;  %4927 = vadd.xlane.f32.xlu0 %v4926_v24 }
 0xcf0   : > { %v4912_v50 = vmul.f32 %v18429_v23, %v18429_v23 }
 0xcf2   : > { %v4932_v11 = vsel %vm2510_vm1, %v4912_v50, 0.0 }
 0xcf3   : > { %4933 = vadd.xlane.f32.xlu0 %v4932_v11 }
 0xd6f   : > { %v4919_v52 = vpop.xlane.xlu1 %4918 }
 0xd70   : > { %v4939_v8 = vmul.f32 0.0625, %v4919_v52  ;;  %v4916_v32 = vpop.xlane.xlu0 %4915 }
 0xd71   : > { %v4938_v0 = vmul.f32 0.0625, %v4916_v32 }
 0xd72   : > { %v4947_v43 = vadd.f32 1e-05, %v4939_v8 }
 0xd73   : > { %v4946_v29 = vadd.f32 1e-05, %v4938_v0 }
 0xd74   : > { %15860 = vrsqrt.f32 %v4947_v43  ;;  %v4925_v31 = vpop.xlane.xlu1 %4924  ;;  %v2662_v43 = vld [vmem:[%s19941_s13 + $0x8] sm:$0xff] }
 0xd75   : > { %15862 = vrsqrt.f32 %v4946_v29  ;;  %v4941_v16 = vmul.f32 0.0625, %v4925_v31  ;;  %v2663_v31 = vld [vmem:[%s19941_s13 + $0x10] sm:$0xff] }
 0xd77   : > { %v4949_v51 = vadd.f32 1e-05, %v4941_v16  ;;  %v2664_v16 = vld [vmem:[%s19941_s13 + $0x18] sm:$0xff] }
 0xd78   : > { %v4931_v9 = vpop.xlane.xlu1 %4930  ;;  %v4922_v20 = vpop.xlane.xlu0 %4921 }
 0xd79   : > { %15864 = vrsqrt.f32 %v4949_v51  ;;  %v4943_v6 = vmul.f32 0.0625, %v4931_v9  ;;  %v4940_v40 = vmul.f32 0.0625, %v4922_v20  ;;  %v14700_v51 = vpack.c.bf16 %v2664_v16, %v2663_v31  ;;  %v2665_v9 = vld [vmem:[%s19941_s13 + $0x20] sm:$0xff]  ;;  %v2666_v20 = vld [vmem:[%s19941_s13 + $0x28] sm:$0xff] }
 0xd7b   : > { %v4951_v5 = vadd.f32 1e-05, %v4943_v6  ;;  %v4948_v39 = vadd.f32 1e-05, %v4940_v40  ;;  %v14704_v6 = vpack.c.bf16 %v2666_v20, %v2665_v9  ;;  %v2667_v40 = vld [vmem:[%s19941_s13 + $0x30] sm:$0xff] }
 0xd7c   : > { %v4937_v60 = vpop.xlane.xlu1 %4936  ;;  %v4928_v25 = vpop.xlane.xlu0 %4927 }
 0xd7d   : > { %15866 = vrsqrt.f32 %v4951_v5  ;;  %v4945_v47 = vmul.f32 0.0625, %v4937_v60  ;;  %v4942_v54 = vmul.f32 0.0625, %v4928_v25  ;;  %v2668_v5 = vld [vmem:[%s19941_s13 + $0x38] sm:$0xff]  ;;  %v13001_v60 = vld [vmem:[%s19942_s22] ss:$0 sm:$0xff]  ;;  %s19943_s22 = sld [smem:[#allocation90_spill]] }
 0xd7e   : > { %v15861_v14 = vpop.eup %15860  ;;  %15868 = vrsqrt.f32 %v4948_v39  ;;  %v14708_v39 = vpack.c.bf16 %v2668_v5, %v2667_v40 }
 0xd7f   : > { %v15863_v13 = vpop.eup %15862  ;;  %v4963_v34 = vmul.f32 %v15861_v14, %v18388_v61  ;;  %v4953_v15 = vadd.f32 1e-05, %v4945_v47  ;;  %v4950_v44 = vadd.f32 1e-05, %v4942_v54 }
 0xd80   : > { %v4934_v27 = vpop.xlane.xlu0 %4933  ;;  %v4962_v18 = vmul.f32 %v15863_v13, %v18391_v49 }
 0xd81   : > { %15870 = vrsqrt.f32 %v4953_v15  ;;  %v4944_v55 = vmul.f32 0.0625, %v4934_v27  ;;  %v4977_v2 = vmul.f32 %v12999_v12, %v4963_v34 }
 0xd82   : > { %15872 = vrsqrt.f32 %v4950_v44  ;;  %v4976_v19 = vmul.f32 %v12999_v12, %v4962_v18 }
 0xd83   : > { %v15865_v41 = vpop.eup %15864  ;;  %v4952_v22 = vadd.f32 1e-05, %v4944_v55  ;;  %v4991_v37 = vadd.f32 %v13000_v7, %v4977_v2 }
 0xd84   : > { %v4990_v26 = vadd.f32 %v13000_v7, %v4976_v19  ;;  %v4965_v61 = vmul.f32 %v15865_v41, %v18399_v48 }
 0xd85   : > { %15874 = vrsqrt.f32 %v4952_v22 }
 0xd86   : > { %13919 = vmatprep.mubr.msk.f32.mxu1 %vm2510_vm1, %v4990_v26  ;;  %v4979_v42 = vmul.f32 %v12999_v12, %v4965_v61 }
 0xd87   : > { %v15867_v1 = vpop.eup %15866  ;;  %13920 = vmatmul.mubr.msk.f32.vlgmr.msra.gmra.mrb[22].mxu1 %vm2510_vm1, %v4991_v37 }
 0xd88   : > { %v15869_v3 = vpop.eup %15868  ;;  %v4967_v21 = vmul.f32 %v15867_v1, %v18405_v17  ;;  %v4993_v62 = vadd.f32 %v13000_v7, %v4979_v42 }
 0xd89   : > { %v4964_v49 = vmul.f32 %v15869_v3, %v18408_v30 }
 0xd8a   : > { %v4981_v53 = vmul.f32 %v12999_v12, %v4967_v21 }
 0xd8b   : > { %v15871_v33 = vpop.eup %15870  ;;  %v4978_v4 = vmul.f32 %v12999_v12, %v4964_v49 }
 0xd8c   : > { %v15873_v24 = vpop.eup %15872  ;;  %v4969_v57 = vmul.f32 %v15871_v33, %v18416_v10  ;;  %v4995_v8 = vadd.f32 %v13000_v7, %v4981_v53 }
 0xd8d   : > { %v4992_v50 = vadd.f32 %v13000_v7, %v4978_v4  ;;  %v4966_v11 = vmul.f32 %v15873_v24, %v18420_v35 }
 0xd8e   : > { %v4983_v35 = vmul.f32 %v12999_v12, %v4969_v57 }
 0xd8f   : > { %v15875_v48 = vpop.eup %15874  ;;  %13922 = vmatprep.mubr.msk.f32.mxu1 %vm2510_vm1, %v4992_v50  ;;  %v4980_v52 = vmul.f32 %v12999_v12, %v4966_v11 }
 0xd90   : > { %13923 = vmatmul.mubr.msk.f32.gmra.mrb[24].mxu1 %vm2510_vm1, %v4993_v62  ;;  %v4968_v17 = vmul.f32 %v15875_v48, %v18429_v23  ;;  %v4997_v0 = vadd.f32 %v13000_v7, %v4983_v35  ;;  %v2661_v23 = vld [vmem:[%s19941_s13] sm:$0xff]  ;;  %s16832_s13 = sshll.u32 %s17052_s9, 4  ;;  %s16833_s13 = int_to_ptr.vmem [resolvable:$false] %s16832_s13 }
 0xd91   : > { %v4994_v30 = vadd.f32 %v13000_v7, %v4980_v52  ;;  %v14696_v29 = vpack.c.bf16 %v2662_v43, %v2661_v23  ;;  %s16834_s14 = scalar_lea.vmem %s16833_s13, 32 }
 0xd92   : > { %v4982_v32 = vmul.f32 %v12999_v12, %v4968_v17 }
 0xd93   : > { %13925 = vmatprep.mubr.msk.f32.mxu1 %vm2510_vm1, %v4994_v30  ;;  %14697 = vmatprep.subr.bf16.mxu1 %v14696_v29 }
 0xd94   : > { %13926 = vmatmul.mubr.msk.f32.gmra.mrb[26].mxu1 %vm2510_vm1, %v4995_v8  ;;  %v4996_v10 = vadd.f32 %v13000_v7, %v4982_v32 }
 0xd95   : > { %14699 = vmatpush3.bf16.msra.mxu1 %v14696_v29 }
 0xd96   : > { %13928 = vmatprep.mubr.msk.f32.mxu1 %vm2510_vm1, %v4996_v10  ;;  %14701 = vmatprep.subr.bf16.mxu1 %v14700_v51 }
 0xd98   : > { %13929 = vmatmul.mubr.msk.f32.gmra.mrb[28].mxu1 %vm2510_vm1, %v4997_v0 }
 0xd99   : > { %14703 = vmatpush3.bf16.msra.mxu1 %v14700_v51 }
 0xd9a   : > { %14705 = vmatprep.subr.bf16.mxu1 %v14704_v6 }
 0xd9d   : > { %14707 = vmatpush3.bf16.msra.mxu1 %v14704_v6 }
 0xd9e   : > { %14709 = vmatprep.subr.bf16.mxu1 %v14708_v39 }
 0xda1   : > { %14711 = vmatpush3.bf16.msra.mxu1 %v14708_v39 }
 0xe5a   : > { %v13921_v25 = vpop.f32.mrb[22].mxu1 }
 0xe5b   : > { %v18464_v47 = vadd.f32 %v13921_v25, %v13001_v60  ;;  %v5094_v54 = vpop.f32.mrb[23].mxu1 }
 0xe5c   : > { %v18466_v14 = vadd.f32 %v13001_v60, %v5094_v54 }
 0xe5d   : > { %v5134_v12 = vmul.f32 %v18464_v47, %v18464_v47 }
 0xe5e   : > { %v5133_v13 = vmul.f32 %v18466_v14, %v18466_v14 }
 0xe5f   : > { %v5142_v34 = vmul.f32 %v5134_v12, %v18464_v47 }
 0xe60   : > { %v5141_v15 = vmul.f32 %v5133_v13, %v18466_v14 }
 0xe61   : > { %v5150_v44 = vmul.f32 0.044715, %v5142_v34 }
 0xe62   : > { %v5149_v27 = vmul.f32 0.044715, %v5141_v15 }
 0xe63   : > { %v5158_v18 = vadd.f32 %v5150_v44, %v18464_v47  ;;  %v13924_v55 = vpop.f32.mrb[24].mxu1 }
 0xe64   : > { %v5157_v7 = vadd.f32 %v5149_v27, %v18466_v14  ;;  %v18476_v2 = vadd.f32 %v13924_v55, %v13001_v60  ;;  %v5104_v19 = vpop.f32.mrb[25].mxu1 }
 0xe65   : > { %v5166_v41 = vmul.f32 0.7978846, %v5158_v18  ;;  %v18478_v22 = vadd.f32 %v13001_v60, %v5104_v19 }
 0xe66   : > { %v5165_v26 = vmul.f32 0.7978846, %v5157_v7  ;;  %v5136_v37 = vmul.f32 %v18476_v2, %v18476_v2 }
 0xe67   : > { %15876 = vtanh.f32 %v5166_v41  ;;  %v5135_v61 = vmul.f32 %v18478_v22, %v18478_v22  ;;  %v13927_v1 = vpop.f32.mrb[26].mxu1 }
 0xe68   : > { %15878 = vtanh.f32 %v5165_v26  ;;  %v5144_v3 = vmul.f32 %v5136_v37, %v18476_v2  ;;  %v18485_v49 = vadd.f32 %v13927_v1, %v13001_v60  ;;  %v5114_v42 = vpop.f32.mrb[27].mxu1 }
 0xe69   : > { %v5143_v21 = vmul.f32 %v5135_v61, %v18478_v22  ;;  %v18488_v33 = vadd.f32 %v13001_v60, %v5114_v42 }
 0xe6a   : > { %v5152_v4 = vmul.f32 0.044715, %v5144_v3  ;;  %v5138_v24 = vmul.f32 %v18485_v49, %v18485_v49 }
 0xe6b   : > { %v5151_v50 = vmul.f32 0.044715, %v5143_v21  ;;  %v5137_v11 = vmul.f32 %v18488_v33, %v18488_v33  ;;  %v13930_v62 = vpop.f32.mrb[28].mxu1 }
 0xe6c   : > { %v5160_v53 = vadd.f32 %v5152_v4, %v18476_v2  ;;  %v5146_v57 = vmul.f32 %v5138_v24, %v18485_v49  ;;  %v18496_v48 = vadd.f32 %v13930_v62, %v13001_v60  ;;  %v5124_v52 = vpop.f32.mrb[29].mxu1 }
 0xe6d   : > { %v5159_v17 = vadd.f32 %v5151_v50, %v18478_v22  ;;  %v5145_v30 = vmul.f32 %v5137_v11, %v18488_v33  ;;  %v5125_v8 = vadd.f32 %v13001_v60, %v5124_v52 }
 0xe6e   : > { %v5168_v32 = vmul.f32 0.7978846, %v5160_v53  ;;  %v5154_v35 = vmul.f32 0.044715, %v5146_v57  ;;  %v5140_v10 = vmul.f32 %v18496_v48, %v18496_v48 }
 0xe6f   : > { %v5167_v0 = vmul.f32 0.7978846, %v5159_v17  ;;  %v5153_v23 = vmul.f32 0.044715, %v5145_v30  ;;  %v5139_v43 = vmul.f32 %v5125_v8, %v5125_v8  ;;  %v5383_v30 = vld [vmem:[%s19943_s22] sm:$0xff] }
 0xe70   : > { %15880 = vtanh.f32 %v5168_v32  ;;  %v5162_v29 = vadd.f32 %v5154_v35, %v18485_v49  ;;  %v5148_v31 = vmul.f32 %v5140_v10, %v18496_v48  ;;  %13975 = vmatprep.mubr.msk.f32.mxu0 %vm5211_vm4, %v5383_v30 }
 0xe71   : > { %v15877_v16 = vpop.eup %15876  ;;  %15882 = vtanh.f32 %v5167_v0  ;;  %v5161_v51 = vadd.f32 %v5153_v23, %v18488_v33  ;;  %v5147_v9 = vmul.f32 %v5139_v43, %v5125_v8 }
 0xe72   : > { %v15879_v20 = vpop.eup %15878  ;;  %v5182_v6 = vadd.f32 1.0, %v15877_v16  ;;  %v5170_v40 = vmul.f32 0.7978846, %v5162_v29  ;;  %v5156_v5 = vmul.f32 0.044715, %v5148_v31 }
 0xe73   : > { %v5169_v39 = vmul.f32 0.7978846, %v5161_v51  ;;  %v5155_v60 = vmul.f32 0.044715, %v5147_v9  ;;  %v5181_v25 = vadd.f32 1.0, %v15879_v20 }
 0xe74   : > { %v5190_v54 = vmul.f32 0.5, %v5182_v6  ;;  %15884 = vtanh.f32 %v5170_v40  ;;  %v5164_v12 = vadd.f32 %v5156_v5, %v18496_v48 }
 0xe75   : > { %15886 = vtanh.f32 %v5169_v39  ;;  %v5163_v13 = vadd.f32 %v5155_v60, %v5125_v8  ;;  %v5189_v34 = vmul.f32 0.5, %v5181_v25 }
 0xe76   : > { %v5172_v15 = vmul.f32 0.7978846, %v5164_v12  ;;  %v5198_v18 = vmul.f32 %v5190_v54, %v18464_v47 }
 0xe77   : > { %v5171_v44 = vmul.f32 0.7978846, %v5163_v13  ;;  %v5197_v27 = vmul.f32 %v5189_v34, %v18466_v14  ;;  %v5385_v13 = vld [vmem:[%s19943_s22 + $0x10] sm:$0xff]  ;;  %v5386_v34 = vld [vmem:[%s19943_s22 + $0x18] sm:$0xff] }
 0xe78   : > { %15888 = vtanh.f32 %v5172_v15  ;;  %v5387_v15 = vld [vmem:[%s19943_s22 + $0x20] sm:$0xff] }
 0xe79   : > { %15890 = vtanh.f32 %v5171_v44  ;;  %13947 = vmatprep.mubr.msk.f32.mxu1 %vm5211_vm4, %v5197_v27  ;;  %v5390_v44 = vld [vmem:[%s19943_s22 + $0x38] sm:$0xff] }
 0xe7a   : > { %v15881_v55 = vpop.eup %15880  ;;  %13948 = vmatmul.mubr.msk.f32.vlgmr.msra.gmra.mrb[30].mxu1 %vm5211_vm4, %v5198_v18 }
 0xe7b   : > { %v15883_v7 = vpop.eup %15882  ;;  %v5184_v19 = vadd.f32 1.0, %v15881_v55 }
 0xe7c   : > { %v5183_v41 = vadd.f32 1.0, %v15883_v7 }
 0xe7d   : > { %v5192_v26 = vmul.f32 0.5, %v5184_v19 }
 0xe7e   : > { %v15885_v37 = vpop.eup %15884  ;;  %v5191_v61 = vmul.f32 0.5, %v5183_v41 }
 0xe7f   : > { %v15887_v1 = vpop.eup %15886  ;;  %v5186_v3 = vadd.f32 1.0, %v15885_v37  ;;  %v5200_v47 = vmul.f32 %v5192_v26, %v18476_v2 }
 0xe80   : > { %v5199_v42 = vmul.f32 %v5191_v61, %v18478_v22  ;;  %v5185_v14 = vadd.f32 1.0, %v15887_v1 }
 0xe81   : > { %v5194_v21 = vmul.f32 0.5, %v5186_v3 }
 0xe82   : > { %v15889_v4 = vpop.eup %15888  ;;  %13950 = vmatprep.mubr.msk.f32.mxu1 %vm5211_vm4, %v5199_v42  ;;  %v5193_v24 = vmul.f32 0.5, %v5185_v14 }
 0xe83   : > { %v15891_v50 = vpop.eup %15890  ;;  %13951 = vmatmul.mubr.msk.f32.gmra.mrb[32].mxu1 %vm5211_vm4, %v5200_v47  ;;  %v5188_v11 = vadd.f32 1.0, %v15889_v4  ;;  %v5202_v57 = vmul.f32 %v5194_v21, %v18485_v49 }
 0xe84   : > { %v5201_v62 = vmul.f32 %v5193_v24, %v18488_v33  ;;  %v5187_v53 = vadd.f32 1.0, %v15891_v50  ;;  %v13010_v33 = vld [vmem:[%s19944_s7] ss:$0 sm:$0xff]  ;;  %s19945_s7 = sld [smem:[#allocation80_spill]] }
 0xe85   : > { %v5196_v22 = vmul.f32 0.5, %v5188_v11 }
 0xe86   : > { %13953 = vmatprep.mubr.msk.f32.mxu1 %vm5211_vm4, %v5201_v62  ;;  %v5195_v2 = vmul.f32 0.5, %v5187_v53 }
 0xe87   : > { %13954 = vmatmul.mubr.msk.f32.gmra.mrb[34].mxu1 %vm5211_vm4, %v5202_v57  ;;  %v5204_v17 = vmul.f32 %v5196_v22, %v18496_v48 }
 0xe88   : > { %v5203_v52 = vmul.f32 %v5195_v2, %v5125_v8 }
 0xe8a   : > { %13956 = vmatprep.mubr.msk.f32.mxu1 %vm5211_vm4, %v5203_v52  ;;  %s19946_s8 = smov %s19945_s7 }
 0xe8b   : > { %13957 = vmatmul.mubr.msk.f32.gmra.mrb[36].mxu1 %vm5211_vm4, %v5204_v17 }
 0xf4d   : > { %v13949_v32 = vpop.f32.mrb[30].mxu1 }
 0xf4e   : > { %v5308_v35 = vadd.f32 %v13949_v32, %v13010_v33  ;;  %v5302_v49 = vpop.f32.mrb[31].mxu1 }
 0xf4f   : > { %v5303_v10 = vadd.f32 %v13010_v33, %v5302_v49 }
 0xf50   : > { %v5342_v0 = vadd.f32 %v5308_v35, %v18349_v59 }
 0xf51   : > { %v5341_v23 = vadd.f32 %v5303_v10, %v18351_v58 }
 0xf53   : > { %v14712_v43 = vpack.c.bf16 %v5342_v0, %v5341_v23 }
 0xf55   : > { %14713 = vmatprep.subr.bf16.mxu0 %v14712_v43 }
 0xf56   : > { %v13952_v8 = vpop.f32.mrb[32].mxu1  ;;  %14715 = vmatpush3.bf16.msra.mxu0 %v14712_v43 }
 0xf57   : > { %v5318_v48 = vadd.f32 %v13952_v8, %v13010_v33  ;;  %v5312_v29 = vpop.f32.mrb[33].mxu1 }
 0xf58   : > { %v5313_v31 = vadd.f32 %v13010_v33, %v5312_v29 }
 0xf59   : > { %v5344_v16 = vadd.f32 %v5318_v48, %v18359_v63 }
 0xf5a   : > { %v5343_v51 = vadd.f32 %v5313_v31, %v18364_v28  ;;  %v13955_v9 = vpop.f32.mrb[34].mxu1 }
 0xf5b   : > { %v5328_v20 = vadd.f32 %v13955_v9, %v13010_v33  ;;  %v5322_v6 = vpop.f32.mrb[35].mxu1 }
 0xf5c   : > { %v5323_v40 = vadd.f32 %v13010_v33, %v5322_v6  ;;  %v14716_v5 = vpack.c.bf16 %v5344_v16, %v5343_v51 }
 0xf5d   : > { %v5346_v59 = vadd.f32 %v5328_v20, %v18367_v36 }
 0xf5e   : > { %v5345_v58 = vadd.f32 %v5323_v40, %v18372_v46  ;;  %v13958_v39 = vpop.f32.mrb[36].mxu1  ;;  %14717 = vmatprep.subr.bf16.mxu0 %v14716_v5  ;;  %v5384_v46 = vld [vmem:[%s19943_s22 + $0x8] sm:$0xff] }
 0xf5f   : > { %v5338_v60 = vadd.f32 %v13958_v39, %v13010_v33  ;;  %v5332_v25 = vpop.f32.mrb[37].mxu1  ;;  %14719 = vmatpush3.bf16.msra.mxu0 %v14716_v5 }
 0xf60   : > { %v5333_v63 = vadd.f32 %v13010_v33, %v5332_v25  ;;  %v14720_v28 = vpack.c.bf16 %v5346_v59, %v5345_v58 }
 0xf61   : > { %v5348_v54 = vadd.f32 %v5338_v60, %v18377_v38  ;;  %v5388_v38 = vld [vmem:[%s19943_s22 + $0x28] sm:$0xff] }
 0xf62   : > { %v5347_v12 = vadd.f32 %v5333_v63, %v18381_v56  ;;  %14721 = vmatprep.subr.bf16.mxu0 %v14720_v28  ;;  %v5389_v56 = vld [vmem:[%s19943_s22 + $0x30] sm:$0xff] }
 0xf63   : > { %14723 = vmatpush3.bf16.msra.mxu0 %v14720_v28 }
 0xf64   : > { %v14724_v36 = vpack.c.bf16 %v5348_v54, %v5347_v12 }
 0xf66   : > { %14725 = vmatprep.subr.bf16.mxu0 %v14724_v36 }
 0xf67   : > { %14727 = vmatpush3.bf16.msra.mxu0 %v14724_v36 }
 0xf6a   : > { %13976 = vmatmul.mubr.msk.f32.vlgmr.msra.gmra.mrb[34].mxu0 %vm5211_vm4, %v5384_v46  ;;  %v5351_v46 = vld [vmem:[%s19945_s7] sm:$0xff]  ;;  %s19948_s7 = sld [smem:[#allocation79_spill]] }
 0xf6b   : > { %13978 = vmatprep.mubr.msk.f32.mxu0 %vm5211_vm4, %v5385_v13  ;;  %v5352_v13 = vld [vmem:[%s19946_s8 + $0x8] sm:$0xff] }
 0xf6e   : > { %13979 = vmatmul.mubr.msk.f32.gmra.mrb[36].mxu0 %vm5211_vm4, %v5386_v34  ;;  %v14728_v34 = vpack.c.bf16 %v5352_v13, %v5351_v46 }
 0xf6f   : > { %13981 = vmatprep.mubr.msk.f32.mxu0 %vm5211_vm4, %v5387_v15 }
 0xf70   : > { %14729 = vmatprep.subr.bf16.mxu1 %v14728_v34 }
 0xf71   : > { %14731 = vmatpush3.bf16.msra.mxu1 %v14728_v34 }
 0xf72   : > { %13982 = vmatmul.mubr.msk.f32.gmra.mrb[38].mxu0 %vm5211_vm4, %v5388_v38 }
 0xf73   : > { %13984 = vmatprep.mubr.msk.f32.mxu0 %vm5211_vm4, %v5389_v56 }
 0xf76   : > { %13985 = vmatmul.mubr.msk.f32.gmra.mrb[40].mxu0 %vm5211_vm4, %v5390_v44 }
0x103d   : > { %v18546_v27 = vpop.f32.mrb[34].mxu0 }
0x103e   : > { %v18548_v18 = vpop.f32.mrb[35].mxu0  ;;  %v5531_v55 = vsel %vm2510_vm1, %v18546_v27, 0.0 }
0x103f   : > { %5532 = vadd.xlane.f32.xlu1 %v5531_v55  ;;  %v5528_v7 = vsel %vm2510_vm1, %v18548_v18, 0.0 }
0x1040   : > { %5529 = vadd.xlane.f32.xlu0 %v5528_v7 }
0x1041   : > { %v18554_v19 = vpop.f32.mrb[36].mxu0 }
0x1042   : > { %v18556_v41 = vpop.f32.mrb[37].mxu0  ;;  %v5537_v26 = vsel %vm2510_vm1, %v18554_v19, 0.0 }
0x1043   : > { %5538 = vadd.xlane.f32.xlu1 %v5537_v26  ;;  %v5534_v37 = vsel %vm2510_vm1, %v18556_v41, 0.0 }
0x1044   : > { %5535 = vadd.xlane.f32.xlu0 %v5534_v37 }
0x1045   : > { %v18562_v61 = vpop.f32.mrb[38].mxu0 }
0x1046   : > { %v18564_v1 = vpop.f32.mrb[39].mxu0  ;;  %v5543_v3 = vsel %vm2510_vm1, %v18562_v61, 0.0 }
0x1047   : > { %5544 = vadd.xlane.f32.xlu1 %v5543_v3  ;;  %v5540_v42 = vsel %vm2510_vm1, %v18564_v1, 0.0 }
0x1048   : > { %5541 = vadd.xlane.f32.xlu0 %v5540_v42 }
0x1049   : > { %v18570_v14 = vpop.f32.mrb[40].mxu0 }
0x104a   : > { %v18572_v47 = vpop.f32.mrb[41].mxu0  ;;  %v5549_v21 = vsel %vm2510_vm1, %v18570_v14, 0.0 }
0x104b   : > { %5550 = vadd.xlane.f32.xlu1 %v5549_v21  ;;  %v5546_v4 = vsel %vm2510_vm1, %v18572_v47, 0.0 }
0x104c   : > { %5547 = vadd.xlane.f32.xlu0 %v5546_v4 }
0x10cc   : > { %v5533_v24 = vpop.xlane.xlu1 %5532 }
0x10cd   : > { %v5553_v50 = vmul.f32 0.0625, %v5533_v24  ;;  %v5530_v11 = vpop.xlane.xlu0 %5529 }
0x10ce   : > { %v5552_v62 = vmul.f32 0.0625, %v5530_v11 }
0x10cf   : > { %v18579_v53 = vsub.f32 %v18546_v27, %v5553_v50 }
0x10d0   : > { %v18582_v57 = vsub.f32 %v18548_v18, %v5552_v62  ;;  %v5539_v22 = vpop.xlane.xlu1 %5538 }
0x10d1   : > { %v5555_v2 = vmul.f32 0.0625, %v5539_v22  ;;  %v5536_v52 = vpop.xlane.xlu0 %5535  ;;  %v5569_v17 = vmul.f32 %v18579_v53, %v18579_v53 }
0x10d2   : > { %v5554_v30 = vmul.f32 0.0625, %v5536_v52  ;;  %v5568_v33 = vmul.f32 %v18582_v57, %v18582_v57 }
0x10d3   : > { %v18589_v32 = vsub.f32 %v18554_v19, %v5555_v2  ;;  %v5579_v35 = vsel %vm2510_vm1, %v5569_v17, 0.0 }
0x10d4   : > { %v18593_v49 = vsub.f32 %v18556_v41, %v5554_v30  ;;  %v5545_v10 = vpop.xlane.xlu1 %5544  ;;  %5580 = vadd.xlane.f32.xlu1 %v5579_v35  ;;  %v5576_v0 = vsel %vm2510_vm1, %v5568_v33, 0.0 }
0x10d5   : > { %v5557_v23 = vmul.f32 0.0625, %v5545_v10  ;;  %v5542_v43 = vpop.xlane.xlu0 %5541  ;;  %5577 = vadd.xlane.f32.xlu0 %v5576_v0  ;;  %v5571_v8 = vmul.f32 %v18589_v32, %v18589_v32  ;;  %v13027_v10 = vld [vmem:[%s19947_s1] ss:$0 sm:$0xff]  ;;  %s19949_s1 = smov 120  }
0x10d6   : > { %v5556_v48 = vmul.f32 0.0625, %v5542_v43  ;;  %v5570_v29 = vmul.f32 %v18593_v49, %v18593_v49 }
0x10d7   : > { %v18601_v31 = vsub.f32 %v18562_v61, %v5557_v23  ;;  %v5585_v16 = vsel %vm2510_vm1, %v5571_v8, 0.0 }
0x10d8   : > { %v18605_v51 = vsub.f32 %v18564_v1, %v5556_v48  ;;  %5586 = vadd.xlane.f32.xlu1 %v5585_v16  ;;  %v5551_v9 = vpop.xlane.xlu1 %5550  ;;  %v5582_v20 = vsel %vm2510_vm1, %v5570_v29, 0.0  ;;  %v13028_v16 = vld [vmem:[%s19948_s7] ss:$0 sm:$0xff]  ;;  %s19950_s7 = smov 112  }
0x10d9   : > { %v5559_v6 = vmul.f32 0.0625, %v5551_v9  ;;  %5583 = vadd.xlane.f32.xlu0 %v5582_v20  ;;  %v5548_v40 = vpop.xlane.xlu0 %5547  ;;  %v5573_v5 = vmul.f32 %v18601_v31, %v18601_v31 }
0x10da   : > { %v5558_v59 = vmul.f32 0.0625, %v5548_v40  ;;  %v5572_v58 = vmul.f32 %v18605_v51, %v18605_v51 }
0x10db   : > { %v18613_v39 = vsub.f32 %v18570_v14, %v5559_v6  ;;  %v5591_v60 = vsel %vm2510_vm1, %v5573_v5, 0.0 }
0x10dc   : > { %v18617_v25 = vsub.f32 %v18572_v47, %v5558_v59  ;;  %5592 = vadd.xlane.f32.xlu1 %v5591_v60  ;;  %v5588_v63 = vsel %vm2510_vm1, %v5572_v58, 0.0 }
0x10dd   : > { %5589 = vadd.xlane.f32.xlu0 %v5588_v63  ;;  %v5575_v28 = vmul.f32 %v18613_v39, %v18613_v39 }
0x10de   : > { %v5574_v54 = vmul.f32 %v18617_v25, %v18617_v25 }
0x10df   : > { %v5597_v12 = vsel %vm2510_vm1, %v5575_v28, 0.0 }
0x10e0   : > { %5598 = vadd.xlane.f32.xlu1 %v5597_v12  ;;  %v5594_v36 = vsel %vm2510_vm1, %v5574_v54, 0.0 }
0x10e1   : > { %5595 = vadd.xlane.f32.xlu0 %v5594_v36 }
0x1161   : > { %v5581_v15 = vpop.xlane.xlu1 %5580 }
0x1162   : > { %v5601_v38 = vmul.f32 0.0625, %v5581_v15  ;;  %v5578_v56 = vpop.xlane.xlu0 %5577 }
0x1163   : > { %v5600_v44 = vmul.f32 0.0625, %v5578_v56 }
0x1164   : > { %v5609_v55 = vadd.f32 1e-05, %v5601_v38 }
0x1165   : > { %v5608_v7 = vadd.f32 1e-05, %v5600_v44  ;;  %v5587_v26 = vpop.xlane.xlu1 %5586 }
0x1166   : > { %15892 = vrsqrt.f32 %v5609_v55  ;;  %v5603_v37 = vmul.f32 0.0625, %v5587_v26  ;;  %v5584_v3 = vpop.xlane.xlu0 %5583 }
0x1167   : > { %15894 = vrsqrt.f32 %v5608_v7  ;;  %v5602_v42 = vmul.f32 0.0625, %v5584_v3  ;;  %v13029_v7 = vld [vmem:[#allocation3] ss:$0 sm:$0xff] }
0x1168   : > { %v5611_v21 = vadd.f32 1e-05, %v5603_v37 }
0x1169   : > { %v5610_v4 = vadd.f32 1e-05, %v5602_v42  ;;  %v5593_v24 = vpop.xlane.xlu1 %5592 }
0x116a   : > { %15896 = vrsqrt.f32 %v5611_v21  ;;  %v5605_v50 = vmul.f32 0.0625, %v5593_v24  ;;  %v5590_v11 = vpop.xlane.xlu0 %5589 }
0x116b   : > { %15898 = vrsqrt.f32 %v5610_v4  ;;  %v5604_v62 = vmul.f32 0.0625, %v5590_v11 }
0x116c   : > { %v5613_v22 = vadd.f32 1e-05, %v5605_v50 }
0x116d   : > { %v5612_v2 = vadd.f32 1e-05, %v5604_v62  ;;  %v5599_v52 = vpop.xlane.xlu1 %5598 }
0x116e   : > { %15900 = vrsqrt.f32 %v5613_v22  ;;  %v5607_v17 = vmul.f32 0.0625, %v5599_v52  ;;  %v5596_v30 = vpop.xlane.xlu0 %5595 }
0x116f   : > { %15902 = vrsqrt.f32 %v5612_v2  ;;  %v5606_v33 = vmul.f32 0.0625, %v5596_v30 }
0x1170   : > { %v15893_v35 = vpop.eup %15892  ;;  %v5615_v0 = vadd.f32 1e-05, %v5607_v17 }
0x1171   : > { %v15895_v23 = vpop.eup %15894  ;;  %v5625_v43 = vmul.f32 %v15893_v35, %v18579_v53  ;;  %v5614_v8 = vadd.f32 1e-05, %v5606_v33 }
0x1172   : > { %15904 = vrsqrt.f32 %v5615_v0  ;;  %v5624_v48 = vmul.f32 %v15895_v23, %v18582_v57 }
0x1173   : > { %v5639_v29 = vmul.f32 %v13027_v10, %v5625_v43  ;;  %15906 = vrsqrt.f32 %v5614_v8 }
0x1174   : > { %v15897_v9 = vpop.eup %15896  ;;  %v5638_v20 = vmul.f32 %v13027_v10, %v5624_v48 }
0x1175   : > { %v15899_v6 = vpop.eup %15898  ;;  %v5627_v40 = vmul.f32 %v15897_v9, %v18589_v32  ;;  %v5653_v58 = vadd.f32 %v13028_v16, %v5639_v29 }
0x1176   : > { %v5652_v5 = vadd.f32 %v13028_v16, %v5638_v20  ;;  %v5626_v59 = vmul.f32 %v15899_v6, %v18593_v49 }
0x1177   : > { %v5641_v60 = vmul.f32 %v13027_v10, %v5627_v40 }
0x1178   : > { %v15901_v63 = vpop.eup %15900  ;;  %13991 = vmatprep.mubr.msk.f32.mxu1 %vm2510_vm1, %v5652_v5  ;;  %v5640_v53 = vmul.f32 %v13027_v10, %v5626_v59 }
0x1179   : > { %v15903_v28 = vpop.eup %15902  ;;  %13992 = vmatmul.mubr.msk.f32.vlgmr.msra.gmra.mrb[38].mxu1 %vm2510_vm1, %v5653_v58  ;;  %v5629_v57 = vmul.f32 %v15901_v63, %v18601_v31  ;;  %v5655_v36 = vadd.f32 %v13028_v16, %v5641_v60 }
0x117a   : > { %v5654_v54 = vadd.f32 %v13028_v16, %v5640_v53  ;;  %v5628_v12 = vmul.f32 %v15903_v28, %v18605_v51 }
0x117b   : > { %v5643_v46 = vmul.f32 %v13027_v10, %v5629_v57 }
0x117c   : > { %v15905_v32 = vpop.eup %15904  ;;  %13994 = vmatprep.mubr.msk.f32.mxu1 %vm2510_vm1, %v5654_v54  ;;  %v5642_v49 = vmul.f32 %v13027_v10, %v5628_v12 }
0x117d   : > { %v15907_v13 = vpop.eup %15906  ;;  %13995 = vmatmul.mubr.msk.f32.gmra.mrb[40].mxu1 %vm2510_vm1, %v5655_v36  ;;  %v5631_v34 = vmul.f32 %v15905_v32, %v18613_v39  ;;  %v5657_v56 = vadd.f32 %v13028_v16, %v5643_v46 }
0x117e   : > { %v5656_v15 = vadd.f32 %v13028_v16, %v5642_v49  ;;  %v5630_v38 = vmul.f32 %v15907_v13, %v18617_v25 }
0x117f   : > { %v5645_v44 = vmul.f32 %v13027_v10, %v5631_v34 }
0x1180   : > { %13997 = vmatprep.mubr.msk.f32.mxu1 %vm2510_vm1, %v5656_v15  ;;  %v5644_v31 = vmul.f32 %v13027_v10, %v5630_v38 }
0x1181   : > { %13998 = vmatmul.mubr.msk.f32.gmra.mrb[42].mxu1 %vm2510_vm1, %v5657_v56  ;;  %v5659_v55 = vadd.f32 %v13028_v16, %v5645_v44 }
0x1182   : > { %v5658_v51 = vadd.f32 %v13028_v16, %v5644_v31 }
0x1184   : > { %14000 = vmatprep.mubr.msk.f32.mxu1 %vm2510_vm1, %v5658_v51 }
0x1185   : > { %14001 = vmatmul.mubr.msk.f32.gmra.mrb[44].mxu1 %vm2510_vm1, %v5659_v55 }
0x124c   : > { %v13993_v26 = vpop.f32.mrb[38].mxu1 }
0x124d   : > { %v18646_v37 = vadd.f32 %v13993_v26, %v13029_v7  ;;  %v5756_v39 = vpop.f32.mrb[39].mxu1 }
0x124e   : > { %v5757_v3 = vadd.f32 %v13029_v7, %v5756_v39 }
0x124f   : > { %5805 = vrot.lane.b32.xlu1 %v18646_v37, %s19949_s1  ;;  %v5828_v44 = vmul.f32 0.35355338, %v18646_v37 }
0x1250   : > { %5803 = vrot.lane.b32.xlu0 %v5757_v3, %s19949_s1  ;;  %v13996_v25 = vpop.f32.mrb[40].mxu1  ;;  %v5827_v42 = vmul.f32 0.35355338, %v5757_v3  ;;  %v15604_v21 = vpack.i.bf16 %v18646_v37, %v5757_v3 }
0x1251   : > { %v18652_v4 = vadd.f32 %v13996_v25, %v13029_v7  ;;  %v5766_v24 = vpop.f32.mrb[41].mxu1 }
0x1252   : > { %v5767_v50 = vadd.f32 %v13029_v7, %v5766_v24  ;;  %14007 = vmatprep.mubr.msk.f32.mxu0 %vm2989_vm2, %v5827_v42 }
0x1253   : > { %5809 = vrot.lane.b32.xlu1 %v18652_v4, %s19949_s1  ;;  %v5830_v51 = vmul.f32 0.35355338, %v18652_v4 }
0x1254   : > { %v13999_v11 = vpop.f32.mrb[42].mxu1  ;;  %v5829_v62 = vmul.f32 0.35355338, %v5767_v50  ;;  %v15609_v22 = vpack.i.bf16 %v18652_v4, %v5767_v50 }
0x1255   : > { %v18658_v2 = vadd.f32 %v13999_v11, %v13029_v7  ;;  %v5776_v52 = vpop.f32.mrb[43].mxu1 }
0x1256   : > { %v5777_v17 = vadd.f32 %v13029_v7, %v5776_v52  ;;  %14014 = vmatprep.mubr.msk.f32.mxu1 %vm2989_vm2, %v5829_v62 }
0x1257   : > { %5807 = vrot.lane.b32.xlu1 %v5767_v50, %s19949_s1 }
0x1258   : > { %5811 = vrot.lane.b32.xlu0 %v5777_v17, %s19949_s1  ;;  %v14002_v30 = vpop.f32.mrb[44].mxu1  ;;  %v15614_v33 = vpack.i.bf16 %v18658_v2, %v5777_v17  ;;  %v5831_v31 = vmul.f32 0.35355338, %v5777_v17 }
0x1259   : > { %v18664_v35 = vadd.f32 %v14002_v30, %v13029_v7  ;;  %v5786_v10 = vpop.f32.mrb[45].mxu1 }
0x125a   : > { %v5787_v0 = vadd.f32 %v13029_v7, %v5786_v10  ;;  %v5832_v7 = vmul.f32 0.35355338, %v18658_v2 }
0x125b   : > { %5813 = vrot.lane.b32.xlu1 %v18658_v2, %s19949_s1  ;;  %v5834_v37 = vmul.f32 0.35355338, %v18664_v35 }
0x125c   : > { %5815 = vrot.lane.b32.xlu0 %v5787_v0, %s19949_s1  ;;  %v15619_v23 = vpack.i.bf16 %v18664_v35, %v5787_v0  ;;  %v5833_v55 = vmul.f32 0.35355338, %v5787_v0 }
0x125f   : > { %5817 = vrot.lane.b32.xlu1 %v18664_v35, %s19949_s1 }
0x1260   : > { %15605 = vrot.lane.b32.xlu0 %v15604_v21, %s19950_s7 }
0x1263   : > { %15610 = vrot.lane.b32.xlu1 %v15609_v22, %s19950_s7 }
0x1264   : > { %15615 = vrot.lane.b32.xlu0 %v15614_v33, %s19950_s7 }
0x1267   : > { %15620 = vrot.lane.b32.xlu1 %v15619_v23, %s19950_s7 }
0x12c1   : > { %v18676_v43 = vpop.permute.xlu1 %5805 }
0x12c2   : > { %v5804_v8 = vpop.permute.xlu0 %5803  ;;  %v5836_v62 = vmul.f32 0.35355338, %v18676_v43 }
0x12c3   : > { %v18679_v48 = vpack.i.bf16 %v18676_v43, %v5804_v8  ;;  %v5835_v26 = vmul.f32 0.35355338, %v5804_v8 }
0x12c5   : > { %v18681_v29 = vpop.permute.xlu1 %5809  ;;  %15625 = vrot.lane.b32.xlu0 %v18679_v48, %s19950_s7 }
0x12c6   : > { %v5838_v8 = vmul.f32 0.35355338, %v18681_v29 }
0x12c9   : > { %v5808_v16 = vpop.permute.xlu1 %5807 }
0x12ca   : > { %v18686_v9 = vpack.i.bf16 %v18681_v29, %v5808_v16  ;;  %v18688_v20 = vpop.permute.xlu0 %5811  ;;  %v5837_v39 = vmul.f32 0.35355338, %v5808_v16 }
0x12cb   : > { %v5839_v2 = vmul.f32 0.35355338, %v18688_v20 }
0x12cc   : > { %15630 = vrot.lane.b32.xlu1 %v18686_v9, %s19950_s7 }
0x12cd   : > { %v18692_v6 = vpop.permute.xlu1 %5813 }
0x12ce   : > { %v18696_v40 = vpack.i.bf16 %v18692_v6, %v18688_v20  ;;  %v18698_v5 = vpop.permute.xlu0 %5815 }
0x12d0   : > { %15635 = vrot.lane.b32.xlu0 %v18696_v40, %s19950_s7 }
0x12d1   : > { %v18702_v59 = vpop.permute.xlu1 %5817 }
0x12d2   : > { %v18706_v58 = vpack.i.bf16 %v18702_v59, %v18698_v5  ;;  %v15606_v60 = vpop.permute.xlu0 %15605 }
0x12d3   : > { %v15608_v63 = vunpack.i.h.bf16 %v15606_v60  ;;  %v15607_v53 = vunpack.i.l.bf16 %v15606_v60 }
0x12d4   : > { %15645 = vrot.lane.b32.xlu0 %v15604_v21, %s19951_s3  ;;  %15640 = vrot.lane.b32.xlu1 %v18706_v58, %s19950_s7 }
0x12d5   : > { %v14732_v28 = vpack.c.bf16 %v15608_v63, %v15607_v53  ;;  %v15611_v57 = vpop.permute.xlu1 %15610  ;;  %v5841_v63 = vmul.f32 0.35355338, %v18698_v5 }
0x12d6   : > { %v15613_v54 = vunpack.i.h.bf16 %v15611_v57  ;;  %v15612_v12 = vunpack.i.l.bf16 %v15611_v57  ;;  %v15616_v36 = vpop.permute.xlu0 %15615  ;;  %v5840_v57 = vmul.f32 0.35355338, %v18692_v6 }
0x12d7   : > { %v15618_v46 = vunpack.i.h.bf16 %v15616_v36  ;;  %v15617_v32 = vunpack.i.l.bf16 %v15616_v36  ;;  %14734 = vmatprep.subr.msk.bf16.mxu0 %vm18068_vm3, %v14732_v28  ;;  %v5842_v36 = vmul.f32 0.35355338, %v18702_v59 }
0x12d8   : > { %v14738_v49 = vpack.c.bf16 %v15613_v54, %v15612_v12  ;;  %15650 = vrot.lane.b32.xlu1 %v15609_v22, %s19951_s3  ;;  %14737 = vmatpush3.bf16.xpose.msk.msra.mxu0 %vm18068_vm3, %v14732_v28 }
0x12d9   : > { %v14744_v13 = vpack.c.bf16 %v15618_v46, %v15617_v32  ;;  %v15621_v34 = vpop.permute.xlu1 %15620 }
0x12da   : > { %v15623_v15 = vunpack.i.h.bf16 %v15621_v34  ;;  %v15622_v38 = vunpack.i.l.bf16 %v15621_v34  ;;  %14740 = vmatprep.subr.msk.bf16.mxu1 %vm18068_vm3, %v14738_v49  ;;  %v5355_v34 = vld [vmem:[%s19952_s4 + $0x8] sm:$0xff] }
0x12db   : > { %14743 = vmatpush3.bf16.xpose.msk.msra.mxu1 %vm18068_vm3, %v14738_v49  ;;  %14746 = vmatprep.subr.msk.bf16.mxu0 %vm18068_vm3, %v14744_v13 }
0x12dc   : > { %v14750_v56 = vpack.c.bf16 %v15623_v15, %v15622_v38  ;;  %15655 = vrot.lane.b32.xlu1 %v15614_v33, %s19951_s3  ;;  %v5354_v15 = vld [vmem:[%s19952_s4] sm:$0xff]  ;;  %v5376_v38 = vld [vmem:[%s19953_s5 + $0x8] sm:$0xff] }
0x12de   : > { %14752 = vmatprep.subr.msk.bf16.mxu1 %vm18068_vm3, %v14750_v56 }
0x12df   : > { %14008 = vmatmul.mubr.msk.f32.vlgmr.msra.gmra.mrb[42].mxu0 %vm2989_vm2, %v5828_v44  ;;  %v5375_v44 = vld [vmem:[%s19953_s5] sm:$0xff] }
0x12e0   : > { %15660 = vrot.lane.b32.xlu1 %v15619_v23, %s19951_s3  ;;  %14749 = vmatpush3.bf16.xpose.msk.msra.mxu0 %vm18068_vm3, %v14744_v13 }
0x12e1   : > { %14021 = vmatprep.mubr.msk.f32.mxu0 %vm2989_vm2, %v5831_v31 }
0x12e2   : > { %14015 = vmatmul.mubr.msk.f32.vlgmr.msra.gmra.mrb[46].mxu1 %vm2989_vm2, %v5830_v51 }
0x12e3   : > { %14755 = vmatpush3.bf16.xpose.msk.msra.mxu1 %vm18068_vm3, %v14750_v56  ;;  %14028 = vmatprep.mubr.msk.f32.mxu1 %vm2989_vm2, %v5833_v55 }
0x12e7   : > { %14022 = vmatmul.mubr.msk.f32.vlgmr.msra.gmra.mrb[44].mxu0 %vm2989_vm2, %v5832_v7  ;;  %v5378_v7 = vld [vmem:[%s19953_s5 + $0x18] sm:$0xff] }
0x12e8   : > { %14035 = vmatprep.mubr.msk.f32.mxu0 %vm2989_vm2, %v5835_v26 }
0x12ea   : > { %14029 = vmatmul.mubr.msk.f32.vlgmr.msra.gmra.mrb[48].mxu1 %vm2989_vm2, %v5834_v37 }
0x12eb   : > { %14042 = vmatprep.mubr.msk.f32.mxu1 %vm2989_vm2, %v5837_v39 }
0x1337   : > { %v15626_v3 = vpop.permute.xlu0 %15625 }
0x1338   : > { %v15628_v25 = vunpack.i.h.bf16 %v15626_v3  ;;  %v15627_v42 = vunpack.i.l.bf16 %v15626_v3 }
0x133a   : > { %v14756_v21 = vpack.c.bf16 %v15628_v25, %v15627_v42 }
0x133c   : > { %14758 = vmatprep.subr.msk.bf16.mxu0 %vm18068_vm3, %v14756_v21 }
0x133d   : > { %14761 = vmatpush3.bf16.xpose.msk.msra.mxu0 %vm18068_vm3, %v14756_v21 }
0x133e   : > { %v15631_v4 = vpop.permute.xlu1 %15630 }
0x133f   : > { %v15633_v24 = vunpack.i.h.bf16 %v15631_v4  ;;  %v15632_v50 = vunpack.i.l.bf16 %v15631_v4 }
0x1341   : > { %v14762_v11 = vpack.c.bf16 %v15633_v24, %v15632_v50  ;;  %v5377_v24 = vld [vmem:[%s19953_s5 + $0x10] sm:$0xff]  ;;  %v5380_v50 = vld [vmem:[%s19953_s5 + $0x28] sm:$0xff] }
0x1342   : > { %v15636_v22 = vpop.permute.xlu0 %15635 }
0x1343   : > { %v15638_v52 = vunpack.i.h.bf16 %v15636_v22  ;;  %v15637_v17 = vunpack.i.l.bf16 %v15636_v22  ;;  %14764 = vmatprep.subr.msk.bf16.mxu1 %vm18068_vm3, %v14762_v11 }
0x1344   : > { %14036 = vmatmul.mubr.msk.f32.vlgmr.msra.gmra.mrb[46].mxu0 %vm2989_vm2, %v5836_v62  ;;  %14767 = vmatpush3.bf16.xpose.msk.msra.mxu1 %vm18068_vm3, %v14762_v11 }
0x1345   : > { %v14768_v30 = vpack.c.bf16 %v15638_v52, %v15637_v17  ;;  %14049 = vmatprep.mubr.msk.f32.mxu0 %vm2989_vm2, %v5839_v2 }
0x1346   : > { %v15641_v33 = vpop.permute.xlu1 %15640  ;;  %v15646_v35 = vpop.permute.xlu0 %15645 }
0x1347   : > { %v15643_v10 = vunpack.i.h.bf16 %v15641_v33  ;;  %v15642_v0 = vunpack.i.l.bf16 %v15641_v33  ;;  %v15648_v23 = vunpack.i.h.bf16 %v15646_v35  ;;  %v15647_v43 = vunpack.i.l.bf16 %v15646_v35  ;;  %14770 = vmatprep.subr.msk.bf16.mxu0 %vm18068_vm3, %v14768_v30  ;;  %v5379_v33 = vld [vmem:[%s19953_s5 + $0x20] sm:$0xff] }
0x1348   : > { %14773 = vmatpush3.bf16.xpose.msk.msra.mxu0 %vm18068_vm3, %v14768_v30 }
0x1349   : > { %v14774_v16 = vpack.c.bf16 %v15643_v10, %v15642_v0  ;;  %v14780_v20 = vpack.c.bf16 %v15648_v23, %v15647_v43 }
0x134a   : > { %v15651_v60 = vpop.permute.xlu1 %15650 }
0x134b   : > { %v15653_v53 = vunpack.i.h.bf16 %v15651_v60  ;;  %v15652_v28 = vunpack.i.l.bf16 %v15651_v60  ;;  %14043 = vmatmul.mubr.msk.f32.vlgmr.msra.gmra.mrb[50].mxu1 %vm2989_vm2, %v5838_v8  ;;  %14776 = vmatprep.subr.msk.bf16.mxu1 %vm18068_vm3, %v14774_v16 }
0x134c   : > { %14781 = vmatprep.subr.bf16.mxu0 %v14780_v20  ;;  %14779 = vmatpush3.bf16.xpose.msk.msra.mxu1 %vm18068_vm3, %v14774_v16  ;;  %v5382_v16 = vld [vmem:[%s19953_s5 + $0x38] sm:$0xff] }
0x134d   : > { %14056 = vmatprep.mubr.msk.f32.mxu1 %vm2989_vm2, %v5841_v63  ;;  %v14784_v29 = vpack.c.bf16 %v15653_v53, %v15652_v28  ;;  %v5381_v53 = vld [vmem:[%s19953_s5 + $0x30] sm:$0xff]  ;;  %s19958_s5 = sld [smem:[#allocation94_spill]] }
0x134e   : > { %v15656_v54 = vpop.permute.xlu1 %15655 }
0x134f   : > { %v15658_v12 = vunpack.i.h.bf16 %v15656_v54  ;;  %v15657_v5 = vunpack.i.l.bf16 %v15656_v54  ;;  %14050 = vmatmul.mubr.msk.f32.vlgmr.msra.gmra.mrb[48].mxu0 %vm2989_vm2, %v5840_v57  ;;  %14785 = vmatprep.subr.bf16.mxu1 %v14784_v29  ;;  %v5357_v54 = vld [vmem:[%s19952_s4 + $0x18] sm:$0xff] }
0x1350   : > { %14783 = vmatpush3.bf16.msra.mxu0 %v14780_v20 }
0x1351   : > { %v18769_v46 = vpack.c.bf16 %v15658_v12, %v15657_v5  ;;  %v5356_v12 = vld [vmem:[%s19952_s4 + $0x10] sm:$0xff]  ;;  %s19954_s4 = sld [smem:[#allocation83_spill]] }
0x1352   : > { %v15661_v32 = vpop.permute.xlu1 %15660 }
0x1353   : > { %v15663_v6 = vunpack.i.h.bf16 %v15661_v32  ;;  %v15662_v49 = vunpack.i.l.bf16 %v15661_v32  ;;  %14057 = vmatmul.mubr.msk.f32.vlgmr.msra.gmra.mrb[52].mxu1 %vm2989_vm2, %v5842_v36  ;;  %14789 = vmatprep.subr.bf16.mxu0 %v18769_v46 }
0x1354   : > { %14787 = vmatpush3.bf16.msra.mxu1 %v14784_v29 }
0x1355   : > { %v18773_v13 = vpack.c.bf16 %v15663_v6, %v15662_v49 }
0x1357   : > { %14793 = vmatprep.subr.bf16.mxu1 %v18773_v13 }
0x13b2   : > { %v14009_v56 = vpop.f32.mrb[42].mxu0 }
0x13b3   : > { %v6556_v59 = vadd.f32 %v14009_v56, %v5355_v34  ;;  %v5923_v31 = vpop.f32.mrb[43].mxu0 }
0x13b4   : > { %v6555_v51 = vadd.f32 %v5923_v31, %v5354_v15 }
0x13b5   : > { %v18780_v55 = vadd.f32 %v6556_v59, %v5376_v38  ;;  %v14016_v26 = vpop.f32.mrb[46].mxu1 }
0x13b6   : > { %v18783_v37 = vadd.f32 %v6555_v51, %v5375_v44  ;;  %v6558_v39 = vadd.f32 %v14016_v26, %v5355_v34  ;;  %v6012_v3 = vpop.f32.mrb[47].mxu1 }
0x13b7   : > { %v6590_v25 = vsel %vm2510_vm1, %v18780_v55, -inf  ;;  %v6557_v21 = vadd.f32 %v6012_v3, %v5354_v15 }
0x13b8   : > { %v18787_v42 = vadd.f32 %v6558_v39, %v5378_v7  ;;  %6591 = vmax.xlane.f32.xlu1 %v6590_v25  ;;  %v6587_v4 = vsel %vm2510_vm1, %v18783_v37, -inf }
0x13b9   : > { %6588 = vmax.xlane.f32.xlu0 %v6587_v4  ;;  %v18793_v2 = vadd.f32 %v6557_v21, %v5377_v24 }
0x13ba   : > { %v14023_v11 = vpop.f32.mrb[44].mxu0  ;;  %v6596_v17 = vsel %vm2510_vm1, %v18787_v42, -inf }
0x13bb   : > { %v6560_v62 = vadd.f32 %v14023_v11, %v5355_v34  ;;  %v6101_v22 = vpop.f32.mrb[45].mxu0  ;;  %v6593_v8 = vsel %vm2510_vm1, %v18793_v2, -inf }
0x13bc   : > { %v6559_v52 = vadd.f32 %v6101_v22, %v5354_v15 }
0x13bd   : > { %v18797_v30 = vadd.f32 %v6560_v62, %v5380_v50  ;;  %v14030_v35 = vpop.f32.mrb[48].mxu1  ;;  %6597 = vmax.xlane.f32.xlu0 %v6596_v17 }
0x13be   : > { %v6190_v10 = vpop.f32.mrb[49].mxu1  ;;  %v18802_v23 = vadd.f32 %v6559_v52, %v5379_v33  ;;  %v6562_v43 = vadd.f32 %v14030_v35, %v5355_v34 }
0x13bf   : > { %v6602_v0 = vsel %vm2510_vm1, %v18797_v30, -inf  ;;  %v6561_v60 = vadd.f32 %v6190_v10, %v5354_v15 }
0x13c0   : > { %6603 = vmax.xlane.f32.xlu1 %v6602_v0  ;;  %v18807_v20 = vadd.f32 %v6562_v43, %v5382_v16  ;;  %v6599_v63 = vsel %vm2510_vm1, %v18802_v23, -inf }
0x13c1   : > { %6594 = vmax.xlane.f32.xlu0 %v6593_v8  ;;  %v18812_v28 = vadd.f32 %v6561_v60, %v5381_v53 }
0x13c2   : > { %v6608_v57 = vsel %vm2510_vm1, %v18807_v20, -inf }
0x13c3   : > { %v6605_v29 = vsel %vm2510_vm1, %v18812_v28, -inf }
0x13c5   : > { %6600 = vmax.xlane.f32.xlu0 %v6599_v63 }
0x13c9   : > { %6609 = vmax.xlane.f32.xlu0 %v6608_v57 }
0x13cd   : > { %6606 = vmax.xlane.f32.xlu0 %v6605_v29 }
0x1417   : > { %v14037_v5 = vpop.f32.mrb[46].mxu0 }
0x1418   : > { %v6564_v36 = vadd.f32 %v14037_v5, %v5357_v54  ;;  %v6279_v32 = vpop.f32.mrb[47].mxu0 }
0x1419   : > { %v6563_v6 = vadd.f32 %v6279_v32, %v5356_v12 }
0x141a   : > { %v18820_v49 = vadd.f32 %v6564_v36, %v5376_v38 }
0x141b   : > { %v18822_v34 = vadd.f32 %v6563_v6, %v5375_v44 }
0x141c   : > { %v6614_v15 = vsel %vm2510_vm1, %v18820_v49, -inf }
0x141d   : > { %6615 = vmax.xlane.f32.xlu1 %v6614_v15  ;;  %v6611_v26 = vsel %vm2510_vm1, %v18822_v34, -inf }
0x141e   : > { %v14044_v56 = vpop.f32.mrb[50].mxu1 }
0x141f   : > { %v6566_v59 = vadd.f32 %v14044_v56, %v5357_v54  ;;  %v6368_v31 = vpop.f32.mrb[51].mxu1 }
0x1420   : > { %v6565_v51 = vadd.f32 %v6368_v31, %v5356_v12 }
0x1421   : > { %v18828_v39 = vadd.f32 %v6566_v59, %v5378_v7  ;;  %6612 = vmax.xlane.f32.xlu1 %v6611_v26 }
0x1422   : > { %v18830_v3 = vadd.f32 %v6565_v51, %v5377_v24  ;;  %v14051_v38 = vpop.f32.mrb[48].mxu0 }
0x1423   : > { %v6568_v25 = vadd.f32 %v14051_v38, %v5357_v54  ;;  %v6457_v44 = vpop.f32.mrb[49].mxu0  ;;  %v6620_v21 = vsel %vm2510_vm1, %v18828_v39, -inf }
0x1424   : > { %v6567_v4 = vadd.f32 %v6457_v44, %v5356_v12  ;;  %v6617_v11 = vsel %vm2510_vm1, %v18830_v3, -inf }
0x1425   : > { %v18836_v62 = vadd.f32 %v6568_v25, %v5380_v50  ;;  %6618 = vmax.xlane.f32.xlu0 %v6617_v11  ;;  %6621 = vmax.xlane.f32.xlu1 %v6620_v21 }
0x1426   : > { %v18838_v22 = vadd.f32 %v6567_v4, %v5379_v33  ;;  %v14058_v7 = vpop.f32.mrb[52].mxu1 }
0x1427   : > { %v6570_v52 = vadd.f32 %v14058_v7, %v5357_v54  ;;  %v6546_v24 = vpop.f32.mrb[53].mxu1  ;;  %v6626_v17 = vsel %vm2510_vm1, %v18836_v62, -inf }
0x1428   : > { %v6569_v35 = vadd.f32 %v6546_v24, %v5356_v12  ;;  %v6623_v10 = vsel %vm2510_vm1, %v18838_v22, -inf }
0x1429   : > { %v18844_v0 = vadd.f32 %v6570_v52, %v5382_v16  ;;  %6627 = vmax.xlane.f32.xlu1 %v6626_v17  ;;  %6624 = vmax.xlane.f32.xlu0 %v6623_v10 }
0x142a   : > { %v18846_v50 = vadd.f32 %v6569_v35, %v5381_v53 }
0x142b   : > { %v6632_v33 = vsel %vm2510_vm1, %v18844_v0, -inf }
0x142c   : > { %v6629_v43 = vsel %vm2510_vm1, %v18846_v50, -inf }
0x142d   : > { %6633 = vmax.xlane.f32.xlu1 %v6632_v33  ;;  %6630 = vmax.xlane.f32.xlu0 %v6629_v43 }
0x143e   : > { %15670 = vrot.lane.b32.xlu1 %v18686_v9, %s19951_s3 }
0x1443   : > { %15665 = vrot.lane.b32.xlu0 %v18679_v48, %s19951_s3 }
0x1445   : > { %v6592_v16 = vpop.xlane.xlu1 %6591 }
0x1446   : > { %v6589_v8 = vpop.xlane.xlu0 %6588  ;;  %v6636_v63 = vsub.f32 %v18780_v55, %v6592_v16 }
0x1447   : > { %v6635_v53 = vsub.f32 %v18783_v37, %v6589_v8 }
0x1448   : > { %v6653_v54 = vmul.f32 1.442695, %v6636_v63 }
0x1449   : > { %v6651_v5 = vmul.f32 1.442695, %v6635_v53 }
0x144a   : > { %v6598_v60 = vpop.xlane.xlu0 %6597  ;;  %15908 = vpow2.f32 %v6653_v54 }
0x144b   : > { %v6638_v12 = vsub.f32 %v18787_v42, %v6598_v60  ;;  %15910 = vpow2.f32 %v6651_v5 }
0x144d   : > { %v6604_v57 = vpop.xlane.xlu1 %6603  ;;  %v6657_v9 = vmul.f32 1.442695, %v6638_v12 }
0x144e   : > { %v6595_v29 = vpop.xlane.xlu0 %6594  ;;  %v6640_v36 = vsub.f32 %v18797_v30, %v6604_v57 }
0x144f   : > { %v6637_v48 = vsub.f32 %v18793_v2, %v6595_v29  ;;  %15912 = vpow2.f32 %v6657_v9 }
0x1450   : > { %v6661_v6 = vmul.f32 1.442695, %v6640_v36 }
0x1451   : > { %v6655_v37 = vmul.f32 1.442695, %v6637_v48 }
0x1452   : > { %v6601_v32 = vpop.xlane.xlu0 %6600  ;;  %15914 = vpow2.f32 %v6661_v6 }
0x1453   : > { %v6639_v15 = vsub.f32 %v18802_v23, %v6601_v32  ;;  %15916 = vpow2.f32 %v6655_v37 }
0x1454   : > { %v18864_v51 = vpop.eup %15908 }
0x1455   : > { %v6659_v56 = vmul.f32 1.442695, %v6639_v15  ;;  %v18866_v2 = vpop.eup %15910  ;;  %v6686_v38 = vsel %vm2510_vm1, %v18864_v51, 0.0 }
0x1456   : > { %v6610_v55 = vpop.xlane.xlu0 %6609 }
0x1457   : > { %v6642_v59 = vsub.f32 %v18807_v20, %v6610_v55  ;;  %15918 = vpow2.f32 %v6659_v56  ;;  %v6683_v20 = vsel %vm2510_vm1, %v18866_v2, 0.0 }
0x1459   : > { %v6665_v30 = vmul.f32 1.442695, %v6642_v59  ;;  %v18868_v23 = vpop.eup %15912 }
0x145a   : > { %v6607_v42 = vpop.xlane.xlu0 %6606  ;;  %v6692_v21 = vsel %vm2510_vm1, %v18868_v23, 0.0 }
0x145b   : > { %v6641_v31 = vsub.f32 %v18812_v28, %v6607_v42  ;;  %15920 = vpow2.f32 %v6665_v30 }
0x145c   : > { %v18874_v25 = vpop.eup %15914 }
0x145d   : > { %v6663_v26 = vmul.f32 1.442695, %v6641_v31  ;;  %v18876_v28 = vpop.eup %15916  ;;  %v6698_v44 = vsel %vm2510_vm1, %v18874_v25, 0.0 }
0x145e   : > { %v6689_v7 = vsel %vm2510_vm1, %v18876_v28, 0.0 }
0x145f   : > { %15922 = vpow2.f32 %v6663_v26 }
0x1461   : > { %v18882_v4 = vpop.eup %15918 }
0x1462   : > { %6687 = vadd.xlane.f32.xlu1 %v6686_v38  ;;  %6684 = vadd.xlane.f32.xlu0 %v6683_v20  ;;  %v6695_v11 = vsel %vm2510_vm1, %v18882_v4, 0.0 }
0x1465   : > { %v18888_v52 = vpop.eup %15920 }
0x1466   : > { %6699 = vadd.xlane.f32.xlu1 %v6698_v44  ;;  %6693 = vadd.xlane.f32.xlu0 %v6692_v21  ;;  %v6704_v24 = vsel %vm2510_vm1, %v18888_v52, 0.0 }
0x1469   : > { %v18892_v17 = vpop.eup %15922 }
0x146a   : > { %6696 = vadd.xlane.f32.xlu1 %v6695_v11  ;;  %6690 = vadd.xlane.f32.xlu0 %v6689_v7  ;;  %v6701_v35 = vsel %vm2510_vm1, %v18892_v17, 0.0 }
0x146e   : > { %6705 = vadd.xlane.f32.xlu0 %v6704_v24 }
0x1472   : > { %6702 = vadd.xlane.f32.xlu0 %v6701_v35 }
0x14aa   : > { %v6616_v10 = vpop.xlane.xlu1 %6615 }
0x14ab   : > { %v6644_v33 = vsub.f32 %v18820_v49, %v6616_v10 }
0x14ad   : > { %v6669_v43 = vmul.f32 1.442695, %v6644_v33 }
0x14ae   : > { %v6613_v8 = vpop.xlane.xlu1 %6612 }
0x14af   : > { %15924 = vpow2.f32 %v6669_v43  ;;  %v6643_v16 = vsub.f32 %v18822_v34, %v6613_v8 }
0x14b1   : > { %v6667_v60 = vmul.f32 1.442695, %v6643_v16 }
0x14b2   : > { %v6619_v63 = vpop.xlane.xlu0 %6618  ;;  %v6622_v53 = vpop.xlane.xlu1 %6621 }
0x14b3   : > { %15926 = vpow2.f32 %v6667_v60  ;;  %v6645_v57 = vsub.f32 %v18830_v3, %v6619_v63  ;;  %v6646_v29 = vsub.f32 %v18828_v39, %v6622_v53 }
0x14b5   : > { %v6671_v54 = vmul.f32 1.442695, %v6645_v57  ;;  %v6673_v12 = vmul.f32 1.442695, %v6646_v29 }
0x14b6   : > { %v6628_v5 = vpop.xlane.xlu1 %6627  ;;  %v6625_v36 = vpop.xlane.xlu0 %6624 }
0x14b7   : > { %15928 = vpow2.f32 %v6671_v54  ;;  %v6648_v49 = vsub.f32 %v18836_v62, %v6628_v5  ;;  %v6647_v32 = vsub.f32 %v18838_v22, %v6625_v36 }
0x14b8   : > { %15930 = vpow2.f32 %v6673_v12 }
0x14b9   : > { %v18902_v9 = vpop.eup %15924  ;;  %v6677_v34 = vmul.f32 1.442695, %v6648_v49  ;;  %v6675_v48 = vmul.f32 1.442695, %v6647_v32 }
0x14ba   : > { %v6634_v6 = vpop.xlane.xlu1 %6633  ;;  %v6631_v15 = vpop.xlane.xlu0 %6630  ;;  %v6710_v3 = vsel %vm2510_vm1, %v18902_v9, 0.0 }
0x14bb   : > { %15932 = vpow2.f32 %v6677_v34  ;;  %v6650_v39 = vsub.f32 %v18844_v0, %v6634_v6  ;;  %v6649_v55 = vsub.f32 %v18846_v50, %v6631_v15  ;;  %6711 = vadd.xlane.f32.xlu1 %v6710_v3 }
0x14bc   : > { %15934 = vpow2.f32 %v6675_v48 }
0x14bd   : > { %v18908_v62 = vpop.eup %15926  ;;  %v6681_v22 = vmul.f32 1.442695, %v6650_v39  ;;  %v6679_v37 = vmul.f32 1.442695, %v6649_v55 }
0x14be   : > { %v6707_v56 = vsel %vm2510_vm1, %v18908_v62, 0.0  ;;  %v15671_v7 = vpop.permute.xlu1 %15670  ;;  %v15666_v24 = vpop.permute.xlu0 %15665 }
0x14bf   : > { %15936 = vpow2.f32 %v6681_v22  ;;  %6708 = vadd.xlane.f32.xlu1 %v6707_v56  ;;  %v15667_v53 = vunpack.i.l.bf16 %v15666_v24  ;;  %v15673_v34 = vunpack.i.h.bf16 %v15671_v7  ;;  %v15672_v48 = vunpack.i.l.bf16 %v15671_v7 }
0x14c0   : > { %15938 = vpow2.f32 %v6679_v37 }
0x14c1   : > { %v18912_v59 = vpop.eup %15928 }
0x14c2   : > { %v18914_v42 = vpop.eup %15930  ;;  %v6713_v0 = vsel %vm2510_vm1, %v18912_v59, 0.0 }
0x14c3   : > { %v6716_v50 = vsel %vm2510_vm1, %v18914_v42, 0.0  ;;  %6714 = vadd.xlane.f32.xlu0 %v6713_v0 }
0x14c4   : > { %6717 = vadd.xlane.f32.xlu1 %v6716_v50 }
0x14c5   : > { %v18920_v30 = vpop.eup %15932 }
0x14c6   : > { %v18922_v31 = vpop.eup %15934  ;;  %v6722_v26 = vsel %vm2510_vm1, %v18920_v30, 0.0 }
0x14c7   : > { %v6719_v38 = vsel %vm2510_vm1, %v18922_v31, 0.0 }
0x14c8   : > { %6723 = vadd.xlane.f32.xlu1 %v6722_v26  ;;  %6720 = vadd.xlane.f32.xlu0 %v6719_v38 }
0x14c9   : > { %v18928_v20 = vpop.eup %15936 }
0x14ca   : > { %v18930_v44 = vpop.eup %15938  ;;  %v6728_v21 = vsel %vm2510_vm1, %v18928_v20, 0.0 }
0x14cb   : > { %v6725_v11 = vsel %vm2510_vm1, %v18930_v44, 0.0 }
0x14cc   : > { %6729 = vadd.xlane.f32.xlu1 %v6728_v21  ;;  %6726 = vadd.xlane.f32.xlu0 %v6725_v11 }
0x14dd   : > { %15680 = vrot.lane.b32.xlu1 %v18706_v58, %s19951_s3  ;;  %v15668_v58 = vunpack.i.h.bf16 %v15666_v24 }
0x14df   : > { %v14796_v12 = vpack.c.bf16 %v15668_v58, %v15667_v53 }
0x14e2   : > { %15675 = vrot.lane.b32.xlu0 %v18696_v40, %s19951_s3 }
0x14ef   : > { %v6688_v35 = vpop.xlane.xlu1 %6687  ;;  %v6685_v10 = vpop.xlane.xlu0 %6684 }
0x14f0   : > { %15940 = vrcp.f32 %v6688_v35 }
0x14f1   : > { %15942 = vrcp.f32 %v6685_v10 }
0x14f3   : > { %v6700_v33 = vpop.xlane.xlu1 %6699  ;;  %v6694_v43 = vpop.xlane.xlu0 %6693 }
0x14f4   : > { %15944 = vrcp.f32 %v6700_v33 }
0x14f5   : > { %15946 = vrcp.f32 %v6694_v43 }
0x14f7   : > { %v6697_v8 = vpop.xlane.xlu1 %6696  ;;  %v6691_v16 = vpop.xlane.xlu0 %6690 }
0x14f8   : > { %15948 = vrcp.f32 %v6697_v8 }
0x14f9   : > { %15950 = vrcp.f32 %v6691_v16 }
0x14fa   : > { %v15941_v60 = vpop.eup %15940 }
0x14fb   : > { %v15943_v63 = vpop.eup %15942  ;;  %v6706_v57 = vpop.xlane.xlu0 %6705  ;;  %v6748_v40 = vmul.f32 %v15941_v60, %v18864_v51 }
0x14fc   : > { %v6747_v29 = vmul.f32 %v15943_v63, %v18866_v2  ;;  %15952 = vrcp.f32 %v6706_v57 }
0x14fe   : > { %14063 = vmatprep.mubr.msk.f32.mxu0 %vm2510_vm1, %v6747_v29  ;;  %v15945_v5 = vpop.eup %15944 }
0x14ff   : > { %14064 = vmatmul.mubr.msk.f32.vlgmr.msra.gmra.mrb[50].mxu0 %vm2510_vm1, %v6748_v40  ;;  %v6703_v54 = vpop.xlane.xlu0 %6702  ;;  %v15947_v36 = vpop.eup %15946  ;;  %v6752_v6 = vmul.f32 %v15945_v5, %v18874_v25  ;;  %v5359_v40 = vld [vmem:[%s19954_s4 + $0x8] sm:$0xff] }
0x1500   : > { %14791 = vmatpush3.bf16.msra.mxu0 %v18769_v46  ;;  %15954 = vrcp.f32 %v6703_v54  ;;  %v6750_v15 = vmul.f32 %v15947_v36, %v18868_v23  ;;  %v14800_v46 = vpack.c.bf16 %v15673_v34, %v15672_v48 }
0x1501   : > { %14797 = vmatprep.subr.bf16.mxu0 %v14796_v12 }
0x1502   : > { %v15949_v49 = vpop.eup %15948 }
0x1503   : > { %v15951_v32 = vpop.eup %15950  ;;  %v6751_v51 = vmul.f32 %v15949_v49, %v18882_v4 }
0x1504   : > { %v6749_v2 = vmul.f32 %v15951_v32, %v18876_v28 }
0x1505   : > { %14077 = vmatprep.mubr.msk.f32.mxu0 %vm2510_vm1, %v6751_v51 }
0x1506   : > { %14070 = vmatprep.mubr.msk.f32.mxu1 %vm2510_vm1, %v6749_v2  ;;  %14078 = vmatmul.mubr.msk.f32.vlgmr.msra.gmra.mrb[52].mxu0 %vm2510_vm1, %v6752_v6  ;;  %v15953_v3 = vpop.eup %15952 }
0x1507   : > { %14071 = vmatmul.mubr.msk.f32.vlgmr.msra.gmra.mrb[54].mxu1 %vm2510_vm1, %v6750_v15  ;;  %14799 = vmatpush3.bf16.msra.mxu0 %v14796_v12  ;;  %v6754_v25 = vmul.f32 %v15953_v3, %v18888_v52 }
0x1508   : > { %14795 = vmatpush3.bf16.msra.mxu1 %v18773_v13 }
0x1509   : > { %14801 = vmatprep.subr.bf16.mxu1 %v14800_v46 }
0x150a   : > { %v15955_v4 = vpop.eup %15954 }
0x150b   : > { %v6753_v28 = vmul.f32 %v15955_v4, %v18892_v17 }
0x150d   : > { %14084 = vmatprep.mubr.msk.f32.mxu1 %vm2510_vm1, %v6753_v28 }
0x150e   : > { %14085 = vmatmul.mubr.msk.f32.vlgmr.msra.gmra.mrb[56].mxu1 %vm2510_vm1, %v6754_v25 }
0x150f   : > { %14803 = vmatpush3.bf16.msra.mxu1 %v14800_v46  ;;  %v13102_v46 = vld [vmem:[#allocation6] ss:$0 sm:$0xff] }
0x1548   : > { %v6712_v23 = vpop.xlane.xlu1 %6711 }
0x1549   : > { %15956 = vrcp.f32 %v6712_v23 }
0x154c   : > { %v6709_v39 = vpop.xlane.xlu1 %6708 }
0x154d   : > { %15958 = vrcp.f32 %v6709_v39 }
0x1550   : > { %v6715_v55 = vpop.xlane.xlu0 %6714 }
0x1551   : > { %v6718_v22 = vpop.xlane.xlu1 %6717  ;;  %15960 = vrcp.f32 %v6715_v55 }
0x1552   : > { %15962 = vrcp.f32 %v6718_v22 }
0x1553   : > { %v15957_v56 = vpop.eup %15956 }
0x1554   : > { %v6756_v26 = vmul.f32 %v15957_v56, %v18902_v9 }
0x1555   : > { %v6724_v13 = vpop.xlane.xlu1 %6723  ;;  %v6721_v37 = vpop.xlane.xlu0 %6720 }
0x1556   : > { %15964 = vrcp.f32 %v6724_v13 }
0x1557   : > { %v15959_v17 = vpop.eup %15958  ;;  %15966 = vrcp.f32 %v6721_v37 }
0x1558   : > { %v6755_v52 = vmul.f32 %v15959_v17, %v18908_v62 }
0x1559   : > { %v6730_v0 = vpop.xlane.xlu1 %6729  ;;  %v6727_v50 = vpop.xlane.xlu0 %6726 }
0x155a   : > { %15968 = vrcp.f32 %v6730_v0  ;;  %14091 = vmatprep.mubr.msk.f32.mxu0 %vm2510_vm1, %v6755_v52 }
0x155b   : > { %v15961_v38 = vpop.eup %15960  ;;  %15970 = vrcp.f32 %v6727_v50  ;;  %14092 = vmatmul.mubr.msk.f32.vlgmr.msra.gmra.mrb[54].mxu0 %vm2510_vm1, %v6756_v26 }
0x155c   : > { %v15963_v21 = vpop.eup %15962  ;;  %v6757_v11 = vmul.f32 %v15961_v38, %v18912_v59 }
0x155d   : > { %v15681_v7 = vpop.permute.xlu1 %15680  ;;  %v15676_v24 = vpop.permute.xlu0 %15675  ;;  %v6758_v35 = vmul.f32 %v15963_v21, %v18914_v42 }
0x155e   : > { %v15683_v10 = vunpack.i.h.bf16 %v15681_v7  ;;  %v15682_v62 = vunpack.i.l.bf16 %v15681_v7  ;;  %v15678_v33 = vunpack.i.h.bf16 %v15676_v24  ;;  %v15677_v43 = vunpack.i.l.bf16 %v15676_v24  ;;  %14098 = vmatprep.mubr.msk.f32.mxu1 %vm2510_vm1, %v6757_v11 }
0x155f   : > { %14099 = vmatmul.mubr.msk.f32.vlgmr.msra.gmra.mrb[58].mxu1 %vm2510_vm1, %v6758_v35 }
0x1560   : > { %v15965_v9 = vpop.eup %15964  ;;  %v14804_v8 = vpack.c.bf16 %v15678_v33, %v15677_v43  ;;  %v14808_v16 = vpack.c.bf16 %v15683_v10, %v15682_v62 }
0x1561   : > { %v15967_v60 = vpop.eup %15966  ;;  %v6760_v63 = vmul.f32 %v15965_v9, %v18920_v30 }
0x1562   : > { %14805 = vmatprep.subr.bf16.mxu0 %v14804_v8  ;;  %14809 = vmatprep.subr.bf16.mxu1 %v14808_v16  ;;  %v6759_v59 = vmul.f32 %v15967_v60, %v18922_v31  ;;  %v5358_v31 = vld [vmem:[%s19954_s4] sm:$0xff]  ;;  %s19955_s4 = sld [smem:[#allocation86_spill]] }
0x1563   : > { %14807 = vmatpush3.bf16.msra.mxu0 %v14804_v8  ;;  %14811 = vmatpush3.bf16.msra.mxu1 %v14808_v16 }
0x1564   : > { %v15969_v42 = vpop.eup %15968  ;;  %14105 = vmatprep.mubr.msk.f32.mxu0 %vm2510_vm1, %v6759_v59  ;;  %14115 = vmatprep.subr.mxu0 %v5359_v40 }
0x1565   : > { %v15971_v58 = vpop.eup %15970  ;;  %v6762_v53 = vmul.f32 %v15969_v42, %v18928_v20 }
0x1566   : > { %14106 = vmatmul.mubr.msk.f32.vlgmr.msra.gmra.mrb[56].mxu0 %vm2510_vm1, %v6760_v63  ;;  %v6761_v57 = vmul.f32 %v15971_v58, %v18930_v44 }
0x1567   : > { %14116 = vmatpush3.msra.mxu0 %v5359_v40 }
0x1568   : > { %14112 = vmatprep.mubr.msk.f32.mxu1 %vm2510_vm1, %v6761_v57  ;;  %14129 = vmatprep.subr.mxu0 %v5358_v31 }
0x1569   : > { %14113 = vmatmul.mubr.msk.f32.vlgmr.msra.gmra.mrb[60].mxu1 %vm2510_vm1, %v6762_v53 }
0x15d2   : > { %v14065_v29 = vpop.f32.mrb[50].mxu0 }
0x15d3   : > { %v6841_v54 = vpop.f32.mrb[51].mxu0 }
0x15d9   : > { %v14079_v12 = vpop.f32.mrb[52].mxu0 }
0x15da   : > { %v14072_v30 = vpop.f32.mrb[54].mxu1  ;;  %v7015_v5 = vpop.f32.mrb[53].mxu0 }
0x15db   : > { %v6928_v36 = vpop.f32.mrb[55].mxu1 }
0x15e1   : > { %v14086_v20 = vpop.f32.mrb[56].mxu1 }
0x15e2   : > { %v7102_v49 = vpop.f32.mrb[57].mxu1 }
0x162e   : > { %v14093_v32 = vpop.f32.mrb[54].mxu0 }
0x162f   : > { %v7189_v34 = vpop.f32.mrb[55].mxu0 }
0x1630   : > { %14117 = vmatprep.mubr.msk.f32.mxu0 %vm2989_vm2, %v7189_v34 }
0x1631   : > { %14118 = vmatmul.mubr.msk.f32.vlgmr.msra.gmra.mrb[58].mxu0 %vm2989_vm2, %v14093_v32 }
0x1632   : > { %v14100_v44 = vpop.f32.mrb[58].mxu1  ;;  %14130 = vmatpush3.msra.mxu0 %v5358_v31 }
0x1633   : > { %v7276_v48 = vpop.f32.mrb[59].mxu1 }
0x1634   : > { %14120 = vmatprep.mubr.msk.f32.mxu0 %vm2989_vm2, %v7276_v48 }
0x1635   : > { %14121 = vmatmul.mubr.msk.f32.gmra.mrb[60].mxu0 %vm2989_vm2, %v14100_v44 }
0x1639   : > { %v14107_v51 = vpop.f32.mrb[56].mxu0 }
0x163a   : > { %v7363_v2 = vpop.f32.mrb[57].mxu0 }
0x163b   : > { %14123 = vmatprep.mubr.msk.f32.mxu0 %vm2989_vm2, %v7363_v2 }
0x163c   : > { %v14114_v6 = vpop.f32.mrb[60].mxu1  ;;  %14124 = vmatmul.mubr.msk.f32.gmra.mrb[62].mxu0 %vm2989_vm2, %v14107_v51 }
0x163d   : > { %v7450_v15 = vpop.f32.mrb[61].mxu1 }
0x163e   : > { %14126 = vmatprep.mubr.msk.f32.mxu0 %vm2989_vm2, %v7450_v15 }
0x1640   : > { %14127 = vmatmul.mubr.msk.f32.gmra.mrb[64].mxu0 %vm2989_vm2, %v14114_v6 }
0x1641   : > { %14131 = vmatprep.mubr.msk.f32.mxu0 %vm2989_vm2, %v6841_v54 }
0x1644   : > { %14132 = vmatmul.mubr.msk.f32.vlgmr.msra.gmra.mrb[58].mxu0 %vm2989_vm2, %v14065_v29 }
0x1645   : > { %14134 = vmatprep.mubr.msk.f32.mxu0 %vm2989_vm2, %v6928_v36 }
0x1648   : > { %14135 = vmatmul.mubr.msk.f32.gmra.mrb[60].mxu0 %vm2989_vm2, %v14072_v30 }
0x1649   : > { %14137 = vmatprep.mubr.msk.f32.mxu0 %vm2989_vm2, %v7015_v5 }
0x164c   : > { %14138 = vmatmul.mubr.msk.f32.gmra.mrb[62].mxu0 %vm2989_vm2, %v14079_v12 }
0x164d   : > { %14140 = vmatprep.mubr.msk.f32.mxu0 %vm2989_vm2, %v7102_v49 }
0x1650   : > { %14141 = vmatmul.mubr.msk.f32.gmra.mrb[64].mxu0 %vm2989_vm2, %v14086_v20 }
0x1717   : > { %v14133_v3 = vpop.f32.mrb[58].mxu0 }
0x1718   : > { %v7718_v4 = vadd.f32 %v14133_v3, %v18546_v27  ;;  %v7678_v28 = vpop.f32.mrb[59].mxu0 }
0x1719   : > { %v7717_v25 = vadd.f32 %v7678_v28, %v18548_v18 }
0x171a   : > { %v18994_v23 = vadd.f32 %v13102_v46, %v7718_v4 }
0x171b   : > { %v18996_v39 = vadd.f32 %v13102_v46, %v7717_v25  ;;  %v14136_v55 = vpop.f32.mrb[60].mxu0 }
0x171c   : > { %v7720_v22 = vadd.f32 %v14136_v55, %v18554_v19  ;;  %v7688_v13 = vpop.f32.mrb[61].mxu0  ;;  %v7742_v37 = vsel %vm2510_vm1, %v18994_v23, 0.0 }
0x171d   : > { %v7719_v56 = vadd.f32 %v7688_v13, %v18556_v41  ;;  %7743 = vadd.xlane.f32.xlu1 %v7742_v37  ;;  %v7739_v27 = vsel %vm2510_vm1, %v18996_v39, 0.0 }
0x171e   : > { %v19004_v17 = vadd.f32 %v13102_v46, %v7720_v22  ;;  %7740 = vadd.xlane.f32.xlu0 %v7739_v27  ;;  %v5363_v27 = vld [vmem:[%s19955_s4] sm:$0xff] }
0x171f   : > { %v14139_v18 = vpop.f32.mrb[62].mxu0  ;;  %v19009_v50 = vadd.f32 %v13102_v46, %v7719_v56 }
0x1720   : > { %v7722_v52 = vadd.f32 %v14139_v18, %v18562_v61  ;;  %v7698_v0 = vpop.f32.mrb[63].mxu0  ;;  %v7748_v19 = vsel %vm2510_vm1, %v19004_v17, 0.0  ;;  %v5364_v18 = vld [vmem:[%s19955_s4 + $0x8] sm:$0xff]  ;;  %s19956_s4 = sld [smem:[#allocation88_spill]] }
0x1721   : > { %v7721_v26 = vadd.f32 %v7698_v0, %v18564_v1  ;;  %v7745_v35 = vsel %vm2510_vm1, %v19009_v50, 0.0 }
0x1722   : > { %v19012_v38 = vadd.f32 %v13102_v46, %v7722_v52  ;;  %7749 = vadd.xlane.f32.xlu0 %v7748_v19  ;;  %v14812_v52 = vpack.c.bf16 %v5364_v18, %v5363_v27 }
0x1723   : > { %v14142_v41 = vpop.f32.mrb[64].mxu0  ;;  %v19017_v24 = vadd.f32 %v13102_v46, %v7721_v26 }
0x1724   : > { %v7724_v21 = vadd.f32 %v14142_v41, %v18570_v14  ;;  %v7708_v11 = vpop.f32.mrb[65].mxu0  ;;  %v7754_v7 = vsel %vm2510_vm1, %v19012_v38, 0.0  ;;  %14813 = vmatprep.subr.bf16.mxu1 %v14812_v52 }
0x1725   : > { %v7723_v61 = vadd.f32 %v7708_v11, %v18572_v47  ;;  %7755 = vadd.xlane.f32.xlu1 %v7754_v7  ;;  %v7751_v14 = vsel %vm2510_vm1, %v19017_v24, 0.0  ;;  %14815 = vmatpush3.bf16.msra.mxu1 %v14812_v52 }
0x1726   : > { %v19022_v10 = vadd.f32 %v13102_v46, %v7724_v21  ;;  %7746 = vadd.xlane.f32.xlu0 %v7745_v35 }
0x1727   : > { %v19026_v62 = vadd.f32 %v13102_v46, %v7723_v61 }
0x1728   : > { %v7760_v1 = vsel %vm2510_vm1, %v19022_v10, 0.0 }
0x1729   : > { %7761 = vadd.xlane.f32.xlu1 %v7760_v1  ;;  %v7757_v47 = vsel %vm2510_vm1, %v19026_v62, 0.0 }
0x172a   : > { %7752 = vadd.xlane.f32.xlu0 %v7751_v14 }
0x172e   : > { %7758 = vadd.xlane.f32.xlu0 %v7757_v47 }
0x17aa   : > { %v7744_v33 = vpop.xlane.xlu1 %7743 }
0x17ab   : > { %v7764_v43 = vmul.f32 0.0625, %v7744_v33  ;;  %v7741_v9 = vpop.xlane.xlu0 %7740 }
0x17ac   : > { %v7763_v8 = vmul.f32 0.0625, %v7741_v9 }
0x17ad   : > { %v19033_v16 = vsub.f32 %v18994_v23, %v7764_v43 }
0x17ae   : > { %v19036_v60 = vsub.f32 %v18996_v39, %v7763_v8 }
0x17af   : > { %v7750_v59 = vpop.xlane.xlu0 %7749  ;;  %v7780_v42 = vmul.f32 %v19033_v16, %v19033_v16 }
0x17b0   : > { %v7766_v63 = vmul.f32 0.0625, %v7750_v59  ;;  %v7779_v58 = vmul.f32 %v19036_v60, %v19036_v60 }
0x17b1   : > { %v7790_v53 = vsel %vm2510_vm1, %v7780_v42, 0.0 }
0x17b2   : > { %v19044_v57 = vsub.f32 %v19004_v17, %v7766_v63  ;;  %v7756_v40 = vpop.xlane.xlu1 %7755  ;;  %7791 = vadd.xlane.f32.xlu1 %v7790_v53  ;;  %v7787_v31 = vsel %vm2510_vm1, %v7779_v58, 0.0  ;;  %v13103_v53 = vld [vmem:[#allocation8] ss:$0 sm:$0xff] }
0x17b3   : > { %v7768_v29 = vmul.f32 0.0625, %v7756_v40  ;;  %v7747_v54 = vpop.xlane.xlu0 %7746  ;;  %7788 = vadd.xlane.f32.xlu0 %v7787_v31 }
0x17b4   : > { %v7765_v12 = vmul.f32 0.0625, %v7747_v54  ;;  %v7782_v30 = vmul.f32 %v19044_v57, %v19044_v57 }
0x17b5   : > { %v19050_v5 = vsub.f32 %v19012_v38, %v7768_v29 }
0x17b6   : > { %v19053_v36 = vsub.f32 %v19009_v50, %v7765_v12  ;;  %v7762_v20 = vpop.xlane.xlu1 %7761  ;;  %v7796_v49 = vsel %vm2510_vm1, %v7782_v30, 0.0 }
0x17b7   : > { %v7770_v32 = vmul.f32 0.0625, %v7762_v20  ;;  %v7753_v34 = vpop.xlane.xlu0 %7752  ;;  %7797 = vadd.xlane.f32.xlu1 %v7796_v49  ;;  %v7784_v44 = vmul.f32 %v19050_v5, %v19050_v5  ;;  %v13104_v49 = vld [vmem:[#allocation9] ss:$0 sm:$0xff] }
0x17b8   : > { %v7767_v48 = vmul.f32 0.0625, %v7753_v34  ;;  %v7781_v51 = vmul.f32 %v19053_v36, %v19053_v36 }
0x17b9   : > { %v19061_v2 = vsub.f32 %v19022_v10, %v7770_v32  ;;  %v7802_v6 = vsel %vm2510_vm1, %v7784_v44, 0.0 }
0x17ba   : > { %v19065_v15 = vsub.f32 %v19017_v24, %v7767_v48  ;;  %v7793_v46 = vsel %vm2510_vm1, %v7781_v51, 0.0 }
0x17bb   : > { %7803 = vadd.xlane.f32.xlu1 %v7802_v6  ;;  %7794 = vadd.xlane.f32.xlu0 %v7793_v46  ;;  %v7759_v3 = vpop.xlane.xlu0 %7758  ;;  %v7786_v4 = vmul.f32 %v19061_v2, %v19061_v2 }
0x17bc   : > { %v7769_v28 = vmul.f32 0.0625, %v7759_v3  ;;  %v7783_v25 = vmul.f32 %v19065_v15, %v19065_v15 }
0x17bd   : > { %v7808_v55 = vsel %vm2510_vm1, %v7786_v4, 0.0 }
0x17be   : > { %v19074_v22 = vsub.f32 %v19026_v62, %v7769_v28  ;;  %v7799_v13 = vsel %vm2510_vm1, %v7783_v25, 0.0 }
0x17bf   : > { %7809 = vadd.xlane.f32.xlu1 %v7808_v55  ;;  %7800 = vadd.xlane.f32.xlu0 %v7799_v13 }
0x17c0   : > { %v7785_v37 = vmul.f32 %v19074_v22, %v19074_v22 }
0x17c2   : > { %v7805_v56 = vsel %vm2510_vm1, %v7785_v37, 0.0 }
0x17c3   : > { %7806 = vadd.xlane.f32.xlu0 %v7805_v56 }
0x183f   : > { %v7792_v0 = vpop.xlane.xlu1 %7791 }
0x1840   : > { %v7812_v19 = vmul.f32 0.0625, %v7792_v0  ;;  %v7789_v26 = vpop.xlane.xlu0 %7788 }
0x1841   : > { %v7811_v41 = vmul.f32 0.0625, %v7789_v26 }
0x1842   : > { %v7820_v21 = vadd.f32 1e-05, %v7812_v19 }
0x1843   : > { %v7819_v11 = vadd.f32 1e-05, %v7811_v41 }
0x1844   : > { %15972 = vrsqrt.f32 %v7820_v21  ;;  %v7798_v7 = vpop.xlane.xlu1 %7797  ;;  %v5367_v21 = vld [vmem:[%s19956_s4 + $0x8] sm:$0xff] }
0x1845   : > { %15974 = vrsqrt.f32 %v7819_v11  ;;  %v7814_v61 = vmul.f32 0.0625, %v7798_v7  ;;  %v5368_v7 = vld [vmem:[%s19956_s4 + $0x10] sm:$0xff] }
0x1847   : > { %v7822_v35 = vadd.f32 1e-05, %v7814_v61  ;;  %v5369_v61 = vld [vmem:[%s19956_s4 + $0x18] sm:$0xff] }
0x1848   : > { %v7804_v1 = vpop.xlane.xlu1 %7803  ;;  %v7795_v14 = vpop.xlane.xlu0 %7794 }
0x1849   : > { %15976 = vrsqrt.f32 %v7822_v35  ;;  %v7816_v47 = vmul.f32 0.0625, %v7804_v1  ;;  %v7813_v33 = vmul.f32 0.0625, %v7795_v14  ;;  %v14820_v35 = vpack.c.bf16 %v5369_v61, %v5368_v7  ;;  %v5370_v1 = vld [vmem:[%s19956_s4 + $0x20] sm:$0xff]  ;;  %v5371_v14 = vld [vmem:[%s19956_s4 + $0x28] sm:$0xff] }
0x184b   : > { %v7824_v43 = vadd.f32 1e-05, %v7816_v47  ;;  %v7821_v9 = vadd.f32 1e-05, %v7813_v33  ;;  %v14824_v47 = vpack.c.bf16 %v5371_v14, %v5370_v1  ;;  %v5372_v33 = vld [vmem:[%s19956_s4 + $0x30] sm:$0xff] }
0x184c   : > { %v7810_v8 = vpop.xlane.xlu1 %7809  ;;  %v7801_v59 = vpop.xlane.xlu0 %7800 }
0x184d   : > { %15978 = vrsqrt.f32 %v7824_v43  ;;  %v7818_v42 = vmul.f32 0.0625, %v7810_v8  ;;  %v7815_v63 = vmul.f32 0.0625, %v7801_v59  ;;  %v5373_v43 = vld [vmem:[%s19956_s4 + $0x38] sm:$0xff]  ;;  %v13105_v8 = vld [vmem:[#allocation11] ss:$0 sm:$0xff] }
0x184e   : > { %v15973_v58 = vpop.eup %15972  ;;  %15980 = vrsqrt.f32 %v7821_v9  ;;  %v14828_v9 = vpack.c.bf16 %v5373_v43, %v5372_v33 }
0x184f   : > { %v15975_v40 = vpop.eup %15974  ;;  %v7836_v31 = vmul.f32 %v15973_v58, %v19033_v16  ;;  %v7826_v29 = vadd.f32 1e-05, %v7818_v42  ;;  %v7823_v54 = vadd.f32 1e-05, %v7815_v63 }
0x1850   : > { %v7807_v12 = vpop.xlane.xlu0 %7806  ;;  %v7835_v30 = vmul.f32 %v15975_v40, %v19036_v60 }
0x1851   : > { %15982 = vrsqrt.f32 %v7826_v29  ;;  %v7817_v20 = vmul.f32 0.0625, %v7807_v12  ;;  %v7850_v32 = vmul.f32 %v13103_v53, %v7836_v31 }
0x1852   : > { %15984 = vrsqrt.f32 %v7823_v54  ;;  %v7849_v34 = vmul.f32 %v13103_v53, %v7835_v30 }
0x1853   : > { %v15977_v44 = vpop.eup %15976  ;;  %v7825_v48 = vadd.f32 1e-05, %v7817_v20  ;;  %v7864_v6 = vadd.f32 %v13104_v49, %v7850_v32 }
0x1854   : > { %v7863_v51 = vadd.f32 %v13104_v49, %v7849_v34  ;;  %v7838_v16 = vmul.f32 %v15977_v44, %v19044_v57 }
0x1855   : > { %15986 = vrsqrt.f32 %v7825_v48 }
0x1856   : > { %14147 = vmatprep.mubr.msk.f32.mxu1 %vm2510_vm1, %v7863_v51  ;;  %v7852_v4 = vmul.f32 %v13103_v53, %v7838_v16 }
0x1857   : > { %v15979_v46 = vpop.eup %15978  ;;  %14148 = vmatmul.mubr.msk.f32.vlgmr.msra.gmra.mrb[62].mxu1 %vm2510_vm1, %v7864_v6 }
0x1858   : > { %v15981_v3 = vpop.eup %15980  ;;  %v7840_v28 = vmul.f32 %v15979_v46, %v19050_v5  ;;  %v7866_v27 = vadd.f32 %v13104_v49, %v7852_v4 }
0x1859   : > { %v7837_v60 = vmul.f32 %v15981_v3, %v19053_v36 }
0x185a   : > { %v7854_v18 = vmul.f32 %v13103_v53, %v7840_v28 }
0x185b   : > { %v15983_v25 = vpop.eup %15982  ;;  %v7851_v55 = vmul.f32 %v13103_v53, %v7837_v60 }
0x185c   : > { %v15985_v13 = vpop.eup %15984  ;;  %v7842_v52 = vmul.f32 %v15983_v25, %v19061_v2  ;;  %v7868_v19 = vadd.f32 %v13104_v49, %v7854_v18 }
0x185d   : > { %v7865_v37 = vadd.f32 %v13104_v49, %v7851_v55  ;;  %v7839_v56 = vmul.f32 %v15985_v13, %v19065_v15 }
0x185e   : > { %v7856_v15 = vmul.f32 %v13103_v53, %v7842_v52 }
0x185f   : > { %v15987_v57 = vpop.eup %15986  ;;  %14150 = vmatprep.mubr.msk.f32.mxu1 %vm2510_vm1, %v7865_v37  ;;  %v7853_v0 = vmul.f32 %v13103_v53, %v7839_v56 }
0x1860   : > { %14151 = vmatmul.mubr.msk.f32.gmra.mrb[64].mxu1 %vm2510_vm1, %v7866_v27  ;;  %v7841_v5 = vmul.f32 %v15987_v57, %v19074_v22  ;;  %v7870_v41 = vadd.f32 %v13104_v49, %v7856_v15  ;;  %v5366_v22 = vld [vmem:[%s19956_s4] sm:$0xff]  ;;  %s19957_s4 = sld [smem:[#allocation91_spill]] }
0x1861   : > { %v7867_v36 = vadd.f32 %v13104_v49, %v7853_v0  ;;  %v14816_v11 = vpack.c.bf16 %v5367_v21, %v5366_v22 }
0x1862   : > { %v7855_v26 = vmul.f32 %v13103_v53, %v7841_v5 }
0x1863   : > { %14153 = vmatprep.mubr.msk.f32.mxu1 %vm2510_vm1, %v7867_v36  ;;  %14817 = vmatprep.subr.bf16.mxu1 %v14816_v11 }
0x1864   : > { %14154 = vmatmul.mubr.msk.f32.gmra.mrb[66].mxu1 %vm2510_vm1, %v7868_v19  ;;  %v7869_v2 = vadd.f32 %v13104_v49, %v7855_v26 }
0x1865   : > { %14819 = vmatpush3.bf16.msra.mxu1 %v14816_v11 }
0x1866   : > { %14156 = vmatprep.mubr.msk.f32.mxu1 %vm2510_vm1, %v7869_v2  ;;  %14821 = vmatprep.subr.bf16.mxu1 %v14820_v35 }
0x1868   : > { %14157 = vmatmul.mubr.msk.f32.gmra.mrb[68].mxu1 %vm2510_vm1, %v7870_v41 }
0x1869   : > { %14823 = vmatpush3.bf16.msra.mxu1 %v14820_v35 }
0x186a   : > { %14825 = vmatprep.subr.bf16.mxu1 %v14824_v47 }
0x186d   : > { %14827 = vmatpush3.bf16.msra.mxu1 %v14824_v47 }
0x186e   : > { %14829 = vmatprep.subr.bf16.mxu1 %v14828_v9 }
0x1871   : > { %14831 = vmatpush3.bf16.msra.mxu1 %v14828_v9 }
0x192a   : > { %v14149_v59 = vpop.f32.mrb[62].mxu1 }
0x192b   : > { %v19106_v42 = vadd.f32 %v14149_v59, %v13105_v8  ;;  %v7967_v63 = vpop.f32.mrb[63].mxu1 }
0x192c   : > { %v19108_v58 = vadd.f32 %v13105_v8, %v7967_v63 }
0x192d   : > { %v8007_v53 = vmul.f32 %v19106_v42, %v19106_v42 }
0x192e   : > { %v8006_v40 = vmul.f32 %v19108_v58, %v19108_v58 }
0x192f   : > { %v8015_v31 = vmul.f32 %v8007_v53, %v19106_v42 }
0x1930   : > { %v8014_v29 = vmul.f32 %v8006_v40, %v19108_v58 }
0x1931   : > { %v8023_v54 = vmul.f32 0.044715, %v8015_v31 }
0x1932   : > { %v8022_v12 = vmul.f32 0.044715, %v8014_v29 }
0x1933   : > { %v8031_v30 = vadd.f32 %v8023_v54, %v19106_v42  ;;  %v14152_v20 = vpop.f32.mrb[64].mxu1 }
0x1934   : > { %v8030_v49 = vadd.f32 %v8022_v12, %v19108_v58  ;;  %v19118_v32 = vadd.f32 %v14152_v20, %v13105_v8  ;;  %v7977_v34 = vpop.f32.mrb[65].mxu1 }
0x1935   : > { %v8039_v44 = vmul.f32 0.7978846, %v8031_v30  ;;  %v19120_v48 = vadd.f32 %v13105_v8, %v7977_v34 }
0x1936   : > { %v8038_v51 = vmul.f32 0.7978846, %v8030_v49  ;;  %v8009_v6 = vmul.f32 %v19118_v32, %v19118_v32 }
0x1937   : > { %15988 = vtanh.f32 %v8039_v44  ;;  %v8008_v16 = vmul.f32 %v19120_v48, %v19120_v48  ;;  %v14155_v46 = vpop.f32.mrb[66].mxu1 }
0x1938   : > { %15990 = vtanh.f32 %v8038_v51  ;;  %v8017_v3 = vmul.f32 %v8009_v6, %v19118_v32  ;;  %v19127_v60 = vadd.f32 %v14155_v46, %v13105_v8  ;;  %v7987_v4 = vpop.f32.mrb[67].mxu1 }
0x1939   : > { %v8016_v28 = vmul.f32 %v8008_v16, %v19120_v48  ;;  %v19130_v25 = vadd.f32 %v13105_v8, %v7987_v4 }
0x193a   : > { %v8025_v55 = vmul.f32 0.044715, %v8017_v3  ;;  %v8011_v13 = vmul.f32 %v19127_v60, %v19127_v60 }
0x193b   : > { %v8024_v37 = vmul.f32 0.044715, %v8016_v28  ;;  %v8010_v56 = vmul.f32 %v19130_v25, %v19130_v25  ;;  %v14158_v27 = vpop.f32.mrb[68].mxu1 }
0x193c   : > { %v8033_v18 = vadd.f32 %v8025_v55, %v19118_v32  ;;  %v8019_v52 = vmul.f32 %v8011_v13, %v19127_v60  ;;  %v19138_v57 = vadd.f32 %v14158_v27, %v13105_v8  ;;  %v7997_v0 = vpop.f32.mrb[69].mxu1 }
0x193d   : > { %v8032_v5 = vadd.f32 %v8024_v37, %v19120_v48  ;;  %v8018_v36 = vmul.f32 %v8010_v56, %v19130_v25  ;;  %v7998_v19 = vadd.f32 %v13105_v8, %v7997_v0 }
0x193e   : > { %v8041_v26 = vmul.f32 0.7978846, %v8033_v18  ;;  %v8027_v15 = vmul.f32 0.044715, %v8019_v52  ;;  %v8013_v2 = vmul.f32 %v19138_v57, %v19138_v57 }
0x193f   : > { %v8040_v41 = vmul.f32 0.7978846, %v8032_v5  ;;  %v8026_v22 = vmul.f32 0.044715, %v8018_v36  ;;  %v8012_v21 = vmul.f32 %v7998_v19, %v7998_v19  ;;  %v5391_v36 = vld [vmem:[%s19957_s4] sm:$0xff] }
0x1940   : > { %15992 = vtanh.f32 %v8041_v26  ;;  %v8035_v11 = vadd.f32 %v8027_v15, %v19127_v60  ;;  %v8021_v7 = vmul.f32 %v8013_v2, %v19138_v57  ;;  %14203 = vmatprep.mubr.msk.f32.mxu0 %vm5211_vm4, %v5391_v36 }
0x1941   : > { %v15989_v61 = vpop.eup %15988  ;;  %15994 = vtanh.f32 %v8040_v41  ;;  %v8034_v35 = vadd.f32 %v8026_v22, %v19130_v25  ;;  %v8020_v1 = vmul.f32 %v8012_v21, %v7998_v19 }
0x1942   : > { %v15991_v14 = vpop.eup %15990  ;;  %v8055_v47 = vadd.f32 1.0, %v15989_v61  ;;  %v8043_v33 = vmul.f32 0.7978846, %v8035_v11  ;;  %v8029_v43 = vmul.f32 0.044715, %v8021_v7 }
0x1943   : > { %v8042_v9 = vmul.f32 0.7978846, %v8034_v35  ;;  %v8028_v8 = vmul.f32 0.044715, %v8020_v1  ;;  %v8054_v59 = vadd.f32 1.0, %v15991_v14 }
0x1944   : > { %v8063_v63 = vmul.f32 0.5, %v8055_v47  ;;  %15996 = vtanh.f32 %v8043_v33  ;;  %v8037_v53 = vadd.f32 %v8029_v43, %v19138_v57 }
0x1945   : > { %15998 = vtanh.f32 %v8042_v9  ;;  %v8036_v40 = vadd.f32 %v8028_v8, %v7998_v19  ;;  %v8062_v31 = vmul.f32 0.5, %v8054_v59 }
0x1946   : > { %v8045_v29 = vmul.f32 0.7978846, %v8037_v53  ;;  %v8071_v30 = vmul.f32 %v8063_v63, %v19106_v42 }
0x1947   : > { %v8044_v54 = vmul.f32 0.7978846, %v8036_v40  ;;  %v8070_v12 = vmul.f32 %v8062_v31, %v19108_v58  ;;  %v5393_v40 = vld [vmem:[%s19957_s4 + $0x10] sm:$0xff]  ;;  %v5394_v31 = vld [vmem:[%s19957_s4 + $0x18] sm:$0xff] }
0x1948   : > { %16000 = vtanh.f32 %v8045_v29  ;;  %v5395_v29 = vld [vmem:[%s19957_s4 + $0x20] sm:$0xff] }
0x1949   : > { %16002 = vtanh.f32 %v8044_v54  ;;  %14175 = vmatprep.mubr.msk.f32.mxu1 %vm5211_vm4, %v8070_v12  ;;  %v5398_v54 = vld [vmem:[%s19957_s4 + $0x38] sm:$0xff]  ;;  %v8360_v12 = vld [vmem:[%s19958_s5] sm:$0xff] }
0x194a   : > { %v15993_v20 = vpop.eup %15992  ;;  %14176 = vmatmul.mubr.msk.f32.vlgmr.msra.gmra.mrb[70].mxu1 %vm5211_vm4, %v8071_v30  ;;  %v8362_v30 = vld [vmem:[%s19958_s5 + $0x10] sm:$0xff] }
0x194b   : > { %v15995_v49 = vpop.eup %15994  ;;  %v8057_v34 = vadd.f32 1.0, %v15993_v20 }
0x194c   : > { %v8056_v44 = vadd.f32 1.0, %v15995_v49 }
0x194d   : > { %v8065_v51 = vmul.f32 0.5, %v8057_v34 }
0x194e   : > { %v15997_v6 = vpop.eup %15996  ;;  %v8064_v16 = vmul.f32 0.5, %v8056_v44 }
0x194f   : > { %v15999_v46 = vpop.eup %15998  ;;  %v8059_v3 = vadd.f32 1.0, %v15997_v6  ;;  %v8073_v42 = vmul.f32 %v8065_v51, %v19118_v32 }
0x1950   : > { %v8072_v4 = vmul.f32 %v8064_v16, %v19120_v48  ;;  %v8058_v58 = vadd.f32 1.0, %v15999_v46 }
0x1951   : > { %v8067_v28 = vmul.f32 0.5, %v8059_v3 }
0x1952   : > { %v16001_v55 = vpop.eup %16000  ;;  %14178 = vmatprep.mubr.msk.f32.mxu1 %vm5211_vm4, %v8072_v4  ;;  %v8066_v13 = vmul.f32 0.5, %v8058_v58 }
0x1953   : > { %v16003_v37 = vpop.eup %16002  ;;  %14179 = vmatmul.mubr.msk.f32.gmra.mrb[72].mxu1 %vm5211_vm4, %v8073_v42  ;;  %v8061_v56 = vadd.f32 1.0, %v16001_v55  ;;  %v8075_v52 = vmul.f32 %v8067_v28, %v19127_v60  ;;  %v8361_v28 = vld [vmem:[%s19958_s5 + $0x8] sm:$0xff]  ;;  %v8363_v55 = vld [vmem:[%s19958_s5 + $0x18] sm:$0xff] }
0x1954   : > { %v8074_v27 = vmul.f32 %v8066_v13, %v19130_v25  ;;  %v8060_v18 = vadd.f32 1.0, %v16003_v37  ;;  %v13114_v25 = vld [vmem:[#allocation12] ss:$0 sm:$0xff]  ;;  %v8364_v13 = vld [vmem:[%s19958_s5 + $0x20] sm:$0xff]  ;;  %v8366_v37 = vld [vmem:[%s19958_s5 + $0x30] sm:$0xff] }
0x1955   : > { %v8069_v0 = vmul.f32 0.5, %v8061_v56  ;;  %v8365_v56 = vld [vmem:[%s19958_s5 + $0x28] sm:$0xff] }
0x1956   : > { %14181 = vmatprep.mubr.msk.f32.mxu1 %vm5211_vm4, %v8074_v27  ;;  %v8068_v48 = vmul.f32 0.5, %v8060_v18  ;;  %v8367_v27 = vld [vmem:[%s19958_s5 + $0x38] sm:$0xff]  ;;  %s17046_s5 = smov 80  }
0x1957   : > { %14182 = vmatmul.mubr.msk.f32.gmra.mrb[74].mxu1 %vm5211_vm4, %v8075_v52  ;;  %v8077_v5 = vmul.f32 %v8069_v0, %v19138_v57 }
0x1958   : > { %v8076_v32 = vmul.f32 %v8068_v48, %v7998_v19 }
0x195a   : > { %14184 = vmatprep.mubr.msk.f32.mxu1 %vm5211_vm4, %v8076_v32 }
0x195b   : > { %14185 = vmatmul.mubr.msk.f32.gmra.mrb[76].mxu1 %vm5211_vm4, %v8077_v5 }
0x195c   : > { %14231 = vmatprep.mubr.msk.f32.mxu1 %vm5211_vm4, %v8360_v12 }
0x1a1d   : > { %v14177_v26 = vpop.f32.mrb[70].mxu1 }
0x1a1e   : > { %v8180_v15 = vadd.f32 %v14177_v26, %v13114_v25  ;;  %v8174_v60 = vpop.f32.mrb[71].mxu1 }
0x1a1f   : > { %v8175_v2 = vadd.f32 %v13114_v25, %v8174_v60 }
0x1a20   : > { %v8214_v41 = vadd.f32 %v8180_v15, %v18994_v23 }
0x1a21   : > { %v8213_v22 = vadd.f32 %v8175_v2, %v18996_v39 }
0x1a23   : > { %v14832_v21 = vpack.c.bf16 %v8214_v41, %v8213_v22 }
0x1a25   : > { %14833 = vmatprep.subr.bf16.mxu0 %v14832_v21 }
0x1a26   : > { %v14180_v19 = vpop.f32.mrb[72].mxu1  ;;  %14835 = vmatpush3.bf16.msra.mxu0 %v14832_v21 }
0x1a27   : > { %v8190_v57 = vadd.f32 %v14180_v19, %v13114_v25  ;;  %v8184_v11 = vpop.f32.mrb[73].mxu1 }
0x1a28   : > { %v8185_v7 = vadd.f32 %v13114_v25, %v8184_v11 }
0x1a29   : > { %v8216_v61 = vadd.f32 %v8190_v57, %v19004_v17 }
0x1a2a   : > { %v8215_v35 = vadd.f32 %v8185_v7, %v19009_v50  ;;  %v14183_v1 = vpop.f32.mrb[74].mxu1 }
0x1a2b   : > { %v8200_v14 = vadd.f32 %v14183_v1, %v13114_v25  ;;  %v8194_v47 = vpop.f32.mrb[75].mxu1 }
0x1a2c   : > { %v8195_v33 = vadd.f32 %v13114_v25, %v8194_v47  ;;  %v14836_v43 = vpack.c.bf16 %v8216_v61, %v8215_v35 }
0x1a2d   : > { %v8218_v23 = vadd.f32 %v8200_v14, %v19012_v38 }
0x1a2e   : > { %v8217_v39 = vadd.f32 %v8195_v33, %v19017_v24  ;;  %v14186_v9 = vpop.f32.mrb[76].mxu1  ;;  %14837 = vmatprep.subr.bf16.mxu0 %v14836_v43  ;;  %v5392_v24 = vld [vmem:[%s19957_s4 + $0x8] sm:$0xff] }
0x1a2f   : > { %v8210_v8 = vadd.f32 %v14186_v9, %v13114_v25  ;;  %v8204_v59 = vpop.f32.mrb[77].mxu1  ;;  %14839 = vmatpush3.bf16.msra.mxu0 %v14836_v43 }
0x1a30   : > { %v8205_v17 = vadd.f32 %v13114_v25, %v8204_v59  ;;  %v14840_v50 = vpack.c.bf16 %v8218_v23, %v8217_v39 }
0x1a31   : > { %v8220_v63 = vadd.f32 %v8210_v8, %v19022_v10  ;;  %v5396_v10 = vld [vmem:[%s19957_s4 + $0x28] sm:$0xff] }
0x1a32   : > { %v8219_v53 = vadd.f32 %v8205_v17, %v19026_v62  ;;  %14841 = vmatprep.subr.bf16.mxu0 %v14840_v50  ;;  %v5397_v62 = vld [vmem:[%s19957_s4 + $0x30] sm:$0xff]  ;;  %s19959_s4 = sld [smem:[#allocation93_spill]] }
0x1a33   : > { %14843 = vmatpush3.bf16.msra.mxu0 %v14840_v50  ;;  %v19259_v50 = vld [vmem:[#allocation15] ss:$0 sm:$0xff] }
0x1a34   : > { %v14844_v38 = vpack.c.bf16 %v8220_v63, %v8219_v53  ;;  %v19263_v63 = vld [vmem:[#allocation14] ss:$0 sm:$0xff] }
0x1a36   : > { %14845 = vmatprep.subr.bf16.mxu0 %v14844_v38 }
0x1a37   : > { %14847 = vmatpush3.bf16.msra.mxu0 %v14844_v38 }
0x1a38   : > { %v8354_v53 = vld [vmem:[%s19959_s4 + $0x10] sm:$0xff]  ;;  %v8355_v38 = vld [vmem:[%s19959_s4 + $0x18] sm:$0xff] }
0x1a3a   : > { %14204 = vmatmul.mubr.msk.f32.vlgmr.msra.gmra.mrb[66].mxu0 %vm5211_vm4, %v5392_v24  ;;  %v14912_v24 = vpack.c.bf16 %v8355_v38, %v8354_v53 }
0x1a3b   : > { %14206 = vmatprep.mubr.msk.f32.mxu0 %vm5211_vm4, %v5393_v40  ;;  %v8352_v40 = vld [vmem:[%s19959_s4] sm:$0xff] }
0x1a3e   : > { %14207 = vmatmul.mubr.msk.f32.gmra.mrb[68].mxu0 %vm5211_vm4, %v5394_v31  ;;  %v8353_v31 = vld [vmem:[%s19959_s4 + $0x8] sm:$0xff] }
0x1a3f   : > { %14209 = vmatprep.mubr.msk.f32.mxu0 %vm5211_vm4, %v5395_v29  ;;  %v19277_v29 = vpack.c.bf16 %v8353_v31, %v8352_v40  ;;  %v8356_v31 = vld [vmem:[%s19959_s4 + $0x20] sm:$0xff] }
0x1a42   : > { %14210 = vmatmul.mubr.msk.f32.gmra.mrb[70].mxu0 %vm5211_vm4, %v5396_v10 }
0x1a43   : > { %14212 = vmatprep.mubr.msk.f32.mxu0 %vm5211_vm4, %v5397_v62 }
0x1a46   : > { %14213 = vmatmul.mubr.msk.f32.gmra.mrb[72].mxu0 %vm5211_vm4, %v5398_v54 }
0x1a47   : > { %14250 = vmatprep.mubr.msk.f32.mxu0 %vm5211_vm4, %v8362_v30 }
0x1b0d   : > { %v14205_v20 = vpop.f32.mrb[66].mxu0 }
0x1b0e   : > { %v8311_v49 = vpop.f32.mrb[67].mxu0 }
0x1b0f   : > { %v14848_v34 = vpack.c.bf16 %v14205_v20, %v8311_v49 }
0x1b11   : > { %v14208_v44 = vpop.f32.mrb[68].mxu0  ;;  %14849 = vmatprep.subr.bf16.mxu1 %v14848_v34  ;;  %14865 = vmatprep.subr.bf16.mxu0 %v14848_v34 }
0x1b12   : > { %v8321_v51 = vpop.f32.mrb[69].mxu0  ;;  %14851 = vmatpush3.bf16.msra.mxu1 %v14848_v34  ;;  %14867 = vmatpush3.bf16.msra.mxu0 %v14848_v34 }
0x1b13   : > { %v14852_v6 = vpack.c.bf16 %v14208_v44, %v8321_v51 }
0x1b15   : > { %v14211_v16 = vpop.f32.mrb[70].mxu0  ;;  %14853 = vmatprep.subr.bf16.mxu1 %v14852_v6  ;;  %14869 = vmatprep.subr.bf16.mxu0 %v14852_v6 }
0x1b16   : > { %v8331_v46 = vpop.f32.mrb[71].mxu0  ;;  %14855 = vmatpush3.bf16.msra.mxu1 %v14852_v6  ;;  %14871 = vmatpush3.bf16.msra.mxu0 %v14852_v6 }
0x1b17   : > { %v14856_v3 = vpack.c.bf16 %v14211_v16, %v8331_v46 }
0x1b19   : > { %v14214_v4 = vpop.f32.mrb[72].mxu0  ;;  %14857 = vmatprep.subr.bf16.mxu1 %v14856_v3  ;;  %14873 = vmatprep.subr.bf16.mxu0 %v14856_v3 }
0x1b1a   : > { %v8341_v58 = vpop.f32.mrb[73].mxu0  ;;  %14859 = vmatpush3.bf16.msra.mxu1 %v14856_v3  ;;  %14875 = vmatpush3.bf16.msra.mxu0 %v14856_v3 }
0x1b1b   : > { %v14860_v42 = vpack.c.bf16 %v14214_v4, %v8341_v58 }
0x1b1d   : > { %14861 = vmatprep.subr.bf16.mxu1 %v14860_v42  ;;  %14877 = vmatprep.subr.bf16.mxu0 %v14860_v42 }
0x1b1e   : > { %14863 = vmatpush3.bf16.msra.mxu1 %v14860_v42  ;;  %14879 = vmatpush3.bf16.msra.mxu0 %v14860_v42 }
0x1b1f   : > { %14881 = vmatprep.subr.bf16.mxu1 %v14848_v34  ;;  %14897 = vmatprep.subr.bf16.mxu0 %v14848_v34 }
0x1b21   : > { %14232 = vmatmul.mubr.msk.f32.vlgmr.msra.gmra.mrb[78].mxu1 %vm5211_vm4, %v8361_v28  ;;  %14251 = vmatmul.mubr.msk.f32.vlgmr.msra.gmra.mrb[74].mxu0 %vm5211_vm4, %v8363_v55 }
0x1b22   : > { %14883 = vmatpush3.bf16.msra.mxu1 %v14848_v34  ;;  %14899 = vmatpush3.bf16.msra.mxu0 %v14848_v34 }
0x1b23   : > { %14885 = vmatprep.subr.bf16.mxu1 %v14852_v6  ;;  %14901 = vmatprep.subr.bf16.mxu0 %v14852_v6 }
0x1b24   : > { %14269 = vmatprep.mubr.msk.f32.mxu1 %vm5211_vm4, %v8364_v13  ;;  %14288 = vmatprep.mubr.msk.f32.mxu0 %vm5211_vm4, %v8366_v37 }
0x1b26   : > { %14887 = vmatpush3.bf16.msra.mxu1 %v14852_v6  ;;  %14903 = vmatpush3.bf16.msra.mxu0 %v14852_v6 }
0x1b27   : > { %14889 = vmatprep.subr.bf16.mxu1 %v14856_v3  ;;  %14905 = vmatprep.subr.bf16.mxu0 %v14856_v3 }
0x1b2a   : > { %14891 = vmatpush3.bf16.msra.mxu1 %v14856_v3  ;;  %14907 = vmatpush3.bf16.msra.mxu0 %v14856_v3 }
0x1b2b   : > { %14893 = vmatprep.subr.bf16.mxu1 %v14860_v42  ;;  %14909 = vmatprep.subr.bf16.mxu0 %v14860_v42 }
0x1b2e   : > { %14895 = vmatpush3.bf16.msra.mxu1 %v14860_v42  ;;  %14911 = vmatpush3.bf16.msra.mxu0 %v14860_v42 }
0x1b2f   : > { %14913 = vmatprep.subr.bf16.mxu1 %v14912_v24 }
0x1b31   : > { %14270 = vmatmul.mubr.msk.f32.vlgmr.msra.gmra.mrb[80].mxu1 %vm5211_vm4, %v8365_v56  ;;  %14289 = vmatmul.mubr.msk.f32.vlgmr.msra.gmra.mrb[76].mxu0 %vm5211_vm4, %v8367_v27 }
0x1b32   : > { %14915 = vmatpush3.bf16.msra.mxu1 %v14912_v24 }
0x1b33   : > { %14917 = vmatprep.subr.bf16.mxu1 %v19277_v29 }
0x1bf4   : > { %v19203_v18 = vpop.f32.mrb[78].mxu1  ;;  %v19205_v52 = vpop.f32.mrb[74].mxu0 }
0x1bf5   : > { %v19207_v0 = vpop.f32.mrb[79].mxu1  ;;  %v8703_v48 = vsel %vm2510_vm1, %v19205_v52, 0.0  ;;  %v19211_v32 = vpop.f32.mrb[75].mxu0  ;;  %v8695_v5 = vsel %vm2510_vm1, %v19203_v18, 0.0  ;;  %v8727_v36 = vmul.f32 %v19203_v18, %v19203_v18  ;;  %v8737_v25 = vmul.f32 %v19205_v52, %v19205_v52 }
0x1bf6   : > { %8704 = vadd.xlane.f32.xlu1 %v8703_v48  ;;  %8696 = vadd.xlane.f32.xlu0 %v8695_v5  ;;  %v8700_v26 = vsel %vm2510_vm1, %v19211_v32, 0.0  ;;  %v8692_v15 = vsel %vm2510_vm1, %v19207_v0, 0.0  ;;  %v8726_v60 = vmul.f32 %v19207_v0, %v19207_v0  ;;  %v8736_v2 = vmul.f32 %v19211_v32, %v19211_v32 }
0x1bf7   : > { %v8741_v41 = vsel %vm2510_vm1, %v8737_v25, 0.0  ;;  %v8731_v22 = vsel %vm2510_vm1, %v8727_v36, 0.0 }
0x1bf8   : > { %v8728_v21 = vsel %vm2510_vm1, %v8726_v60, 0.0  ;;  %v8738_v19 = vsel %vm2510_vm1, %v8736_v2, 0.0 }
0x1bfa   : > { %8701 = vadd.xlane.f32.xlu1 %v8700_v26  ;;  %8693 = vadd.xlane.f32.xlu0 %v8692_v15 }
0x1bfe   : > { %8742 = vadd.xlane.f32.xlu1 %v8741_v41  ;;  %8732 = vadd.xlane.f32.xlu0 %v8731_v22 }
0x1c02   : > { %8729 = vadd.xlane.f32.xlu1 %v8728_v21  ;;  %8739 = vadd.xlane.f32.xlu0 %v8738_v19 }
0x1c04   : > { %v19231_v57 = vpop.f32.mrb[80].mxu1  ;;  %v19233_v11 = vpop.f32.mrb[76].mxu0 }
0x1c05   : > { %v8747_v7 = vmul.f32 %v19231_v57, %v19231_v57  ;;  %v19237_v61 = vpop.f32.mrb[77].mxu0  ;;  %v8719_v35 = vsel %vm2510_vm1, %v19233_v11, 0.0  ;;  %v8711_v1 = vsel %vm2510_vm1, %v19231_v57, 0.0  ;;  %v19243_v14 = vpop.f32.mrb[81].mxu1  ;;  %v8757_v23 = vmul.f32 %v19233_v11, %v19233_v11 }
0x1c06   : > { %8720 = vadd.xlane.f32.xlu0 %v8719_v35  ;;  %8712 = vadd.xlane.f32.xlu1 %v8711_v1  ;;  %v8746_v33 = vmul.f32 %v19243_v14, %v19243_v14  ;;  %v8708_v43 = vsel %vm2510_vm1, %v19243_v14, 0.0  ;;  %v8756_v39 = vmul.f32 %v19237_v61, %v19237_v61  ;;  %v8716_v8 = vsel %vm2510_vm1, %v19237_v61, 0.0 }
0x1c07   : > { %v8751_v47 = vsel %vm2510_vm1, %v8747_v7, 0.0  ;;  %v8761_v59 = vsel %vm2510_vm1, %v8757_v23, 0.0 }
0x1c08   : > { %v8748_v9 = vsel %vm2510_vm1, %v8746_v33, 0.0  ;;  %v8758_v17 = vsel %vm2510_vm1, %v8756_v39, 0.0 }
0x1c0a   : > { %8752 = vadd.xlane.f32.xlu1 %v8751_v47  ;;  %8709 = vadd.xlane.f32.xlu0 %v8708_v43 }
0x1c0e   : > { %8749 = vadd.xlane.f32.xlu1 %v8748_v9  ;;  %8717 = vadd.xlane.f32.xlu0 %v8716_v8 }
0x1c12   : > { %8762 = vadd.xlane.f32.xlu1 %v8761_v59  ;;  %8759 = vadd.xlane.f32.xlu0 %v8758_v17 }
0x1c23   : > { %8805 = vrot.lane.b32.xlu1 %v19259_v50, %s19950_s7 }
0x1c27   : > { %8976 = vrot.lane.b32.xlu1 %v19263_v63, %s19951_s3 }
0x1c28   : > { %8800 = vrot.lane.b32.xlu0 %v19263_v63, %s19950_s7 }
0x1c2b   : > { %8981 = vrot.lane.b32.xlu1 %v19259_v50, %s19951_s3 }
0x1c2c   : > { %9073 = vrot.lane.b32.xlu0 %v19263_v63, %s17046_s5 }
0x1c2f   : > { %9078 = vrot.lane.b32.xlu1 %v19259_v50, %s17046_s5  ;;  %s19960_s5 = sld [smem:[#allocation96_spill]] }
0x1c83   : > { %v8705_v10 = vpop.xlane.xlu1 %8704  ;;  %v8697_v62 = vpop.xlane.xlu0 %8696 }
0x1c84   : > { %v8707_v6 = vadd.f32 %v8705_v10, %v8697_v62  ;;  %v8357_v10 = vld [vmem:[%s19959_s4 + $0x28] sm:$0xff] }
0x1c87   : > { %v8702_v54 = vpop.xlane.xlu1 %8701  ;;  %v8694_v12 = vpop.xlane.xlu0 %8693 }
0x1c88   : > { %v8706_v4 = vadd.f32 %v8702_v54, %v8694_v12  ;;  %v14920_v12 = vpack.c.bf16 %v8357_v10, %v8356_v31 }
0x1c8b   : > { %v8743_v30 = vpop.xlane.xlu1 %8742  ;;  %v8733_v20 = vpop.xlane.xlu0 %8732 }
0x1c8c   : > { %v8745_v13 = vadd.f32 %v8743_v30, %v8733_v20 }
0x1c8f   : > { %v8730_v49 = vpop.xlane.xlu1 %8729  ;;  %v8740_v34 = vpop.xlane.xlu0 %8739 }
0x1c90   : > { %v8744_v37 = vadd.f32 %v8740_v34, %v8730_v49 }
0x1c93   : > { %v8721_v44 = vpop.xlane.xlu0 %8720  ;;  %v8713_v51 = vpop.xlane.xlu1 %8712 }
0x1c94   : > { %v8715_v16 = vadd.f32 %v8713_v51, %v8707_v6 }
0x1c96   : > { %v8723_v58 = vadd.f32 %v8721_v44, %v8715_v16  ;;  %v8359_v44 = vld [vmem:[%s19959_s4 + $0x38] sm:$0xff] }
0x1c97   : > { %v8753_v46 = vpop.xlane.xlu1 %8752  ;;  %v8710_v3 = vpop.xlane.xlu0 %8709 }
0x1c98   : > { %v8714_v42 = vadd.f32 %v8710_v3, %v8706_v4  ;;  %v19280_v27 = vmul.f32 0.015625, %v8723_v58  ;;  %v8755_v48 = vadd.f32 %v8753_v46, %v8745_v13 }
0x1c9a   : > { %v8769_v2 = vmul.f32 %v19280_v27, %v19280_v27  ;;  %v8797_v47 = vsub.f32 %v19205_v52, %v19280_v27  ;;  %v8777_v52 = vsub.f32 %v19203_v18, %v19280_v27  ;;  %v8973_v51 = vsub.f32 %v19231_v57, %v19280_v27 }
0x1c9b   : > { %v8750_v28 = vpop.xlane.xlu1 %8749  ;;  %v8718_v55 = vpop.xlane.xlu0 %8717  ;;  %v9070_v57 = vsub.f32 %v19233_v11, %v19280_v27 }
0x1c9c   : > { %v8722_v56 = vadd.f32 %v8718_v55, %v8714_v42  ;;  %v8754_v5 = vadd.f32 %v8750_v28, %v8744_v37 }
0x1c9e   : > { %v8724_v36 = vmul.f32 0.015625, %v8722_v56 }
0x1c9f   : > { %v8763_v25 = vpop.xlane.xlu1 %8762  ;;  %v8760_v26 = vpop.xlane.xlu0 %8759 }
0x1ca0   : > { %v8765_v15 = vadd.f32 %v8763_v25, %v8755_v48  ;;  %v8764_v60 = vadd.f32 %v8760_v26, %v8754_v5  ;;  %v8768_v22 = vmul.f32 %v8724_v36, %v8724_v36  ;;  %v8796_v43 = vsub.f32 %v19211_v32, %v8724_v36 }
0x1ca1   : > { %v8776_v23 = vsub.f32 %v19207_v0, %v8724_v36  ;;  %v8972_v0 = vsub.f32 %v19243_v14, %v8724_v36  ;;  %v8358_v14 = vld [vmem:[%s19959_s4 + $0x30] sm:$0xff]  ;;  %v9069_v6 = vsub.f32 %v19237_v61, %v8724_v36  ;;  %s19782_s4 = smov 104  }
0x1ca2   : > { %v8767_v41 = vmul.f32 0.015625, %v8765_v15  ;;  %v8766_v21 = vmul.f32 0.015625, %v8764_v60  ;;  %v14924_v4 = vpack.c.bf16 %v8359_v44, %v8358_v14 }
0x1ca3   : > { %v8801_v59 = vpop.permute.xlu0 %8800  ;;  %v8806_v53 = vpop.permute.xlu1 %8805 }
0x1ca4   : > { %v8771_v19 = vsub.f32 %v8767_v41, %v8769_v2  ;;  %v8770_v7 = vsub.f32 %v8766_v21, %v8768_v22 }
0x1ca6   : > { %v8773_v35 = vadd.f32 1e-05, %v8771_v19  ;;  %v8772_v1 = vadd.f32 1e-05, %v8770_v7  ;;  %v9168_v7 = vld [vmem:[%s19960_s5] sm:$0xff] }
0x1ca7   : > { %v8977_v49 = vpop.permute.xlu1 %8976  ;;  %v9074_v42 = vpop.permute.xlu0 %9073 }
0x1ca8   : > { %16004 = vrsqrt.f32 %v8773_v35  ;;  %v9169_v35 = vld [vmem:[%s19960_s5 + $0x8] sm:$0xff] }
0x1ca9   : > { %16006 = vrsqrt.f32 %v8772_v1  ;;  %v14928_v1 = vpack.c.bf16 %v9169_v35, %v9168_v7 }
0x1cab   : > { %v8982_v46 = vpop.permute.xlu1 %8981  ;;  %14929 = vmatprep.subr.bf16.mxu0 %v14928_v1 }
0x1cac   : > { %14931 = vmatpush3.bf16.msra.mxu0 %v14928_v1 }
0x1caf   : > { %v9079_v61 = vpop.permute.xlu1 %9078 }
0x1cb2   : > { %v16005_v33 = vpop.eup %16004 }
0x1cb3   : > { %v16007_v39 = vpop.eup %16006  ;;  %v8799_v9 = vmul.f32 %v16005_v33, %v8797_v47  ;;  %v8779_v54 = vmul.f32 %v16005_v33, %v8777_v52  ;;  %v8975_v16 = vmul.f32 %v16005_v33, %v8973_v51  ;;  %v9072_v13 = vmul.f32 %v16005_v33, %v9070_v57  ;;  %v9170_v47 = vld [vmem:[%s19960_s5 + $0x10] sm:$0xff]  ;;  %v9171_v33 = vld [vmem:[%s19960_s5 + $0x18] sm:$0xff]  ;;  %s19964_s5 = sld [smem:[#allocation105_spill]] }
0x1cb4   : > { %v8798_v8 = vmul.f32 %v16007_v39, %v8796_v43  ;;  %v8778_v17 = vmul.f32 %v16007_v39, %v8776_v23  ;;  %v8974_v30 = vmul.f32 %v16007_v39, %v8972_v0  ;;  %v14932_v43 = vpack.c.bf16 %v9171_v33, %v9170_v47 }
0x1cb5   : > { %v8804_v38 = vmul.f32 %v8801_v59, %v8799_v9  ;;  %v8787_v18 = vmul.f32 %v19263_v63, %v8779_v54  ;;  %v13151_v54 = vld [vmem:[#allocation20] ss:$0 sm:$0xff] }
0x1cb6   : > { %v8803_v24 = vmul.f32 %v8801_v59, %v8798_v8  ;;  %v8786_v40 = vmul.f32 %v19263_v63, %v8778_v17  ;;  %v8979_v34 = vmul.f32 %v8977_v49, %v8974_v30  ;;  %v8980_v63 = vmul.f32 %v8977_v49, %v8975_v16  ;;  %14933 = vmatprep.subr.bf16.mxu0 %v14932_v43 }
0x1cb7   : > { %v8809_v62 = vadd.f32 %v8806_v53, %v8804_v38  ;;  %v8795_v3 = vadd.f32 %v19259_v50, %v8787_v18  ;;  %14935 = vmatpush3.bf16.msra.mxu0 %v14932_v43  ;;  %v13149_v38 = vld [vmem:[#allocation17] ss:$0 sm:$0xff] }
0x1cb8   : > { %v8808_v32 = vadd.f32 %v8806_v53, %v8803_v24  ;;  %v8794_v20 = vadd.f32 %v19259_v50, %v8786_v40  ;;  %v8984_v58 = vadd.f32 %v8982_v46, %v8979_v34  ;;  %v8985_v55 = vadd.f32 %v8982_v46, %v8980_v63  ;;  %v13150_v40 = vld [vmem:[#allocation18] ss:$0 sm:$0xff] }
0x1cb9   : > { %v9077_v50 = vmul.f32 %v9074_v42, %v9072_v13 }
0x1cba   : > { %14295 = vmatprep.mubr.msk.f32.mxu1 %vm2510_vm1, %v8808_v32 }
0x1cbb   : > { %14296 = vmatmul.mubr.msk.f32.vlgmr.msra.gmra.mrb[82].mxu1 %vm2510_vm1, %v8809_v62  ;;  %v9082_v56 = vadd.f32 %v9079_v61, %v9077_v50 }
0x1cbc   : > { %14919 = vmatpush3.bf16.msra.mxu1 %v19277_v29  ;;  %14302 = vmatprep.mubr.msk.f32.mxu1 %vm2510_vm1, %v8794_v20  ;;  %v9071_v29 = vmul.f32 %v16007_v39, %v9069_v6 }
0x1cbd   : > { %14921 = vmatprep.subr.bf16.mxu1 %v14920_v12 }
0x1cbe   : > { %v9076_v28 = vmul.f32 %v9074_v42, %v9071_v29 }
0x1cc0   : > { %v9081_v37 = vadd.f32 %v9079_v61, %v9076_v28 }
0x1cc3   : > { %14303 = vmatmul.mubr.msk.f32.vlgmr.msra.gmra.mrb[82].mxu1 %vm2510_vm1, %v8795_v3 }
0x1cc4   : > { %14923 = vmatpush3.bf16.msra.mxu1 %v14920_v12  ;;  %14309 = vmatprep.mubr.msk.f32.mxu1 %vm2510_vm1, %v8984_v58 }
0x1cc5   : > { %14925 = vmatprep.subr.bf16.mxu1 %v14924_v4 }
0x1ccb   : > { %14310 = vmatmul.mubr.msk.f32.vlgmr.msra.gmra.mrb[82].mxu1 %vm2510_vm1, %v8985_v55 }
0x1ccc   : > { %14927 = vmatpush3.bf16.msra.mxu1 %v14924_v4  ;;  %14316 = vmatprep.mubr.msk.f32.mxu1 %vm2510_vm1, %v9081_v37 }
0x1cd3   : > { %14317 = vmatmul.mubr.msk.f32.vlgmr.msra.gmra.mrb[82].mxu1 %vm2510_vm1, %v9082_v56 }
0x1da6   : > { %v19313_v48 = vpop.f32.mrb[82].mxu1 }
0x1da7   : > { %v19315_v5 = vpop.f32.mrb[83].mxu1  ;;  %v9214_v11 = vsel %vm9210_vm5, %v19313_v48, 0.0 }
0x1da8   : > { %9215 = vadd.xlane.f32.xlu1 %v9214_v11  ;;  %v9211_v27 = vsel %vm9210_vm5, %v19315_v5, 0.0 }
0x1da9   : > { %9212 = vadd.xlane.f32.xlu0 %v9211_v27 }
0x1e35   : > { %v9216_v36 = vpop.xlane.xlu1 %9215 }
0x1e36   : > { %v9219_v25 = vmul.f32 0.03125, %v9216_v36  ;;  %v9213_v26 = vpop.xlane.xlu0 %9212 }
0x1e37   : > { %v9218_v15 = vmul.f32 0.03125, %v9213_v26 }
0x1e38   : > { %v9221_v60 = vsub.f32 %v19313_v48, %v9219_v25 }
0x1e39   : > { %v9220_v2 = vsub.f32 %v19315_v5, %v9218_v15 }
0x1e3a   : > { %v9223_v21 = vmul.f32 %v9221_v60, %v9221_v60 }
0x1e3b   : > { %v9222_v41 = vmul.f32 %v9220_v2, %v9220_v2 }
0x1e3c   : > { %v9227_v19 = vsel %vm9210_vm5, %v9223_v21, 0.0 }
0x1e3d   : > { %v9224_v22 = vsel %vm9210_vm5, %v9222_v41, 0.0 }
0x1e3e   : > { %9225 = vadd.xlane.f32.xlu0 %v9224_v22 }
0x1e42   : > { %9228 = vadd.xlane.f32.xlu0 %v9227_v19 }
0x1ecb   : > { %v9226_v23 = vpop.xlane.xlu0 %9225 }
0x1ecc   : > { %v9230_v39 = vmul.f32 0.03125, %v9226_v23 }
0x1ece   : > { %v9232_v9 = vadd.f32 1e-05, %v9230_v39 }
0x1ecf   : > { %v9229_v8 = vpop.xlane.xlu0 %9228 }
0x1ed0   : > { %16008 = vrsqrt.f32 %v9232_v9  ;;  %v9231_v59 = vmul.f32 0.03125, %v9229_v8 }
0x1ed2   : > { %v9233_v17 = vadd.f32 1e-05, %v9231_v59 }
0x1ed4   : > { %16010 = vrsqrt.f32 %v9233_v17 }
0x1eda   : > { %v16009_v53 = vpop.eup %16008 }
0x1edb   : > { %v9236_v24 = vmul.f32 %v16009_v53, %v9220_v2 }
0x1edd   : > { %v9244_v31 = vmul.f32 %v13149_v38, %v9236_v24 }
0x1ede   : > { %v16011_v10 = vpop.eup %16010 }
0x1edf   : > { %v9237_v52 = vmul.f32 %v16011_v10, %v9221_v60  ;;  %v9252_v62 = vadd.f32 %v13150_v40, %v9244_v31 }
0x1ee1   : > { %v9245_v0 = vmul.f32 %v13149_v38, %v9237_v52  ;;  %14327 = vmatprep.mubr.msk.f32.mxu0 %vm9210_vm5, %v9252_v62 }
0x1ee3   : > { %v9253_v32 = vadd.f32 %v13150_v40, %v9245_v0 }
0x1ee5   : > { %14328 = vmatmul.mubr.msk.f32.vlgmr.msra.gmra.mrb[78].mxu0 %vm9210_vm5, %v9253_v32 }
0x1fb8   : > { %v14329_v12 = vpop.f32.mrb[78].mxu0 }
0x1fb9   : > { %v9338_v30 = vadd.f32 %v14329_v12, %v13151_v54  ;;  %v9332_v20 = vpop.f32.mrb[79].mxu0 }
0x1fba   : > { %v9333_v49 = vadd.f32 %v13151_v54, %v9332_v20 }
0x1fbb   : > { %9345 = vrot.lane.b32.xlu1 %v9338_v30, %s19949_s1  ;;  %v9362_v61 = vmul.f32 0.35355338, %v9338_v30 }
0x1fbc   : > { %9343 = vrot.lane.b32.xlu0 %v9333_v49, %s19949_s1  ;;  %v9361_v18 = vmul.f32 0.35355338, %v9333_v49  ;;  %v19333_v34 = vpack.i.bf16 %v9338_v30, %v9333_v49 }
0x1fbe   : > { %14334 = vmatprep.mubr.msk.f32.mxu1 %vm2989_vm2, %v9361_v18 }
0x1fbf   : > { %9349 = vrot.lane.b32.xlu1 %v9333_v49, %s19950_s7 }
0x1fc0   : > { %9355 = vrot.lane.b32.xlu0 %v9333_v49, %s19782_s4 }
0x1fc3   : > { %9351 = vrot.lane.b32.xlu1 %v9338_v30, %s19950_s7 }
0x1fc4   : > { %15685 = vrot.lane.b32.xlu0 %v19333_v34, %s19951_s3 }
0x1fc7   : > { %9357 = vrot.lane.b32.xlu1 %v9338_v30, %s19782_s4  ;;  %s19961_s4 = sld [smem:[#allocation98_spill]] }
0x1fcd   : > { %v9174_v7 = vld [vmem:[%s19961_s4 + $0x8] sm:$0xff]  ;;  %v9173_v35 = vld [vmem:[%s19961_s4] sm:$0xff]  ;;  %v9175_v9 = vld [vmem:[%s19961_s4 + $0x10] sm:$0xff] }
0x1fce   : > { %v9176_v59 = vld [vmem:[%s19961_s4 + $0x18] sm:$0xff]  ;;  %v9178_v40 = vld [vmem:[%s19961_s4 + $0x28] sm:$0xff]  ;;  %v9177_v31 = vld [vmem:[%s19961_s4 + $0x20] sm:$0xff] }
0x1fcf   : > { %v9180_v54 = vld [vmem:[%s19961_s4 + $0x38] sm:$0xff]  ;;  %v9179_v30 = vld [vmem:[%s19961_s4 + $0x30] sm:$0xff]  ;;  %s19785_s4 = smov 64  }
0x202d   : > { %v9346_v14 = vpop.permute.xlu1 %9345 }
0x202e   : > { %v9344_v44 = vpop.permute.xlu0 %9343  ;;  %v9364_v26 = vmul.f32 0.35355338, %v9346_v14 }
0x202f   : > { %v9363_v51 = vmul.f32 0.35355338, %v9344_v44  ;;  %v19342_v6 = vpack.i.bf16 %v9346_v14, %v9344_v44 }
0x2031   : > { %v9350_v16 = vpop.permute.xlu1 %9349  ;;  %14341 = vmatprep.mubr.msk.f32.mxu0 %vm2989_vm2, %v9363_v51  ;;  %15690 = vrot.lane.b32.xlu1 %v19342_v6, %s19951_s3 }
0x2032   : > { %v9356_v46 = vpop.permute.xlu0 %9355  ;;  %v9365_v55 = vmul.f32 0.35355338, %v9350_v16 }
0x2033   : > { %v9367_v60 = vmul.f32 0.35355338, %v9356_v46 }
0x2035   : > { %v9352_v3 = vpop.permute.xlu1 %9351 }
0x2036   : > { %v19347_v4 = vpack.i.bf16 %v9352_v3, %v9350_v16  ;;  %v15686_v58 = vpop.permute.xlu0 %15685  ;;  %v9366_v21 = vmul.f32 0.35355338, %v9352_v3 }
0x2037   : > { %v15688_v29 = vunpack.i.h.bf16 %v15686_v58  ;;  %v15687_v42 = vunpack.i.l.bf16 %v15686_v58 }
0x2038   : > { %15695 = vrot.lane.b32.xlu0 %v19347_v4, %s19951_s3 }
0x2039   : > { %v14936_v63 = vpack.c.bf16 %v15688_v29, %v15687_v42  ;;  %v9358_v28 = vpop.permute.xlu1 %9357 }
0x203a   : > { %v19351_v57 = vpack.i.bf16 %v9358_v28, %v9356_v46  ;;  %v9368_v19 = vmul.f32 0.35355338, %v9358_v28 }
0x203b   : > { %14938 = vmatprep.subr.msk.bf16.mxu1 %vm18068_vm3, %v14936_v63 }
0x203c   : > { %15700 = vrot.lane.b32.xlu1 %v19351_v57, %s19951_s3  ;;  %14941 = vmatpush3.bf16.xpose.msk.msra.mxu1 %vm18068_vm3, %v14936_v63 }
0x2043   : > { %14335 = vmatmul.mubr.msk.f32.vlgmr.msra.gmra.mrb[84].mxu1 %vm2989_vm2, %v9362_v61 }
0x2044   : > { %14348 = vmatprep.mubr.msk.f32.mxu1 %vm2989_vm2, %v9365_v55 }
0x20a3   : > { %v15691_v13 = vpop.permute.xlu1 %15690 }
0x20a4   : > { %v15693_v37 = vunpack.i.h.bf16 %v15691_v13  ;;  %v15692_v50 = vunpack.i.l.bf16 %v15691_v13 }
0x20a6   : > { %v14942_v56 = vpack.c.bf16 %v15693_v37, %v15692_v50 }
0x20a8   : > { %14944 = vmatprep.subr.msk.bf16.mxu0 %vm18068_vm3, %v14942_v56 }
0x20a9   : > { %14947 = vmatpush3.bf16.xpose.msk.msra.mxu0 %vm18068_vm3, %v14942_v56 }
0x20aa   : > { %v15696_v11 = vpop.permute.xlu0 %15695 }
0x20ab   : > { %v15698_v27 = vunpack.i.h.bf16 %v15696_v11  ;;  %v15697_v36 = vunpack.i.l.bf16 %v15696_v11 }
0x20ad   : > { %v14948_v25 = vpack.c.bf16 %v15698_v27, %v15697_v36 }
0x20ae   : > { %v15701_v15 = vpop.permute.xlu1 %15700 }
0x20af   : > { %v15703_v2 = vunpack.i.h.bf16 %v15701_v15  ;;  %v15702_v41 = vunpack.i.l.bf16 %v15701_v15  ;;  %14950 = vmatprep.subr.msk.bf16.mxu1 %vm18068_vm3, %v14948_v25 }
0x20b0   : > { %14342 = vmatmul.mubr.msk.f32.vlgmr.msra.gmra.mrb[80].mxu0 %vm2989_vm2, %v9364_v26  ;;  %14953 = vmatpush3.bf16.xpose.msk.msra.mxu1 %vm18068_vm3, %v14948_v25 }
0x20b1   : > { %v14954_v22 = vpack.c.bf16 %v15703_v2, %v15702_v41  ;;  %14355 = vmatprep.mubr.msk.f32.mxu0 %vm2989_vm2, %v9367_v60 }
0x20b3   : > { %14956 = vmatprep.subr.msk.bf16.mxu0 %vm18068_vm3, %v14954_v22 }
0x20b4   : > { %14959 = vmatpush3.bf16.xpose.msk.msra.mxu0 %vm18068_vm3, %v14954_v22 }
0x20b7   : > { %14349 = vmatmul.mubr.msk.f32.vlgmr.msra.gmra.mrb[86].mxu1 %vm2989_vm2, %v9366_v21 }
0x20bb   : > { %14356 = vmatmul.mubr.msk.f32.vlgmr.msra.gmra.mrb[82].mxu0 %vm2989_vm2, %v9368_v19 }
0x2116   : > { %v14336_v1 = vpop.f32.mrb[84].mxu1 }
0x2117   : > { %v9726_v47 = vadd.f32 %v14336_v1, %v9174_v7  ;;  %v9449_v33 = vpop.f32.mrb[85].mxu1 }
0x2118   : > { %v9725_v43 = vadd.f32 %v9449_v33, %v9173_v35 }
0x2119   : > { %v9736_v23 = vsel %vm2510_vm1, %v9726_v47, -inf }
0x211a   : > { %9737 = vmax.xlane.f32.xlu1 %v9736_v23  ;;  %v9733_v39 = vsel %vm2510_vm1, %v9725_v43, -inf }
0x211b   : > { %9734 = vmax.xlane.f32.xlu0 %v9733_v39 }
0x2183   : > { %v14343_v8 = vpop.f32.mrb[80].mxu0 }
0x2184   : > { %v9538_v17 = vpop.f32.mrb[81].mxu0  ;;  %v9728_v38 = vadd.f32 %v14343_v8, %v9176_v59 }
0x2185   : > { %v9727_v53 = vadd.f32 %v9538_v17, %v9175_v9 }
0x2186   : > { %v9742_v0 = vsel %vm2510_vm1, %v9728_v38, -inf }
0x2187   : > { %v9739_v24 = vsel %vm2510_vm1, %v9727_v53, -inf }
0x2188   : > { %9740 = vmax.xlane.f32.xlu0 %v9739_v24 }
0x218a   : > { %v14350_v10 = vpop.f32.mrb[86].mxu1 }
0x218b   : > { %v19386_v52 = vadd.f32 %v14350_v10, %v9178_v40  ;;  %v9627_v62 = vpop.f32.mrb[87].mxu1 }
0x218c   : > { %v9729_v32 = vadd.f32 %v9627_v62, %v9177_v31  ;;  %9743 = vmax.xlane.f32.xlu0 %v9742_v0 }
0x218d   : > { %v9748_v12 = vsel %vm2510_vm1, %v19386_v52, -inf }
0x218e   : > { %v14357_v20 = vpop.f32.mrb[82].mxu0  ;;  %9749 = vmax.xlane.f32.xlu1 %v9748_v12  ;;  %v9745_v49 = vsel %vm2510_vm1, %v9729_v32, -inf }
0x218f   : > { %v9732_v18 = vadd.f32 %v14357_v20, %v9180_v54  ;;  %v9716_v14 = vpop.f32.mrb[83].mxu0 }
0x2190   : > { %v19394_v44 = vadd.f32 %v9716_v14, %v9179_v30  ;;  %9746 = vmax.xlane.f32.xlu0 %v9745_v49 }
0x2191   : > { %v9754_v51 = vsel %vm2510_vm1, %v9732_v18, -inf }
0x2192   : > { %9755 = vmax.xlane.f32.xlu1 %v9754_v51  ;;  %v9751_v16 = vsel %vm2510_vm1, %v19394_v44, -inf }
0x2194   : > { %9752 = vmax.xlane.f32.xlu0 %v9751_v16 }
0x21a7   : > { %v9738_v46 = vpop.xlane.xlu1 %9737 }
0x21a8   : > { %v9758_v3 = vsub.f32 %v9726_v47, %v9738_v46  ;;  %v9735_v29 = vpop.xlane.xlu0 %9734 }
0x21a9   : > { %v9757_v42 = vsub.f32 %v9725_v43, %v9735_v29 }
0x21aa   : > { %v9767_v58 = vmul.f32 1.442695, %v9758_v3  ;;  %15705 = vrot.lane.b32.xlu0 %v19333_v34, %s19785_s4 }
0x21ab   : > { %v9765_v28 = vmul.f32 1.442695, %v9757_v42 }
0x21ac   : > { %16012 = vpow2.f32 %v9767_v58 }
0x21ad   : > { %16014 = vpow2.f32 %v9765_v28 }
0x21b6   : > { %v19401_v63 = vpop.eup %16012 }
0x21b7   : > { %v9784_v61 = vsel %vm2510_vm1, %v19401_v63, 0.0  ;;  %v16015_v55 = vpop.eup %16014 }
0x21b8   : > { %9785 = vadd.xlane.f32.xlu1 %v9784_v61  ;;  %v9781_v13 = vsel %vm2510_vm1, %v16015_v55, 0.0 }
0x21c9   : > { %9782 = vadd.xlane.f32.xlu0 %v9781_v13 }
0x2215   : > { %v9741_v37 = vpop.xlane.xlu0 %9740 }
0x2216   : > { %v9759_v50 = vsub.f32 %v9727_v53, %v9741_v37 }
0x2218   : > { %v9769_v56 = vmul.f32 1.442695, %v9759_v50 }
0x2219   : > { %v9744_v11 = vpop.xlane.xlu0 %9743 }
0x221a   : > { %16016 = vpow2.f32 %v9769_v56  ;;  %v9760_v34 = vsub.f32 %v9728_v38, %v9744_v11 }
0x221b   : > { %v9750_v27 = vpop.xlane.xlu1 %9749 }
0x221c   : > { %v9771_v36 = vmul.f32 1.442695, %v9760_v34  ;;  %v9762_v59 = vsub.f32 %v19386_v52, %v9750_v27 }
0x221d   : > { %v9747_v25 = vpop.xlane.xlu0 %9746 }
0x221e   : > { %16018 = vpow2.f32 %v9771_v36  ;;  %v9761_v26 = vsub.f32 %v9729_v32, %v9747_v25  ;;  %v9775_v17 = vmul.f32 1.442695, %v9762_v59 }
0x221f   : > { %v9756_v15 = vpop.xlane.xlu1 %9755 }
0x2220   : > { %v9773_v60 = vmul.f32 1.442695, %v9761_v26  ;;  %v9764_v2 = vsub.f32 %v9732_v18, %v9756_v15 }
0x2221   : > { %v9753_v41 = vpop.xlane.xlu0 %9752 }
0x2222   : > { %16020 = vpow2.f32 %v9773_v60  ;;  %v9779_v22 = vmul.f32 1.442695, %v9764_v2  ;;  %v9763_v53 = vsub.f32 %v19394_v44, %v9753_v41 }
0x2224   : > { %v16017_v21 = vpop.eup %16016  ;;  %16022 = vpow2.f32 %v9779_v22  ;;  %v9777_v38 = vmul.f32 1.442695, %v9763_v53 }
0x2225   : > { %v15706_v19 = vpop.permute.xlu0 %15705  ;;  %v9787_v7 = vsel %vm2510_vm1, %v16017_v21, 0.0  ;;  %16024 = vpow2.f32 %v9775_v17 }
0x2226   : > { %v15708_v35 = vunpack.i.h.bf16 %v15706_v19  ;;  %v15707_v1 = vunpack.i.l.bf16 %v15706_v19  ;;  %9788 = vadd.xlane.f32.xlu0 %v9787_v7  ;;  %16026 = vpow2.f32 %v9777_v38 }
0x2228   : > { %v16019_v47 = vpop.eup %16018  ;;  %v14960_v33 = vpack.c.bf16 %v15708_v35, %v15707_v1 }
0x2229   : > { %v9790_v43 = vsel %vm2510_vm1, %v16019_v47, 0.0 }
0x222a   : > { %9791 = vadd.xlane.f32.xlu1 %v9790_v43  ;;  %14961 = vmatprep.subr.bf16.mxu1 %v14960_v33  ;;  %v13186_v43 = vld [vmem:[#allocation21] ss:$0 sm:$0xff] }
0x222b   : > { %14963 = vmatpush3.bf16.msra.mxu1 %v14960_v33 }
0x222c   : > { %v16021_v23 = vpop.eup %16020 }
0x222d   : > { %v9793_v39 = vsel %vm2510_vm1, %v16021_v23, 0.0 }
0x222e   : > { %v19409_v9 = vpop.eup %16022  ;;  %9794 = vadd.xlane.f32.xlu0 %v9793_v39 }
0x222f   : > { %v9802_v8 = vsel %vm2510_vm1, %v19409_v9, 0.0  ;;  %v16025_v31 = vpop.eup %16024 }
0x2230   : > { %v9796_v10 = vsel %vm2510_vm1, %v16025_v31, 0.0  ;;  %v16027_v62 = vpop.eup %16026 }
0x2232   : > { %9803 = vadd.xlane.f32.xlu0 %v9802_v8 }
0x223b   : > { %15710 = vrot.lane.b32.xlu1 %v19342_v6, %s19785_s4 }
0x2245   : > { %v9786_v24 = vpop.xlane.xlu1 %9785 }
0x2246   : > { %16028 = vrcp.f32 %v9786_v24 }
0x2248   : > { %15715 = vrot.lane.b32.xlu0 %v19347_v4, %s19785_s4  ;;  %v9799_v4 = vsel %vm2510_vm1, %v16027_v62, 0.0 }
0x2250   : > { %v16029_v6 = vpop.eup %16028 }
0x2251   : > { %v9814_v32 = vmul.f32 %v16029_v6, %v19401_v63 }
0x2256   : > { %v9783_v40 = vpop.xlane.xlu0 %9782 }
0x2257   : > { %16030 = vrcp.f32 %v9783_v40 }
0x225f   : > { %9797 = vadd.xlane.f32.xlu1 %v9796_v10 }
0x2261   : > { %v16031_v0 = vpop.eup %16030 }
0x2262   : > { %v9813_v52 = vmul.f32 %v16031_v0, %v16015_v55 }
0x2263   : > { %9800 = vadd.xlane.f32.xlu1 %v9799_v4 }
0x2264   : > { %14362 = vmatprep.mubr.msk.f32.mxu1 %vm2510_vm1, %v9813_v52 }
0x2265   : > { %14363 = vmatmul.mubr.msk.f32.vlgmr.msra.gmra.mrb[88].mxu1 %vm2510_vm1, %v9814_v32 }
0x2274   : > { %15720 = vrot.lane.b32.xlu1 %v19351_v57, %s19785_s4  ;;  %s19962_s4 = sld [smem:[#allocation99_spill]] }
0x227a   : > { %v9182_v15 = vld [vmem:[%s19962_s4 + $0x8] sm:$0xff]  ;;  %v9181_v60 = vld [vmem:[%s19962_s4] sm:$0xff]  ;;  %v9183_v19 = vld [vmem:[%s19962_s4 + $0x10] sm:$0xff] }
0x227b   : > { %v9184_v7 = vld [vmem:[%s19962_s4 + $0x18] sm:$0xff]  ;;  %s19963_s4 = sld [smem:[#allocation103_spill]] }
0x2281   : > { %v9188_v52 = vld [vmem:[%s19963_s4] sm:$0xff]  ;;  %v9189_v32 = vld [vmem:[%s19963_s4 + $0x8] sm:$0xff] }
0x22b3   : > { %v9789_v54 = vpop.xlane.xlu0 %9788 }
0x22b4   : > { %16032 = vrcp.f32 %v9789_v54  ;;  %v14976_v54 = vpack.c.bf16 %v9189_v32, %v9188_v52 }
0x22b7   : > { %v9792_v12 = vpop.xlane.xlu1 %9791 }
0x22b8   : > { %16034 = vrcp.f32 %v9792_v12  ;;  %v9190_v12 = vld [vmem:[%s19963_s4 + $0x10] sm:$0xff] }
0x22bb   : > { %v15711_v30 = vpop.permute.xlu1 %15710  ;;  %v9795_v20 = vpop.xlane.xlu0 %9794 }
0x22bc   : > { %v15713_v49 = vunpack.i.h.bf16 %v15711_v30  ;;  %v15712_v18 = vunpack.i.l.bf16 %v15711_v30  ;;  %16036 = vrcp.f32 %v9795_v20  ;;  %v9191_v30 = vld [vmem:[%s19963_s4 + $0x18] sm:$0xff]  ;;  %s19965_s4 = sld [smem:[#allocation109_spill]] }
0x22bd   : > { %v14980_v20 = vpack.c.bf16 %v9191_v30, %v9190_v12 }
0x22be   : > { %v16033_v14 = vpop.eup %16032  ;;  %v14964_v44 = vpack.c.bf16 %v15713_v49, %v15712_v18 }
0x22bf   : > { %v9804_v51 = vpop.xlane.xlu0 %9803  ;;  %v9815_v16 = vmul.f32 %v16033_v14, %v16017_v21 }
0x22c0   : > { %14965 = vmatprep.subr.bf16.mxu1 %v14964_v44 }
0x22c1   : > { %14967 = vmatpush3.bf16.msra.mxu1 %v14964_v44  ;;  %14369 = vmatprep.mubr.msk.f32.mxu1 %vm2510_vm1, %v9815_v16 }
0x22c2   : > { %v16035_v46 = vpop.eup %16034 }
0x22c3   : > { %v9816_v3 = vmul.f32 %v16035_v46, %v16019_v47  ;;  %v15716_v57 = vpop.permute.xlu0 %15715 }
0x22c4   : > { %v15718_v58 = vunpack.i.h.bf16 %v15716_v57  ;;  %v15717_v29 = vunpack.i.l.bf16 %v15716_v57 }
0x22c5   : > { %14370 = vmatmul.mubr.msk.f32.vlgmr.msra.gmra.mrb[90].mxu1 %vm2510_vm1, %v9816_v3  ;;  %v13187_v3 = vld [vmem:[#allocation23] ss:$0 sm:$0xff] }
0x22c6   : > { %v16037_v42 = vpop.eup %16036  ;;  %v14968_v63 = vpack.c.bf16 %v15718_v58, %v15717_v29 }
0x22c7   : > { %v9817_v28 = vmul.f32 %v16037_v42, %v16021_v23  ;;  %v13188_v42 = vld [vmem:[#allocation24] ss:$0 sm:$0xff] }
0x22c8   : > { %14969 = vmatprep.subr.bf16.mxu0 %v14968_v63 }
0x22c9   : > { %14971 = vmatpush3.bf16.msra.mxu0 %v14968_v63  ;;  %14376 = vmatprep.mubr.msk.f32.mxu0 %vm2510_vm1, %v9817_v28 }
0x22ca   : > { %14386 = vmatprep.subr.mxu0 %v9182_v15 }
0x22ec   : > { %v9798_v61 = vpop.xlane.xlu1 %9797 }
0x22ed   : > { %16038 = vrcp.f32 %v9798_v61 }
0x22ee   : > { %16040 = vrcp.f32 %v9804_v51 }
0x22f0   : > { %v9801_v55 = vpop.xlane.xlu1 %9800 }
0x22f1   : > { %16042 = vrcp.f32 %v9801_v55 }
0x22f4   : > { %v15721_v13 = vpop.permute.xlu1 %15720 }
0x22f5   : > { %v15723_v37 = vunpack.i.h.bf16 %v15721_v13  ;;  %v15722_v50 = vunpack.i.l.bf16 %v15721_v13  ;;  %v9193_v13 = vld [vmem:[%s19964_s5] sm:$0xff] }
0x22f7   : > { %v16039_v56 = vpop.eup %16038  ;;  %v14972_v11 = vpack.c.bf16 %v15723_v37, %v15722_v50  ;;  %v9194_v37 = vld [vmem:[%s19964_s5 + $0x8] sm:$0xff] }
0x22f8   : > { %v9818_v34 = vmul.f32 %v16039_v56, %v16025_v31  ;;  %v16041_v27 = vpop.eup %16040  ;;  %v14984_v50 = vpack.c.bf16 %v9194_v37, %v9193_v13  ;;  %v9195_v56 = vld [vmem:[%s19964_s5 + $0x10] sm:$0xff] }
0x22f9   : > { %14973 = vmatprep.subr.bf16.mxu1 %v14972_v11  ;;  %v9820_v26 = vmul.f32 %v16041_v27, %v19409_v9  ;;  %v9197_v27 = vld [vmem:[%s19964_s5 + $0x20] sm:$0xff] }
0x22fa   : > { %14377 = vmatmul.mubr.msk.f32.vlgmr.msra.gmra.mrb[84].mxu0 %vm2510_vm1, %v9818_v34  ;;  %14975 = vmatpush3.bf16.msra.mxu1 %v14972_v11  ;;  %v9196_v11 = vld [vmem:[%s19964_s5 + $0x18] sm:$0xff] }
0x22fb   : > { %v16043_v36 = vpop.eup %16042  ;;  %14387 = vmatpush3.msra.mxu0 %v9182_v15  ;;  %14977 = vmatprep.subr.bf16.mxu1 %v14976_v54  ;;  %v14988_v34 = vpack.c.bf16 %v9196_v11, %v9195_v56  ;;  %v9200_v15 = vld [vmem:[%s19964_s5 + $0x38] sm:$0xff]  ;;  %v10739_v56 = vld [vmem:[%s19965_s4] sm:$0xff]  ;;  %v10740_v11 = vld [vmem:[%s19965_s4 + $0x8] sm:$0xff] }
0x22fc   : > { %v9819_v25 = vmul.f32 %v16043_v36, %v16027_v62  ;;  %14391 = vmatprep.subr.mxu0 %v9181_v60  ;;  %v9198_v36 = vld [vmem:[%s19964_s5 + $0x28] sm:$0xff] }
0x22fe   : > { %14383 = vmatprep.mubr.msk.f32.mxu1 %vm2510_vm1, %v9819_v25  ;;  %v14992_v25 = vpack.c.bf16 %v9198_v36, %v9197_v27  ;;  %v10741_v27 = vld [vmem:[%s19965_s4 + $0x10] sm:$0xff]  ;;  %v10742_v36 = vld [vmem:[%s19965_s4 + $0x18] sm:$0xff]  ;;  %s19966_s4 = smov 104  }
0x22ff   : > { %14384 = vmatmul.mubr.msk.f32.vlgmr.msra.gmra.mrb[92].mxu1 %vm2510_vm1, %v9820_v26  ;;  %v9199_v26 = vld [vmem:[%s19964_s5 + $0x30] sm:$0xff] }
0x2300   : > { %14979 = vmatpush3.bf16.msra.mxu1 %v14976_v54 }
0x2301   : > { %14981 = vmatprep.subr.bf16.mxu1 %v14980_v20 }
0x2304   : > { %14983 = vmatpush3.bf16.msra.mxu1 %v14980_v20 }
0x2305   : > { %14985 = vmatprep.subr.bf16.mxu1 %v14984_v50 }
0x2338   : > { %v14364_v2 = vpop.f32.mrb[88].mxu1 }
0x2339   : > { %v9899_v41 = vpop.f32.mrb[89].mxu1 }
0x2398   : > { %v14371_v22 = vpop.f32.mrb[90].mxu1 }
0x2399   : > { %v9986_v21 = vpop.f32.mrb[91].mxu1 }
0x239a   : > { %14388 = vmatprep.mubr.msk.f32.mxu0 %vm2989_vm2, %v9986_v21 }
0x239b   : > { %14389 = vmatmul.mubr.msk.f32.vlgmr.msra.gmra.mrb[86].mxu0 %vm2989_vm2, %v14371_v22  ;;  %v9203_v22 = vld [vmem:[%s19964_s5 + $0x50] sm:$0xff] }
0x239c   : > { %14393 = vmatprep.mubr.msk.f32.mxu0 %vm2989_vm2, %v9899_v41  ;;  %14392 = vmatpush3.msra.mxu0 %v9181_v60  ;;  %v14996_v60 = vpack.c.bf16 %v9200_v15, %v9199_v26  ;;  %v9202_v41 = vld [vmem:[%s19964_s5 + $0x48] sm:$0xff] }
0x239d   : > { %14396 = vmatprep.subr.mxu0 %v9183_v19 }
0x23a3   : > { %14394 = vmatmul.mubr.msk.f32.vlgmr.msra.gmra.mrb[86].mxu0 %vm2989_vm2, %v14364_v2  ;;  %v9201_v2 = vld [vmem:[%s19964_s5 + $0x40] sm:$0xff] }
0x23a4   : > { %14397 = vmatpush3.msra.mxu0 %v9183_v19  ;;  %v15000_v21 = vpack.c.bf16 %v9202_v41, %v9201_v2  ;;  %v9204_v19 = vld [vmem:[%s19964_s5 + $0x58] sm:$0xff] }
0x23a5   : > { %14401 = vmatprep.subr.mxu0 %v9184_v7 }
0x23cd   : > { %v14378_v35 = vpop.f32.mrb[84].mxu0 }
0x23ce   : > { %v10073_v1 = vpop.f32.mrb[85].mxu0 }
0x23cf   : > { %14398 = vmatprep.mubr.msk.f32.mxu0 %vm2989_vm2, %v10073_v1  ;;  %v9206_v1 = vld [vmem:[%s19964_s5 + $0x68] sm:$0xff] }
0x23d0   : > { %14399 = vmatmul.mubr.msk.f32.vlgmr.msra.gmra.mrb[86].mxu0 %vm2989_vm2, %v14378_v35  ;;  %v9205_v35 = vld [vmem:[%s19964_s5 + $0x60] sm:$0xff] }
0x23d1   : > { %14402 = vmatpush3.msra.mxu0 %v9184_v7  ;;  %v15004_v7 = vpack.c.bf16 %v9204_v19, %v9203_v22  ;;  %v13193_v19 = vld [vmem:[#allocation29] ss:$0 sm:$0xff] }
0x23d2   : > { %v14385_v47 = vpop.f32.mrb[92].mxu1 }
0x23d3   : > { %v10160_v33 = vpop.f32.mrb[93].mxu1 }
0x23d4   : > { %14403 = vmatprep.mubr.msk.f32.mxu0 %vm2989_vm2, %v10160_v33  ;;  %v9207_v33 = vld [vmem:[%s19964_s5 + $0x70] sm:$0xff] }
0x23d8   : > { %14404 = vmatmul.mubr.msk.f32.vlgmr.msra.gmra.mrb[86].mxu0 %vm2989_vm2, %v14385_v47  ;;  %v15008_v47 = vpack.c.bf16 %v9206_v1, %v9205_v35 }
0x24ab   : > { %v14405_v23 = vpop.f32.mrb[86].mxu0 }
0x24ac   : > { %v10498_v39 = vadd.f32 %v14405_v23, %v19313_v48  ;;  %v10486_v9 = vpop.f32.mrb[87].mxu0 }
0x24ad   : > { %v10497_v8 = vadd.f32 %v10486_v9, %v19315_v5 }
0x24ae   : > { %v19447_v59 = vadd.f32 %v13186_v43, %v10498_v39  ;;  %v13189_v39 = vld [vmem:[#allocation26] ss:$0 sm:$0xff] }
0x24af   : > { %v19449_v17 = vadd.f32 %v13186_v43, %v10497_v8  ;;  %v9208_v43 = vld [vmem:[%s19964_s5 + $0x78] sm:$0xff] }
0x24b0   : > { %v10510_v53 = vsel %vm9210_vm5, %v19447_v59, 0.0  ;;  %v15012_v23 = vpack.c.bf16 %v9208_v43, %v9207_v33 }
0x24b1   : > { %10511 = vadd.xlane.f32.xlu0 %v10510_v53  ;;  %v10507_v38 = vsel %vm9210_vm5, %v19449_v17, 0.0 }
0x24b2   : > { %10508 = vadd.xlane.f32.xlu1 %v10507_v38 }
0x253e   : > { %v10512_v24 = vpop.xlane.xlu0 %10511 }
0x253f   : > { %v10514_v48 = vmul.f32 0.03125, %v10512_v24  ;;  %v10509_v40 = vpop.xlane.xlu1 %10508 }
0x2540   : > { %v10513_v5 = vmul.f32 0.03125, %v10509_v40 }
0x2541   : > { %v10516_v31 = vsub.f32 %v19447_v59, %v10514_v48 }
0x2542   : > { %v10515_v10 = vsub.f32 %v19449_v17, %v10513_v5 }
0x2543   : > { %v10518_v62 = vmul.f32 %v10516_v31, %v10516_v31 }
0x2544   : > { %v10517_v6 = vmul.f32 %v10515_v10, %v10515_v10 }
0x2545   : > { %v10522_v0 = vsel %vm9210_vm5, %v10518_v62, 0.0 }
0x2546   : > { %10523 = vadd.xlane.f32.xlu1 %v10522_v0  ;;  %v10519_v4 = vsel %vm9210_vm5, %v10517_v6, 0.0 }
0x2547   : > { %10520 = vadd.xlane.f32.xlu0 %v10519_v4 }
0x25d3   : > { %v10524_v49 = vpop.xlane.xlu1 %10523 }
0x25d4   : > { %v10526_v18 = vmul.f32 0.03125, %v10524_v49  ;;  %v10521_v14 = vpop.xlane.xlu0 %10520 }
0x25d5   : > { %v10525_v44 = vmul.f32 0.03125, %v10521_v14  ;;  %v13192_v14 = vld [vmem:[#allocation27] ss:$0 sm:$0xff] }
0x25d6   : > { %v10528_v51 = vadd.f32 1e-05, %v10526_v18 }
0x25d7   : > { %v10527_v16 = vadd.f32 1e-05, %v10525_v44 }
0x25d8   : > { %16044 = vrsqrt.f32 %v10528_v51 }
0x25d9   : > { %16046 = vrsqrt.f32 %v10527_v16 }
0x25e2   : > { %v16045_v46 = vpop.eup %16044 }
0x25e3   : > { %v16047_v57 = vpop.eup %16046  ;;  %v10532_v58 = vmul.f32 %v16045_v46, %v10516_v31 }
0x25e4   : > { %v10531_v29 = vmul.f32 %v16047_v57, %v10515_v10 }
0x25e5   : > { %v10540_v63 = vmul.f32 %v13187_v3, %v10532_v58 }
0x25e6   : > { %v10539_v28 = vmul.f32 %v13187_v3, %v10531_v29 }
0x25e7   : > { %v10548_v55 = vadd.f32 %v13188_v42, %v10540_v63 }
0x25e8   : > { %v10547_v61 = vadd.f32 %v13188_v42, %v10539_v28 }
0x25ea   : > { %14414 = vmatprep.mubr.msk.f32.mxu1 %vm9210_vm5, %v10547_v61 }
0x25eb   : > { %14415 = vmatmul.mubr.msk.f32.vlgmr.msra.gmra.mrb[94].mxu1 %vm9210_vm5, %v10548_v55 }
0x25ec   : > { %14987 = vmatpush3.bf16.msra.mxu1 %v14984_v50 }
0x25ed   : > { %14989 = vmatprep.subr.bf16.mxu1 %v14988_v34 }
0x25f0   : > { %14991 = vmatpush3.bf16.msra.mxu1 %v14988_v34  ;;  %v15016_v34 = vpack.c.bf16 %v10740_v11, %v10739_v56 }
0x25f1   : > { %14993 = vmatprep.subr.bf16.mxu1 %v14992_v25 }
0x25f2   : > { %15017 = vmatprep.subr.bf16.mxu0 %v15016_v34 }
0x25f3   : > { %15019 = vmatpush3.bf16.msra.mxu0 %v15016_v34 }
0x25f4   : > { %14995 = vmatpush3.bf16.msra.mxu1 %v14992_v25  ;;  %v15020_v25 = vpack.c.bf16 %v10742_v36, %v10741_v27 }
0x25f5   : > { %14997 = vmatprep.subr.bf16.mxu1 %v14996_v60 }
0x25f6   : > { %15021 = vmatprep.subr.bf16.mxu0 %v15020_v25 }
0x25f7   : > { %15023 = vmatpush3.bf16.msra.mxu0 %v15020_v25 }
0x25f8   : > { %14999 = vmatpush3.bf16.msra.mxu1 %v14996_v60 }
0x25f9   : > { %15001 = vmatprep.subr.bf16.mxu1 %v15000_v21 }
0x25fc   : > { %15003 = vmatpush3.bf16.msra.mxu1 %v15000_v21 }
0x25fd   : > { %15005 = vmatprep.subr.bf16.mxu1 %v15004_v7 }
0x2600   : > { %15007 = vmatpush3.bf16.msra.mxu1 %v15004_v7 }
0x2601   : > { %15009 = vmatprep.subr.bf16.mxu1 %v15008_v47 }
0x2604   : > { %15011 = vmatpush3.bf16.msra.mxu1 %v15008_v47  ;;  %v13194_v47 = vld [vmem:[#allocation30] ss:$0 sm:$0xff] }
0x2605   : > { %15013 = vmatprep.subr.bf16.mxu1 %v15012_v23 }
0x2608   : > { %15015 = vmatpush3.bf16.msra.mxu1 %v15012_v23 }
0x26be   : > { %v14416_v9 = vpop.f32.mrb[94].mxu1 }
0x26bf   : > { %v10633_v8 = vadd.f32 %v14416_v9, %v13189_v39  ;;  %v10627_v53 = vpop.f32.mrb[95].mxu1  ;;  %v13195_v9 = vld [vmem:[#allocation32] ss:$0 sm:$0xff] }
0x26c0   : > { %v10628_v38 = vadd.f32 %v13189_v39, %v10627_v53 }
0x26c1   : > { %v10637_v24 = vmul.f32 %v10633_v8, %v10633_v8 }
0x26c2   : > { %v10636_v48 = vmul.f32 %v10628_v38, %v10628_v38 }
0x26c3   : > { %v10639_v40 = vmul.f32 %v10637_v24, %v10633_v8 }
0x26c4   : > { %v10638_v5 = vmul.f32 %v10636_v48, %v10628_v38 }
0x26c5   : > { %v10641_v31 = vmul.f32 0.044715, %v10639_v40 }
0x26c6   : > { %v10640_v10 = vmul.f32 0.044715, %v10638_v5 }
0x26c7   : > { %v10643_v62 = vadd.f32 %v10641_v31, %v10633_v8 }
0x26c8   : > { %v10642_v6 = vadd.f32 %v10640_v10, %v10628_v38 }
0x26c9   : > { %v10645_v0 = vmul.f32 0.7978846, %v10643_v62 }
0x26ca   : > { %v10644_v4 = vmul.f32 0.7978846, %v10642_v6 }
0x26cb   : > { %16048 = vtanh.f32 %v10645_v0 }
0x26cc   : > { %16050 = vtanh.f32 %v10644_v4 }
0x26d5   : > { %v16049_v52 = vpop.eup %16048 }
0x26d6   : > { %v16051_v32 = vpop.eup %16050  ;;  %v10649_v54 = vadd.f32 1.0, %v16049_v52 }
0x26d7   : > { %v10648_v12 = vadd.f32 1.0, %v16051_v32 }
0x26d8   : > { %v10651_v30 = vmul.f32 0.5, %v10649_v54 }
0x26d9   : > { %v10650_v20 = vmul.f32 0.5, %v10648_v12 }
0x26da   : > { %v10653_v18 = vmul.f32 %v10651_v30, %v10633_v8 }
0x26db   : > { %v10652_v49 = vmul.f32 %v10650_v20, %v10628_v38 }
0x26dd   : > { %14449 = vmatprep.mubr.f32.mxu1 %v10652_v49 }
0x26de   : > { %14450 = vmatmul.mubr.f32.vlgmr.msra.gmra.mrb[96].mxu1 %v10653_v18 }
0x27b1   : > { %v14451_v44 = vpop.f32.mrb[96].mxu1 }
0x27b2   : > { %v10732_v51 = vadd.f32 %v14451_v44, %v13192_v14  ;;  %v10726_v16 = vpop.f32.mrb[97].mxu1 }
0x27b3   : > { %v10727_v46 = vadd.f32 %v13192_v14, %v10726_v16 }
0x27b4   : > { %v19482_v3 = vadd.f32 %v10732_v51, %v19447_v59 }
0x27b5   : > { %v19485_v57 = vadd.f32 %v10727_v46, %v19449_v17 }
0x27b6   : > { %v10784_v58 = vsel %vm9210_vm5, %v19482_v3, 0.0 }
0x27b7   : > { %10785 = vadd.xlane.f32.xlu1 %v10784_v58  ;;  %v10781_v29 = vsel %vm9210_vm5, %v19485_v57, 0.0 }
0x27b8   : > { %10782 = vadd.xlane.f32.xlu0 %v10781_v29 }
0x2844   : > { %v10786_v42 = vpop.xlane.xlu1 %10785 }
0x2845   : > { %v10788_v63 = vmul.f32 0.03125, %v10786_v42  ;;  %v10783_v28 = vpop.xlane.xlu0 %10782 }
0x2846   : > { %v10787_v59 = vmul.f32 0.03125, %v10783_v28 }
0x2847   : > { %v10790_v61 = vsub.f32 %v19482_v3, %v10788_v63 }
0x2848   : > { %v10789_v17 = vsub.f32 %v19485_v57, %v10787_v59 }
0x2849   : > { %v10792_v55 = vmul.f32 %v10790_v61, %v10790_v61 }
0x284a   : > { %v10791_v13 = vmul.f32 %v10789_v17, %v10789_v17 }
0x284b   : > { %v10796_v37 = vsel %vm9210_vm5, %v10792_v55, 0.0 }
0x284c   : > { %10797 = vadd.xlane.f32.xlu1 %v10796_v37  ;;  %v10793_v50 = vsel %vm9210_vm5, %v10791_v13, 0.0 }
0x284d   : > { %10794 = vadd.xlane.f32.xlu0 %v10793_v50 }
0x28d9   : > { %v10798_v26 = vpop.xlane.xlu1 %10797 }
0x28da   : > { %v10800_v15 = vmul.f32 0.03125, %v10798_v26  ;;  %v10795_v60 = vpop.xlane.xlu0 %10794 }
0x28db   : > { %v10799_v2 = vmul.f32 0.03125, %v10795_v60 }
0x28dc   : > { %v10802_v41 = vadd.f32 1e-05, %v10800_v15 }
0x28dd   : > { %v10801_v22 = vadd.f32 1e-05, %v10799_v2 }
0x28de   : > { %16052 = vrsqrt.f32 %v10802_v41 }
0x28df   : > { %16054 = vrsqrt.f32 %v10801_v22 }
0x28e8   : > { %v16053_v21 = vpop.eup %16052 }
0x28e9   : > { %v16055_v7 = vpop.eup %16054  ;;  %v10806_v35 = vmul.f32 %v16053_v21, %v10790_v61 }
0x28ea   : > { %v10805_v1 = vmul.f32 %v16055_v7, %v10789_v17 }
0x28eb   : > { %v10814_v33 = vmul.f32 %v13193_v19, %v10806_v35 }
0x28ec   : > { %v10813_v43 = vmul.f32 %v13193_v19, %v10805_v1 }
0x28ed   : > { %v10822_v39 = vadd.f32 %v13194_v47, %v10814_v33 }
0x28ee   : > { %v10821_v23 = vadd.f32 %v13194_v47, %v10813_v43 }
0x28f0   : > { %14460 = vmatprep.mubr.msk.f32.mxu0 %vm9210_vm5, %v10821_v23 }
0x28f1   : > { %14461 = vmatmul.mubr.msk.f32.vlgmr.msra.gmra.mrb[88].mxu0 %vm9210_vm5, %v10822_v39 }
0x29c4   : > { %v14462_v8 = vpop.f32.mrb[88].mxu0 }
0x29c5   : > { %v10907_v53 = vadd.f32 %v14462_v8, %v13195_v9  ;;  %v10901_v38 = vpop.f32.mrb[89].mxu0 }
0x29c6   : > { %v10902_v24 = vadd.f32 %v13195_v9, %v10901_v38 }
0x29c7   : > { %10914 = vrot.lane.b32.xlu1 %v10907_v53, %s19949_s1  ;;  %v10931_v18 = vmul.f32 0.35355338, %v10907_v53 }
0x29c8   : > { %10912 = vrot.lane.b32.xlu0 %v10902_v24, %s19949_s1  ;;  %v10930_v48 = vmul.f32 0.35355338, %v10902_v24  ;;  %v19503_v40 = vpack.i.bf16 %v10907_v53, %v10902_v24  ;;  %s19969_s1 = sld [smem:[#allocation112_spill]] }
0x29ca   : > { %14467 = vmatprep.mubr.msk.f32.mxu0 %vm2989_vm2, %v10930_v48 }
0x29cb   : > { %10918 = vrot.lane.b32.xlu1 %v10902_v24, %s19950_s7 }
0x29cc   : > { %10924 = vrot.lane.b32.xlu0 %v10902_v24, %s19966_s4 }
0x29cf   : > { %10920 = vrot.lane.b32.xlu1 %v10907_v53, %s19950_s7  ;;  %s19970_s7 = sld [smem:[#allocation115_spill]] }
0x29d0   : > { %15725 = vrot.lane.b32.xlu0 %v19503_v40, %s19951_s3 }
0x29d3   : > { %10926 = vrot.lane.b32.xlu1 %v10907_v53, %s19966_s4  ;;  %s19967_s4 = sld [smem:[#allocation111_spill]] }
0x29d9   : > { %v10747_v34 = vld [vmem:[%s19967_s4 + $0x18] sm:$0xff]  ;;  %v10746_v27 = vld [vmem:[%s19967_s4 + $0x10] sm:$0xff]  ;;  %v10744_v25 = vld [vmem:[%s19967_s4] sm:$0xff] }
0x29da   : > { %v10745_v22 = vld [vmem:[%s19967_s4 + $0x8] sm:$0xff]  ;;  %v10748_v47 = vld [vmem:[%s19967_s4 + $0x20] sm:$0xff]  ;;  %v10751_v43 = vld [vmem:[%s19967_s4 + $0x38] sm:$0xff] }
0x29db   : > { %v10749_v21 = vld [vmem:[%s19967_s4 + $0x28] sm:$0xff]  ;;  %v10750_v24 = vld [vmem:[%s19967_s4 + $0x30] sm:$0xff] }
0x2a39   : > { %v10915_v5 = vpop.permute.xlu1 %10914 }
0x2a3a   : > { %v10913_v31 = vpop.permute.xlu0 %10912  ;;  %v10933_v28 = vmul.f32 0.35355338, %v10915_v5 }
0x2a3b   : > { %v19512_v10 = vpack.i.bf16 %v10915_v5, %v10913_v31  ;;  %v10932_v14 = vmul.f32 0.35355338, %v10913_v31 }
0x2a3d   : > { %v10919_v62 = vpop.permute.xlu1 %10918  ;;  %15730 = vrot.lane.b32.xlu1 %v19512_v10, %s19951_s3 }
0x2a3e   : > { %v10925_v6 = vpop.permute.xlu0 %10924  ;;  %v10934_v61 = vmul.f32 0.35355338, %v10919_v62 }
0x2a3f   : > { %v10936_v0 = vmul.f32 0.35355338, %v10925_v6 }
0x2a41   : > { %v10921_v4 = vpop.permute.xlu1 %10920  ;;  %14488 = vmatprep.mubr.msk.f32.mxu1 %vm2989_vm2, %v10936_v0 }
0x2a42   : > { %v19517_v52 = vpack.i.bf16 %v10921_v4, %v10919_v62  ;;  %v15726_v32 = vpop.permute.xlu0 %15725  ;;  %v10935_v37 = vmul.f32 0.35355338, %v10921_v4 }
0x2a43   : > { %v15728_v54 = vunpack.i.h.bf16 %v15726_v32  ;;  %v15727_v12 = vunpack.i.l.bf16 %v15726_v32 }
0x2a44   : > { %15735 = vrot.lane.b32.xlu0 %v19517_v52, %s19951_s3 }
0x2a45   : > { %v15024_v30 = vpack.c.bf16 %v15728_v54, %v15727_v12  ;;  %v10927_v20 = vpop.permute.xlu1 %10926 }
0x2a46   : > { %v19521_v49 = vpack.i.bf16 %v10927_v20, %v10925_v6  ;;  %v10937_v50 = vmul.f32 0.35355338, %v10927_v20 }
0x2a47   : > { %15026 = vmatprep.subr.msk.bf16.mxu0 %vm18068_vm3, %v15024_v30 }
0x2a48   : > { %15740 = vrot.lane.b32.xlu1 %v19521_v49, %s19951_s3  ;;  %15029 = vmatpush3.bf16.xpose.msk.msra.mxu0 %vm18068_vm3, %v15024_v30  ;;  %s19968_s3 = smov 64  }
0x2a4f   : > { %14468 = vmatmul.mubr.msk.f32.vlgmr.msra.gmra.mrb[90].mxu0 %vm2989_vm2, %v10931_v18 }
0x2a50   : > { %14474 = vmatprep.mubr.msk.f32.mxu0 %vm2989_vm2, %v10932_v14 }
0x2aaf   : > { %v15731_v44 = vpop.permute.xlu1 %15730 }
0x2ab0   : > { %v15733_v51 = vunpack.i.h.bf16 %v15731_v44  ;;  %v15732_v16 = vunpack.i.l.bf16 %v15731_v44 }
0x2ab2   : > { %v15030_v46 = vpack.c.bf16 %v15733_v51, %v15732_v16 }
0x2ab4   : > { %15032 = vmatprep.subr.msk.bf16.mxu0 %vm18068_vm3, %v15030_v46 }
0x2ab5   : > { %15035 = vmatpush3.bf16.xpose.msk.msra.mxu0 %vm18068_vm3, %v15030_v46 }
0x2ab6   : > { %v15736_v58 = vpop.permute.xlu0 %15735 }
0x2ab7   : > { %v15738_v29 = vunpack.i.h.bf16 %v15736_v58  ;;  %v15737_v42 = vunpack.i.l.bf16 %v15736_v58 }
0x2ab9   : > { %v15036_v63 = vpack.c.bf16 %v15738_v29, %v15737_v42 }
0x2aba   : > { %v15741_v59 = vpop.permute.xlu1 %15740 }
0x2abb   : > { %v15743_v17 = vunpack.i.h.bf16 %v15741_v59  ;;  %v15742_v55 = vunpack.i.l.bf16 %v15741_v59  ;;  %15038 = vmatprep.subr.msk.bf16.mxu0 %vm18068_vm3, %v15036_v63 }
0x2abc   : > { %14475 = vmatmul.mubr.msk.f32.vlgmr.msra.gmra.mrb[92].mxu0 %vm2989_vm2, %v10933_v28 }
0x2abd   : > { %v15042_v13 = vpack.c.bf16 %v15743_v17, %v15742_v55  ;;  %15041 = vmatpush3.bf16.xpose.msk.msra.mxu0 %vm18068_vm3, %v15036_v63  ;;  %14481 = vmatprep.mubr.msk.f32.mxu0 %vm2989_vm2, %v10934_v61 }
0x2abf   : > { %15044 = vmatprep.subr.msk.bf16.mxu1 %vm18068_vm3, %v15042_v13 }
0x2ac0   : > { %15047 = vmatpush3.bf16.xpose.msk.msra.mxu1 %vm18068_vm3, %v15042_v13 }
0x2ac4   : > { %14482 = vmatmul.mubr.msk.f32.vlgmr.msra.gmra.mrb[94].mxu0 %vm2989_vm2, %v10935_v37 }
0x2ac7   : > { %14489 = vmatmul.mubr.msk.f32.vlgmr.msra.gmra.mrb[98].mxu1 %vm2989_vm2, %v10937_v50 }
0x2b22   : > { %v14469_v56 = vpop.f32.mrb[90].mxu0 }
0x2b23   : > { %v11018_v11 = vpop.f32.mrb[91].mxu0  ;;  %v11295_v19 = vadd.f32 %v14469_v56, %v10745_v22 }
0x2b24   : > { %v11294_v2 = vadd.f32 %v11018_v11, %v10744_v25 }
0x2b25   : > { %v11305_v38 = vsel %vm2510_vm1, %v11295_v19, -inf }
0x2b26   : > { %v11302_v35 = vsel %vm2510_vm1, %v11294_v2, -inf }
0x2b8f   : > { %v14476_v36 = vpop.f32.mrb[92].mxu0 }
0x2b90   : > { %v11297_v26 = vadd.f32 %v14476_v36, %v10747_v34  ;;  %v11107_v15 = vpop.f32.mrb[93].mxu0 }
0x2b91   : > { %v11296_v45 = vadd.f32 %v11107_v15, %v10746_v27 }
0x2b92   : > { %v11311_v60 = vsel %vm2510_vm1, %v11297_v26, -inf }
0x2b93   : > { %11312 = vmax.xlane.f32.xlu1 %v11311_v60  ;;  %v11308_v41 = vsel %vm2510_vm1, %v11296_v45, -inf }
0x2b94   : > { %11309 = vmax.xlane.f32.xlu0 %v11308_v41 }
0x2b97   : > { %v14483_v7 = vpop.f32.mrb[94].mxu0 }
0x2b98   : > { %v19555_v1 = vadd.f32 %v14483_v7, %v10749_v21  ;;  %11303 = vmax.xlane.f32.xlu0 %v11302_v35  ;;  %v11196_v33 = vpop.f32.mrb[95].mxu0 }
0x2b99   : > { %v11298_v9 = vadd.f32 %v11196_v33, %v10748_v47 }
0x2b9a   : > { %v14490_v23 = vpop.f32.mrb[98].mxu1  ;;  %v11317_v39 = vsel %vm2510_vm1, %v19555_v1, -inf }
0x2b9b   : > { %v11301_v8 = vadd.f32 %v14490_v23, %v10751_v43  ;;  %v11285_v53 = vpop.f32.mrb[99].mxu1  ;;  %11318 = vmax.xlane.f32.xlu1 %v11317_v39  ;;  %v11314_v31 = vsel %vm2510_vm1, %v11298_v9, -inf }
0x2b9c   : > { %11306 = vmax.xlane.f32.xlu0 %v11305_v38  ;;  %v11300_v5 = vadd.f32 %v11285_v53, %v10750_v24 }
0x2b9d   : > { %v11323_v48 = vsel %vm2510_vm1, %v11301_v8, -inf }
0x2b9e   : > { %v11320_v62 = vsel %vm2510_vm1, %v11300_v5, -inf }
0x2b9f   : > { %11324 = vmax.xlane.f32.xlu1 %v11323_v48 }
0x2ba0   : > { %11315 = vmax.xlane.f32.xlu0 %v11314_v31 }
0x2ba4   : > { %11321 = vmax.xlane.f32.xlu0 %v11320_v62 }
0x2c20   : > { %v11313_v0 = vpop.xlane.xlu1 %11312 }
0x2c21   : > { %v11310_v6 = vpop.xlane.xlu0 %11309  ;;  %v11329_v12 = vsub.f32 %v11297_v26, %v11313_v0 }
0x2c22   : > { %v11328_v4 = vsub.f32 %v11296_v45, %v11310_v6 }
0x2c23   : > { %v11340_v51 = vmul.f32 1.442695, %v11329_v12 }
0x2c24   : > { %v11338_v30 = vmul.f32 1.442695, %v11328_v4 }
0x2c25   : > { %v11304_v32 = vpop.xlane.xlu0 %11303 }
0x2c26   : > { %v11326_v54 = vsub.f32 %v11294_v2, %v11304_v32 }
0x2c28   : > { %v11334_v20 = vmul.f32 1.442695, %v11326_v54  ;;  %v11319_v18 = vpop.xlane.xlu1 %11318 }
0x2c29   : > { %v11307_v14 = vpop.xlane.xlu0 %11306  ;;  %v11331_v25 = vsub.f32 %v19555_v1, %v11319_v18 }
0x2c2a   : > { %16056 = vpow2.f32 %v11334_v20  ;;  %v11327_v44 = vsub.f32 %v11295_v19, %v11307_v14 }
0x2c2b   : > { %16058 = vpow2.f32 %v11338_v30  ;;  %v11344_v15 = vmul.f32 1.442695, %v11331_v25 }
0x2c2c   : > { %v11336_v16 = vmul.f32 1.442695, %v11327_v44  ;;  %v11325_v46 = vpop.xlane.xlu1 %11324 }
0x2c2d   : > { %v11333_v58 = vsub.f32 %v11301_v8, %v11325_v46  ;;  %v11316_v56 = vpop.xlane.xlu0 %11315 }
0x2c2e   : > { %16060 = vpow2.f32 %v11336_v16  ;;  %v11330_v11 = vsub.f32 %v11298_v9, %v11316_v56 }
0x2c2f   : > { %16062 = vpow2.f32 %v11340_v51  ;;  %v11348_v29 = vmul.f32 1.442695, %v11333_v58 }
0x2c30   : > { %v11342_v34 = vmul.f32 1.442695, %v11330_v11 }
0x2c31   : > { %16064 = vpow2.f32 %v11348_v29  ;;  %v11322_v27 = vpop.xlane.xlu0 %11321 }
0x2c32   : > { %16066 = vpow2.f32 %v11342_v34  ;;  %v11332_v36 = vsub.f32 %v11300_v5, %v11322_v27 }
0x2c34   : > { %v16057_v42 = vpop.eup %16056  ;;  %v11346_v26 = vmul.f32 1.442695, %v11332_v36  ;;  %v13230_v36 = vld [vmem:[#allocation33] ss:$0 sm:$0xff] }
0x2c35   : > { %v11350_v63 = vsel %vm2510_vm1, %v16057_v42, 0.0  ;;  %v16059_v28 = vpop.eup %16058 }
0x2c36   : > { %11351 = vadd.xlane.f32.xlu0 %v11350_v63  ;;  %v11356_v17 = vsel %vm2510_vm1, %v16059_v28, 0.0  ;;  %16068 = vpow2.f32 %v11346_v26 }
0x2c37   : > { %16070 = vpow2.f32 %v11344_v15 }
0x2c38   : > { %v19567_v59 = vpop.eup %16060 }
0x2c39   : > { %v11353_v61 = vsel %vm2510_vm1, %v19567_v59, 0.0  ;;  %v16063_v55 = vpop.eup %16062 }
0x2c3a   : > { %11354 = vadd.xlane.f32.xlu1 %v11353_v61  ;;  %11357 = vadd.xlane.f32.xlu0 %v11356_v17  ;;  %v11359_v13 = vsel %vm2510_vm1, %v16063_v55, 0.0 }
0x2c3b   : > { %v19573_v37 = vpop.eup %16064 }
0x2c3c   : > { %v11371_v50 = vsel %vm2510_vm1, %v19573_v37, 0.0  ;;  %v16067_v45 = vpop.eup %16066 }
0x2c3d   : > { %v11362_v60 = vsel %vm2510_vm1, %v16067_v45, 0.0 }
0x2c3e   : > { %11360 = vadd.xlane.f32.xlu1 %v11359_v13 }
0x2c42   : > { %11372 = vadd.xlane.f32.xlu1 %v11371_v50  ;;  %v10755_v50 = vld [vmem:[%s19969_s1 + $0x18] sm:$0xff] }
0x2c50   : > { %15745 = vrot.lane.b32.xlu0 %v19512_v10, %s19968_s3  ;;  %v19583_v10 = vpop.eup %16068 }
0x2c51   : > { %v19587_v2 = vpop.eup %16070 }
0x2c52   : > { %v11365_v41 = vsel %vm2510_vm1, %v19587_v2, 0.0 }
0x2c53   : > { %15750 = vrot.lane.b32.xlu1 %v19503_v40, %s19968_s3  ;;  %v11368_v40 = vsel %vm2510_vm1, %v19583_v10, 0.0 }
0x2c6f   : > { %11363 = vadd.xlane.f32.xlu0 %v11362_v60 }
0x2c77   : > { %11369 = vadd.xlane.f32.xlu1 %v11368_v40 }
0x2c7b   : > { %11366 = vadd.xlane.f32.xlu1 %v11365_v41 }
0x2c85   : > { %15755 = vrot.lane.b32.xlu0 %v19517_v52, %s19968_s3 }
0x2c8c   : > { %15760 = vrot.lane.b32.xlu1 %v19521_v49, %s19968_s3  ;;  %s19971_s3 = smov %s19970_s7 }
0x2cc3   : > { %v11352_v22 = vpop.xlane.xlu0 %11351 }
0x2cc4   : > { %16072 = vrcp.f32 %v11352_v22 }
0x2cc7   : > { %v11355_v21 = vpop.xlane.xlu1 %11354  ;;  %v11358_v19 = vpop.xlane.xlu0 %11357 }
0x2cc8   : > { %16074 = vrcp.f32 %v11358_v19 }
0x2ccb   : > { %v11361_v7 = vpop.xlane.xlu1 %11360  ;;  %v15746_v35 = vpop.permute.xlu0 %15745 }
0x2ccc   : > { %16076 = vrcp.f32 %v11361_v7  ;;  %v15748_v1 = vunpack.i.h.bf16 %v15746_v35  ;;  %v15747_v47 = vunpack.i.l.bf16 %v15746_v35 }
0x2ccd   : > { %16078 = vrcp.f32 %v11355_v21 }
0x2cce   : > { %v16073_v33 = vpop.eup %16072  ;;  %v15052_v43 = vpack.c.bf16 %v15748_v1, %v15747_v47 }
0x2ccf   : > { %v11373_v23 = vpop.xlane.xlu1 %11372  ;;  %v11382_v39 = vmul.f32 %v16073_v33, %v16057_v42  ;;  %v10759_v33 = vld [vmem:[%s19970_s7] sm:$0xff]  ;;  %s2342_s7 = sand.u32 1, %s16938_s12  }
0x2cd0   : > { %15053 = vmatprep.subr.bf16.mxu1 %v15052_v43  ;;  %s12443_s6 = scalar_lea.sflag [#allocation5], %s2342_s7 }
0x2cd1   : > { %14495 = vmatprep.mubr.msk.f32.mxu0 %vm2510_vm1, %v11382_v39  ;;  %15055 = vmatpush3.bf16.msra.mxu1 %v15052_v43  ;;  %v10760_v43 = vld [vmem:[%s19971_s3 + $0x8] sm:$0xff]  ;;  %v10761_v39 = vld [vmem:[%s19971_s3 + $0x10] sm:$0xff] }
0x2cd2   : > { %v16075_v52 = vpop.eup %16074 }
0x2cd3   : > { %v15751_v49 = vpop.permute.xlu1 %15750  ;;  %v11384_v53 = vmul.f32 %v16075_v52, %v16059_v28  ;;  %v10753_v28 = vld [vmem:[%s19969_s1 + $0x8] sm:$0xff]  ;;  %v10762_v52 = vld [vmem:[%s19971_s3 + $0x18] sm:$0xff]  ;;  %s13240_s3 = sshll.u32 %s17427_s11, 4 }
0x2cd4   : > { %v15753_v9 = vunpack.i.h.bf16 %v15751_v49  ;;  %v15752_v8 = vunpack.i.l.bf16 %v15751_v49  ;;  %v15068_v49 = vpack.c.bf16 %v10762_v52, %v10761_v39  ;;  %s19671_s5 = scalar_lea.hbm %s17399_s24, %s13240_s3 }
0x2cd5   : > { %14502 = vmatprep.mubr.msk.f32.mxu1 %vm2510_vm1, %v11384_v53 }
0x2cd6   : > { %v16077_v38 = vpop.eup %16076  ;;  %v15048_v24 = vpack.c.bf16 %v15753_v9, %v15752_v8 }
0x2cd7   : > { %v16079_v48 = vpop.eup %16078  ;;  %v11385_v5 = vmul.f32 %v16077_v38, %v16063_v55  ;;  %v10754_v55 = vld [vmem:[%s19969_s1 + $0x10] sm:$0xff] }
0x2cd8   : > { %15049 = vmatprep.subr.bf16.mxu0 %v15048_v24  ;;  %v11383_v31 = vmul.f32 %v16079_v48, %v19567_v59  ;;  %v10752_v59 = vld [vmem:[%s19969_s1] sm:$0xff]  ;;  %s19972_s1 = sld [smem:[#allocation117_spill]] }
0x2cd9   : > { %15051 = vmatpush3.bf16.msra.mxu0 %v15048_v24  ;;  %14503 = vmatmul.mubr.msk.f32.vlgmr.msra.gmra.mrb[100].mxu1 %vm2510_vm1, %v11385_v5 }
0x2cdc   : > { %14496 = vmatmul.mubr.msk.f32.vlgmr.msra.gmra.mrb[96].mxu0 %vm2510_vm1, %v11383_v31  ;;  %v13231_v31 = vld [vmem:[#allocation35] ss:$0 sm:$0xff] }
0x2cfc   : > { %v11364_v62 = vpop.xlane.xlu0 %11363 }
0x2cfd   : > { %16080 = vrcp.f32 %v11364_v62 }
0x2d00   : > { %v15756_v6 = vpop.permute.xlu0 %15755 }
0x2d01   : > { %v15758_v0 = vunpack.i.h.bf16 %v15756_v6  ;;  %v15757_v4 = vunpack.i.l.bf16 %v15756_v6  ;;  %v13232_v6 = vld [vmem:[#allocation36] ss:$0 sm:$0xff] }
0x2d03   : > { %v15056_v32 = vpack.c.bf16 %v15758_v0, %v15757_v4 }
0x2d04   : > { %v11370_v54 = vpop.xlane.xlu1 %11369 }
0x2d05   : > { %16082 = vrcp.f32 %v11370_v54  ;;  %15057 = vmatprep.subr.bf16.mxu0 %v15056_v32 }
0x2d06   : > { %16084 = vrcp.f32 %v11373_v23  ;;  %15059 = vmatpush3.bf16.msra.mxu0 %v15056_v32  ;;  %v15064_v23 = vpack.c.bf16 %v10760_v43, %v10759_v33 }
0x2d07   : > { %v16081_v12 = vpop.eup %16080  ;;  %14519 = vmatprep.subr.mxu0 %v10753_v28 }
0x2d08   : > { %v11367_v30 = vpop.xlane.xlu1 %11366  ;;  %v11386_v20 = vmul.f32 %v16081_v12, %v16067_v45 }
0x2d09   : > { %16086 = vrcp.f32 %v11367_v30 }
0x2d0a   : > { %14509 = vmatprep.mubr.msk.f32.mxu0 %vm2510_vm1, %v11386_v20  ;;  %v10764_v20 = vld [vmem:[%s19972_s1] sm:$0xff] }
0x2d0c   : > { %v15761_v18 = vpop.permute.xlu1 %15760 }
0x2d0d   : > { %v15763_v14 = vunpack.i.h.bf16 %v15761_v18  ;;  %v15762_v44 = vunpack.i.l.bf16 %v15761_v18  ;;  %v10765_v18 = vld [vmem:[%s19972_s1 + $0x8] sm:$0xff] }
0x2d0f   : > { %v16083_v51 = vpop.eup %16082  ;;  %v15060_v16 = vpack.c.bf16 %v15763_v14, %v15762_v44  ;;  %v15072_v14 = vpack.c.bf16 %v10765_v18, %v10764_v20  ;;  %v10766_v44 = vld [vmem:[%s19972_s1 + $0x10] sm:$0xff] }
0x2d10   : > { %v16085_v46 = vpop.eup %16084  ;;  %v11388_v58 = vmul.f32 %v16083_v51, %v19583_v10  ;;  %v10767_v51 = vld [vmem:[%s19972_s1 + $0x18] sm:$0xff] }
0x2d11   : > { %15061 = vmatprep.subr.bf16.mxu1 %v15060_v16  ;;  %v11389_v42 = vmul.f32 %v16085_v46, %v19573_v37  ;;  %v10768_v46 = vld [vmem:[%s19972_s1 + $0x20] sm:$0xff] }
0x2d12   : > { %15063 = vmatpush3.bf16.msra.mxu1 %v15060_v16  ;;  %14516 = vmatprep.mubr.msk.f32.mxu1 %vm2510_vm1, %v11388_v58  ;;  %v15076_v16 = vpack.c.bf16 %v10767_v51, %v10766_v44  ;;  %v10769_v58 = vld [vmem:[%s19972_s1 + $0x28] sm:$0xff]  ;;  %v12310_v51 = vld [vmem:[%s17391_s17 + $0x10] sm:$0xff] }
0x2d13   : > { %v16087_v29 = vpop.eup %16086  ;;  %15065 = vmatprep.subr.bf16.mxu1 %v15064_v23  ;;  %v12309_v44 = vld [vmem:[%s17391_s17 + $0x8] sm:$0xff] }
0x2d14   : > { %v11387_v63 = vmul.f32 %v16087_v29, %v19587_v2  ;;  %v15080_v29 = vpack.c.bf16 %v10769_v58, %v10768_v46  ;;  %v12311_v58 = vld [vmem:[%s17391_s17 + $0x18] sm:$0xff] }
0x2d15   : > { %14517 = vmatmul.mubr.msk.f32.vlgmr.msra.gmra.mrb[102].mxu1 %vm2510_vm1, %v11389_v42  ;;  %v10770_v42 = vld [vmem:[%s19972_s1 + $0x30] sm:$0xff] }
0x2d16   : > { %14510 = vmatmul.mubr.msk.f32.vlgmr.msra.gmra.mrb[98].mxu0 %vm2510_vm1, %v11387_v63  ;;  %15067 = vmatpush3.bf16.msra.mxu1 %v15064_v23  ;;  %v10771_v63 = vld [vmem:[%s19972_s1 + $0x38] sm:$0xff] }
0x2d17   : > { %14520 = vmatpush3.msra.mxu0 %v10753_v28  ;;  %15069 = vmatprep.subr.bf16.mxu1 %v15068_v49  ;;  %v15084_v28 = vpack.c.bf16 %v10771_v63, %v10770_v42  ;;  %v15108_v42 = vpack.c.bf16 %v12311_v58, %v12310_v51 }
0x2d18   : > { %14524 = vmatprep.subr.mxu0 %v10752_v59 }
0x2d1a   : > { %15071 = vmatpush3.bf16.msra.mxu1 %v15068_v49 }
0x2d1b   : > { %15073 = vmatprep.subr.bf16.mxu1 %v15072_v14 }
0x2dac   : > { %v14504_v61 = vpop.f32.mrb[100].mxu1 }
0x2dad   : > { %v11555_v17 = vpop.f32.mrb[101].mxu1 }
0x2dae   : > { %14521 = vmatprep.mubr.msk.f32.mxu0 %vm2989_vm2, %v11555_v17  ;;  %v10774_v17 = vld [vmem:[%s19972_s1 + $0x50] sm:$0xff] }
0x2daf   : > { %v14497_v13 = vpop.f32.mrb[96].mxu0  ;;  %14522 = vmatmul.mubr.msk.f32.vlgmr.msra.gmra.mrb[100].mxu0 %vm2989_vm2, %v14504_v61  ;;  %v10773_v61 = vld [vmem:[%s19972_s1 + $0x48] sm:$0xff] }
0x2db0   : > { %v11468_v37 = vpop.f32.mrb[97].mxu0  ;;  %14525 = vmatpush3.msra.mxu0 %v10752_v59  ;;  %v10772_v59 = vld [vmem:[%s19972_s1 + $0x40] sm:$0xff] }
0x2db1   : > { %14526 = vmatprep.mubr.msk.f32.mxu0 %vm2989_vm2, %v11468_v37  ;;  %14529 = vmatprep.subr.mxu0 %v10754_v55 }
0x2db7   : > { %14527 = vmatmul.mubr.msk.f32.vlgmr.msra.gmra.mrb[100].mxu0 %vm2989_vm2, %v14497_v13  ;;  %v10775_v13 = vld [vmem:[%s19972_s1 + $0x58] sm:$0xff] }
0x2db8   : > { %14530 = vmatpush3.msra.mxu0 %v10754_v55  ;;  %v15088_v55 = vpack.c.bf16 %v10773_v61, %v10772_v59  ;;  %v15092_v37 = vpack.c.bf16 %v10775_v13, %v10774_v17 }
0x2db9   : > { %14534 = vmatprep.subr.mxu0 %v10755_v50 }
0x2de8   : > { %v14518_v56 = vpop.f32.mrb[102].mxu1 }
0x2de9   : > { %v14511_v11 = vpop.f32.mrb[98].mxu0  ;;  %v11729_v34 = vpop.f32.mrb[103].mxu1 }
0x2dea   : > { %v11642_v27 = vpop.f32.mrb[99].mxu0 }
0x2deb   : > { %14531 = vmatprep.mubr.msk.f32.mxu0 %vm2989_vm2, %v11642_v27  ;;  %v10779_v27 = vld [vmem:[%s19972_s1 + $0x78] sm:$0xff] }
0x2dec   : > { %14532 = vmatmul.mubr.msk.f32.vlgmr.msra.gmra.mrb[100].mxu0 %vm2989_vm2, %v14511_v11 }
0x2ded   : > { %14535 = vmatpush3.msra.mxu0 %v10755_v50  ;;  %14536 = vmatprep.mubr.msk.f32.mxu0 %vm2989_vm2, %v11729_v34  ;;  %v10776_v50 = vld [vmem:[%s19972_s1 + $0x60] sm:$0xff]  ;;  %v10778_v34 = vld [vmem:[%s19972_s1 + $0x70] sm:$0xff] }
0x2df4   : > { %14537 = vmatmul.mubr.msk.f32.vlgmr.msra.gmra.mrb[100].mxu0 %vm2989_vm2, %v14518_v56  ;;  %v10777_v56 = vld [vmem:[%s19972_s1 + $0x68] sm:$0xff]  ;;  %s2343_s1 = scalar_lea.vmem [#allocation44], %s2342_s7 }
0x2df5   : > { %v15096_v11 = vpack.c.bf16 %v10777_v56, %v10776_v50  ;;  %s12458_s4 = sshll.u32 %s2343_s1, 4  ;;  %s12459_s4 = int_to_ptr.vmem [resolvable:$true] %s12458_s4 }
0x2df6   : > { %s16828_s8 = scalar_lea.vmem %s12459_s4, 16  ;;  %p16835_p12 = scmp.lt.s32.totalorder %s12459_s4, %s16833_s13 }
0x2df7   : > { %p16829_p2 = scmp.ne.s32.totalorder %s12459_s4, %s16828_s8  ;;  %p16836_p5 = scmp.lt.s32.totalorder %s16834_s14, %s16828_s8 }
0x2df9   : > { %p16830_p3 = pnand %p16829_p2, %p19973_p0  ;;  %p16837_p6 = por %p16836_p5, %p16835_p12 }
0x2dfb   : > { %p16831_p4 = pneg %p16830_p3 }
0x2dfd   : > { %p16838_p9 = pnand %p16837_p6, %p16831_p4 }
0x2ec7   : > { %v14538_v25 = vpop.f32.mrb[100].mxu0 }
0x2ec8   : > { %v12067_v26 = vadd.f32 %v14538_v25, %v19482_v3  ;;  %v12055_v15 = vpop.f32.mrb[101].mxu0  ;;  %v13233_v25 = vld [vmem:[#allocation38] ss:$0 sm:$0xff] }
0x2ec9   : > { %v12066_v45 = vadd.f32 %v12055_v15, %v19485_v57 }
0x2eca   : > { %v19621_v60 = vadd.f32 %v13230_v36, %v12067_v26 }
0x2ecb   : > { %v19623_v10 = vadd.f32 %v13230_v36, %v12066_v45  ;;  %v15100_v36 = vpack.c.bf16 %v10779_v27, %v10778_v34 }
0x2ecc   : > { %v12079_v40 = vsel %vm9210_vm5, %v19621_v60, 0.0 }
0x2ecd   : > { %12080 = vadd.xlane.f32.xlu1 %v12079_v40  ;;  %v12076_v2 = vsel %vm9210_vm5, %v19623_v10, 0.0 }
0x2ece   : > { %12077 = vadd.xlane.f32.xlu0 %v12076_v2 }
0x2f5a   : > { %v12081_v41 = vpop.xlane.xlu1 %12080 }
0x2f5b   : > { %v12083_v22 = vmul.f32 0.03125, %v12081_v41  ;;  %v12078_v3 = vpop.xlane.xlu0 %12077 }
0x2f5c   : > { %v12082_v57 = vmul.f32 0.03125, %v12078_v3 }
0x2f5d   : > { %v12085_v21 = vsub.f32 %v19621_v60, %v12083_v22 }
0x2f5e   : > { %v12084_v19 = vsub.f32 %v19623_v10, %v12082_v57 }
0x2f5f   : > { %v12087_v1 = vmul.f32 %v12085_v21, %v12085_v21 }
0x2f60   : > { %v12086_v7 = vmul.f32 %v12084_v19, %v12084_v19 }
0x2f61   : > { %v12091_v47 = vsel %vm9210_vm5, %v12087_v1, 0.0 }
0x2f62   : > { %v12088_v35 = vsel %vm9210_vm5, %v12086_v7, 0.0 }
0x2f63   : > { %12089 = vadd.xlane.f32.xlu0 %v12088_v35 }
0x2f67   : > { %12092 = vadd.xlane.f32.xlu0 %v12091_v47 }
0x2ff0   : > { %v12090_v9 = vpop.xlane.xlu0 %12089 }
0x2ff1   : > { %v12094_v8 = vmul.f32 0.03125, %v12090_v9 }
0x2ff3   : > { %v12096_v53 = vadd.f32 1e-05, %v12094_v8  ;;  %v13236_v8 = vld [vmem:[#allocation39] ss:$0 sm:$0xff] }
0x2ff4   : > { %v12093_v38 = vpop.xlane.xlu0 %12092 }
0x2ff5   : > { %16088 = vrsqrt.f32 %v12096_v53  ;;  %v12095_v24 = vmul.f32 0.03125, %v12093_v38 }
0x2ff7   : > { %v12097_v48 = vadd.f32 1e-05, %v12095_v24 }
0x2ff9   : > { %16090 = vrsqrt.f32 %v12097_v48 }
0x2fff   : > { %v16089_v5 = vpop.eup %16088 }
0x3000   : > { %v12100_v62 = vmul.f32 %v16089_v5, %v12084_v19 }
0x3002   : > { %v12108_v0 = vmul.f32 %v13231_v31, %v12100_v62 }
0x3003   : > { %v16091_v4 = vpop.eup %16090 }
0x3004   : > { %v12101_v32 = vmul.f32 %v16091_v4, %v12085_v21  ;;  %v12116_v54 = vadd.f32 %v13232_v6, %v12108_v0 }
0x3006   : > { %v12109_v12 = vmul.f32 %v13231_v31, %v12101_v32  ;;  %14547 = vmatprep.mubr.msk.f32.mxu1 %vm9210_vm5, %v12116_v54 }
0x3008   : > { %v12117_v30 = vadd.f32 %v13232_v6, %v12109_v12 }
0x300a   : > { %14548 = vmatmul.mubr.msk.f32.vlgmr.msra.gmra.mrb[104].mxu1 %vm9210_vm5, %v12117_v30 }
0x300b   : > { %15075 = vmatpush3.bf16.msra.mxu1 %v15072_v14  ;;  %v12308_v14 = vld [vmem:[%s17391_s17] sm:$0xff] }
0x300c   : > { %15077 = vmatprep.subr.bf16.mxu1 %v15076_v16  ;;  %v15105_v46 = vpack.c.bf16 %v12309_v44, %v12308_v14 }
0x300f   : > { %15079 = vmatpush3.bf16.msra.mxu1 %v15076_v16  ;;  %v17049_v16 = vmov 0.0|0.0  }
0x3010   : > { %15081 = vmatprep.subr.bf16.mxu1 %v15080_v29  ;;  %15104 = vmatprep.subr.bf16.mxu0 %v17049_v16 }
0x3011   : > { %15106 = vmatpush3.bf16.msra.mxu0 %v15105_v46 }
0x3012   : > { %15107 = vmatprep.subr.bf16.mxu0 %v17049_v16 }
0x3013   : > { %15083 = vmatpush3.bf16.msra.mxu1 %v15080_v29  ;;  %v17051_v29 = vmov 0.0  }
0x3014   : > { %15085 = vmatprep.subr.bf16.mxu1 %v15084_v28  ;;  %14593 = vmatprep.mubr.msk.f32.mxu0 %vm17050_vm6, %v17051_v29 }
0x3015   : > { %15109 = vmatpush3.bf16.msra.mxu0 %v15108_v42 }
0x3017   : > { %15087 = vmatpush3.bf16.msra.mxu1 %v15084_v28 }
0x3018   : > { %15089 = vmatprep.subr.bf16.mxu1 %v15088_v55 }
0x301b   : > { %15091 = vmatpush3.bf16.msra.mxu1 %v15088_v55 }
0x301c   : > { %15093 = vmatprep.subr.bf16.mxu1 %v15092_v37 }
0x301f   : > { %15095 = vmatpush3.bf16.msra.mxu1 %v15092_v37  ;;  %v13237_v37 = vld [vmem:[#allocation41] ss:$0 sm:$0xff] }
0x3020   : > { %15097 = vmatprep.subr.bf16.mxu1 %v15096_v11 }
0x3023   : > { %15099 = vmatpush3.bf16.msra.mxu1 %v15096_v11  ;;  %v13238_v11 = vld [vmem:[#allocation42] ss:$0 sm:$0xff] }
0x3024   : > { %15101 = vmatprep.subr.bf16.mxu1 %v15100_v36 }
0x3027   : > { %15103 = vmatpush3.bf16.msra.mxu1 %v15100_v36 }
0x30dd   : > { %v14549_v26 = vpop.f32.mrb[104].mxu1 }
0x30de   : > { %v12202_v15 = vadd.f32 %v14549_v26, %v13233_v25  ;;  %v12196_v45 = vpop.f32.mrb[105].mxu1 }
0x30df   : > { %v12197_v40 = vadd.f32 %v13233_v25, %v12196_v45 }
0x30e0   : > { %v12206_v2 = vmul.f32 %v12202_v15, %v12202_v15 }
0x30e1   : > { %v12205_v41 = vmul.f32 %v12197_v40, %v12197_v40 }
0x30e2   : > { %v12208_v22 = vmul.f32 %v12206_v2, %v12202_v15 }
0x30e3   : > { %v12207_v3 = vmul.f32 %v12205_v41, %v12197_v40 }
0x30e4   : > { %v12210_v57 = vmul.f32 0.044715, %v12208_v22 }
0x30e5   : > { %v12209_v21 = vmul.f32 0.044715, %v12207_v3 }
0x30e6   : > { %v12212_v19 = vadd.f32 %v12210_v57, %v12202_v15 }
0x30e7   : > { %v12211_v7 = vadd.f32 %v12209_v21, %v12197_v40 }
0x30e8   : > { %v12214_v35 = vmul.f32 0.7978846, %v12212_v19 }
0x30e9   : > { %v12213_v1 = vmul.f32 0.7978846, %v12211_v7 }
0x30ea   : > { %16092 = vtanh.f32 %v12214_v35 }
0x30eb   : > { %16094 = vtanh.f32 %v12213_v1 }
0x30f4   : > { %v16093_v47 = vpop.eup %16092 }
0x30f5   : > { %v16095_v33 = vpop.eup %16094  ;;  %v12218_v43 = vadd.f32 1.0, %v16093_v47 }
0x30f6   : > { %v12217_v23 = vadd.f32 1.0, %v16095_v33 }
0x30f7   : > { %v12220_v39 = vmul.f32 0.5, %v12218_v43 }
0x30f8   : > { %v12219_v52 = vmul.f32 0.5, %v12217_v23 }
0x30f9   : > { %v12222_v9 = vmul.f32 %v12220_v39, %v12202_v15 }
0x30fa   : > { %v12221_v49 = vmul.f32 %v12219_v52, %v12197_v40 }
0x30fc   : > { %14582 = vmatprep.mubr.f32.mxu1 %v12221_v49 }
0x30fd   : > { %14583 = vmatmul.mubr.f32.vlgmr.msra.gmra.mrb[106].mxu1 %v12222_v9 }
0x31d0   : > { %v14584_v53 = vpop.f32.mrb[106].mxu1 }
0x31d1   : > { %v12301_v38 = vadd.f32 %v14584_v53, %v13236_v8  ;;  %v12295_v24 = vpop.f32.mrb[107].mxu1 }
0x31d2   : > { %v12296_v48 = vadd.f32 %v13236_v8, %v12295_v24 }
0x31d3   : > { %v12305_v5 = vadd.f32 %v12301_v38, %v19621_v60 }
0x31d4   : > { %v12304_v31 = vadd.f32 %v12296_v48, %v19623_v10 }
0x31d5   : > { %v12316_v62 = vsel %vm9210_vm5, %v12305_v5, 0.0 }
0x31d6   : > { %12317 = vadd.xlane.f32.xlu1 %v12316_v62  ;;  %v12313_v6 = vsel %vm9210_vm5, %v12304_v31, 0.0 }
0x31d7   : > { %12314 = vadd.xlane.f32.xlu0 %v12313_v6 }
0x3263   : > { %v12318_v0 = vpop.xlane.xlu1 %12317 }
0x3264   : > { %v12320_v4 = vmul.f32 0.03125, %v12318_v0  ;;  %v12315_v32 = vpop.xlane.xlu0 %12314 }
0x3265   : > { %v12319_v54 = vmul.f32 0.03125, %v12315_v32 }
0x3266   : > { %v12322_v12 = vsub.f32 %v12305_v5, %v12320_v4 }
0x3267   : > { %v12321_v30 = vsub.f32 %v12304_v31, %v12319_v54 }
0x3268   : > { %v12324_v20 = vmul.f32 %v12322_v12, %v12322_v12 }
0x3269   : > { %v12323_v60 = vmul.f32 %v12321_v30, %v12321_v30 }
0x326a   : > { %v12328_v10 = vsel %vm9210_vm5, %v12324_v20, 0.0 }
0x326b   : > { %12329 = vadd.xlane.f32.xlu1 %v12328_v10  ;;  %v12325_v18 = vsel %vm9210_vm5, %v12323_v60, 0.0 }
0x326c   : > { %12326 = vadd.xlane.f32.xlu0 %v12325_v18 }
0x32f8   : > { %v12330_v63 = vpop.xlane.xlu1 %12329 }
0x32f9   : > { %v12332_v28 = vmul.f32 0.03125, %v12330_v63  ;;  %v12327_v59 = vpop.xlane.xlu0 %12326 }
0x32fa   : > { %v12331_v61 = vmul.f32 0.03125, %v12327_v59 }
0x32fb   : > { %v12334_v17 = vadd.f32 1e-05, %v12332_v28 }
0x32fc   : > { %v12333_v55 = vadd.f32 1e-05, %v12331_v61 }
0x32fd   : > { %16096 = vrsqrt.f32 %v12334_v17 }
0x32fe   : > { %16098 = vrsqrt.f32 %v12333_v55 }
0x3307   : > { %v16097_v13 = vpop.eup %16096 }
0x3308   : > { %v16099_v50 = vpop.eup %16098  ;;  %v12338_v56 = vmul.f32 %v16097_v13, %v12322_v12 }
0x3309   : > { %v12337_v34 = vmul.f32 %v16099_v50, %v12321_v30 }
0x330a   : > { %v12346_v27 = vmul.f32 %v13237_v37, %v12338_v56 }
0x330b   : > { %v12345_v36 = vmul.f32 %v13237_v37, %v12337_v34 }
0x330c   : > { %v12354_v25 = vadd.f32 %v13238_v11, %v12346_v27 }
0x330d   : > { %v12353_v26 = vadd.f32 %v13238_v11, %v12345_v36 }
0x330e   : > { %v12356_v15 = vsel %vm9210_vm5, %v12354_v25, 0.0 }
0x330f   : > { %v12355_v45 = vsel %vm9210_vm5, %v12353_v26, 0.0 }
0x3310   : > { %v12357_v40 = vadd.f32 %v12356_v15, %v12355_v45 }
0x3312   : > { %v12358_v2 = vrot.slane %v12357_v40, 4 }
0x3314   : > { %v12359_v41 = vadd.f32 %v12358_v2, %v12357_v40 }
0x3316   : > { %v12360_v22 = vrot.slane %v12359_v41, 2 }
0x3318   : > { %v12361_v3 = vadd.f32 %v12360_v22, %v12359_v41 }
0x331a   : > { %v12362_v57 = vrot.slane %v12361_v3, 1 }
0x331c   : > { %v12363_v21 = vadd.f32 %v12362_v57, %v12361_v3 }
0x331e   : > { %v12364_v19 = vmul.f32 0.0625, %v12363_v21 }
0x3320   : > { %14594 = vmatmul.mubr.msk.f32.vlgmr.msra.gmra.mrb[102].mxu0 %vm9210_vm5, %v12364_v19  ;;  %12439 = vst.msk [vmem:[%s2343_s1] sm:$0x1] %vm12438_vm7, %v12364_v19 }
0x3321   : > { %16841 = shalt.err (!%p16838_p9)
}
0x3322   : > { %s16842_s11 = scalar_lea.hbm %s19671_s5, 16  ;;  %s16846_s9 = scalar_lea.hbm %s17399_s24, 32 }
0x3323   : > { %p16843_p10 = scmp.ne.s32.totalorder %s19671_s5, %s16842_s11  ;;  %p16847_p11 = scmp.lt.u32.totalorder %s19671_s5, %s17399_s24 }
0x3324   : > { %p16848_p13 = scmp.lt.u32.totalorder %s16846_s9, %s16842_s11  ;;  %p16850_p2 = scmp.lt.u32.totalorder %s16842_s11, %s19671_s5 }
0x3325   : > { %p16844_p7 = pnand %p16843_p10, %p19973_p0 }
0x3326   : > { %p16849_p1 = por %p16848_p13, %p16847_p11 }
0x3327   : > { %p16845_p8 = pneg %p16844_p7 }
0x3328   : > { %p16851_p3 = por %p16850_p2, %p16849_p1 }
0x332a   : > { %p16852_p4 = pnand %p16851_p3, %p16845_p8 }
0x332c   : > { %16855 = shalt.err (!%p16852_p4)
}
0x332d   : > { %15250 = dma.vmem_to_hbm [thread:$0]  (%p19973_p0), %s12459_s4, 16, %s19671_s5, %s12443_s6   ;;  %v12312_v7 = vld [vmem:[#allocation2] sm:$0x1]  ;;  %vm12440_vm8 = vcmask 0  }
0x332e   : > { %s2356_s14 = scalar_lea.vmem %s17404_s29, %s17809_s2 }
0x33f3   : > { %v12434_v35 = vpop.f32.mrb[102].mxu0 }
0x33f4   : > { %v12435_v1 = vadd.f32 %v12434_v35, %v12312_v7  ;;  %v14595_v47 = vpop.f32.mrb[103].mxu0 }
0x33f6   : > { %12441 = vst.msk [vmem:[%s2356_s14] sm:$0x1] %vm12440_vm8, %v12435_v1 }
0x33f7 PF: > { %s19974_s8 = sld [smem:[#allocation124_spill]]  ;;  %p15387_p12 = scmp.ge.s32.totalorder %s16946_s10, 2 }
0x33f8   : > { %s12473_s13 = sand.u32 1, %s16934_s0  }
0x33f9   : > { %s12474_s26 = scalar_lea.sflag [#allocation5], %s12473_s13 }
0x33fd   : > { %p19975_p5 = scmp.ne.s32.totalorder %s19974_s8, 0 }
0x33ff   : > { %p15332_p6 = pnand %p15387_p12, %p19975_p5 }
0x3401   : > { %16929 = dma.done.wait (!%p15332_p6), %s12474_s26, 16  }
0x3402   : > { %16931 = vsyncadd (!%p15332_p6), %s12474_s26, 4294967280  ;;  %s19976_s10 = sld [smem:[#allocation122_spill]]  ;;  %s19977_s6 = sld [smem:[#allocation121_spill]] }
0x3403   : > { %s19978_s7 = sld [smem:[#allocation123_spill]]  ;;  %s19979_s0 = smov %s16938_s12 }
0x3408   : > { %p166_p0 = scmp.ge.s32.totalorder %s19976_s10, 4   ;;  %s19980_s12 = smov %s19977_s6 }
0x340a   :  { %168 = sbr.rel (!%p166_p0) target bundleno = 152 (0x98), region = 513 }
0x3411   :  { %12484 = vsyncpa [#allocation4], 1 }
0x3412   :  { %12486 = vsyncpa [#allocation4 + $0x1], 1 }
0x3413   :  { %12487 = vsyncpa [#allocation7], 1 }
0x3414   :  { %12488 = vsyncpa [#allocation10], 1 }
0x3415   :  { %12489 = vsyncpa [#allocation13], 1 }
0x3416   :  { %12490 = vsyncpa [#allocation16], 1 }
0x3417   :  { %12491 = vsyncpa [#allocation19], 1 }
0x3418   :  { %12492 = vsyncpa [#allocation22], 1 }
0x3419   :  { %12493 = vsyncpa [#allocation25], 1 }
0x341a   :  { %12494 = vsyncpa [#allocation28], 1 }
0x341b   :  { %12495 = vsyncpa [#allocation31], 1 }
0x341c   :  { %12496 = vsyncpa [#allocation34], 1 }
0x341d   :  { %12497 = vsyncpa [#allocation37], 1 }
0x341e   :  { %12498 = vsyncpa [#allocation40], 1 }
0x341f   :  { %12499 = vsyncpa [#allocation43], 1 }
0x3420   :  { %12500 = vsyncpa [#allocation5], 1 }
0x3421   :  { %12502 = vsyncpa [#allocation5 + $0x1], 1 }

</bundles_post_ra>
